<compile_context>
chip_gen: v7x
topology: tpu7x:2x2x1
jax: 0.10.0
libtpu: 0.0.40
codegen_flags: <defaults>
</compile_context>

<pallas_src>
import functools

import jax
import jax.numpy as jnp
import numpy as np
from jax.experimental import pallas as pl
from jax.experimental.pallas import tpu as pltpu


# ------------------------------ small helpers ------------------------------ #

def _round_up(x, m):
    return (x + m - 1) // m * m


# ----------------------------- Pallas kernels ------------------------------ #

def _matmul_bias_kernel(x_ref, w_ref, b_ref, o_ref):
    # (tm, K) @ (K, N) + (1, N) -> (tm, N); bf16 MXU operands, f32 accumulate.
    o_ref[...] = (
        jnp.dot(x_ref[...].astype(jnp.bfloat16), w_ref[...],
                preferred_element_type=jnp.float32)
        + b_ref[...]
    )


def _matmul2_bias_kernel(xa_ref, xb_ref, wa_ref, wb_ref, b_ref, o_ref):
    # (tm, Ka)@(Ka, N) + (tm, Kb)@(Kb, N) + (1, N).  Consumes the (fwd, bwd)
    # GRU outputs without ever materializing a concatenation.
    o_ref[...] = (
        jnp.dot(xa_ref[...].astype(jnp.bfloat16), wa_ref[...],
                preferred_element_type=jnp.float32)
        + jnp.dot(xb_ref[...].astype(jnp.bfloat16), wb_ref[...],
                  preferred_element_type=jnp.float32)
        + b_ref[...]
    )


def _proj_logsoftmax_kernel(xa_ref, xb_ref, wa_ref, wb_ref, b_ref, o_ref, *, vocab):
    logits = (
        jnp.dot(xa_ref[...].astype(jnp.bfloat16), wa_ref[...],
                preferred_element_type=jnp.float32)
        + jnp.dot(xb_ref[...].astype(jnp.bfloat16), wb_ref[...],
                  preferred_element_type=jnp.float32)
        + b_ref[...]
    )
    # Mask padded vocab columns before the max / logsumexp.
    col = jax.lax.broadcasted_iota(jnp.int32, logits.shape, 1)
    logits = jnp.where(col < vocab, logits, jnp.float32(-1e30))
    m = jnp.max(logits, axis=-1, keepdims=True)
    s = logits - m
    lse = jnp.log(jnp.sum(jnp.exp(s), axis=-1, keepdims=True))
    o_ref[...] = s - lse


def _bigru_kernel(gif_ref, gib_ref, whh_ref, bhn_ref,
                  of_ref, ob_ref, hf_ref, hb_ref, *, hp, tb, t_real):
    # Interleaved bidirectional GRU recurrence over one time block.
    #   grid = (time-block,)  ("arbitrary": sequential over time)
    # gif_ref: (tb, Bp, 3Hp) f32   precomputed x@W_ih^T + folded biases, fwd block i
    # gib_ref: (tb, Bp, 3Hp) f32   same, bwd block nb-1-i
    # whh_ref: (2, Hp, 3Hp) bf16   recurrent weights (gate-major columns)
    # bhn_ref: (2, 1, Hp)  f32     only the n-gate recurrent bias (r/z folded)
    # of_ref / ob_ref: (tb, Bp, Hp) bf16 outputs
    # hf_ref / hb_ref: (Bp, Hp) f32 scratch hidden states carried across blocks
    i = pl.program_id(0)
    nb = pl.num_programs(0)

    @pl.when(i == 0)
    def _():
        hf_ref[...] = jnp.zeros_like(hf_ref)
        hb_ref[...] = jnp.zeros_like(hb_ref)

    whh_f = whh_ref[0]
    whh_b = whh_ref[1]
    bhn_f = bhn_ref[0]
    bhn_b = bhn_ref[1]

    def gru_cell(gi, gh, bhn, h):
        # r/z biases are already folded into gi; only b_hn is added here.
        r = jax.nn.sigmoid(gi[:, :hp] + gh[:, :hp])
        z = jax.nn.sigmoid(gi[:, hp:2 * hp] + gh[:, hp:2 * hp])
        n = jnp.tanh(gi[:, 2 * hp:] + r * (gh[:, 2 * hp:] + bhn))
        return (1.0 - z) * n + z * h

    def step(k, carry):
        hf, hb = carry
        lf = k                      # forward walks its block ascending
        lb = tb - 1 - k             # backward walks its block descending
        t_f = i * tb + lf
        t_b = (nb - 1 - i) * tb + lb
        # Two independent dependency chains: issue both (Bp,Hp)@(Hp,3Hp)
        # matmuls back-to-back so they hide each other's MXU/EUP latency.
        # TODO(synk): pltpu.matmul_push_rhs weight residency across the
        # unrolled block would further cut the per-step RHS re-stream.
        ghf = jnp.dot(hf.astype(jnp.bfloat16), whh_f,
                      preferred_element_type=jnp.float32)
        ghb = jnp.dot(hb.astype(jnp.bfloat16), whh_b,
                      preferred_element_type=jnp.float32)
        hf_new = gru_cell(gif_ref[lf], ghf, bhn_f, hf)
        hb_new = gru_cell(gib_ref[lb], ghb, bhn_b, hb)
        vf = t_f < t_real           # skip padded timesteps
        vb = t_b < t_real
        hf_new = jnp.where(vf, hf_new, hf)
        hb_new = jnp.where(vb, hb_new, hb)
        of_ref[lf] = jnp.where(vf, hf_new, 0.0).astype(of_ref.dtype)
        ob_ref[lb] = jnp.where(vb, hb_new, 0.0).astype(ob_ref.dtype)
        return hf_new, hb_new

    hf_fin, hb_fin = jax.lax.fori_loop(0, tb, step,
                                       (hf_ref[...], hb_ref[...]), unroll=True)
    hf_ref[...] = hf_fin
    hb_ref[...] = hb_fin


# ------------------------------ Pallas wrappers ----------------------------- #

def matmul_bias(x, w, b, *, tm):
    M, K = x.shape
    N = w.shape[1]
    return pl.pallas_call(
        _matmul_bias_kernel,
        out_shape=jax.ShapeDtypeStruct((M, N), jnp.float32),
        grid_spec=pltpu.PrefetchScalarGridSpec(
            num_scalar_prefetch=0,
            grid=(M // tm,),
            in_specs=[
                pl.BlockSpec((tm, K), lambda m: (m, 0)),
                pl.BlockSpec((K, N), lambda m: (0, 0)),
                pl.BlockSpec((1, N), lambda m: (0, 0)),
            ],
            out_specs=pl.BlockSpec((tm, N), lambda m: (m, 0)),
        ),
        compiler_params=pltpu.CompilerParams(dimension_semantics=("parallel",)),
    )(x, w, b)


def gru_input_gates_single(x, w_st, b_st, *, tm):
    # Layer 0: x (M, Din) f32; w_st (2, Din, 3Hp) bf16; b_st (2, 1, 3Hp) f32.
    M, Din = x.shape
    G = w_st.shape[-1]
    return pl.pallas_call(
        _matmul_bias_kernel,
        out_shape=jax.ShapeDtypeStruct((2, M, G), jnp.float32),
        grid_spec=pltpu.PrefetchScalarGridSpec(
            num_scalar_prefetch=0,
            grid=(2, M // tm),
            in_specs=[
                pl.BlockSpec((tm, Din), lambda d, m: (m, 0)),
                pl.BlockSpec((None, Din, G), lambda d, m: (d, 0, 0)),
                pl.BlockSpec((None, 1, G), lambda d, m: (d, 0, 0)),
            ],
            out_specs=pl.BlockSpec((None, tm, G), lambda d, m: (d, m, 0)),
        ),
        compiler_params=pltpu.CompilerParams(
            dimension_semantics=("parallel", "parallel")),
    )(x, w_st, b_st)


def gru_input_gates_pair(xa, xb, wa_st, wb_st, b_st, *, tm):
    # Layers >= 1: xa / xb (M, Hp) bf16 are the fwd / bwd outputs of the
    # previous layer (no concat).
    M, Hin = xa.shape
    G = wa_st.shape[-1]
    return pl.pallas_call(
        _matmul2_bias_kernel,
        out_shape=jax.ShapeDtypeStruct((2, M, G), jnp.float32),
        grid_spec=pltpu.PrefetchScalarGridSpec(
            num_scalar_prefetch=0,
            grid=(2, M // tm),
            in_specs=[
                pl.BlockSpec((tm, Hin), lambda d, m: (m, 0)),
                pl.BlockSpec((tm, Hin), lambda d, m: (m, 0)),
                pl.BlockSpec((None, Hin, G), lambda d, m: (d, 0, 0)),
                pl.BlockSpec((None, Hin, G), lambda d, m: (d, 0, 0)),
                pl.BlockSpec((None, 1, G), lambda d, m: (d, 0, 0)),
            ],
            out_specs=pl.BlockSpec((None, tm, G), lambda d, m: (d, m, 0)),
        ),
        compiler_params=pltpu.CompilerParams(
            dimension_semantics=("parallel", "parallel")),
    )(xa, xb, wa_st, wb_st, b_st)


def bigru_recurrence(gi, whh_st, bhn_st, *, t_real, tb):
    # gi: (2, T_pad, Bp, 3Hp) f32; whh_st: (2, Hp, 3Hp) bf16; bhn_st: (2, 1, Hp).
    # Returns (out_fwd, out_bwd), each (T_pad, Bp, Hp) bf16.
    _, T_pad, Bp, G = gi.shape
    hp = G // 3
    nb = T_pad // tb
    out_sd = jax.ShapeDtypeStruct((T_pad, Bp, hp), jnp.bfloat16)
    return pl.pallas_call(
        functools.partial(_bigru_kernel, hp=hp, tb=tb, t_real=t_real),
        out_shape=(out_sd, out_sd),
        grid_spec=pltpu.PrefetchScalarGridSpec(
            num_scalar_prefetch=0,
            grid=(nb,),
            in_specs=[
                # fwd reads time block i, bwd reads block nb-1-i of the same gi.
                pl.BlockSpec((None, tb, Bp, G), lambda i: (0, i, 0, 0)),
                pl.BlockSpec((None, tb, Bp, G), lambda i: (1, nb - 1 - i, 0, 0)),
                # Constant index maps: weights are DMA'd once and stay resident.
                pl.BlockSpec((2, hp, G), lambda i: (0, 0, 0)),
                pl.BlockSpec((2, 1, hp), lambda i: (0, 0, 0)),
            ],
            out_specs=(
                pl.BlockSpec((tb, Bp, hp), lambda i: (i, 0, 0)),
                pl.BlockSpec((tb, Bp, hp), lambda i: (nb - 1 - i, 0, 0)),
            ),
            scratch_shapes=[pltpu.VMEM((Bp, hp), jnp.float32),
                            pltpu.VMEM((Bp, hp), jnp.float32)],
        ),
        compiler_params=pltpu.CompilerParams(dimension_semantics=("arbitrary",)),
    )(gi, gi, whh_st, bhn_st)


def proj_logsoftmax(xa, xb, wa, wb, b, *, vocab, tm):
    M, Hin = xa.shape
    Vp = wa.shape[-1]
    return pl.pallas_call(
        functools.partial(_proj_logsoftmax_kernel, vocab=vocab),
        out_shape=jax.ShapeDtypeStruct((M, Vp), jnp.float32),
        grid_spec=pltpu.PrefetchScalarGridSpec(
            num_scalar_prefetch=0,
            grid=(M // tm,),
            in_specs=[
                pl.BlockSpec((tm, Hin), lambda m: (m, 0)),
                pl.BlockSpec((tm, Hin), lambda m: (m, 0)),
                pl.BlockSpec((Hin, Vp), lambda m: (0, 0)),
                pl.BlockSpec((Hin, Vp), lambda m: (0, 0)),
                pl.BlockSpec((1, Vp), lambda m: (0, 0)),
            ],
            out_specs=pl.BlockSpec((tm, Vp), lambda m: (m, 0)),
        ),
        compiler_params=pltpu.CompilerParams(dimension_semantics=("parallel",)),
    )(xa, xb, wa, wb, b)


# ----------------------------- Parameter prepping ---------------------------- #

def _prep_gate_mat(w, din_p, hp):
    # w: (3H, Din) in PyTorch layout (gate blocks [r; z; n] along rows).
    # Returns (Din_p, 3*Hp) bf16 with each gate block padded to Hp columns.
    h3, din = w.shape
    h = h3 // 3
    w = w.reshape(3, h, din)
    w = jnp.transpose(w, (2, 0, 1))                       # (Din, 3, H)
    w = jnp.pad(w, ((0, din_p - din), (0, 0), (0, hp - h)))
    return w.reshape(din_p, 3 * hp).astype(jnp.bfloat16)


def _prep_gate_bias_folded(bih, bhh, hp):
    # Fold b_hr / b_hz into the input-gate bias (the precomputed gi side);
    # only b_hn is added inside the recurrence (PyTorch:
    # n = tanh(Win x + b_in + r * (Whn h + b_hn))).
    h = bih.shape[0] // 3
    bih3 = bih.reshape(3, h)
    bhh3 = bhh.reshape(3, h)
    folded = bih3.at[0].add(bhh3[0]).at[1].add(bhh3[1])
    folded = jnp.pad(folded, ((0, 0), (0, hp - h))).reshape(1, 3 * hp)
    bhn = jnp.pad(bhh3[2], (0, hp - h)).reshape(1, hp)
    return folded.astype(jnp.float32), bhn.astype(jnp.float32)


def prepare_params(params, *, hidden_dim, num_layers, vocab_size):
    """One-time transpose / gate-pad / bias-fold / bf16-cast of PyTorch weights."""
    H = hidden_dim
    Hp = _round_up(H, 128)
    Vp = _round_up(vocab_size, 128)

    prep = {}
    conv_w = params["conv_w"]                              # (H, Cin, K)
    _, Cin, K = conv_w.shape
    w = jnp.transpose(conv_w, (2, 1, 0)).reshape(K * Cin, H)
    prep["conv_w"] = jnp.pad(w, ((0, 0), (0, Hp - H))).astype(jnp.bfloat16)
    prep["conv_b"] = jnp.pad(params["conv_b"],
                             (0, Hp - H)).reshape(1, Hp).astype(jnp.float32)

    prep["gru"] = []
    for layer in range(num_layers):
        p = params["gru"][layer]
        lp = {}
        if layer == 0:
            lp["wih"] = jnp.stack([_prep_gate_mat(p["wih_f"], Hp, Hp),
                                   _prep_gate_mat(p["wih_b"], Hp, Hp)])
        else:
            # split input weights into fwd-half / bwd-half columns (no concat).
            lp["wih_a"] = jnp.stack([_prep_gate_mat(p["wih_f"][:, :H], Hp, Hp),
                                     _prep_gate_mat(p["wih_b"][:, :H], Hp, Hp)])
            lp["wih_b2"] = jnp.stack([_prep_gate_mat(p["wih_f"][:, H:], Hp, Hp),
                                      _prep_gate_mat(p["wih_b"][:, H:], Hp, Hp)])
        bf, nf = _prep_gate_bias_folded(p["bih_f"], p["bhh_f"], Hp)
        bb, nbk = _prep_gate_bias_folded(p["bih_b"], p["bhh_b"], Hp)
        lp["bih"] = jnp.stack([bf, bb])                    # (2, 1, 3Hp)
        lp["bhn"] = jnp.stack([nf, nbk])                   # (2, 1, Hp)
        lp["whh"] = jnp.stack([_prep_gate_mat(p["whh_f"], Hp, Hp),
                               _prep_gate_mat(p["whh_b"], Hp, Hp)])
        prep["gru"].append(lp)

    pw = params["proj_w"]                                  # (V, 2H)
    prep["proj_wa"] = jnp.pad(pw[:, :H].T,
                              ((0, Hp - H), (0, Vp - vocab_size))).astype(jnp.bfloat16)
    prep["proj_wb"] = jnp.pad(pw[:, H:].T,
                              ((0, Hp - H), (0, Vp - vocab_size))).astype(jnp.bfloat16)
    prep["proj_b"] = jnp.pad(params["proj_b"],
                             (0, Vp - vocab_size)).reshape(1, Vp).astype(jnp.float32)
    return prep, dict(hp=Hp, vp=Vp)


# ------------------------------ Decoder forward ----------------------------- #

@functools.partial(jax.jit, static_argnames=(
    "conv_kernel", "conv_stride", "num_layers", "vocab_size", "hp", "vp", "tb"))
def decoder_forward(x, prep, *, conv_kernel, conv_stride, num_layers,
                    vocab_size, hp, vp, tb=16):
    """x: (B, T, in_feature_dim) float32 -> (B, T_out, vocab) log-probs."""
    B, T, Cin = x.shape
    K, S = conv_kernel, conv_stride
    T_out = (T - K) // S + 1
    Bp = _round_up(max(B, 1), 16)        # bf16 sublane tile is (16, 128)
    T_pad = _round_up(T_out, tb)         # time padded to the tb block
    M = T_pad * Bp                       # = nb * tb * Bp
    G = 3 * hp
    tm = tb * 16                         # divides M by construction (Bp % 16 == 0)
    tm_proj = min(128, M)                # small tile: (tm, Vp) logits stay in vregs

    # Conv1d via im2col (gather/pad are XLA glue; the matmul is the Pallas hot
    # path).  Padded time rows produce garbage gi rows that the recurrence masks.
    x_p = jnp.pad(x, ((0, Bp - B), (0, 0), (0, 0)))
    idx = (jnp.arange(T_out) * S)[:, None] + jnp.arange(K)[None, :]      # (T_out, K)
    patches = jnp.transpose(x_p[:, idx, :], (1, 0, 2, 3))                # (T_out,Bp,K,Cin)
    patches = patches.reshape(T_out * Bp, K * Cin)                       # time-major rows
    patches = jnp.pad(patches, ((0, (T_pad - T_out) * Bp), (0, 0)))      # (M, K*Cin)

    seq = matmul_bias(patches, prep["conv_w"], prep["conv_b"], tm=tm)    # (M, Hp) f32
    # Dropout(p=0) / eval-mode dropout is the identity; omitted.

    out_f = out_b = None
    for layer in range(num_layers):
        lp = prep["gru"][layer]
        if layer == 0:
            gi = gru_input_gates_single(seq, lp["wih"], lp["bih"], tm=tm)
        else:
            gi = gru_input_gates_pair(out_f.reshape(M, hp), out_b.reshape(M, hp),
                                      lp["wih_a"], lp["wih_b2"], lp["bih"], tm=tm)
        out_f, out_b = bigru_recurrence(gi.reshape(2, T_pad, Bp, G),
                                        lp["whh"], lp["bhn"],
                                        t_real=T_out, tb=tb)   # 2x (T_pad,Bp,Hp) bf16

    # Transpose the small, H-wide GRU outputs to batch-major BEFORE the V-wide
    # projection so the big (B, T, vocab) tensor never round-trips a transpose.
    xf = jnp.transpose(out_f, (1, 0, 2)).reshape(M, hp)
    xb = jnp.transpose(out_b, (1, 0, 2)).reshape(M, hp)
    logp = proj_logsoftmax(xf, xb, prep["proj_wa"], prep["proj_wb"], prep["proj_b"],
                           vocab=vocab_size, tm=tm_proj)                 # (M, Vp)
    logp = logp.reshape(Bp, T_pad, vp)
    return logp[:B, :T_out, :vocab_size]


# ----------------------------- Pure-JAX reference --------------------------- #

def decoder_reference(x, params, *, conv_kernel, conv_stride, hidden_dim, num_layers):
    B, T, Cin = x.shape
    K, S = conv_kernel, conv_stride
    T_out = (T - K) // S + 1
    idx = (jnp.arange(T_out) * S)[:, None] + jnp.arange(K)[None, :]
    patches = x[:, idx, :].reshape(B, T_out, K * Cin)
    w_mat = jnp.transpose(params["conv_w"], (2, 1, 0)).reshape(K * Cin, hidden_dim)
    h = patches @ w_mat + params["conv_b"]
    seq = jnp.transpose(h, (1, 0, 2))

    def gru_dir_ref(xs, wih, whh, bih, bhh, reverse):
        H = hidden_dim

        def step(hprev, xt):
            gi = xt @ wih.T + bih
            gh = hprev @ whh.T + bhh
            r = jax.nn.sigmoid(gi[:, :H] + gh[:, :H])
            z = jax.nn.sigmoid(gi[:, H:2 * H] + gh[:, H:2 * H])
            n = jnp.tanh(gi[:, 2 * H:] + r * gh[:, 2 * H:])
            hn = (1.0 - z) * n + z * hprev
            return hn, hn

        h0 = jnp.zeros((xs.shape[1], H), jnp.float32)
        xs_ = xs[::-1] if reverse else xs
        _, ys = jax.lax.scan(step, h0, xs_)
        return ys[::-1] if reverse else ys

    for layer in range(num_layers):
        p = params["gru"][layer]
        of = gru_dir_ref(seq, p["wih_f"], p["whh_f"], p["bih_f"], p["bhh_f"], False)
        ob = gru_dir_ref(seq, p["wih_b"], p["whh_b"], p["bih_b"], p["bhh_b"], True)
        seq = jnp.concatenate([of, ob], axis=-1)

    out = jnp.transpose(seq, (1, 0, 2)) @ params["proj_w"].T + params["proj_b"]
    return jax.nn.log_softmax(out, axis=-1)


# ------------------------------- Parameter init ------------------------------ #

def init_params(key, in_feature_dim, conv_kernel, hidden_dim, num_layers, vocab_size):
    keys = iter(jax.random.split(key, 8 * num_layers + 8))

    def u(shape, scale):
        return jax.random.uniform(next(keys), shape, jnp.float32, -scale, scale)

    params = {}
    kc = 1.0 / np.sqrt(in_feature_dim * conv_kernel)
    params["conv_w"] = u((hidden_dim, in_feature_dim, conv_kernel), kc)   # (H, Cin, K)
    params["conv_b"] = u((hidden_dim,), kc)

    params["gru"] = []
    kh = 1.0 / np.sqrt(hidden_dim)
    for layer in range(num_layers):
        din = hidden_dim if layer == 0 else 2 * hidden_dim
        lp = {}
        for d in ("f", "b"):
            lp[f"wih_{d}"] = u((3 * hidden_dim, din), kh)
            lp[f"whh_{d}"] = u((3 * hidden_dim, hidden_dim), kh)
            lp[f"bih_{d}"] = u((3 * hidden_dim,), kh)
            lp[f"bhh_{d}"] = u((3 * hidden_dim,), kh)
        params["gru"].append(lp)

    kp = 1.0 / np.sqrt(2 * hidden_dim)
    params["proj_w"] = u((vocab_size, 2 * hidden_dim), kp)   # PyTorch Linear layout
    params["proj_b"] = u((vocab_size,), kp)
    return params


# ------------------------------------ Main ----------------------------------- #

if __name__ == "__main__":
    B, T = 2, 16
    in_feature_dim = 8
    conv_kernel, conv_stride = 3, 2
    hidden_dim = 32
    num_layers = 2
    vocab_size = 16

    root = jax.random.PRNGKey(0)
    kx, kp = jax.random.split(root)
    x = jax.random.normal(kx, (B, T, in_feature_dim), jnp.float32)
    params = init_params(kp, in_feature_dim, conv_kernel, hidden_dim, num_layers,
                         vocab_size)

    prep, dims = prepare_params(params, hidden_dim=hidden_dim,
                                num_layers=num_layers, vocab_size=vocab_size)

    out = decoder_forward(x, prep,
                          conv_kernel=conv_kernel, conv_stride=conv_stride,
                          num_layers=num_layers, vocab_size=vocab_size,
                          hp=dims["hp"], vp=dims["vp"], tb=16)
    out = jax.block_until_ready(out)

    ref = decoder_reference(x, params,
                            conv_kernel=conv_kernel, conv_stride=conv_stride,
                            hidden_dim=hidden_dim, num_layers=num_layers)
    ref = jax.block_until_ready(ref)

    T_out = (T - conv_kernel) // conv_stride + 1
    assert out.shape == (B, T_out, vocab_size), out.shape
    # bf16 matmul operands / bf16 activation storage (f32 accumulation and state)
    # -> looser tolerance vs the f32 reference.
    np.testing.assert_allclose(np.asarray(out), np.asarray(ref), atol=5e-2, rtol=5e-2)

    print("KERNEL_OK")
</pallas_src>

<mosaic_0001>
module attributes {stable_mosaic.version = 11 : i64} {
  func.func @_matmul_bias_kernel(%arg0: i32, %arg1: memref<256x24xf32, #tpu.memory_space<vmem>>, %arg2: memref<24x128xbf16, #tpu.memory_space<vmem>>, %arg3: memref<1x128xf32, #tpu.memory_space<vmem>>, %arg4: memref<256x128xf32, #tpu.memory_space<vmem>>) attributes {dimension_semantics = [#tpu.dimension_semantics<parallel>], iteration_bounds = array<i64: 1>, scalar_prefetch = 0 : i64, scratch_operands = 0 : i64, tpu.core_type = #tpu.core_type<tc>, window_params = [{transform_indices = @transform_0, window_bounds = array<i64: 256, 24>}, {pipeline_mode = #tpu.pipeline_mode<synchronous>, transform_indices = @transform_1, window_bounds = array<i64: 24, 128>}, {pipeline_mode = #tpu.pipeline_mode<synchronous>, transform_indices = @transform_2, window_bounds = array<i64: 1, 128>}, {transform_indices = @transform_3, window_bounds = array<i64: 256, 128>}]} {
    %c0 = arith.constant 0 : index
    %c0_0 = arith.constant 0 : index
    %0 = vector.load %arg1[%c0, %c0_0] : memref<256x24xf32, #tpu.memory_space<vmem>>, vector<256x24xf32>
    %1 = arith.truncf %0 : vector<256x24xf32> to vector<256x24xbf16>
    %c0_1 = arith.constant 0 : index
    %c0_2 = arith.constant 0 : index
    %2 = vector.load %arg2[%c0_1, %c0_2] : memref<24x128xbf16, #tpu.memory_space<vmem>>, vector<24x128xbf16>
    %cst = arith.constant dense<0.000000e+00> : vector<256x128xf32>
    %3 = tpu.matmul %1, %2, %cst {dimension_numbers = #tpu.dot_dimension_numbers<[1], [0], [0], [1], [0, 0, 1, 1], [], []>} : vector<256x24xbf16>, vector<24x128xbf16>, vector<256x128xf32> -> vector<256x128xf32>
    %c0_3 = arith.constant 0 : index
    %c0_4 = arith.constant 0 : index
    %4 = vector.load %arg3[%c0_3, %c0_4] : memref<1x128xf32, #tpu.memory_space<vmem>>, vector<1x128xf32>
    %5 = vector.broadcast %4 : vector<1x128xf32> to vector<256x128xf32>
    %6 = arith.addf %3, %5 : vector<256x128xf32>
    %c0_5 = arith.constant 0 : index
    %c0_6 = arith.constant 0 : index
    %7 = vector.load %arg4[%c0_5, %c0_6] : memref<256x128xf32, #tpu.memory_space<vmem>>, vector<256x128xf32>
    tpu.vector_store %arg4[%c0_5, %c0_6], %6 {strides = array<i32>} : memref<256x128xf32, #tpu.memory_space<vmem>>, vector<256x128xf32>,
    return
  }
  func.func @transform_0(%arg0: i32) -> (i32, i32) {
    %c0_i32 = arith.constant 0 : i32
    %c0_i32_0 = arith.constant 0 : i32
    return %arg0, %c0_i32 : i32, i32
  }
  func.func @transform_1(%arg0: i32) -> (i32, i32) {
    %c0_i32 = arith.constant 0 : i32
    %c0_i32_0 = arith.constant 0 : i32
    %c0_i32_1 = arith.constant 0 : i32
    return %c0_i32, %c0_i32_0 : i32, i32
  }
  func.func @transform_2(%arg0: i32) -> (i32, i32) {
    %c0_i32 = arith.constant 0 : i32
    %c0_i32_0 = arith.constant 0 : i32
    %c0_i32_1 = arith.constant 0 : i32
    return %c0_i32, %c0_i32_0 : i32, i32
  }
  func.func @transform_3(%arg0: i32) -> (i32, i32) {
    %c0_i32 = arith.constant 0 : i32
    %c0_i32_0 = arith.constant 0 : i32
    return %arg0, %c0_i32 : i32, i32
  }
}

module attributes {stable_mosaic.version = 11 : i64} {
  func.func @_matmul2_bias_kernel(%arg0: i32, %arg1: i32, %arg2: memref<256x128xbf16, #tpu.memory_space<vmem>>, %arg3: memref<256x128xbf16, #tpu.memory_space<vmem>>, %arg4: memref<1x128x384xbf16, #tpu.memory_space<vmem>>, %arg5: memref<1x128x384xbf16, #tpu.memory_space<vmem>>, %arg6: memref<1x1x384xf32, #tpu.memory_space<vmem>>, %arg7: memref<1x256x384xf32, #tpu.memory_space<vmem>>) attributes {dimension_semantics = [#tpu.dimension_semantics<parallel>, #tpu.dimension_semantics<parallel>], iteration_bounds = array<i64: 2, 1>, scalar_prefetch = 0 : i64, scratch_operands = 0 : i64, tpu.core_type = #tpu.core_type<tc>, window_params = [{transform_indices = @transform_0, window_bounds = array<i64: 256, 128>}, {transform_indices = @transform_1, window_bounds = array<i64: 256, 128>}, {transform_indices = @transform_2, window_bounds = array<i64: 1, 128, 384>}, {transform_indices = @transform_3, window_bounds = array<i64: 1, 128, 384>}, {transform_indices = @transform_4, window_bounds = array<i64: 1, 1, 384>}, {transform_indices = @transform_5, window_bounds = array<i64: 1, 256, 384>}]} {
    %c0 = arith.constant 0 : index
    %c0_0 = arith.constant 0 : index
    %0 = vector.load %arg2[%c0, %c0_0] : memref<256x128xbf16, #tpu.memory_space<vmem>>, vector<256x128xbf16>
    %c0_1 = arith.constant 0 : index
    %c0_2 = arith.constant 0 : index
    %c0_3 = arith.constant 0 : index
    %1 = vector.load %arg4[%c0_1, %c0_2, %c0_3] : memref<1x128x384xbf16, #tpu.memory_space<vmem>>, vector<1x128x384xbf16>
    %2 = vector.shape_cast %1 : vector<1x128x384xbf16> to vector<128x384xbf16>
    %cst = arith.constant dense<0.000000e+00> : vector<256x384xf32>
    %3 = tpu.matmul %0, %2, %cst {dimension_numbers = #tpu.dot_dimension_numbers<[1], [0], [0], [1], [0, 0, 1, 1], [], []>} : vector<256x128xbf16>, vector<128x384xbf16>, vector<256x384xf32> -> vector<256x384xf32>
    %c0_4 = arith.constant 0 : index
    %c0_5 = arith.constant 0 : index
    %4 = vector.load %arg3[%c0_4, %c0_5] : memref<256x128xbf16, #tpu.memory_space<vmem>>, vector<256x128xbf16>
    %c0_6 = arith.constant 0 : index
    %c0_7 = arith.constant 0 : index
    %c0_8 = arith.constant 0 : index
    %5 = vector.load %arg5[%c0_6, %c0_7, %c0_8] : memref<1x128x384xbf16, #tpu.memory_space<vmem>>, vector<1x128x384xbf16>
    %6 = vector.shape_cast %5 : vector<1x128x384xbf16> to vector<128x384xbf16>
    %cst_9 = arith.constant dense<0.000000e+00> : vector<256x384xf32>
    %7 = tpu.matmul %4, %6, %cst_9 {dimension_numbers = #tpu.dot_dimension_numbers<[1], [0], [0], [1], [0, 0, 1, 1], [], []>} : vector<256x128xbf16>, vector<128x384xbf16>, vector<256x384xf32> -> vector<256x384xf32>
    %8 = arith.addf %3, %7 : vector<256x384xf32>
    %c0_10 = arith.constant 0 : index
    %c0_11 = arith.constant 0 : index
    %c0_12 = arith.constant 0 : index
    %9 = vector.load %arg6[%c0_10, %c0_11, %c0_12] : memref<1x1x384xf32, #tpu.memory_space<vmem>>, vector<1x1x384xf32>
    %10 = vector.shape_cast %9 : vector<1x1x384xf32> to vector<1x384xf32>
    %11 = vector.broadcast %10 : vector<1x384xf32> to vector<256x384xf32>
    %12 = arith.addf %8, %11 : vector<256x384xf32>
    %c0_13 = arith.constant 0 : index
    %c0_14 = arith.constant 0 : index
    %c0_15 = arith.constant 0 : index
    %13 = vector.load %arg7[%c0_13, %c0_14, %c0_15] : memref<1x256x384xf32, #tpu.memory_space<vmem>>, vector<1x256x384xf32>
    %14 = vector.shape_cast %13 : vector<1x256x384xf32> to vector<256x384xf32>
    %15 = vector.shape_cast %12 : vector<256x384xf32> to vector<1x256x384xf32>
    tpu.vector_store %arg7[%c0_13, %c0_14, %c0_15], %15 {strides = array<i32>} : memref<1x256x384xf32, #tpu.memory_space<vmem>>, vector<1x256x384xf32>,
    return
  }
  func.func @transform_0(%arg0: i32, %arg1: i32) -> (i32, i32) {
    %c0_i32 = arith.constant 0 : i32
    %c0_i32_0 = arith.constant 0 : i32
    return %arg1, %c0_i32 : i32, i32
  }
  func.func @transform_1(%arg0: i32, %arg1: i32) -> (i32, i32) {
    %c0_i32 = arith.constant 0 : i32
    %c0_i32_0 = arith.constant 0 : i32
    return %arg1, %c0_i32 : i32, i32
  }
  func.func @transform_2(%arg0: i32, %arg1: i32) -> (i32, i32, i32) {
    %c0_i32 = arith.constant 0 : i32
    %c0_i32_0 = arith.constant 0 : i32
    %c0_i32_1 = arith.constant 0 : i32
    return %arg0, %c0_i32, %c0_i32_0 : i32, i32, i32
  }
  func.func @transform_3(%arg0: i32, %arg1: i32) -> (i32, i32, i32) {
    %c0_i32 = arith.constant 0 : i32
    %c0_i32_0 = arith.constant 0 : i32
    %c0_i32_1 = arith.constant 0 : i32
    return %arg0, %c0_i32, %c0_i32_0 : i32, i32, i32
  }
  func.func @transform_4(%arg0: i32, %arg1: i32) -> (i32, i32, i32) {
    %c0_i32 = arith.constant 0 : i32
    %c0_i32_0 = arith.constant 0 : i32
    %c0_i32_1 = arith.constant 0 : i32
    return %arg0, %c0_i32, %c0_i32_0 : i32, i32, i32
  }
  func.func @transform_5(%arg0: i32, %arg1: i32) -> (i32, i32, i32) {
    %c0_i32 = arith.constant 0 : i32
    %c0_i32_0 = arith.constant 0 : i32
    return %arg0, %arg1, %c0_i32 : i32, i32, i32
  }
}

module attributes {stable_mosaic.version = 11 : i64} {
  func.func @_matmul_bias_kernel(%arg0: i32, %arg1: i32, %arg2: memref<256x128xf32, #tpu.memory_space<vmem>>, %arg3: memref<1x128x384xbf16, #tpu.memory_space<vmem>>, %arg4: memref<1x1x384xf32, #tpu.memory_space<vmem>>, %arg5: memref<1x256x384xf32, #tpu.memory_space<vmem>>) attributes {dimension_semantics = [#tpu.dimension_semantics<parallel>, #tpu.dimension_semantics<parallel>], iteration_bounds = array<i64: 2, 1>, scalar_prefetch = 0 : i64, scratch_operands = 0 : i64, tpu.core_type = #tpu.core_type<tc>, window_params = [{transform_indices = @transform_0, window_bounds = array<i64: 256, 128>}, {transform_indices = @transform_1, window_bounds = array<i64: 1, 128, 384>}, {transform_indices = @transform_2, window_bounds = array<i64: 1, 1, 384>}, {transform_indices = @transform_3, window_bounds = array<i64: 1, 256, 384>}]} {
    %c0 = arith.constant 0 : index
    %c0_0 = arith.constant 0 : index
    %0 = vector.load %arg2[%c0, %c0_0] : memref<256x128xf32, #tpu.memory_space<vmem>>, vector<256x128xf32>
    %1 = arith.truncf %0 : vector<256x128xf32> to vector<256x128xbf16>
    %c0_1 = arith.constant 0 : index
    %c0_2 = arith.constant 0 : index
    %c0_3 = arith.constant 0 : index
    %2 = vector.load %arg3[%c0_1, %c0_2, %c0_3] : memref<1x128x384xbf16, #tpu.memory_space<vmem>>, vector<1x128x384xbf16>
    %3 = vector.shape_cast %2 : vector<1x128x384xbf16> to vector<128x384xbf16>
    %cst = arith.constant dense<0.000000e+00> : vector<256x384xf32>
    %4 = tpu.matmul %1, %3, %cst {dimension_numbers = #tpu.dot_dimension_numbers<[1], [0], [0], [1], [0, 0, 1, 1], [], []>} : vector<256x128xbf16>, vector<128x384xbf16>, vector<256x384xf32> -> vector<256x384xf32>
    %c0_4 = arith.constant 0 : index
    %c0_5 = arith.constant 0 : index
    %c0_6 = arith.constant 0 : index
    %5 = vector.load %arg4[%c0_4, %c0_5, %c0_6] : memref<1x1x384xf32, #tpu.memory_space<vmem>>, vector<1x1x384xf32>
    %6 = vector.shape_cast %5 : vector<1x1x384xf32> to vector<1x384xf32>
    %7 = vector.broadcast %6 : vector<1x384xf32> to vector<256x384xf32>
    %8 = arith.addf %4, %7 : vector<256x384xf32>
    %c0_7 = arith.constant 0 : index
    %c0_8 = arith.constant 0 : index
    %c0_9 = arith.constant 0 : index
    %9 = vector.load %arg5[%c0_7, %c0_8, %c0_9] : memref<1x256x384xf32, #tpu.memory_space<vmem>>, vector<1x256x384xf32>
    %10 = vector.shape_cast %9 : vector<1x256x384xf32> to vector<256x384xf32>
    %11 = vector.shape_cast %8 : vector<256x384xf32> to vector<1x256x384xf32>
    tpu.vector_store %arg5[%c0_7, %c0_8, %c0_9], %11 {strides = array<i32>} : memref<1x256x384xf32, #tpu.memory_space<vmem>>, vector<1x256x384xf32>,
    return
  }
  func.func @transform_0(%arg0: i32, %arg1: i32) -> (i32, i32) {
    %c0_i32 = arith.constant 0 : i32
    %c0_i32_0 = arith.constant 0 : i32
    return %arg1, %c0_i32 : i32, i32
  }
  func.func @transform_1(%arg0: i32, %arg1: i32) -> (i32, i32, i32) {
    %c0_i32 = arith.constant 0 : i32
    %c0_i32_0 = arith.constant 0 : i32
    %c0_i32_1 = arith.constant 0 : i32
    return %arg0, %c0_i32, %c0_i32_0 : i32, i32, i32
  }
  func.func @transform_2(%arg0: i32, %arg1: i32) -> (i32, i32, i32) {
    %c0_i32 = arith.constant 0 : i32
    %c0_i32_0 = arith.constant 0 : i32
    %c0_i32_1 = arith.constant 0 : i32
    return %arg0, %c0_i32, %c0_i32_0 : i32, i32, i32
  }
  func.func @transform_3(%arg0: i32, %arg1: i32) -> (i32, i32, i32) {
    %c0_i32 = arith.constant 0 : i32
    %c0_i32_0 = arith.constant 0 : i32
    return %arg0, %arg1, %c0_i32 : i32, i32, i32
  }
}

module attributes {stable_mosaic.version = 11 : i64} {
  func.func @_bigru_kernel(%arg0: i32, %arg1: memref<1x16x16x384xf32, #tpu.memory_space<vmem>>, %arg2: memref<1x16x16x384xf32, #tpu.memory_space<vmem>>, %arg3: memref<2x128x384xbf16, #tpu.memory_space<vmem>>, %arg4: memref<2x1x128xf32, #tpu.memory_space<vmem>>, %arg5: memref<16x16x128xbf16, #tpu.memory_space<vmem>>, %arg6: memref<16x16x128xbf16, #tpu.memory_space<vmem>>, %arg7: memref<16x128xf32, #tpu.memory_space<vmem>>, %arg8: memref<16x128xf32, #tpu.memory_space<vmem>>) attributes {dimension_semantics = [#tpu.dimension_semantics<arbitrary>], iteration_bounds = array<i64: 1>, scalar_prefetch = 0 : i64, scratch_operands = 2 : i64, tpu.core_type = #tpu.core_type<tc>, window_params = [{transform_indices = @transform_0, window_bounds = array<i64: 1, 16, 16, 384>}, {transform_indices = @transform_1, window_bounds = array<i64: 1, 16, 16, 384>}, {pipeline_mode = #tpu.pipeline_mode<synchronous>, transform_indices = @transform_2, window_bounds = array<i64: 2, 128, 384>}, {pipeline_mode = #tpu.pipeline_mode<synchronous>, transform_indices = @transform_3, window_bounds = array<i64: 2, 1, 128>}, {transform_indices = @transform_4, window_bounds = array<i64: 16, 16, 128>}, {transform_indices = @transform_5, window_bounds = array<i64: 16, 16, 128>}]} {
    %c0_i32 = arith.constant 0 : i32
    %0 = arith.cmpi eq, %arg0, %c0_i32 : i32
    %1 = arith.extui %0 : i1 to i32
    %c0_i32_0 = arith.constant 0 : i32
    %2 = arith.cmpi ne, %1, %c0_i32_0 : i32
    scf.if %2 {
      %cst_435 = arith.constant 0.000000e+00 : f32
      %1455 = vector.broadcast %cst_435 : f32 to vector<16x128xf32>
      %c0_436 = arith.constant 0 : index
      %c0_437 = arith.constant 0 : index
      %1456 = vector.load %arg7[%c0_436, %c0_437] : memref<16x128xf32, #tpu.memory_space<vmem>>, vector<16x128xf32>
      tpu.vector_store %arg7[%c0_436, %c0_437], %1455 {strides = array<i32>} : memref<16x128xf32, #tpu.memory_space<vmem>>, vector<16x128xf32>,
      %cst_438 = arith.constant 0.000000e+00 : f32
      %1457 = vector.broadcast %cst_438 : f32 to vector<16x128xf32>
      %c0_439 = arith.constant 0 : index
      %c0_440 = arith.constant 0 : index
      %1458 = vector.load %arg8[%c0_439, %c0_440] : memref<16x128xf32, #tpu.memory_space<vmem>>, vector<16x128xf32>
      tpu.vector_store %arg8[%c0_439, %c0_440], %1457 {strides = array<i32>} : memref<16x128xf32, #tpu.memory_space<vmem>>, vector<16x128xf32>,
    } else {
    }
    %c0 = arith.constant 0 : index
    %c0_1 = arith.constant 0 : index
    %c0_2 = arith.constant 0 : index
    %3 = vector.load %arg3[%c0, %c0_1, %c0_2] : memref<2x128x384xbf16, #tpu.memory_space<vmem>>, vector<1x128x384xbf16>
    %4 = vector.shape_cast %3 : vector<1x128x384xbf16> to vector<128x384xbf16>
    %c1 = arith.constant 1 : index
    %c0_3 = arith.constant 0 : index
    %c0_4 = arith.constant 0 : index
    %5 = vector.load %arg3[%c1, %c0_3, %c0_4] : memref<2x128x384xbf16, #tpu.memory_space<vmem>>, vector<1x128x384xbf16>
    %6 = vector.shape_cast %5 : vector<1x128x384xbf16> to vector<128x384xbf16>
    %c0_5 = arith.constant 0 : index
    %c0_6 = arith.constant 0 : index
    %c0_7 = arith.constant 0 : index
    %7 = vector.load %arg4[%c0_5, %c0_6, %c0_7] : memref<2x1x128xf32, #tpu.memory_space<vmem>>, vector<1x1x128xf32>
    %8 = vector.shape_cast %7 : vector<1x1x128xf32> to vector<1x128xf32>
    %c1_8 = arith.constant 1 : index
    %c0_9 = arith.constant 0 : index
    %c0_10 = arith.constant 0 : index
    %9 = vector.load %arg4[%c1_8, %c0_9, %c0_10] : memref<2x1x128xf32, #tpu.memory_space<vmem>>, vector<1x1x128xf32>
    %10 = vector.shape_cast %9 : vector<1x1x128xf32> to vector<1x128xf32>
    %c0_11 = arith.constant 0 : index
    %c0_12 = arith.constant 0 : index
    %11 = vector.load %arg7[%c0_11, %c0_12] : memref<16x128xf32, #tpu.memory_space<vmem>>, vector<16x128xf32>
    %c0_13 = arith.constant 0 : index
    %c0_14 = arith.constant 0 : index
    %12 = vector.load %arg8[%c0_13, %c0_14] : memref<16x128xf32, #tpu.memory_space<vmem>>, vector<16x128xf32>
    %c0_i32_15 = arith.constant 0 : i32
    %c15_i32 = arith.constant 15 : i32
    %13 = arith.subi %c15_i32, %c0_i32_15 : i32
    %c16_i32 = arith.constant 16 : i32
    %14 = arith.muli %arg0, %c16_i32 : i32
    %15 = arith.addi %14, %c0_i32_15 : i32
    %c0_i32_16 = arith.constant 0 : i32
    %16 = arith.subi %c0_i32_16, %arg0 : i32
    %c16_i32_17 = arith.constant 16 : i32
    %17 = arith.muli %16, %c16_i32_17 : i32
    %18 = arith.addi %17, %13 : i32
    %19 = arith.truncf %11 : vector<16x128xf32> to vector<16x128xbf16>
    %cst = arith.constant dense<0.000000e+00> : vector<16x384xf32>
    %20 = tpu.matmul %19, %4, %cst {dimension_numbers = #tpu.dot_dimension_numbers<[1], [0], [0], [1], [0, 0, 1, 1], [], []>} : vector<16x128xbf16>, vector<128x384xbf16>, vector<16x384xf32> -> vector<16x384xf32>
    %21 = arith.truncf %12 : vector<16x128xf32> to vector<16x128xbf16>
    %cst_18 = arith.constant dense<0.000000e+00> : vector<16x384xf32>
    %22 = tpu.matmul %21, %6, %cst_18 {dimension_numbers = #tpu.dot_dimension_numbers<[1], [0], [0], [1], [0, 0, 1, 1], [], []>} : vector<16x128xbf16>, vector<128x384xbf16>, vector<16x384xf32> -> vector<16x384xf32>
    %c0_19 = arith.constant 0 : index
    %23 = arith.index_cast %c0_i32_15 : i32 to index
    %c0_20 = arith.constant 0 : index
    %c0_21 = arith.constant 0 : index
    %24 = vector.load %arg1[%c0_19, %23, %c0_20, %c0_21] : memref<1x16x16x384xf32, #tpu.memory_space<vmem>>, vector<1x1x16x384xf32>
    %25 = vector.shape_cast %24 : vector<1x1x16x384xf32> to vector<16x384xf32>
    %26 = vector.extract_strided_slice %25 {offsets = [0, 0], sizes = [16, 128], strides = [1, 1]} : vector<16x384xf32> to vector<16x128xf32>
    %27 = vector.extract_strided_slice %20 {offsets = [0, 0], sizes = [16, 128], strides = [1, 1]} : vector<16x384xf32> to vector<16x128xf32>
    %28 = arith.addf %26, %27 : vector<16x128xf32>
    %29 = arith.negf %28 : vector<16x128xf32>
    %30 = math.exp %29 : vector<16x128xf32>
    %cst_22 = arith.constant 1.000000e+00 : f32
    %31 = vector.broadcast %cst_22 : f32 to vector<16x128xf32>
    %32 = arith.addf %31, %30 : vector<16x128xf32>
    %33 = arith.divf %31, %32 : vector<16x128xf32>
    %34 = vector.extract_strided_slice %25 {offsets = [0, 128], sizes = [16, 128], strides = [1, 1]} : vector<16x384xf32> to vector<16x128xf32>
    %35 = vector.extract_strided_slice %20 {offsets = [0, 128], sizes = [16, 128], strides = [1, 1]} : vector<16x384xf32> to vector<16x128xf32>
    %36 = arith.addf %34, %35 : vector<16x128xf32>
    %37 = arith.negf %36 : vector<16x128xf32>
    %38 = math.exp %37 : vector<16x128xf32>
    %cst_23 = arith.constant 1.000000e+00 : f32
    %39 = vector.broadcast %cst_23 : f32 to vector<16x128xf32>
    %40 = arith.addf %39, %38 : vector<16x128xf32>
    %41 = arith.divf %39, %40 : vector<16x128xf32>
    %42 = vector.extract_strided_slice %25 {offsets = [0, 256], sizes = [16, 128], strides = [1, 1]} : vector<16x384xf32> to vector<16x128xf32>
    %43 = vector.extract_strided_slice %20 {offsets = [0, 256], sizes = [16, 128], strides = [1, 1]} : vector<16x384xf32> to vector<16x128xf32>
    %44 = vector.broadcast %8 : vector<1x128xf32> to vector<16x128xf32>
    %45 = arith.addf %43, %44 : vector<16x128xf32>
    %46 = arith.mulf %33, %45 : vector<16x128xf32>
    %47 = arith.addf %42, %46 : vector<16x128xf32>
    %48 = math.tanh %47 : vector<16x128xf32>
    %cst_24 = arith.constant 1.000000e+00 : f32
    %49 = vector.broadcast %cst_24 : f32 to vector<16x128xf32>
    %50 = arith.subf %49, %41 : vector<16x128xf32>
    %51 = arith.mulf %50, %48 : vector<16x128xf32>
    %52 = arith.mulf %41, %11 : vector<16x128xf32>
    %53 = arith.addf %51, %52 : vector<16x128xf32>
    %c0_25 = arith.constant 0 : index
    %54 = arith.index_cast %13 : i32 to index
    %c0_26 = arith.constant 0 : index
    %c0_27 = arith.constant 0 : index
    %55 = vector.load %arg2[%c0_25, %54, %c0_26, %c0_27] : memref<1x16x16x384xf32, #tpu.memory_space<vmem>>, vector<1x1x16x384xf32>
    %56 = vector.shape_cast %55 : vector<1x1x16x384xf32> to vector<16x384xf32>
    %57 = vector.extract_strided_slice %56 {offsets = [0, 0], sizes = [16, 128], strides = [1, 1]} : vector<16x384xf32> to vector<16x128xf32>
    %58 = vector.extract_strided_slice %22 {offsets = [0, 0], sizes = [16, 128], strides = [1, 1]} : vector<16x384xf32> to vector<16x128xf32>
    %59 = arith.addf %57, %58 : vector<16x128xf32>
    %60 = arith.negf %59 : vector<16x128xf32>
    %61 = math.exp %60 : vector<16x128xf32>
    %cst_28 = arith.constant 1.000000e+00 : f32
    %62 = vector.broadcast %cst_28 : f32 to vector<16x128xf32>
    %63 = arith.addf %62, %61 : vector<16x128xf32>
    %64 = arith.divf %62, %63 : vector<16x128xf32>
    %65 = vector.extract_strided_slice %56 {offsets = [0, 128], sizes = [16, 128], strides = [1, 1]} : vector<16x384xf32> to vector<16x128xf32>
    %66 = vector.extract_strided_slice %22 {offsets = [0, 128], sizes = [16, 128], strides = [1, 1]} : vector<16x384xf32> to vector<16x128xf32>
    %67 = arith.addf %65, %66 : vector<16x128xf32>
    %68 = arith.negf %67 : vector<16x128xf32>
    %69 = math.exp %68 : vector<16x128xf32>
    %cst_29 = arith.constant 1.000000e+00 : f32
    %70 = vector.broadcast %cst_29 : f32 to vector<16x128xf32>
    %71 = arith.addf %70, %69 : vector<16x128xf32>
    %72 = arith.divf %70, %71 : vector<16x128xf32>
    %73 = vector.extract_strided_slice %56 {offsets = [0, 256], sizes = [16, 128], strides = [1, 1]} : vector<16x384xf32> to vector<16x128xf32>
    %74 = vector.extract_strided_slice %22 {offsets = [0, 256], sizes = [16, 128], strides = [1, 1]} : vector<16x384xf32> to vector<16x128xf32>
    %75 = vector.broadcast %10 : vector<1x128xf32> to vector<16x128xf32>
    %76 = arith.addf %74, %75 : vector<16x128xf32>
    %77 = arith.mulf %64, %76 : vector<16x128xf32>
    %78 = arith.addf %73, %77 : vector<16x128xf32>
    %79 = math.tanh %78 : vector<16x128xf32>
    %cst_30 = arith.constant 1.000000e+00 : f32
    %80 = vector.broadcast %cst_30 : f32 to vector<16x128xf32>
    %81 = arith.subf %80, %72 : vector<16x128xf32>
    %82 = arith.mulf %81, %79 : vector<16x128xf32>
    %83 = arith.mulf %72, %12 : vector<16x128xf32>
    %84 = arith.addf %82, %83 : vector<16x128xf32>
    %c7_i32 = arith.constant 7 : i32
    %85 = arith.cmpi slt, %15, %c7_i32 : i32
    %c7_i32_31 = arith.constant 7 : i32
    %86 = arith.cmpi slt, %18, %c7_i32_31 : i32
    %87 = arith.select %85, %53, %11 : vector<16x128xf32>
    %88 = arith.select %86, %84, %12 : vector<16x128xf32>
    %cst_32 = arith.constant 0.000000e+00 : f32
    %89 = vector.broadcast %cst_32 : f32 to vector<16x128xf32>
    %90 = arith.select %85, %87, %89 : vector<16x128xf32>
    %91 = arith.truncf %90 : vector<16x128xf32> to vector<16x128xbf16>
    %92 = arith.index_cast %c0_i32_15 : i32 to index
    %c0_33 = arith.constant 0 : index
    %c0_34 = arith.constant 0 : index
    %93 = vector.load %arg5[%92, %c0_33, %c0_34] : memref<16x16x128xbf16, #tpu.memory_space<vmem>>, vector<1x16x128xbf16>
    %94 = vector.shape_cast %93 : vector<1x16x128xbf16> to vector<16x128xbf16>
    %95 = vector.shape_cast %91 : vector<16x128xbf16> to vector<1x16x128xbf16>
    tpu.vector_store %arg5[%92, %c0_33, %c0_34], %95 {strides = array<i32>} : memref<16x16x128xbf16, #tpu.memory_space<vmem>>, vector<1x16x128xbf16>,
    %cst_35 = arith.constant 0.000000e+00 : f32
    %96 = vector.broadcast %cst_35 : f32 to vector<16x128xf32>
    %97 = arith.select %86, %88, %96 : vector<16x128xf32>
    %98 = arith.truncf %97 : vector<16x128xf32> to vector<16x128xbf16>
    %99 = arith.index_cast %13 : i32 to index
    %c0_36 = arith.constant 0 : index
    %c0_37 = arith.constant 0 : index
    %100 = vector.load %arg6[%99, %c0_36, %c0_37] : memref<16x16x128xbf16, #tpu.memory_space<vmem>>, vector<1x16x128xbf16>
    %101 = vector.shape_cast %100 : vector<1x16x128xbf16> to vector<16x128xbf16>
    %102 = vector.shape_cast %98 : vector<16x128xbf16> to vector<1x16x128xbf16>
    tpu.vector_store %arg6[%99, %c0_36, %c0_37], %102 {strides = array<i32>} : memref<16x16x128xbf16, #tpu.memory_space<vmem>>, vector<1x16x128xbf16>,
    %c1_i32 = arith.constant 1 : i32
    %c15_i32_38 = arith.constant 15 : i32
    %103 = arith.subi %c15_i32_38, %c1_i32 : i32
    %c16_i32_39 = arith.constant 16 : i32
    %104 = arith.muli %arg0, %c16_i32_39 : i32
    %105 = arith.addi %104, %c1_i32 : i32
    %c0_i32_40 = arith.constant 0 : i32
    %106 = arith.subi %c0_i32_40, %arg0 : i32
    %c16_i32_41 = arith.constant 16 : i32
    %107 = arith.muli %106, %c16_i32_41 : i32
    %108 = arith.addi %107, %103 : i32
    %109 = arith.truncf %87 : vector<16x128xf32> to vector<16x128xbf16>
    %cst_42 = arith.constant dense<0.000000e+00> : vector<16x384xf32>
    %110 = tpu.matmul %109, %4, %cst_42 {dimension_numbers = #tpu.dot_dimension_numbers<[1], [0], [0], [1], [0, 0, 1, 1], [], []>} : vector<16x128xbf16>, vector<128x384xbf16>, vector<16x384xf32> -> vector<16x384xf32>
    %111 = arith.truncf %88 : vector<16x128xf32> to vector<16x128xbf16>
    %cst_43 = arith.constant dense<0.000000e+00> : vector<16x384xf32>
    %112 = tpu.matmul %111, %6, %cst_43 {dimension_numbers = #tpu.dot_dimension_numbers<[1], [0], [0], [1], [0, 0, 1, 1], [], []>} : vector<16x128xbf16>, vector<128x384xbf16>, vector<16x384xf32> -> vector<16x384xf32>
    %c0_44 = arith.constant 0 : index
    %113 = arith.index_cast %c1_i32 : i32 to index
    %c0_45 = arith.constant 0 : index
    %c0_46 = arith.constant 0 : index
    %114 = vector.load %arg1[%c0_44, %113, %c0_45, %c0_46] : memref<1x16x16x384xf32, #tpu.memory_space<vmem>>, vector<1x1x16x384xf32>
    %115 = vector.shape_cast %114 : vector<1x1x16x384xf32> to vector<16x384xf32>
    %116 = vector.extract_strided_slice %115 {offsets = [0, 0], sizes = [16, 128], strides = [1, 1]} : vector<16x384xf32> to vector<16x128xf32>
    %117 = vector.extract_strided_slice %110 {offsets = [0, 0], sizes = [16, 128], strides = [1, 1]} : vector<16x384xf32> to vector<16x128xf32>
    %118 = arith.addf %116, %117 : vector<16x128xf32>
    %119 = arith.negf %118 : vector<16x128xf32>
    %120 = math.exp %119 : vector<16x128xf32>
    %cst_47 = arith.constant 1.000000e+00 : f32
    %121 = vector.broadcast %cst_47 : f32 to vector<16x128xf32>
    %122 = arith.addf %121, %120 : vector<16x128xf32>
    %123 = arith.divf %121, %122 : vector<16x128xf32>
    %124 = vector.extract_strided_slice %115 {offsets = [0, 128], sizes = [16, 128], strides = [1, 1]} : vector<16x384xf32> to vector<16x128xf32>
    %125 = vector.extract_strided_slice %110 {offsets = [0, 128], sizes = [16, 128], strides = [1, 1]} : vector<16x384xf32> to vector<16x128xf32>
    %126 = arith.addf %124, %125 : vector<16x128xf32>
    %127 = arith.negf %126 : vector<16x128xf32>
    %128 = math.exp %127 : vector<16x128xf32>
    %cst_48 = arith.constant 1.000000e+00 : f32
    %129 = vector.broadcast %cst_48 : f32 to vector<16x128xf32>
    %130 = arith.addf %129, %128 : vector<16x128xf32>
    %131 = arith.divf %129, %130 : vector<16x128xf32>
    %132 = vector.extract_strided_slice %115 {offsets = [0, 256], sizes = [16, 128], strides = [1, 1]} : vector<16x384xf32> to vector<16x128xf32>
    %133 = vector.extract_strided_slice %110 {offsets = [0, 256], sizes = [16, 128], strides = [1, 1]} : vector<16x384xf32> to vector<16x128xf32>
    %134 = vector.broadcast %8 : vector<1x128xf32> to vector<16x128xf32>
    %135 = arith.addf %133, %134 : vector<16x128xf32>
    %136 = arith.mulf %123, %135 : vector<16x128xf32>
    %137 = arith.addf %132, %136 : vector<16x128xf32>
    %138 = math.tanh %137 : vector<16x128xf32>
    %cst_49 = arith.constant 1.000000e+00 : f32
    %139 = vector.broadcast %cst_49 : f32 to vector<16x128xf32>
    %140 = arith.subf %139, %131 : vector<16x128xf32>
    %141 = arith.mulf %140, %138 : vector<16x128xf32>
    %142 = arith.mulf %131, %87 : vector<16x128xf32>
    %143 = arith.addf %141, %142 : vector<16x128xf32>
    %c0_50 = arith.constant 0 : index
    %144 = arith.index_cast %103 : i32 to index
    %c0_51 = arith.constant 0 : index
    %c0_52 = arith.constant 0 : index
    %145 = vector.load %arg2[%c0_50, %144, %c0_51, %c0_52] : memref<1x16x16x384xf32, #tpu.memory_space<vmem>>, vector<1x1x16x384xf32>
    %146 = vector.shape_cast %145 : vector<1x1x16x384xf32> to vector<16x384xf32>
    %147 = vector.extract_strided_slice %146 {offsets = [0, 0], sizes = [16, 128], strides = [1, 1]} : vector<16x384xf32> to vector<16x128xf32>
    %148 = vector.extract_strided_slice %112 {offsets = [0, 0], sizes = [16, 128], strides = [1, 1]} : vector<16x384xf32> to vector<16x128xf32>
    %149 = arith.addf %147, %148 : vector<16x128xf32>
    %150 = arith.negf %149 : vector<16x128xf32>
    %151 = math.exp %150 : vector<16x128xf32>
    %cst_53 = arith.constant 1.000000e+00 : f32
    %152 = vector.broadcast %cst_53 : f32 to vector<16x128xf32>
    %153 = arith.addf %152, %151 : vector<16x128xf32>
    %154 = arith.divf %152, %153 : vector<16x128xf32>
    %155 = vector.extract_strided_slice %146 {offsets = [0, 128], sizes = [16, 128], strides = [1, 1]} : vector<16x384xf32> to vector<16x128xf32>
    %156 = vector.extract_strided_slice %112 {offsets = [0, 128], sizes = [16, 128], strides = [1, 1]} : vector<16x384xf32> to vector<16x128xf32>
    %157 = arith.addf %155, %156 : vector<16x128xf32>
    %158 = arith.negf %157 : vector<16x128xf32>
    %159 = math.exp %158 : vector<16x128xf32>
    %cst_54 = arith.constant 1.000000e+00 : f32
    %160 = vector.broadcast %cst_54 : f32 to vector<16x128xf32>
    %161 = arith.addf %160, %159 : vector<16x128xf32>
    %162 = arith.divf %160, %161 : vector<16x128xf32>
    %163 = vector.extract_strided_slice %146 {offsets = [0, 256], sizes = [16, 128], strides = [1, 1]} : vector<16x384xf32> to vector<16x128xf32>
    %164 = vector.extract_strided_slice %112 {offsets = [0, 256], sizes = [16, 128], strides = [1, 1]} : vector<16x384xf32> to vector<16x128xf32>
    %165 = vector.broadcast %10 : vector<1x128xf32> to vector<16x128xf32>
    %166 = arith.addf %164, %165 : vector<16x128xf32>
    %167 = arith.mulf %154, %166 : vector<16x128xf32>
    %168 = arith.addf %163, %167 : vector<16x128xf32>
    %169 = math.tanh %168 : vector<16x128xf32>
    %cst_55 = arith.constant 1.000000e+00 : f32
    %170 = vector.broadcast %cst_55 : f32 to vector<16x128xf32>
    %171 = arith.subf %170, %162 : vector<16x128xf32>
    %172 = arith.mulf %171, %169 : vector<16x128xf32>
    %173 = arith.mulf %162, %88 : vector<16x128xf32>
    %174 = arith.addf %172, %173 : vector<16x128xf32>
    %c7_i32_56 = arith.constant 7 : i32
    %175 = arith.cmpi slt, %105, %c7_i32_56 : i32
    %c7_i32_57 = arith.constant 7 : i32
    %176 = arith.cmpi slt, %108, %c7_i32_57 : i32
    %177 = arith.select %175, %143, %87 : vector<16x128xf32>
    %178 = arith.select %176, %174, %88 : vector<16x128xf32>
    %cst_58 = arith.constant 0.000000e+00 : f32
    %179 = vector.broadcast %cst_58 : f32 to vector<16x128xf32>
    %180 = arith.select %175, %177, %179 : vector<16x128xf32>
    %181 = arith.truncf %180 : vector<16x128xf32> to vector<16x128xbf16>
    %182 = arith.index_cast %c1_i32 : i32 to index
    %c0_59 = arith.constant 0 : index
    %c0_60 = arith.constant 0 : index
    %183 = vector.load %arg5[%182, %c0_59, %c0_60] : memref<16x16x128xbf16, #tpu.memory_space<vmem>>, vector<1x16x128xbf16>
    %184 = vector.shape_cast %183 : vector<1x16x128xbf16> to vector<16x128xbf16>
    %185 = vector.shape_cast %181 : vector<16x128xbf16> to vector<1x16x128xbf16>
    tpu.vector_store %arg5[%182, %c0_59, %c0_60], %185 {strides = array<i32>} : memref<16x16x128xbf16, #tpu.memory_space<vmem>>, vector<1x16x128xbf16>,
    %cst_61 = arith.constant 0.000000e+00 : f32
    %186 = vector.broadcast %cst_61 : f32 to vector<16x128xf32>
    %187 = arith.select %176, %178, %186 : vector<16x128xf32>
    %188 = arith.truncf %187 : vector<16x128xf32> to vector<16x128xbf16>
    %189 = arith.index_cast %103 : i32 to index
    %c0_62 = arith.constant 0 : index
    %c0_63 = arith.constant 0 : index
    %190 = vector.load %arg6[%189, %c0_62, %c0_63] : memref<16x16x128xbf16, #tpu.memory_space<vmem>>, vector<1x16x128xbf16>
    %191 = vector.shape_cast %190 : vector<1x16x128xbf16> to vector<16x128xbf16>
    %192 = vector.shape_cast %188 : vector<16x128xbf16> to vector<1x16x128xbf16>
    tpu.vector_store %arg6[%189, %c0_62, %c0_63], %192 {strides = array<i32>} : memref<16x16x128xbf16, #tpu.memory_space<vmem>>, vector<1x16x128xbf16>,
    %c2_i32 = arith.constant 2 : i32
    %c15_i32_64 = arith.constant 15 : i32
    %193 = arith.subi %c15_i32_64, %c2_i32 : i32
    %c16_i32_65 = arith.constant 16 : i32
    %194 = arith.muli %arg0, %c16_i32_65 : i32
    %195 = arith.addi %194, %c2_i32 : i32
    %c0_i32_66 = arith.constant 0 : i32
    %196 = arith.subi %c0_i32_66, %arg0 : i32
    %c16_i32_67 = arith.constant 16 : i32
    %197 = arith.muli %196, %c16_i32_67 : i32
    %198 = arith.addi %197, %193 : i32
    %199 = arith.truncf %177 : vector<16x128xf32> to vector<16x128xbf16>
    %cst_68 = arith.constant dense<0.000000e+00> : vector<16x384xf32>
    %200 = tpu.matmul %199, %4, %cst_68 {dimension_numbers = #tpu.dot_dimension_numbers<[1], [0], [0], [1], [0, 0, 1, 1], [], []>} : vector<16x128xbf16>, vector<128x384xbf16>, vector<16x384xf32> -> vector<16x384xf32>
    %201 = arith.truncf %178 : vector<16x128xf32> to vector<16x128xbf16>
    %cst_69 = arith.constant dense<0.000000e+00> : vector<16x384xf32>
    %202 = tpu.matmul %201, %6, %cst_69 {dimension_numbers = #tpu.dot_dimension_numbers<[1], [0], [0], [1], [0, 0, 1, 1], [], []>} : vector<16x128xbf16>, vector<128x384xbf16>, vector<16x384xf32> -> vector<16x384xf32>
    %c0_70 = arith.constant 0 : index
    %203 = arith.index_cast %c2_i32 : i32 to index
    %c0_71 = arith.constant 0 : index
    %c0_72 = arith.constant 0 : index
    %204 = vector.load %arg1[%c0_70, %203, %c0_71, %c0_72] : memref<1x16x16x384xf32, #tpu.memory_space<vmem>>, vector<1x1x16x384xf32>
    %205 = vector.shape_cast %204 : vector<1x1x16x384xf32> to vector<16x384xf32>
    %206 = vector.extract_strided_slice %205 {offsets = [0, 0], sizes = [16, 128], strides = [1, 1]} : vector<16x384xf32> to vector<16x128xf32>
    %207 = vector.extract_strided_slice %200 {offsets = [0, 0], sizes = [16, 128], strides = [1, 1]} : vector<16x384xf32> to vector<16x128xf32>
    %208 = arith.addf %206, %207 : vector<16x128xf32>
    %209 = arith.negf %208 : vector<16x128xf32>
    %210 = math.exp %209 : vector<16x128xf32>
    %cst_73 = arith.constant 1.000000e+00 : f32
    %211 = vector.broadcast %cst_73 : f32 to vector<16x128xf32>
    %212 = arith.addf %211, %210 : vector<16x128xf32>
    %213 = arith.divf %211, %212 : vector<16x128xf32>
    %214 = vector.extract_strided_slice %205 {offsets = [0, 128], sizes = [16, 128], strides = [1, 1]} : vector<16x384xf32> to vector<16x128xf32>
    %215 = vector.extract_strided_slice %200 {offsets = [0, 128], sizes = [16, 128], strides = [1, 1]} : vector<16x384xf32> to vector<16x128xf32>
    %216 = arith.addf %214, %215 : vector<16x128xf32>
    %217 = arith.negf %216 : vector<16x128xf32>
    %218 = math.exp %217 : vector<16x128xf32>
    %cst_74 = arith.constant 1.000000e+00 : f32
    %219 = vector.broadcast %cst_74 : f32 to vector<16x128xf32>
    %220 = arith.addf %219, %218 : vector<16x128xf32>
    %221 = arith.divf %219, %220 : vector<16x128xf32>
    %222 = vector.extract_strided_slice %205 {offsets = [0, 256], sizes = [16, 128], strides = [1, 1]} : vector<16x384xf32> to vector<16x128xf32>
    %223 = vector.extract_strided_slice %200 {offsets = [0, 256], sizes = [16, 128], strides = [1, 1]} : vector<16x384xf32> to vector<16x128xf32>
    %224 = vector.broadcast %8 : vector<1x128xf32> to vector<16x128xf32>
    %225 = arith.addf %223, %224 : vector<16x128xf32>
    %226 = arith.mulf %213, %225 : vector<16x128xf32>
    %227 = arith.addf %222, %226 : vector<16x128xf32>
    %228 = math.tanh %227 : vector<16x128xf32>
    %cst_75 = arith.constant 1.000000e+00 : f32
    %229 = vector.broadcast %cst_75 : f32 to vector<16x128xf32>
    %230 = arith.subf %229, %221 : vector<16x128xf32>
    %231 = arith.mulf %230, %228 : vector<16x128xf32>
    %232 = arith.mulf %221, %177 : vector<16x128xf32>
    %233 = arith.addf %231, %232 : vector<16x128xf32>
    %c0_76 = arith.constant 0 : index
    %234 = arith.index_cast %193 : i32 to index
    %c0_77 = arith.constant 0 : index
    %c0_78 = arith.constant 0 : index
    %235 = vector.load %arg2[%c0_76, %234, %c0_77, %c0_78] : memref<1x16x16x384xf32, #tpu.memory_space<vmem>>, vector<1x1x16x384xf32>
    %236 = vector.shape_cast %235 : vector<1x1x16x384xf32> to vector<16x384xf32>
    %237 = vector.extract_strided_slice %236 {offsets = [0, 0], sizes = [16, 128], strides = [1, 1]} : vector<16x384xf32> to vector<16x128xf32>
    %238 = vector.extract_strided_slice %202 {offsets = [0, 0], sizes = [16, 128], strides = [1, 1]} : vector<16x384xf32> to vector<16x128xf32>
    %239 = arith.addf %237, %238 : vector<16x128xf32>
    %240 = arith.negf %239 : vector<16x128xf32>
    %241 = math.exp %240 : vector<16x128xf32>
    %cst_79 = arith.constant 1.000000e+00 : f32
    %242 = vector.broadcast %cst_79 : f32 to vector<16x128xf32>
    %243 = arith.addf %242, %241 : vector<16x128xf32>
    %244 = arith.divf %242, %243 : vector<16x128xf32>
    %245 = vector.extract_strided_slice %236 {offsets = [0, 128], sizes = [16, 128], strides = [1, 1]} : vector<16x384xf32> to vector<16x128xf32>
    %246 = vector.extract_strided_slice %202 {offsets = [0, 128], sizes = [16, 128], strides = [1, 1]} : vector<16x384xf32> to vector<16x128xf32>
    %247 = arith.addf %245, %246 : vector<16x128xf32>
    %248 = arith.negf %247 : vector<16x128xf32>
    %249 = math.exp %248 : vector<16x128xf32>
    %cst_80 = arith.constant 1.000000e+00 : f32
    %250 = vector.broadcast %cst_80 : f32 to vector<16x128xf32>
    %251 = arith.addf %250, %249 : vector<16x128xf32>
    %252 = arith.divf %250, %251 : vector<16x128xf32>
    %253 = vector.extract_strided_slice %236 {offsets = [0, 256], sizes = [16, 128], strides = [1, 1]} : vector<16x384xf32> to vector<16x128xf32>
    %254 = vector.extract_strided_slice %202 {offsets = [0, 256], sizes = [16, 128], strides = [1, 1]} : vector<16x384xf32> to vector<16x128xf32>
    %255 = vector.broadcast %10 : vector<1x128xf32> to vector<16x128xf32>
    %256 = arith.addf %254, %255 : vector<16x128xf32>
    %257 = arith.mulf %244, %256 : vector<16x128xf32>
    %258 = arith.addf %253, %257 : vector<16x128xf32>
    %259 = math.tanh %258 : vector<16x128xf32>
    %cst_81 = arith.constant 1.000000e+00 : f32
    %260 = vector.broadcast %cst_81 : f32 to vector<16x128xf32>
    %261 = arith.subf %260, %252 : vector<16x128xf32>
    %262 = arith.mulf %261, %259 : vector<16x128xf32>
    %263 = arith.mulf %252, %178 : vector<16x128xf32>
    %264 = arith.addf %262, %263 : vector<16x128xf32>
    %c7_i32_82 = arith.constant 7 : i32
    %265 = arith.cmpi slt, %195, %c7_i32_82 : i32
    %c7_i32_83 = arith.constant 7 : i32
    %266 = arith.cmpi slt, %198, %c7_i32_83 : i32
    %267 = arith.select %265, %233, %177 : vector<16x128xf32>
    %268 = arith.select %266, %264, %178 : vector<16x128xf32>
    %cst_84 = arith.constant 0.000000e+00 : f32
    %269 = vector.broadcast %cst_84 : f32 to vector<16x128xf32>
    %270 = arith.select %265, %267, %269 : vector<16x128xf32>
    %271 = arith.truncf %270 : vector<16x128xf32> to vector<16x128xbf16>
    %272 = arith.index_cast %c2_i32 : i32 to index
    %c0_85 = arith.constant 0 : index
    %c0_86 = arith.constant 0 : index
    %273 = vector.load %arg5[%272, %c0_85, %c0_86] : memref<16x16x128xbf16, #tpu.memory_space<vmem>>, vector<1x16x128xbf16>
    %274 = vector.shape_cast %273 : vector<1x16x128xbf16> to vector<16x128xbf16>
    %275 = vector.shape_cast %271 : vector<16x128xbf16> to vector<1x16x128xbf16>
    tpu.vector_store %arg5[%272, %c0_85, %c0_86], %275 {strides = array<i32>} : memref<16x16x128xbf16, #tpu.memory_space<vmem>>, vector<1x16x128xbf16>,
    %cst_87 = arith.constant 0.000000e+00 : f32
    %276 = vector.broadcast %cst_87 : f32 to vector<16x128xf32>
    %277 = arith.select %266, %268, %276 : vector<16x128xf32>
    %278 = arith.truncf %277 : vector<16x128xf32> to vector<16x128xbf16>
    %279 = arith.index_cast %193 : i32 to index
    %c0_88 = arith.constant 0 : index
    %c0_89 = arith.constant 0 : index
    %280 = vector.load %arg6[%279, %c0_88, %c0_89] : memref<16x16x128xbf16, #tpu.memory_space<vmem>>, vector<1x16x128xbf16>
    %281 = vector.shape_cast %280 : vector<1x16x128xbf16> to vector<16x128xbf16>
    %282 = vector.shape_cast %278 : vector<16x128xbf16> to vector<1x16x128xbf16>
    tpu.vector_store %arg6[%279, %c0_88, %c0_89], %282 {strides = array<i32>} : memref<16x16x128xbf16, #tpu.memory_space<vmem>>, vector<1x16x128xbf16>,
    %c3_i32 = arith.constant 3 : i32
    %c15_i32_90 = arith.constant 15 : i32
    %283 = arith.subi %c15_i32_90, %c3_i32 : i32
    %c16_i32_91 = arith.constant 16 : i32
    %284 = arith.muli %arg0, %c16_i32_91 : i32
    %285 = arith.addi %284, %c3_i32 : i32
    %c0_i32_92 = arith.constant 0 : i32
    %286 = arith.subi %c0_i32_92, %arg0 : i32
    %c16_i32_93 = arith.constant 16 : i32
    %287 = arith.muli %286, %c16_i32_93 : i32
    %288 = arith.addi %287, %283 : i32
    %289 = arith.truncf %267 : vector<16x128xf32> to vector<16x128xbf16>
    %cst_94 = arith.constant dense<0.000000e+00> : vector<16x384xf32>
    %290 = tpu.matmul %289, %4, %cst_94 {dimension_numbers = #tpu.dot_dimension_numbers<[1], [0], [0], [1], [0, 0, 1, 1], [], []>} : vector<16x128xbf16>, vector<128x384xbf16>, vector<16x384xf32> -> vector<16x384xf32>
    %291 = arith.truncf %268 : vector<16x128xf32> to vector<16x128xbf16>
    %cst_95 = arith.constant dense<0.000000e+00> : vector<16x384xf32>
    %292 = tpu.matmul %291, %6, %cst_95 {dimension_numbers = #tpu.dot_dimension_numbers<[1], [0], [0], [1], [0, 0, 1, 1], [], []>} : vector<16x128xbf16>, vector<128x384xbf16>, vector<16x384xf32> -> vector<16x384xf32>
    %c0_96 = arith.constant 0 : index
    %293 = arith.index_cast %c3_i32 : i32 to index
    %c0_97 = arith.constant 0 : index
    %c0_98 = arith.constant 0 : index
    %294 = vector.load %arg1[%c0_96, %293, %c0_97, %c0_98] : memref<1x16x16x384xf32, #tpu.memory_space<vmem>>, vector<1x1x16x384xf32>
    %295 = vector.shape_cast %294 : vector<1x1x16x384xf32> to vector<16x384xf32>
    %296 = vector.extract_strided_slice %295 {offsets = [0, 0], sizes = [16, 128], strides = [1, 1]} : vector<16x384xf32> to vector<16x128xf32>
    %297 = vector.extract_strided_slice %290 {offsets = [0, 0], sizes = [16, 128], strides = [1, 1]} : vector<16x384xf32> to vector<16x128xf32>
    %298 = arith.addf %296, %297 : vector<16x128xf32>
    %299 = arith.negf %298 : vector<16x128xf32>
    %300 = math.exp %299 : vector<16x128xf32>
    %cst_99 = arith.constant 1.000000e+00 : f32
    %301 = vector.broadcast %cst_99 : f32 to vector<16x128xf32>
    %302 = arith.addf %301, %300 : vector<16x128xf32>
    %303 = arith.divf %301, %302 : vector<16x128xf32>
    %304 = vector.extract_strided_slice %295 {offsets = [0, 128], sizes = [16, 128], strides = [1, 1]} : vector<16x384xf32> to vector<16x128xf32>
    %305 = vector.extract_strided_slice %290 {offsets = [0, 128], sizes = [16, 128], strides = [1, 1]} : vector<16x384xf32> to vector<16x128xf32>
    %306 = arith.addf %304, %305 : vector<16x128xf32>
    %307 = arith.negf %306 : vector<16x128xf32>
    %308 = math.exp %307 : vector<16x128xf32>
    %cst_100 = arith.constant 1.000000e+00 : f32
    %309 = vector.broadcast %cst_100 : f32 to vector<16x128xf32>
    %310 = arith.addf %309, %308 : vector<16x128xf32>
    %311 = arith.divf %309, %310 : vector<16x128xf32>
    %312 = vector.extract_strided_slice %295 {offsets = [0, 256], sizes = [16, 128], strides = [1, 1]} : vector<16x384xf32> to vector<16x128xf32>
    %313 = vector.extract_strided_slice %290 {offsets = [0, 256], sizes = [16, 128], strides = [1, 1]} : vector<16x384xf32> to vector<16x128xf32>
    %314 = vector.broadcast %8 : vector<1x128xf32> to vector<16x128xf32>
    %315 = arith.addf %313, %314 : vector<16x128xf32>
    %316 = arith.mulf %303, %315 : vector<16x128xf32>
    %317 = arith.addf %312, %316 : vector<16x128xf32>
    %318 = math.tanh %317 : vector<16x128xf32>
    %cst_101 = arith.constant 1.000000e+00 : f32
    %319 = vector.broadcast %cst_101 : f32 to vector<16x128xf32>
    %320 = arith.subf %319, %311 : vector<16x128xf32>
    %321 = arith.mulf %320, %318 : vector<16x128xf32>
    %322 = arith.mulf %311, %267 : vector<16x128xf32>
    %323 = arith.addf %321, %322 : vector<16x128xf32>
    %c0_102 = arith.constant 0 : index
    %324 = arith.index_cast %283 : i32 to index
    %c0_103 = arith.constant 0 : index
    %c0_104 = arith.constant 0 : index
    %325 = vector.load %arg2[%c0_102, %324, %c0_103, %c0_104] : memref<1x16x16x384xf32, #tpu.memory_space<vmem>>, vector<1x1x16x384xf32>
    %326 = vector.shape_cast %325 : vector<1x1x16x384xf32> to vector<16x384xf32>
    %327 = vector.extract_strided_slice %326 {offsets = [0, 0], sizes = [16, 128], strides = [1, 1]} : vector<16x384xf32> to vector<16x128xf32>
    %328 = vector.extract_strided_slice %292 {offsets = [0, 0], sizes = [16, 128], strides = [1, 1]} : vector<16x384xf32> to vector<16x128xf32>
    %329 = arith.addf %327, %328 : vector<16x128xf32>
    %330 = arith.negf %329 : vector<16x128xf32>
    %331 = math.exp %330 : vector<16x128xf32>
    %cst_105 = arith.constant 1.000000e+00 : f32
    %332 = vector.broadcast %cst_105 : f32 to vector<16x128xf32>
    %333 = arith.addf %332, %331 : vector<16x128xf32>
    %334 = arith.divf %332, %333 : vector<16x128xf32>
    %335 = vector.extract_strided_slice %326 {offsets = [0, 128], sizes = [16, 128], strides = [1, 1]} : vector<16x384xf32> to vector<16x128xf32>
    %336 = vector.extract_strided_slice %292 {offsets = [0, 128], sizes = [16, 128], strides = [1, 1]} : vector<16x384xf32> to vector<16x128xf32>
    %337 = arith.addf %335, %336 : vector<16x128xf32>
    %338 = arith.negf %337 : vector<16x128xf32>
    %339 = math.exp %338 : vector<16x128xf32>
    %cst_106 = arith.constant 1.000000e+00 : f32
    %340 = vector.broadcast %cst_106 : f32 to vector<16x128xf32>
    %341 = arith.addf %340, %339 : vector<16x128xf32>
    %342 = arith.divf %340, %341 : vector<16x128xf32>
    %343 = vector.extract_strided_slice %326 {offsets = [0, 256], sizes = [16, 128], strides = [1, 1]} : vector<16x384xf32> to vector<16x128xf32>
    %344 = vector.extract_strided_slice %292 {offsets = [0, 256], sizes = [16, 128], strides = [1, 1]} : vector<16x384xf32> to vector<16x128xf32>
    %345 = vector.broadcast %10 : vector<1x128xf32> to vector<16x128xf32>
    %346 = arith.addf %344, %345 : vector<16x128xf32>
    %347 = arith.mulf %334, %346 : vector<16x128xf32>
    %348 = arith.addf %343, %347 : vector<16x128xf32>
    %349 = math.tanh %348 : vector<16x128xf32>
    %cst_107 = arith.constant 1.000000e+00 : f32
    %350 = vector.broadcast %cst_107 : f32 to vector<16x128xf32>
    %351 = arith.subf %350, %342 : vector<16x128xf32>
    %352 = arith.mulf %351, %349 : vector<16x128xf32>
    %353 = arith.mulf %342, %268 : vector<16x128xf32>
    %354 = arith.addf %352, %353 : vector<16x128xf32>
    %c7_i32_108 = arith.constant 7 : i32
    %355 = arith.cmpi slt, %285, %c7_i32_108 : i32
    %c7_i32_109 = arith.constant 7 : i32
    %356 = arith.cmpi slt, %288, %c7_i32_109 : i32
    %357 = arith.select %355, %323, %267 : vector<16x128xf32>
    %358 = arith.select %356, %354, %268 : vector<16x128xf32>
    %cst_110 = arith.constant 0.000000e+00 : f32
    %359 = vector.broadcast %cst_110 : f32 to vector<16x128xf32>
    %360 = arith.select %355, %357, %359 : vector<16x128xf32>
    %361 = arith.truncf %360 : vector<16x128xf32> to vector<16x128xbf16>
    %362 = arith.index_cast %c3_i32 : i32 to index
    %c0_111 = arith.constant 0 : index
    %c0_112 = arith.constant 0 : index
    %363 = vector.load %arg5[%362, %c0_111, %c0_112] : memref<16x16x128xbf16, #tpu.memory_space<vmem>>, vector<1x16x128xbf16>
    %364 = vector.shape_cast %363 : vector<1x16x128xbf16> to vector<16x128xbf16>
    %365 = vector.shape_cast %361 : vector<16x128xbf16> to vector<1x16x128xbf16>
    tpu.vector_store %arg5[%362, %c0_111, %c0_112], %365 {strides = array<i32>} : memref<16x16x128xbf16, #tpu.memory_space<vmem>>, vector<1x16x128xbf16>,
    %cst_113 = arith.constant 0.000000e+00 : f32
    %366 = vector.broadcast %cst_113 : f32 to vector<16x128xf32>
    %367 = arith.select %356, %358, %366 : vector<16x128xf32>
    %368 = arith.truncf %367 : vector<16x128xf32> to vector<16x128xbf16>
    %369 = arith.index_cast %283 : i32 to index
    %c0_114 = arith.constant 0 : index
    %c0_115 = arith.constant 0 : index
    %370 = vector.load %arg6[%369, %c0_114, %c0_115] : memref<16x16x128xbf16, #tpu.memory_space<vmem>>, vector<1x16x128xbf16>
    %371 = vector.shape_cast %370 : vector<1x16x128xbf16> to vector<16x128xbf16>
    %372 = vector.shape_cast %368 : vector<16x128xbf16> to vector<1x16x128xbf16>
    tpu.vector_store %arg6[%369, %c0_114, %c0_115], %372 {strides = array<i32>} : memref<16x16x128xbf16, #tpu.memory_space<vmem>>, vector<1x16x128xbf16>,
    %c4_i32 = arith.constant 4 : i32
    %c15_i32_116 = arith.constant 15 : i32
    %373 = arith.subi %c15_i32_116, %c4_i32 : i32
    %c16_i32_117 = arith.constant 16 : i32
    %374 = arith.muli %arg0, %c16_i32_117 : i32
    %375 = arith.addi %374, %c4_i32 : i32
    %c0_i32_118 = arith.constant 0 : i32
    %376 = arith.subi %c0_i32_118, %arg0 : i32
    %c16_i32_119 = arith.constant 16 : i32
    %377 = arith.muli %376, %c16_i32_119 : i32
    %378 = arith.addi %377, %373 : i32
    %379 = arith.truncf %357 : vector<16x128xf32> to vector<16x128xbf16>
    %cst_120 = arith.constant dense<0.000000e+00> : vector<16x384xf32>
    %380 = tpu.matmul %379, %4, %cst_120 {dimension_numbers = #tpu.dot_dimension_numbers<[1], [0], [0], [1], [0, 0, 1, 1], [], []>} : vector<16x128xbf16>, vector<128x384xbf16>, vector<16x384xf32> -> vector<16x384xf32>
    %381 = arith.truncf %358 : vector<16x128xf32> to vector<16x128xbf16>
    %cst_121 = arith.constant dense<0.000000e+00> : vector<16x384xf32>
    %382 = tpu.matmul %381, %6, %cst_121 {dimension_numbers = #tpu.dot_dimension_numbers<[1], [0], [0], [1], [0, 0, 1, 1], [], []>} : vector<16x128xbf16>, vector<128x384xbf16>, vector<16x384xf32> -> vector<16x384xf32>
    %c0_122 = arith.constant 0 : index
    %383 = arith.index_cast %c4_i32 : i32 to index
    %c0_123 = arith.constant 0 : index
    %c0_124 = arith.constant 0 : index
    %384 = vector.load %arg1[%c0_122, %383, %c0_123, %c0_124] : memref<1x16x16x384xf32, #tpu.memory_space<vmem>>, vector<1x1x16x384xf32>
    %385 = vector.shape_cast %384 : vector<1x1x16x384xf32> to vector<16x384xf32>
    %386 = vector.extract_strided_slice %385 {offsets = [0, 0], sizes = [16, 128], strides = [1, 1]} : vector<16x384xf32> to vector<16x128xf32>
    %387 = vector.extract_strided_slice %380 {offsets = [0, 0], sizes = [16, 128], strides = [1, 1]} : vector<16x384xf32> to vector<16x128xf32>
    %388 = arith.addf %386, %387 : vector<16x128xf32>
    %389 = arith.negf %388 : vector<16x128xf32>
    %390 = math.exp %389 : vector<16x128xf32>
    %cst_125 = arith.constant 1.000000e+00 : f32
    %391 = vector.broadcast %cst_125 : f32 to vector<16x128xf32>
    %392 = arith.addf %391, %390 : vector<16x128xf32>
    %393 = arith.divf %391, %392 : vector<16x128xf32>
    %394 = vector.extract_strided_slice %385 {offsets = [0, 128], sizes = [16, 128], strides = [1, 1]} : vector<16x384xf32> to vector<16x128xf32>
    %395 = vector.extract_strided_slice %380 {offsets = [0, 128], sizes = [16, 128], strides = [1, 1]} : vector<16x384xf32> to vector<16x128xf32>
    %396 = arith.addf %394, %395 : vector<16x128xf32>
    %397 = arith.negf %396 : vector<16x128xf32>
    %398 = math.exp %397 : vector<16x128xf32>
    %cst_126 = arith.constant 1.000000e+00 : f32
    %399 = vector.broadcast %cst_126 : f32 to vector<16x128xf32>
    %400 = arith.addf %399, %398 : vector<16x128xf32>
    %401 = arith.divf %399, %400 : vector<16x128xf32>
    %402 = vector.extract_strided_slice %385 {offsets = [0, 256], sizes = [16, 128], strides = [1, 1]} : vector<16x384xf32> to vector<16x128xf32>
    %403 = vector.extract_strided_slice %380 {offsets = [0, 256], sizes = [16, 128], strides = [1, 1]} : vector<16x384xf32> to vector<16x128xf32>
    %404 = vector.broadcast %8 : vector<1x128xf32> to vector<16x128xf32>
    %405 = arith.addf %403, %404 : vector<16x128xf32>
    %406 = arith.mulf %393, %405 : vector<16x128xf32>
    %407 = arith.addf %402, %406 : vector<16x128xf32>
    %408 = math.tanh %407 : vector<16x128xf32>
    %cst_127 = arith.constant 1.000000e+00 : f32
    %409 = vector.broadcast %cst_127 : f32 to vector<16x128xf32>
    %410 = arith.subf %409, %401 : vector<16x128xf32>
    %411 = arith.mulf %410, %408 : vector<16x128xf32>
    %412 = arith.mulf %401, %357 : vector<16x128xf32>
    %413 = arith.addf %411, %412 : vector<16x128xf32>
    %c0_128 = arith.constant 0 : index
    %414 = arith.index_cast %373 : i32 to index
    %c0_129 = arith.constant 0 : index
    %c0_130 = arith.constant 0 : index
    %415 = vector.load %arg2[%c0_128, %414, %c0_129, %c0_130] : memref<1x16x16x384xf32, #tpu.memory_space<vmem>>, vector<1x1x16x384xf32>
    %416 = vector.shape_cast %415 : vector<1x1x16x384xf32> to vector<16x384xf32>
    %417 = vector.extract_strided_slice %416 {offsets = [0, 0], sizes = [16, 128], strides = [1, 1]} : vector<16x384xf32> to vector<16x128xf32>
    %418 = vector.extract_strided_slice %382 {offsets = [0, 0], sizes = [16, 128], strides = [1, 1]} : vector<16x384xf32> to vector<16x128xf32>
    %419 = arith.addf %417, %418 : vector<16x128xf32>
    %420 = arith.negf %419 : vector<16x128xf32>
    %421 = math.exp %420 : vector<16x128xf32>
    %cst_131 = arith.constant 1.000000e+00 : f32
    %422 = vector.broadcast %cst_131 : f32 to vector<16x128xf32>
    %423 = arith.addf %422, %421 : vector<16x128xf32>
    %424 = arith.divf %422, %423 : vector<16x128xf32>
    %425 = vector.extract_strided_slice %416 {offsets = [0, 128], sizes = [16, 128], strides = [1, 1]} : vector<16x384xf32> to vector<16x128xf32>
    %426 = vector.extract_strided_slice %382 {offsets = [0, 128], sizes = [16, 128], strides = [1, 1]} : vector<16x384xf32> to vector<16x128xf32>
    %427 = arith.addf %425, %426 : vector<16x128xf32>
    %428 = arith.negf %427 : vector<16x128xf32>
    %429 = math.exp %428 : vector<16x128xf32>
    %cst_132 = arith.constant 1.000000e+00 : f32
    %430 = vector.broadcast %cst_132 : f32 to vector<16x128xf32>
    %431 = arith.addf %430, %429 : vector<16x128xf32>
    %432 = arith.divf %430, %431 : vector<16x128xf32>
    %433 = vector.extract_strided_slice %416 {offsets = [0, 256], sizes = [16, 128], strides = [1, 1]} : vector<16x384xf32> to vector<16x128xf32>
    %434 = vector.extract_strided_slice %382 {offsets = [0, 256], sizes = [16, 128], strides = [1, 1]} : vector<16x384xf32> to vector<16x128xf32>
    %435 = vector.broadcast %10 : vector<1x128xf32> to vector<16x128xf32>
    %436 = arith.addf %434, %435 : vector<16x128xf32>
    %437 = arith.mulf %424, %436 : vector<16x128xf32>
    %438 = arith.addf %433, %437 : vector<16x128xf32>
    %439 = math.tanh %438 : vector<16x128xf32>
    %cst_133 = arith.constant 1.000000e+00 : f32
    %440 = vector.broadcast %cst_133 : f32 to vector<16x128xf32>
    %441 = arith.subf %440, %432 : vector<16x128xf32>
    %442 = arith.mulf %441, %439 : vector<16x128xf32>
    %443 = arith.mulf %432, %358 : vector<16x128xf32>
    %444 = arith.addf %442, %443 : vector<16x128xf32>
    %c7_i32_134 = arith.constant 7 : i32
    %445 = arith.cmpi slt, %375, %c7_i32_134 : i32
    %c7_i32_135 = arith.constant 7 : i32
    %446 = arith.cmpi slt, %378, %c7_i32_135 : i32
    %447 = arith.select %445, %413, %357 : vector<16x128xf32>
    %448 = arith.select %446, %444, %358 : vector<16x128xf32>
    %cst_136 = arith.constant 0.000000e+00 : f32
    %449 = vector.broadcast %cst_136 : f32 to vector<16x128xf32>
    %450 = arith.select %445, %447, %449 : vector<16x128xf32>
    %451 = arith.truncf %450 : vector<16x128xf32> to vector<16x128xbf16>
    %452 = arith.index_cast %c4_i32 : i32 to index
    %c0_137 = arith.constant 0 : index
    %c0_138 = arith.constant 0 : index
    %453 = vector.load %arg5[%452, %c0_137, %c0_138] : memref<16x16x128xbf16, #tpu.memory_space<vmem>>, vector<1x16x128xbf16>
    %454 = vector.shape_cast %453 : vector<1x16x128xbf16> to vector<16x128xbf16>
    %455 = vector.shape_cast %451 : vector<16x128xbf16> to vector<1x16x128xbf16>
    tpu.vector_store %arg5[%452, %c0_137, %c0_138], %455 {strides = array<i32>} : memref<16x16x128xbf16, #tpu.memory_space<vmem>>, vector<1x16x128xbf16>,
    %cst_139 = arith.constant 0.000000e+00 : f32
    %456 = vector.broadcast %cst_139 : f32 to vector<16x128xf32>
    %457 = arith.select %446, %448, %456 : vector<16x128xf32>
    %458 = arith.truncf %457 : vector<16x128xf32> to vector<16x128xbf16>
    %459 = arith.index_cast %373 : i32 to index
    %c0_140 = arith.constant 0 : index
    %c0_141 = arith.constant 0 : index
    %460 = vector.load %arg6[%459, %c0_140, %c0_141] : memref<16x16x128xbf16, #tpu.memory_space<vmem>>, vector<1x16x128xbf16>
    %461 = vector.shape_cast %460 : vector<1x16x128xbf16> to vector<16x128xbf16>
    %462 = vector.shape_cast %458 : vector<16x128xbf16> to vector<1x16x128xbf16>
    tpu.vector_store %arg6[%459, %c0_140, %c0_141], %462 {strides = array<i32>} : memref<16x16x128xbf16, #tpu.memory_space<vmem>>, vector<1x16x128xbf16>,
    %c5_i32 = arith.constant 5 : i32
    %c15_i32_142 = arith.constant 15 : i32
    %463 = arith.subi %c15_i32_142, %c5_i32 : i32
    %c16_i32_143 = arith.constant 16 : i32
    %464 = arith.muli %arg0, %c16_i32_143 : i32
    %465 = arith.addi %464, %c5_i32 : i32
    %c0_i32_144 = arith.constant 0 : i32
    %466 = arith.subi %c0_i32_144, %arg0 : i32
    %c16_i32_145 = arith.constant 16 : i32
    %467 = arith.muli %466, %c16_i32_145 : i32
    %468 = arith.addi %467, %463 : i32
    %469 = arith.truncf %447 : vector<16x128xf32> to vector<16x128xbf16>
    %cst_146 = arith.constant dense<0.000000e+00> : vector<16x384xf32>
    %470 = tpu.matmul %469, %4, %cst_146 {dimension_numbers = #tpu.dot_dimension_numbers<[1], [0], [0], [1], [0, 0, 1, 1], [], []>} : vector<16x128xbf16>, vector<128x384xbf16>, vector<16x384xf32> -> vector<16x384xf32>
    %471 = arith.truncf %448 : vector<16x128xf32> to vector<16x128xbf16>
    %cst_147 = arith.constant dense<0.000000e+00> : vector<16x384xf32>
    %472 = tpu.matmul %471, %6, %cst_147 {dimension_numbers = #tpu.dot_dimension_numbers<[1], [0], [0], [1], [0, 0, 1, 1], [], []>} : vector<16x128xbf16>, vector<128x384xbf16>, vector<16x384xf32> -> vector<16x384xf32>
    %c0_148 = arith.constant 0 : index
    %473 = arith.index_cast %c5_i32 : i32 to index
    %c0_149 = arith.constant 0 : index
    %c0_150 = arith.constant 0 : index
    %474 = vector.load %arg1[%c0_148, %473, %c0_149, %c0_150] : memref<1x16x16x384xf32, #tpu.memory_space<vmem>>, vector<1x1x16x384xf32>
    %475 = vector.shape_cast %474 : vector<1x1x16x384xf32> to vector<16x384xf32>
    %476 = vector.extract_strided_slice %475 {offsets = [0, 0], sizes = [16, 128], strides = [1, 1]} : vector<16x384xf32> to vector<16x128xf32>
    %477 = vector.extract_strided_slice %470 {offsets = [0, 0], sizes = [16, 128], strides = [1, 1]} : vector<16x384xf32> to vector<16x128xf32>
    %478 = arith.addf %476, %477 : vector<16x128xf32>
    %479 = arith.negf %478 : vector<16x128xf32>
    %480 = math.exp %479 : vector<16x128xf32>
    %cst_151 = arith.constant 1.000000e+00 : f32
    %481 = vector.broadcast %cst_151 : f32 to vector<16x128xf32>
    %482 = arith.addf %481, %480 : vector<16x128xf32>
    %483 = arith.divf %481, %482 : vector<16x128xf32>
    %484 = vector.extract_strided_slice %475 {offsets = [0, 128], sizes = [16, 128], strides = [1, 1]} : vector<16x384xf32> to vector<16x128xf32>
    %485 = vector.extract_strided_slice %470 {offsets = [0, 128], sizes = [16, 128], strides = [1, 1]} : vector<16x384xf32> to vector<16x128xf32>
    %486 = arith.addf %484, %485 : vector<16x128xf32>
    %487 = arith.negf %486 : vector<16x128xf32>
    %488 = math.exp %487 : vector<16x128xf32>
    %cst_152 = arith.constant 1.000000e+00 : f32
    %489 = vector.broadcast %cst_152 : f32 to vector<16x128xf32>
    %490 = arith.addf %489, %488 : vector<16x128xf32>
    %491 = arith.divf %489, %490 : vector<16x128xf32>
    %492 = vector.extract_strided_slice %475 {offsets = [0, 256], sizes = [16, 128], strides = [1, 1]} : vector<16x384xf32> to vector<16x128xf32>
    %493 = vector.extract_strided_slice %470 {offsets = [0, 256], sizes = [16, 128], strides = [1, 1]} : vector<16x384xf32> to vector<16x128xf32>
    %494 = vector.broadcast %8 : vector<1x128xf32> to vector<16x128xf32>
    %495 = arith.addf %493, %494 : vector<16x128xf32>
    %496 = arith.mulf %483, %495 : vector<16x128xf32>
    %497 = arith.addf %492, %496 : vector<16x128xf32>
    %498 = math.tanh %497 : vector<16x128xf32>
    %cst_153 = arith.constant 1.000000e+00 : f32
    %499 = vector.broadcast %cst_153 : f32 to vector<16x128xf32>
    %500 = arith.subf %499, %491 : vector<16x128xf32>
    %501 = arith.mulf %500, %498 : vector<16x128xf32>
    %502 = arith.mulf %491, %447 : vector<16x128xf32>
    %503 = arith.addf %501, %502 : vector<16x128xf32>
    %c0_154 = arith.constant 0 : index
    %504 = arith.index_cast %463 : i32 to index
    %c0_155 = arith.constant 0 : index
    %c0_156 = arith.constant 0 : index
    %505 = vector.load %arg2[%c0_154, %504, %c0_155, %c0_156] : memref<1x16x16x384xf32, #tpu.memory_space<vmem>>, vector<1x1x16x384xf32>
    %506 = vector.shape_cast %505 : vector<1x1x16x384xf32> to vector<16x384xf32>
    %507 = vector.extract_strided_slice %506 {offsets = [0, 0], sizes = [16, 128], strides = [1, 1]} : vector<16x384xf32> to vector<16x128xf32>
    %508 = vector.extract_strided_slice %472 {offsets = [0, 0], sizes = [16, 128], strides = [1, 1]} : vector<16x384xf32> to vector<16x128xf32>
    %509 = arith.addf %507, %508 : vector<16x128xf32>
    %510 = arith.negf %509 : vector<16x128xf32>
    %511 = math.exp %510 : vector<16x128xf32>
    %cst_157 = arith.constant 1.000000e+00 : f32
    %512 = vector.broadcast %cst_157 : f32 to vector<16x128xf32>
    %513 = arith.addf %512, %511 : vector<16x128xf32>
    %514 = arith.divf %512, %513 : vector<16x128xf32>
    %515 = vector.extract_strided_slice %506 {offsets = [0, 128], sizes = [16, 128], strides = [1, 1]} : vector<16x384xf32> to vector<16x128xf32>
    %516 = vector.extract_strided_slice %472 {offsets = [0, 128], sizes = [16, 128], strides = [1, 1]} : vector<16x384xf32> to vector<16x128xf32>
    %517 = arith.addf %515, %516 : vector<16x128xf32>
    %518 = arith.negf %517 : vector<16x128xf32>
    %519 = math.exp %518 : vector<16x128xf32>
    %cst_158 = arith.constant 1.000000e+00 : f32
    %520 = vector.broadcast %cst_158 : f32 to vector<16x128xf32>
    %521 = arith.addf %520, %519 : vector<16x128xf32>
    %522 = arith.divf %520, %521 : vector<16x128xf32>
    %523 = vector.extract_strided_slice %506 {offsets = [0, 256], sizes = [16, 128], strides = [1, 1]} : vector<16x384xf32> to vector<16x128xf32>
    %524 = vector.extract_strided_slice %472 {offsets = [0, 256], sizes = [16, 128], strides = [1, 1]} : vector<16x384xf32> to vector<16x128xf32>
    %525 = vector.broadcast %10 : vector<1x128xf32> to vector<16x128xf32>
    %526 = arith.addf %524, %525 : vector<16x128xf32>
    %527 = arith.mulf %514, %526 : vector<16x128xf32>
    %528 = arith.addf %523, %527 : vector<16x128xf32>
    %529 = math.tanh %528 : vector<16x128xf32>
    %cst_159 = arith.constant 1.000000e+00 : f32
    %530 = vector.broadcast %cst_159 : f32 to vector<16x128xf32>
    %531 = arith.subf %530, %522 : vector<16x128xf32>
    %532 = arith.mulf %531, %529 : vector<16x128xf32>
    %533 = arith.mulf %522, %448 : vector<16x128xf32>
    %534 = arith.addf %532, %533 : vector<16x128xf32>
    %c7_i32_160 = arith.constant 7 : i32
    %535 = arith.cmpi slt, %465, %c7_i32_160 : i32
    %c7_i32_161 = arith.constant 7 : i32
    %536 = arith.cmpi slt, %468, %c7_i32_161 : i32
    %537 = arith.select %535, %503, %447 : vector<16x128xf32>
    %538 = arith.select %536, %534, %448 : vector<16x128xf32>
    %cst_162 = arith.constant 0.000000e+00 : f32
    %539 = vector.broadcast %cst_162 : f32 to vector<16x128xf32>
    %540 = arith.select %535, %537, %539 : vector<16x128xf32>
    %541 = arith.truncf %540 : vector<16x128xf32> to vector<16x128xbf16>
    %542 = arith.index_cast %c5_i32 : i32 to index
    %c0_163 = arith.constant 0 : index
    %c0_164 = arith.constant 0 : index
    %543 = vector.load %arg5[%542, %c0_163, %c0_164] : memref<16x16x128xbf16, #tpu.memory_space<vmem>>, vector<1x16x128xbf16>
    %544 = vector.shape_cast %543 : vector<1x16x128xbf16> to vector<16x128xbf16>
    %545 = vector.shape_cast %541 : vector<16x128xbf16> to vector<1x16x128xbf16>
    tpu.vector_store %arg5[%542, %c0_163, %c0_164], %545 {strides = array<i32>} : memref<16x16x128xbf16, #tpu.memory_space<vmem>>, vector<1x16x128xbf16>,
    %cst_165 = arith.constant 0.000000e+00 : f32
    %546 = vector.broadcast %cst_165 : f32 to vector<16x128xf32>
    %547 = arith.select %536, %538, %546 : vector<16x128xf32>
    %548 = arith.truncf %547 : vector<16x128xf32> to vector<16x128xbf16>
    %549 = arith.index_cast %463 : i32 to index
    %c0_166 = arith.constant 0 : index
    %c0_167 = arith.constant 0 : index
    %550 = vector.load %arg6[%549, %c0_166, %c0_167] : memref<16x16x128xbf16, #tpu.memory_space<vmem>>, vector<1x16x128xbf16>
    %551 = vector.shape_cast %550 : vector<1x16x128xbf16> to vector<16x128xbf16>
    %552 = vector.shape_cast %548 : vector<16x128xbf16> to vector<1x16x128xbf16>
    tpu.vector_store %arg6[%549, %c0_166, %c0_167], %552 {strides = array<i32>} : memref<16x16x128xbf16, #tpu.memory_space<vmem>>, vector<1x16x128xbf16>,
    %c6_i32 = arith.constant 6 : i32
    %c15_i32_168 = arith.constant 15 : i32
    %553 = arith.subi %c15_i32_168, %c6_i32 : i32
    %c16_i32_169 = arith.constant 16 : i32
    %554 = arith.muli %arg0, %c16_i32_169 : i32
    %555 = arith.addi %554, %c6_i32 : i32
    %c0_i32_170 = arith.constant 0 : i32
    %556 = arith.subi %c0_i32_170, %arg0 : i32
    %c16_i32_171 = arith.constant 16 : i32
    %557 = arith.muli %556, %c16_i32_171 : i32
    %558 = arith.addi %557, %553 : i32
    %559 = arith.truncf %537 : vector<16x128xf32> to vector<16x128xbf16>
    %cst_172 = arith.constant dense<0.000000e+00> : vector<16x384xf32>
    %560 = tpu.matmul %559, %4, %cst_172 {dimension_numbers = #tpu.dot_dimension_numbers<[1], [0], [0], [1], [0, 0, 1, 1], [], []>} : vector<16x128xbf16>, vector<128x384xbf16>, vector<16x384xf32> -> vector<16x384xf32>
    %561 = arith.truncf %538 : vector<16x128xf32> to vector<16x128xbf16>
    %cst_173 = arith.constant dense<0.000000e+00> : vector<16x384xf32>
    %562 = tpu.matmul %561, %6, %cst_173 {dimension_numbers = #tpu.dot_dimension_numbers<[1], [0], [0], [1], [0, 0, 1, 1], [], []>} : vector<16x128xbf16>, vector<128x384xbf16>, vector<16x384xf32> -> vector<16x384xf32>
    %c0_174 = arith.constant 0 : index
    %563 = arith.index_cast %c6_i32 : i32 to index
    %c0_175 = arith.constant 0 : index
    %c0_176 = arith.constant 0 : index
    %564 = vector.load %arg1[%c0_174, %563, %c0_175, %c0_176] : memref<1x16x16x384xf32, #tpu.memory_space<vmem>>, vector<1x1x16x384xf32>
    %565 = vector.shape_cast %564 : vector<1x1x16x384xf32> to vector<16x384xf32>
    %566 = vector.extract_strided_slice %565 {offsets = [0, 0], sizes = [16, 128], strides = [1, 1]} : vector<16x384xf32> to vector<16x128xf32>
    %567 = vector.extract_strided_slice %560 {offsets = [0, 0], sizes = [16, 128], strides = [1, 1]} : vector<16x384xf32> to vector<16x128xf32>
    %568 = arith.addf %566, %567 : vector<16x128xf32>
    %569 = arith.negf %568 : vector<16x128xf32>
    %570 = math.exp %569 : vector<16x128xf32>
    %cst_177 = arith.constant 1.000000e+00 : f32
    %571 = vector.broadcast %cst_177 : f32 to vector<16x128xf32>
    %572 = arith.addf %571, %570 : vector<16x128xf32>
    %573 = arith.divf %571, %572 : vector<16x128xf32>
    %574 = vector.extract_strided_slice %565 {offsets = [0, 128], sizes = [16, 128], strides = [1, 1]} : vector<16x384xf32> to vector<16x128xf32>
    %575 = vector.extract_strided_slice %560 {offsets = [0, 128], sizes = [16, 128], strides = [1, 1]} : vector<16x384xf32> to vector<16x128xf32>
    %576 = arith.addf %574, %575 : vector<16x128xf32>
    %577 = arith.negf %576 : vector<16x128xf32>
    %578 = math.exp %577 : vector<16x128xf32>
    %cst_178 = arith.constant 1.000000e+00 : f32
    %579 = vector.broadcast %cst_178 : f32 to vector<16x128xf32>
    %580 = arith.addf %579, %578 : vector<16x128xf32>
    %581 = arith.divf %579, %580 : vector<16x128xf32>
    %582 = vector.extract_strided_slice %565 {offsets = [0, 256], sizes = [16, 128], strides = [1, 1]} : vector<16x384xf32> to vector<16x128xf32>
    %583 = vector.extract_strided_slice %560 {offsets = [0, 256], sizes = [16, 128], strides = [1, 1]} : vector<16x384xf32> to vector<16x128xf32>
    %584 = vector.broadcast %8 : vector<1x128xf32> to vector<16x128xf32>
    %585 = arith.addf %583, %584 : vector<16x128xf32>
    %586 = arith.mulf %573, %585 : vector<16x128xf32>
    %587 = arith.addf %582, %586 : vector<16x128xf32>
    %588 = math.tanh %587 : vector<16x128xf32>
    %cst_179 = arith.constant 1.000000e+00 : f32
    %589 = vector.broadcast %cst_179 : f32 to vector<16x128xf32>
    %590 = arith.subf %589, %581 : vector<16x128xf32>
    %591 = arith.mulf %590, %588 : vector<16x128xf32>
    %592 = arith.mulf %581, %537 : vector<16x128xf32>
    %593 = arith.addf %591, %592 : vector<16x128xf32>
    %c0_180 = arith.constant 0 : index
    %594 = arith.index_cast %553 : i32 to index
    %c0_181 = arith.constant 0 : index
    %c0_182 = arith.constant 0 : index
    %595 = vector.load %arg2[%c0_180, %594, %c0_181, %c0_182] : memref<1x16x16x384xf32, #tpu.memory_space<vmem>>, vector<1x1x16x384xf32>
    %596 = vector.shape_cast %595 : vector<1x1x16x384xf32> to vector<16x384xf32>
    %597 = vector.extract_strided_slice %596 {offsets = [0, 0], sizes = [16, 128], strides = [1, 1]} : vector<16x384xf32> to vector<16x128xf32>
    %598 = vector.extract_strided_slice %562 {offsets = [0, 0], sizes = [16, 128], strides = [1, 1]} : vector<16x384xf32> to vector<16x128xf32>
    %599 = arith.addf %597, %598 : vector<16x128xf32>
    %600 = arith.negf %599 : vector<16x128xf32>
    %601 = math.exp %600 : vector<16x128xf32>
    %cst_183 = arith.constant 1.000000e+00 : f32
    %602 = vector.broadcast %cst_183 : f32 to vector<16x128xf32>
    %603 = arith.addf %602, %601 : vector<16x128xf32>
    %604 = arith.divf %602, %603 : vector<16x128xf32>
    %605 = vector.extract_strided_slice %596 {offsets = [0, 128], sizes = [16, 128], strides = [1, 1]} : vector<16x384xf32> to vector<16x128xf32>
    %606 = vector.extract_strided_slice %562 {offsets = [0, 128], sizes = [16, 128], strides = [1, 1]} : vector<16x384xf32> to vector<16x128xf32>
    %607 = arith.addf %605, %606 : vector<16x128xf32>
    %608 = arith.negf %607 : vector<16x128xf32>
    %609 = math.exp %608 : vector<16x128xf32>
    %cst_184 = arith.constant 1.000000e+00 : f32
    %610 = vector.broadcast %cst_184 : f32 to vector<16x128xf32>
    %611 = arith.addf %610, %609 : vector<16x128xf32>
    %612 = arith.divf %610, %611 : vector<16x128xf32>
    %613 = vector.extract_strided_slice %596 {offsets = [0, 256], sizes = [16, 128], strides = [1, 1]} : vector<16x384xf32> to vector<16x128xf32>
    %614 = vector.extract_strided_slice %562 {offsets = [0, 256], sizes = [16, 128], strides = [1, 1]} : vector<16x384xf32> to vector<16x128xf32>
    %615 = vector.broadcast %10 : vector<1x128xf32> to vector<16x128xf32>
    %616 = arith.addf %614, %615 : vector<16x128xf32>
    %617 = arith.mulf %604, %616 : vector<16x128xf32>
    %618 = arith.addf %613, %617 : vector<16x128xf32>
    %619 = math.tanh %618 : vector<16x128xf32>
    %cst_185 = arith.constant 1.000000e+00 : f32
    %620 = vector.broadcast %cst_185 : f32 to vector<16x128xf32>
    %621 = arith.subf %620, %612 : vector<16x128xf32>
    %622 = arith.mulf %621, %619 : vector<16x128xf32>
    %623 = arith.mulf %612, %538 : vector<16x128xf32>
    %624 = arith.addf %622, %623 : vector<16x128xf32>
    %c7_i32_186 = arith.constant 7 : i32
    %625 = arith.cmpi slt, %555, %c7_i32_186 : i32
    %c7_i32_187 = arith.constant 7 : i32
    %626 = arith.cmpi slt, %558, %c7_i32_187 : i32
    %627 = arith.select %625, %593, %537 : vector<16x128xf32>
    %628 = arith.select %626, %624, %538 : vector<16x128xf32>
    %cst_188 = arith.constant 0.000000e+00 : f32
    %629 = vector.broadcast %cst_188 : f32 to vector<16x128xf32>
    %630 = arith.select %625, %627, %629 : vector<16x128xf32>
    %631 = arith.truncf %630 : vector<16x128xf32> to vector<16x128xbf16>
    %632 = arith.index_cast %c6_i32 : i32 to index
    %c0_189 = arith.constant 0 : index
    %c0_190 = arith.constant 0 : index
    %633 = vector.load %arg5[%632, %c0_189, %c0_190] : memref<16x16x128xbf16, #tpu.memory_space<vmem>>, vector<1x16x128xbf16>
    %634 = vector.shape_cast %633 : vector<1x16x128xbf16> to vector<16x128xbf16>
    %635 = vector.shape_cast %631 : vector<16x128xbf16> to vector<1x16x128xbf16>
    tpu.vector_store %arg5[%632, %c0_189, %c0_190], %635 {strides = array<i32>} : memref<16x16x128xbf16, #tpu.memory_space<vmem>>, vector<1x16x128xbf16>,
    %cst_191 = arith.constant 0.000000e+00 : f32
    %636 = vector.broadcast %cst_191 : f32 to vector<16x128xf32>
    %637 = arith.select %626, %628, %636 : vector<16x128xf32>
    %638 = arith.truncf %637 : vector<16x128xf32> to vector<16x128xbf16>
    %639 = arith.index_cast %553 : i32 to index
    %c0_192 = arith.constant 0 : index
    %c0_193 = arith.constant 0 : index
    %640 = vector.load %arg6[%639, %c0_192, %c0_193] : memref<16x16x128xbf16, #tpu.memory_space<vmem>>, vector<1x16x128xbf16>
    %641 = vector.shape_cast %640 : vector<1x16x128xbf16> to vector<16x128xbf16>
    %642 = vector.shape_cast %638 : vector<16x128xbf16> to vector<1x16x128xbf16>
    tpu.vector_store %arg6[%639, %c0_192, %c0_193], %642 {strides = array<i32>} : memref<16x16x128xbf16, #tpu.memory_space<vmem>>, vector<1x16x128xbf16>,
    %c7_i32_194 = arith.constant 7 : i32
    %c15_i32_195 = arith.constant 15 : i32
    %643 = arith.subi %c15_i32_195, %c7_i32_194 : i32
    %c16_i32_196 = arith.constant 16 : i32
    %644 = arith.muli %arg0, %c16_i32_196 : i32
    %645 = arith.addi %644, %c7_i32_194 : i32
    %c0_i32_197 = arith.constant 0 : i32
    %646 = arith.subi %c0_i32_197, %arg0 : i32
    %c16_i32_198 = arith.constant 16 : i32
    %647 = arith.muli %646, %c16_i32_198 : i32
    %648 = arith.addi %647, %643 : i32
    %649 = arith.truncf %627 : vector<16x128xf32> to vector<16x128xbf16>
    %cst_199 = arith.constant dense<0.000000e+00> : vector<16x384xf32>
    %650 = tpu.matmul %649, %4, %cst_199 {dimension_numbers = #tpu.dot_dimension_numbers<[1], [0], [0], [1], [0, 0, 1, 1], [], []>} : vector<16x128xbf16>, vector<128x384xbf16>, vector<16x384xf32> -> vector<16x384xf32>
    %651 = arith.truncf %628 : vector<16x128xf32> to vector<16x128xbf16>
    %cst_200 = arith.constant dense<0.000000e+00> : vector<16x384xf32>
    %652 = tpu.matmul %651, %6, %cst_200 {dimension_numbers = #tpu.dot_dimension_numbers<[1], [0], [0], [1], [0, 0, 1, 1], [], []>} : vector<16x128xbf16>, vector<128x384xbf16>, vector<16x384xf32> -> vector<16x384xf32>
    %c0_201 = arith.constant 0 : index
    %653 = arith.index_cast %c7_i32_194 : i32 to index
    %c0_202 = arith.constant 0 : index
    %c0_203 = arith.constant 0 : index
    %654 = vector.load %arg1[%c0_201, %653, %c0_202, %c0_203] : memref<1x16x16x384xf32, #tpu.memory_space<vmem>>, vector<1x1x16x384xf32>
    %655 = vector.shape_cast %654 : vector<1x1x16x384xf32> to vector<16x384xf32>
    %656 = vector.extract_strided_slice %655 {offsets = [0, 0], sizes = [16, 128], strides = [1, 1]} : vector<16x384xf32> to vector<16x128xf32>
    %657 = vector.extract_strided_slice %650 {offsets = [0, 0], sizes = [16, 128], strides = [1, 1]} : vector<16x384xf32> to vector<16x128xf32>
    %658 = arith.addf %656, %657 : vector<16x128xf32>
    %659 = arith.negf %658 : vector<16x128xf32>
    %660 = math.exp %659 : vector<16x128xf32>
    %cst_204 = arith.constant 1.000000e+00 : f32
    %661 = vector.broadcast %cst_204 : f32 to vector<16x128xf32>
    %662 = arith.addf %661, %660 : vector<16x128xf32>
    %663 = arith.divf %661, %662 : vector<16x128xf32>
    %664 = vector.extract_strided_slice %655 {offsets = [0, 128], sizes = [16, 128], strides = [1, 1]} : vector<16x384xf32> to vector<16x128xf32>
    %665 = vector.extract_strided_slice %650 {offsets = [0, 128], sizes = [16, 128], strides = [1, 1]} : vector<16x384xf32> to vector<16x128xf32>
    %666 = arith.addf %664, %665 : vector<16x128xf32>
    %667 = arith.negf %666 : vector<16x128xf32>
    %668 = math.exp %667 : vector<16x128xf32>
    %cst_205 = arith.constant 1.000000e+00 : f32
    %669 = vector.broadcast %cst_205 : f32 to vector<16x128xf32>
    %670 = arith.addf %669, %668 : vector<16x128xf32>
    %671 = arith.divf %669, %670 : vector<16x128xf32>
    %672 = vector.extract_strided_slice %655 {offsets = [0, 256], sizes = [16, 128], strides = [1, 1]} : vector<16x384xf32> to vector<16x128xf32>
    %673 = vector.extract_strided_slice %650 {offsets = [0, 256], sizes = [16, 128], strides = [1, 1]} : vector<16x384xf32> to vector<16x128xf32>
    %674 = vector.broadcast %8 : vector<1x128xf32> to vector<16x128xf32>
    %675 = arith.addf %673, %674 : vector<16x128xf32>
    %676 = arith.mulf %663, %675 : vector<16x128xf32>
    %677 = arith.addf %672, %676 : vector<16x128xf32>
    %678 = math.tanh %677 : vector<16x128xf32>
    %cst_206 = arith.constant 1.000000e+00 : f32
    %679 = vector.broadcast %cst_206 : f32 to vector<16x128xf32>
    %680 = arith.subf %679, %671 : vector<16x128xf32>
    %681 = arith.mulf %680, %678 : vector<16x128xf32>
    %682 = arith.mulf %671, %627 : vector<16x128xf32>
    %683 = arith.addf %681, %682 : vector<16x128xf32>
    %c0_207 = arith.constant 0 : index
    %684 = arith.index_cast %643 : i32 to index
    %c0_208 = arith.constant 0 : index
    %c0_209 = arith.constant 0 : index
    %685 = vector.load %arg2[%c0_207, %684, %c0_208, %c0_209] : memref<1x16x16x384xf32, #tpu.memory_space<vmem>>, vector<1x1x16x384xf32>
    %686 = vector.shape_cast %685 : vector<1x1x16x384xf32> to vector<16x384xf32>
    %687 = vector.extract_strided_slice %686 {offsets = [0, 0], sizes = [16, 128], strides = [1, 1]} : vector<16x384xf32> to vector<16x128xf32>
    %688 = vector.extract_strided_slice %652 {offsets = [0, 0], sizes = [16, 128], strides = [1, 1]} : vector<16x384xf32> to vector<16x128xf32>
    %689 = arith.addf %687, %688 : vector<16x128xf32>
    %690 = arith.negf %689 : vector<16x128xf32>
    %691 = math.exp %690 : vector<16x128xf32>
    %cst_210 = arith.constant 1.000000e+00 : f32
    %692 = vector.broadcast %cst_210 : f32 to vector<16x128xf32>
    %693 = arith.addf %692, %691 : vector<16x128xf32>
    %694 = arith.divf %692, %693 : vector<16x128xf32>
    %695 = vector.extract_strided_slice %686 {offsets = [0, 128], sizes = [16, 128], strides = [1, 1]} : vector<16x384xf32> to vector<16x128xf32>
    %696 = vector.extract_strided_slice %652 {offsets = [0, 128], sizes = [16, 128], strides = [1, 1]} : vector<16x384xf32> to vector<16x128xf32>
    %697 = arith.addf %695, %696 : vector<16x128xf32>
    %698 = arith.negf %697 : vector<16x128xf32>
    %699 = math.exp %698 : vector<16x128xf32>
    %cst_211 = arith.constant 1.000000e+00 : f32
    %700 = vector.broadcast %cst_211 : f32 to vector<16x128xf32>
    %701 = arith.addf %700, %699 : vector<16x128xf32>
    %702 = arith.divf %700, %701 : vector<16x128xf32>
    %703 = vector.extract_strided_slice %686 {offsets = [0, 256], sizes = [16, 128], strides = [1, 1]} : vector<16x384xf32> to vector<16x128xf32>
    %704 = vector.extract_strided_slice %652 {offsets = [0, 256], sizes = [16, 128], strides = [1, 1]} : vector<16x384xf32> to vector<16x128xf32>
    %705 = vector.broadcast %10 : vector<1x128xf32> to vector<16x128xf32>
    %706 = arith.addf %704, %705 : vector<16x128xf32>
    %707 = arith.mulf %694, %706 : vector<16x128xf32>
    %708 = arith.addf %703, %707 : vector<16x128xf32>
    %709 = math.tanh %708 : vector<16x128xf32>
    %cst_212 = arith.constant 1.000000e+00 : f32
    %710 = vector.broadcast %cst_212 : f32 to vector<16x128xf32>
    %711 = arith.subf %710, %702 : vector<16x128xf32>
    %712 = arith.mulf %711, %709 : vector<16x128xf32>
    %713 = arith.mulf %702, %628 : vector<16x128xf32>
    %714 = arith.addf %712, %713 : vector<16x128xf32>
    %c7_i32_213 = arith.constant 7 : i32
    %715 = arith.cmpi slt, %645, %c7_i32_213 : i32
    %c7_i32_214 = arith.constant 7 : i32
    %716 = arith.cmpi slt, %648, %c7_i32_214 : i32
    %717 = arith.select %715, %683, %627 : vector<16x128xf32>
    %718 = arith.select %716, %714, %628 : vector<16x128xf32>
    %cst_215 = arith.constant 0.000000e+00 : f32
    %719 = vector.broadcast %cst_215 : f32 to vector<16x128xf32>
    %720 = arith.select %715, %717, %719 : vector<16x128xf32>
    %721 = arith.truncf %720 : vector<16x128xf32> to vector<16x128xbf16>
    %722 = arith.index_cast %c7_i32_194 : i32 to index
    %c0_216 = arith.constant 0 : index
    %c0_217 = arith.constant 0 : index
    %723 = vector.load %arg5[%722, %c0_216, %c0_217] : memref<16x16x128xbf16, #tpu.memory_space<vmem>>, vector<1x16x128xbf16>
    %724 = vector.shape_cast %723 : vector<1x16x128xbf16> to vector<16x128xbf16>
    %725 = vector.shape_cast %721 : vector<16x128xbf16> to vector<1x16x128xbf16>
    tpu.vector_store %arg5[%722, %c0_216, %c0_217], %725 {strides = array<i32>} : memref<16x16x128xbf16, #tpu.memory_space<vmem>>, vector<1x16x128xbf16>,
    %cst_218 = arith.constant 0.000000e+00 : f32
    %726 = vector.broadcast %cst_218 : f32 to vector<16x128xf32>
    %727 = arith.select %716, %718, %726 : vector<16x128xf32>
    %728 = arith.truncf %727 : vector<16x128xf32> to vector<16x128xbf16>
    %729 = arith.index_cast %643 : i32 to index
    %c0_219 = arith.constant 0 : index
    %c0_220 = arith.constant 0 : index
    %730 = vector.load %arg6[%729, %c0_219, %c0_220] : memref<16x16x128xbf16, #tpu.memory_space<vmem>>, vector<1x16x128xbf16>
    %731 = vector.shape_cast %730 : vector<1x16x128xbf16> to vector<16x128xbf16>
    %732 = vector.shape_cast %728 : vector<16x128xbf16> to vector<1x16x128xbf16>
    tpu.vector_store %arg6[%729, %c0_219, %c0_220], %732 {strides = array<i32>} : memref<16x16x128xbf16, #tpu.memory_space<vmem>>, vector<1x16x128xbf16>,
    %c8_i32 = arith.constant 8 : i32
    %c15_i32_221 = arith.constant 15 : i32
    %733 = arith.subi %c15_i32_221, %c8_i32 : i32
    %c16_i32_222 = arith.constant 16 : i32
    %734 = arith.muli %arg0, %c16_i32_222 : i32
    %735 = arith.addi %734, %c8_i32 : i32
    %c0_i32_223 = arith.constant 0 : i32
    %736 = arith.subi %c0_i32_223, %arg0 : i32
    %c16_i32_224 = arith.constant 16 : i32
    %737 = arith.muli %736, %c16_i32_224 : i32
    %738 = arith.addi %737, %733 : i32
    %739 = arith.truncf %717 : vector<16x128xf32> to vector<16x128xbf16>
    %cst_225 = arith.constant dense<0.000000e+00> : vector<16x384xf32>
    %740 = tpu.matmul %739, %4, %cst_225 {dimension_numbers = #tpu.dot_dimension_numbers<[1], [0], [0], [1], [0, 0, 1, 1], [], []>} : vector<16x128xbf16>, vector<128x384xbf16>, vector<16x384xf32> -> vector<16x384xf32>
    %741 = arith.truncf %718 : vector<16x128xf32> to vector<16x128xbf16>
    %cst_226 = arith.constant dense<0.000000e+00> : vector<16x384xf32>
    %742 = tpu.matmul %741, %6, %cst_226 {dimension_numbers = #tpu.dot_dimension_numbers<[1], [0], [0], [1], [0, 0, 1, 1], [], []>} : vector<16x128xbf16>, vector<128x384xbf16>, vector<16x384xf32> -> vector<16x384xf32>
    %c0_227 = arith.constant 0 : index
    %743 = arith.index_cast %c8_i32 : i32 to index
    %c0_228 = arith.constant 0 : index
    %c0_229 = arith.constant 0 : index
    %744 = vector.load %arg1[%c0_227, %743, %c0_228, %c0_229] : memref<1x16x16x384xf32, #tpu.memory_space<vmem>>, vector<1x1x16x384xf32>
    %745 = vector.shape_cast %744 : vector<1x1x16x384xf32> to vector<16x384xf32>
    %746 = vector.extract_strided_slice %745 {offsets = [0, 0], sizes = [16, 128], strides = [1, 1]} : vector<16x384xf32> to vector<16x128xf32>
    %747 = vector.extract_strided_slice %740 {offsets = [0, 0], sizes = [16, 128], strides = [1, 1]} : vector<16x384xf32> to vector<16x128xf32>
    %748 = arith.addf %746, %747 : vector<16x128xf32>
    %749 = arith.negf %748 : vector<16x128xf32>
    %750 = math.exp %749 : vector<16x128xf32>
    %cst_230 = arith.constant 1.000000e+00 : f32
    %751 = vector.broadcast %cst_230 : f32 to vector<16x128xf32>
    %752 = arith.addf %751, %750 : vector<16x128xf32>
    %753 = arith.divf %751, %752 : vector<16x128xf32>
    %754 = vector.extract_strided_slice %745 {offsets = [0, 128], sizes = [16, 128], strides = [1, 1]} : vector<16x384xf32> to vector<16x128xf32>
    %755 = vector.extract_strided_slice %740 {offsets = [0, 128], sizes = [16, 128], strides = [1, 1]} : vector<16x384xf32> to vector<16x128xf32>
    %756 = arith.addf %754, %755 : vector<16x128xf32>
    %757 = arith.negf %756 : vector<16x128xf32>
    %758 = math.exp %757 : vector<16x128xf32>
    %cst_231 = arith.constant 1.000000e+00 : f32
    %759 = vector.broadcast %cst_231 : f32 to vector<16x128xf32>
    %760 = arith.addf %759, %758 : vector<16x128xf32>
    %761 = arith.divf %759, %760 : vector<16x128xf32>
    %762 = vector.extract_strided_slice %745 {offsets = [0, 256], sizes = [16, 128], strides = [1, 1]} : vector<16x384xf32> to vector<16x128xf32>
    %763 = vector.extract_strided_slice %740 {offsets = [0, 256], sizes = [16, 128], strides = [1, 1]} : vector<16x384xf32> to vector<16x128xf32>
    %764 = vector.broadcast %8 : vector<1x128xf32> to vector<16x128xf32>
    %765 = arith.addf %763, %764 : vector<16x128xf32>
    %766 = arith.mulf %753, %765 : vector<16x128xf32>
    %767 = arith.addf %762, %766 : vector<16x128xf32>
    %768 = math.tanh %767 : vector<16x128xf32>
    %cst_232 = arith.constant 1.000000e+00 : f32
    %769 = vector.broadcast %cst_232 : f32 to vector<16x128xf32>
    %770 = arith.subf %769, %761 : vector<16x128xf32>
    %771 = arith.mulf %770, %768 : vector<16x128xf32>
    %772 = arith.mulf %761, %717 : vector<16x128xf32>
    %773 = arith.addf %771, %772 : vector<16x128xf32>
    %c0_233 = arith.constant 0 : index
    %774 = arith.index_cast %733 : i32 to index
    %c0_234 = arith.constant 0 : index
    %c0_235 = arith.constant 0 : index
    %775 = vector.load %arg2[%c0_233, %774, %c0_234, %c0_235] : memref<1x16x16x384xf32, #tpu.memory_space<vmem>>, vector<1x1x16x384xf32>
    %776 = vector.shape_cast %775 : vector<1x1x16x384xf32> to vector<16x384xf32>
    %777 = vector.extract_strided_slice %776 {offsets = [0, 0], sizes = [16, 128], strides = [1, 1]} : vector<16x384xf32> to vector<16x128xf32>
    %778 = vector.extract_strided_slice %742 {offsets = [0, 0], sizes = [16, 128], strides = [1, 1]} : vector<16x384xf32> to vector<16x128xf32>
    %779 = arith.addf %777, %778 : vector<16x128xf32>
    %780 = arith.negf %779 : vector<16x128xf32>
    %781 = math.exp %780 : vector<16x128xf32>
    %cst_236 = arith.constant 1.000000e+00 : f32
    %782 = vector.broadcast %cst_236 : f32 to vector<16x128xf32>
    %783 = arith.addf %782, %781 : vector<16x128xf32>
    %784 = arith.divf %782, %783 : vector<16x128xf32>
    %785 = vector.extract_strided_slice %776 {offsets = [0, 128], sizes = [16, 128], strides = [1, 1]} : vector<16x384xf32> to vector<16x128xf32>
    %786 = vector.extract_strided_slice %742 {offsets = [0, 128], sizes = [16, 128], strides = [1, 1]} : vector<16x384xf32> to vector<16x128xf32>
    %787 = arith.addf %785, %786 : vector<16x128xf32>
    %788 = arith.negf %787 : vector<16x128xf32>
    %789 = math.exp %788 : vector<16x128xf32>
    %cst_237 = arith.constant 1.000000e+00 : f32
    %790 = vector.broadcast %cst_237 : f32 to vector<16x128xf32>
    %791 = arith.addf %790, %789 : vector<16x128xf32>
    %792 = arith.divf %790, %791 : vector<16x128xf32>
    %793 = vector.extract_strided_slice %776 {offsets = [0, 256], sizes = [16, 128], strides = [1, 1]} : vector<16x384xf32> to vector<16x128xf32>
    %794 = vector.extract_strided_slice %742 {offsets = [0, 256], sizes = [16, 128], strides = [1, 1]} : vector<16x384xf32> to vector<16x128xf32>
    %795 = vector.broadcast %10 : vector<1x128xf32> to vector<16x128xf32>
    %796 = arith.addf %794, %795 : vector<16x128xf32>
    %797 = arith.mulf %784, %796 : vector<16x128xf32>
    %798 = arith.addf %793, %797 : vector<16x128xf32>
    %799 = math.tanh %798 : vector<16x128xf32>
    %cst_238 = arith.constant 1.000000e+00 : f32
    %800 = vector.broadcast %cst_238 : f32 to vector<16x128xf32>
    %801 = arith.subf %800, %792 : vector<16x128xf32>
    %802 = arith.mulf %801, %799 : vector<16x128xf32>
    %803 = arith.mulf %792, %718 : vector<16x128xf32>
    %804 = arith.addf %802, %803 : vector<16x128xf32>
    %c7_i32_239 = arith.constant 7 : i32
    %805 = arith.cmpi slt, %735, %c7_i32_239 : i32
    %c7_i32_240 = arith.constant 7 : i32
    %806 = arith.cmpi slt, %738, %c7_i32_240 : i32
    %807 = arith.select %805, %773, %717 : vector<16x128xf32>
    %808 = arith.select %806, %804, %718 : vector<16x128xf32>
    %cst_241 = arith.constant 0.000000e+00 : f32
    %809 = vector.broadcast %cst_241 : f32 to vector<16x128xf32>
    %810 = arith.select %805, %807, %809 : vector<16x128xf32>
    %811 = arith.truncf %810 : vector<16x128xf32> to vector<16x128xbf16>
    %812 = arith.index_cast %c8_i32 : i32 to index
    %c0_242 = arith.constant 0 : index
    %c0_243 = arith.constant 0 : index
    %813 = vector.load %arg5[%812, %c0_242, %c0_243] : memref<16x16x128xbf16, #tpu.memory_space<vmem>>, vector<1x16x128xbf16>
    %814 = vector.shape_cast %813 : vector<1x16x128xbf16> to vector<16x128xbf16>
    %815 = vector.shape_cast %811 : vector<16x128xbf16> to vector<1x16x128xbf16>
    tpu.vector_store %arg5[%812, %c0_242, %c0_243], %815 {strides = array<i32>} : memref<16x16x128xbf16, #tpu.memory_space<vmem>>, vector<1x16x128xbf16>,
    %cst_244 = arith.constant 0.000000e+00 : f32
    %816 = vector.broadcast %cst_244 : f32 to vector<16x128xf32>
    %817 = arith.select %806, %808, %816 : vector<16x128xf32>
    %818 = arith.truncf %817 : vector<16x128xf32> to vector<16x128xbf16>
    %819 = arith.index_cast %733 : i32 to index
    %c0_245 = arith.constant 0 : index
    %c0_246 = arith.constant 0 : index
    %820 = vector.load %arg6[%819, %c0_245, %c0_246] : memref<16x16x128xbf16, #tpu.memory_space<vmem>>, vector<1x16x128xbf16>
    %821 = vector.shape_cast %820 : vector<1x16x128xbf16> to vector<16x128xbf16>
    %822 = vector.shape_cast %818 : vector<16x128xbf16> to vector<1x16x128xbf16>
    tpu.vector_store %arg6[%819, %c0_245, %c0_246], %822 {strides = array<i32>} : memref<16x16x128xbf16, #tpu.memory_space<vmem>>, vector<1x16x128xbf16>,
    %c9_i32 = arith.constant 9 : i32
    %c15_i32_247 = arith.constant 15 : i32
    %823 = arith.subi %c15_i32_247, %c9_i32 : i32
    %c16_i32_248 = arith.constant 16 : i32
    %824 = arith.muli %arg0, %c16_i32_248 : i32
    %825 = arith.addi %824, %c9_i32 : i32
    %c0_i32_249 = arith.constant 0 : i32
    %826 = arith.subi %c0_i32_249, %arg0 : i32
    %c16_i32_250 = arith.constant 16 : i32
    %827 = arith.muli %826, %c16_i32_250 : i32
    %828 = arith.addi %827, %823 : i32
    %829 = arith.truncf %807 : vector<16x128xf32> to vector<16x128xbf16>
    %cst_251 = arith.constant dense<0.000000e+00> : vector<16x384xf32>
    %830 = tpu.matmul %829, %4, %cst_251 {dimension_numbers = #tpu.dot_dimension_numbers<[1], [0], [0], [1], [0, 0, 1, 1], [], []>} : vector<16x128xbf16>, vector<128x384xbf16>, vector<16x384xf32> -> vector<16x384xf32>
    %831 = arith.truncf %808 : vector<16x128xf32> to vector<16x128xbf16>
    %cst_252 = arith.constant dense<0.000000e+00> : vector<16x384xf32>
    %832 = tpu.matmul %831, %6, %cst_252 {dimension_numbers = #tpu.dot_dimension_numbers<[1], [0], [0], [1], [0, 0, 1, 1], [], []>} : vector<16x128xbf16>, vector<128x384xbf16>, vector<16x384xf32> -> vector<16x384xf32>
    %c0_253 = arith.constant 0 : index
    %833 = arith.index_cast %c9_i32 : i32 to index
    %c0_254 = arith.constant 0 : index
    %c0_255 = arith.constant 0 : index
    %834 = vector.load %arg1[%c0_253, %833, %c0_254, %c0_255] : memref<1x16x16x384xf32, #tpu.memory_space<vmem>>, vector<1x1x16x384xf32>
    %835 = vector.shape_cast %834 : vector<1x1x16x384xf32> to vector<16x384xf32>
    %836 = vector.extract_strided_slice %835 {offsets = [0, 0], sizes = [16, 128], strides = [1, 1]} : vector<16x384xf32> to vector<16x128xf32>
    %837 = vector.extract_strided_slice %830 {offsets = [0, 0], sizes = [16, 128], strides = [1, 1]} : vector<16x384xf32> to vector<16x128xf32>
    %838 = arith.addf %836, %837 : vector<16x128xf32>
    %839 = arith.negf %838 : vector<16x128xf32>
    %840 = math.exp %839 : vector<16x128xf32>
    %cst_256 = arith.constant 1.000000e+00 : f32
    %841 = vector.broadcast %cst_256 : f32 to vector<16x128xf32>
    %842 = arith.addf %841, %840 : vector<16x128xf32>
    %843 = arith.divf %841, %842 : vector<16x128xf32>
    %844 = vector.extract_strided_slice %835 {offsets = [0, 128], sizes = [16, 128], strides = [1, 1]} : vector<16x384xf32> to vector<16x128xf32>
    %845 = vector.extract_strided_slice %830 {offsets = [0, 128], sizes = [16, 128], strides = [1, 1]} : vector<16x384xf32> to vector<16x128xf32>
    %846 = arith.addf %844, %845 : vector<16x128xf32>
    %847 = arith.negf %846 : vector<16x128xf32>
    %848 = math.exp %847 : vector<16x128xf32>
    %cst_257 = arith.constant 1.000000e+00 : f32
    %849 = vector.broadcast %cst_257 : f32 to vector<16x128xf32>
    %850 = arith.addf %849, %848 : vector<16x128xf32>
    %851 = arith.divf %849, %850 : vector<16x128xf32>
    %852 = vector.extract_strided_slice %835 {offsets = [0, 256], sizes = [16, 128], strides = [1, 1]} : vector<16x384xf32> to vector<16x128xf32>
    %853 = vector.extract_strided_slice %830 {offsets = [0, 256], sizes = [16, 128], strides = [1, 1]} : vector<16x384xf32> to vector<16x128xf32>
    %854 = vector.broadcast %8 : vector<1x128xf32> to vector<16x128xf32>
    %855 = arith.addf %853, %854 : vector<16x128xf32>
    %856 = arith.mulf %843, %855 : vector<16x128xf32>
    %857 = arith.addf %852, %856 : vector<16x128xf32>
    %858 = math.tanh %857 : vector<16x128xf32>
    %cst_258 = arith.constant 1.000000e+00 : f32
    %859 = vector.broadcast %cst_258 : f32 to vector<16x128xf32>
    %860 = arith.subf %859, %851 : vector<16x128xf32>
    %861 = arith.mulf %860, %858 : vector<16x128xf32>
    %862 = arith.mulf %851, %807 : vector<16x128xf32>
    %863 = arith.addf %861, %862 : vector<16x128xf32>
    %c0_259 = arith.constant 0 : index
    %864 = arith.index_cast %823 : i32 to index
    %c0_260 = arith.constant 0 : index
    %c0_261 = arith.constant 0 : index
    %865 = vector.load %arg2[%c0_259, %864, %c0_260, %c0_261] : memref<1x16x16x384xf32, #tpu.memory_space<vmem>>, vector<1x1x16x384xf32>
    %866 = vector.shape_cast %865 : vector<1x1x16x384xf32> to vector<16x384xf32>
    %867 = vector.extract_strided_slice %866 {offsets = [0, 0], sizes = [16, 128], strides = [1, 1]} : vector<16x384xf32> to vector<16x128xf32>
    %868 = vector.extract_strided_slice %832 {offsets = [0, 0], sizes = [16, 128], strides = [1, 1]} : vector<16x384xf32> to vector<16x128xf32>
    %869 = arith.addf %867, %868 : vector<16x128xf32>
    %870 = arith.negf %869 : vector<16x128xf32>
    %871 = math.exp %870 : vector<16x128xf32>
    %cst_262 = arith.constant 1.000000e+00 : f32
    %872 = vector.broadcast %cst_262 : f32 to vector<16x128xf32>
    %873 = arith.addf %872, %871 : vector<16x128xf32>
    %874 = arith.divf %872, %873 : vector<16x128xf32>
    %875 = vector.extract_strided_slice %866 {offsets = [0, 128], sizes = [16, 128], strides = [1, 1]} : vector<16x384xf32> to vector<16x128xf32>
    %876 = vector.extract_strided_slice %832 {offsets = [0, 128], sizes = [16, 128], strides = [1, 1]} : vector<16x384xf32> to vector<16x128xf32>
    %877 = arith.addf %875, %876 : vector<16x128xf32>
    %878 = arith.negf %877 : vector<16x128xf32>
    %879 = math.exp %878 : vector<16x128xf32>
    %cst_263 = arith.constant 1.000000e+00 : f32
    %880 = vector.broadcast %cst_263 : f32 to vector<16x128xf32>
    %881 = arith.addf %880, %879 : vector<16x128xf32>
    %882 = arith.divf %880, %881 : vector<16x128xf32>
    %883 = vector.extract_strided_slice %866 {offsets = [0, 256], sizes = [16, 128], strides = [1, 1]} : vector<16x384xf32> to vector<16x128xf32>
    %884 = vector.extract_strided_slice %832 {offsets = [0, 256], sizes = [16, 128], strides = [1, 1]} : vector<16x384xf32> to vector<16x128xf32>
    %885 = vector.broadcast %10 : vector<1x128xf32> to vector<16x128xf32>
    %886 = arith.addf %884, %885 : vector<16x128xf32>
    %887 = arith.mulf %874, %886 : vector<16x128xf32>
    %888 = arith.addf %883, %887 : vector<16x128xf32>
    %889 = math.tanh %888 : vector<16x128xf32>
    %cst_264 = arith.constant 1.000000e+00 : f32
    %890 = vector.broadcast %cst_264 : f32 to vector<16x128xf32>
    %891 = arith.subf %890, %882 : vector<16x128xf32>
    %892 = arith.mulf %891, %889 : vector<16x128xf32>
    %893 = arith.mulf %882, %808 : vector<16x128xf32>
    %894 = arith.addf %892, %893 : vector<16x128xf32>
    %c7_i32_265 = arith.constant 7 : i32
    %895 = arith.cmpi slt, %825, %c7_i32_265 : i32
    %c7_i32_266 = arith.constant 7 : i32
    %896 = arith.cmpi slt, %828, %c7_i32_266 : i32
    %897 = arith.select %895, %863, %807 : vector<16x128xf32>
    %898 = arith.select %896, %894, %808 : vector<16x128xf32>
    %cst_267 = arith.constant 0.000000e+00 : f32
    %899 = vector.broadcast %cst_267 : f32 to vector<16x128xf32>
    %900 = arith.select %895, %897, %899 : vector<16x128xf32>
    %901 = arith.truncf %900 : vector<16x128xf32> to vector<16x128xbf16>
    %902 = arith.index_cast %c9_i32 : i32 to index
    %c0_268 = arith.constant 0 : index
    %c0_269 = arith.constant 0 : index
    %903 = vector.load %arg5[%902, %c0_268, %c0_269] : memref<16x16x128xbf16, #tpu.memory_space<vmem>>, vector<1x16x128xbf16>
    %904 = vector.shape_cast %903 : vector<1x16x128xbf16> to vector<16x128xbf16>
    %905 = vector.shape_cast %901 : vector<16x128xbf16> to vector<1x16x128xbf16>
    tpu.vector_store %arg5[%902, %c0_268, %c0_269], %905 {strides = array<i32>} : memref<16x16x128xbf16, #tpu.memory_space<vmem>>, vector<1x16x128xbf16>,
    %cst_270 = arith.constant 0.000000e+00 : f32
    %906 = vector.broadcast %cst_270 : f32 to vector<16x128xf32>
    %907 = arith.select %896, %898, %906 : vector<16x128xf32>
    %908 = arith.truncf %907 : vector<16x128xf32> to vector<16x128xbf16>
    %909 = arith.index_cast %823 : i32 to index
    %c0_271 = arith.constant 0 : index
    %c0_272 = arith.constant 0 : index
    %910 = vector.load %arg6[%909, %c0_271, %c0_272] : memref<16x16x128xbf16, #tpu.memory_space<vmem>>, vector<1x16x128xbf16>
    %911 = vector.shape_cast %910 : vector<1x16x128xbf16> to vector<16x128xbf16>
    %912 = vector.shape_cast %908 : vector<16x128xbf16> to vector<1x16x128xbf16>
    tpu.vector_store %arg6[%909, %c0_271, %c0_272], %912 {strides = array<i32>} : memref<16x16x128xbf16, #tpu.memory_space<vmem>>, vector<1x16x128xbf16>,
    %c10_i32 = arith.constant 10 : i32
    %c15_i32_273 = arith.constant 15 : i32
    %913 = arith.subi %c15_i32_273, %c10_i32 : i32
    %c16_i32_274 = arith.constant 16 : i32
    %914 = arith.muli %arg0, %c16_i32_274 : i32
    %915 = arith.addi %914, %c10_i32 : i32
    %c0_i32_275 = arith.constant 0 : i32
    %916 = arith.subi %c0_i32_275, %arg0 : i32
    %c16_i32_276 = arith.constant 16 : i32
    %917 = arith.muli %916, %c16_i32_276 : i32
    %918 = arith.addi %917, %913 : i32
    %919 = arith.truncf %897 : vector<16x128xf32> to vector<16x128xbf16>
    %cst_277 = arith.constant dense<0.000000e+00> : vector<16x384xf32>
    %920 = tpu.matmul %919, %4, %cst_277 {dimension_numbers = #tpu.dot_dimension_numbers<[1], [0], [0], [1], [0, 0, 1, 1], [], []>} : vector<16x128xbf16>, vector<128x384xbf16>, vector<16x384xf32> -> vector<16x384xf32>
    %921 = arith.truncf %898 : vector<16x128xf32> to vector<16x128xbf16>
    %cst_278 = arith.constant dense<0.000000e+00> : vector<16x384xf32>
    %922 = tpu.matmul %921, %6, %cst_278 {dimension_numbers = #tpu.dot_dimension_numbers<[1], [0], [0], [1], [0, 0, 1, 1], [], []>} : vector<16x128xbf16>, vector<128x384xbf16>, vector<16x384xf32> -> vector<16x384xf32>
    %c0_279 = arith.constant 0 : index
    %923 = arith.index_cast %c10_i32 : i32 to index
    %c0_280 = arith.constant 0 : index
    %c0_281 = arith.constant 0 : index
    %924 = vector.load %arg1[%c0_279, %923, %c0_280, %c0_281] : memref<1x16x16x384xf32, #tpu.memory_space<vmem>>, vector<1x1x16x384xf32>
    %925 = vector.shape_cast %924 : vector<1x1x16x384xf32> to vector<16x384xf32>
    %926 = vector.extract_strided_slice %925 {offsets = [0, 0], sizes = [16, 128], strides = [1, 1]} : vector<16x384xf32> to vector<16x128xf32>
    %927 = vector.extract_strided_slice %920 {offsets = [0, 0], sizes = [16, 128], strides = [1, 1]} : vector<16x384xf32> to vector<16x128xf32>
    %928 = arith.addf %926, %927 : vector<16x128xf32>
    %929 = arith.negf %928 : vector<16x128xf32>
    %930 = math.exp %929 : vector<16x128xf32>
    %cst_282 = arith.constant 1.000000e+00 : f32
    %931 = vector.broadcast %cst_282 : f32 to vector<16x128xf32>
    %932 = arith.addf %931, %930 : vector<16x128xf32>
    %933 = arith.divf %931, %932 : vector<16x128xf32>
    %934 = vector.extract_strided_slice %925 {offsets = [0, 128], sizes = [16, 128], strides = [1, 1]} : vector<16x384xf32> to vector<16x128xf32>
    %935 = vector.extract_strided_slice %920 {offsets = [0, 128], sizes = [16, 128], strides = [1, 1]} : vector<16x384xf32> to vector<16x128xf32>
    %936 = arith.addf %934, %935 : vector<16x128xf32>
    %937 = arith.negf %936 : vector<16x128xf32>
    %938 = math.exp %937 : vector<16x128xf32>
    %cst_283 = arith.constant 1.000000e+00 : f32
    %939 = vector.broadcast %cst_283 : f32 to vector<16x128xf32>
    %940 = arith.addf %939, %938 : vector<16x128xf32>
    %941 = arith.divf %939, %940 : vector<16x128xf32>
    %942 = vector.extract_strided_slice %925 {offsets = [0, 256], sizes = [16, 128], strides = [1, 1]} : vector<16x384xf32> to vector<16x128xf32>
    %943 = vector.extract_strided_slice %920 {offsets = [0, 256], sizes = [16, 128], strides = [1, 1]} : vector<16x384xf32> to vector<16x128xf32>
    %944 = vector.broadcast %8 : vector<1x128xf32> to vector<16x128xf32>
    %945 = arith.addf %943, %944 : vector<16x128xf32>
    %946 = arith.mulf %933, %945 : vector<16x128xf32>
    %947 = arith.addf %942, %946 : vector<16x128xf32>
    %948 = math.tanh %947 : vector<16x128xf32>
    %cst_284 = arith.constant 1.000000e+00 : f32
    %949 = vector.broadcast %cst_284 : f32 to vector<16x128xf32>
    %950 = arith.subf %949, %941 : vector<16x128xf32>
    %951 = arith.mulf %950, %948 : vector<16x128xf32>
    %952 = arith.mulf %941, %897 : vector<16x128xf32>
    %953 = arith.addf %951, %952 : vector<16x128xf32>
    %c0_285 = arith.constant 0 : index
    %954 = arith.index_cast %913 : i32 to index
    %c0_286 = arith.constant 0 : index
    %c0_287 = arith.constant 0 : index
    %955 = vector.load %arg2[%c0_285, %954, %c0_286, %c0_287] : memref<1x16x16x384xf32, #tpu.memory_space<vmem>>, vector<1x1x16x384xf32>
    %956 = vector.shape_cast %955 : vector<1x1x16x384xf32> to vector<16x384xf32>
    %957 = vector.extract_strided_slice %956 {offsets = [0, 0], sizes = [16, 128], strides = [1, 1]} : vector<16x384xf32> to vector<16x128xf32>
    %958 = vector.extract_strided_slice %922 {offsets = [0, 0], sizes = [16, 128], strides = [1, 1]} : vector<16x384xf32> to vector<16x128xf32>
    %959 = arith.addf %957, %958 : vector<16x128xf32>
    %960 = arith.negf %959 : vector<16x128xf32>
    %961 = math.exp %960 : vector<16x128xf32>
    %cst_288 = arith.constant 1.000000e+00 : f32
    %962 = vector.broadcast %cst_288 : f32 to vector<16x128xf32>
    %963 = arith.addf %962, %961 : vector<16x128xf32>
    %964 = arith.divf %962, %963 : vector<16x128xf32>
    %965 = vector.extract_strided_slice %956 {offsets = [0, 128], sizes = [16, 128], strides = [1, 1]} : vector<16x384xf32> to vector<16x128xf32>
    %966 = vector.extract_strided_slice %922 {offsets = [0, 128], sizes = [16, 128], strides = [1, 1]} : vector<16x384xf32> to vector<16x128xf32>
    %967 = arith.addf %965, %966 : vector<16x128xf32>
    %968 = arith.negf %967 : vector<16x128xf32>
    %969 = math.exp %968 : vector<16x128xf32>
    %cst_289 = arith.constant 1.000000e+00 : f32
    %970 = vector.broadcast %cst_289 : f32 to vector<16x128xf32>
    %971 = arith.addf %970, %969 : vector<16x128xf32>
    %972 = arith.divf %970, %971 : vector<16x128xf32>
    %973 = vector.extract_strided_slice %956 {offsets = [0, 256], sizes = [16, 128], strides = [1, 1]} : vector<16x384xf32> to vector<16x128xf32>
    %974 = vector.extract_strided_slice %922 {offsets = [0, 256], sizes = [16, 128], strides = [1, 1]} : vector<16x384xf32> to vector<16x128xf32>
    %975 = vector.broadcast %10 : vector<1x128xf32> to vector<16x128xf32>
    %976 = arith.addf %974, %975 : vector<16x128xf32>
    %977 = arith.mulf %964, %976 : vector<16x128xf32>
    %978 = arith.addf %973, %977 : vector<16x128xf32>
    %979 = math.tanh %978 : vector<16x128xf32>
    %cst_290 = arith.constant 1.000000e+00 : f32
    %980 = vector.broadcast %cst_290 : f32 to vector<16x128xf32>
    %981 = arith.subf %980, %972 : vector<16x128xf32>
    %982 = arith.mulf %981, %979 : vector<16x128xf32>
    %983 = arith.mulf %972, %898 : vector<16x128xf32>
    %984 = arith.addf %982, %983 : vector<16x128xf32>
    %c7_i32_291 = arith.constant 7 : i32
    %985 = arith.cmpi slt, %915, %c7_i32_291 : i32
    %c7_i32_292 = arith.constant 7 : i32
    %986 = arith.cmpi slt, %918, %c7_i32_292 : i32
    %987 = arith.select %985, %953, %897 : vector<16x128xf32>
    %988 = arith.select %986, %984, %898 : vector<16x128xf32>
    %cst_293 = arith.constant 0.000000e+00 : f32
    %989 = vector.broadcast %cst_293 : f32 to vector<16x128xf32>
    %990 = arith.select %985, %987, %989 : vector<16x128xf32>
    %991 = arith.truncf %990 : vector<16x128xf32> to vector<16x128xbf16>
    %992 = arith.index_cast %c10_i32 : i32 to index
    %c0_294 = arith.constant 0 : index
    %c0_295 = arith.constant 0 : index
    %993 = vector.load %arg5[%992, %c0_294, %c0_295] : memref<16x16x128xbf16, #tpu.memory_space<vmem>>, vector<1x16x128xbf16>
    %994 = vector.shape_cast %993 : vector<1x16x128xbf16> to vector<16x128xbf16>
    %995 = vector.shape_cast %991 : vector<16x128xbf16> to vector<1x16x128xbf16>
    tpu.vector_store %arg5[%992, %c0_294, %c0_295], %995 {strides = array<i32>} : memref<16x16x128xbf16, #tpu.memory_space<vmem>>, vector<1x16x128xbf16>,
    %cst_296 = arith.constant 0.000000e+00 : f32
    %996 = vector.broadcast %cst_296 : f32 to vector<16x128xf32>
    %997 = arith.select %986, %988, %996 : vector<16x128xf32>
    %998 = arith.truncf %997 : vector<16x128xf32> to vector<16x128xbf16>
    %999 = arith.index_cast %913 : i32 to index
    %c0_297 = arith.constant 0 : index
    %c0_298 = arith.constant 0 : index
    %1000 = vector.load %arg6[%999, %c0_297, %c0_298] : memref<16x16x128xbf16, #tpu.memory_space<vmem>>, vector<1x16x128xbf16>
    %1001 = vector.shape_cast %1000 : vector<1x16x128xbf16> to vector<16x128xbf16>
    %1002 = vector.shape_cast %998 : vector<16x128xbf16> to vector<1x16x128xbf16>
    tpu.vector_store %arg6[%999, %c0_297, %c0_298], %1002 {strides = array<i32>} : memref<16x16x128xbf16, #tpu.memory_space<vmem>>, vector<1x16x128xbf16>,
    %c11_i32 = arith.constant 11 : i32
    %c15_i32_299 = arith.constant 15 : i32
    %1003 = arith.subi %c15_i32_299, %c11_i32 : i32
    %c16_i32_300 = arith.constant 16 : i32
    %1004 = arith.muli %arg0, %c16_i32_300 : i32
    %1005 = arith.addi %1004, %c11_i32 : i32
    %c0_i32_301 = arith.constant 0 : i32
    %1006 = arith.subi %c0_i32_301, %arg0 : i32
    %c16_i32_302 = arith.constant 16 : i32
    %1007 = arith.muli %1006, %c16_i32_302 : i32
    %1008 = arith.addi %1007, %1003 : i32
    %1009 = arith.truncf %987 : vector<16x128xf32> to vector<16x128xbf16>
    %cst_303 = arith.constant dense<0.000000e+00> : vector<16x384xf32>
    %1010 = tpu.matmul %1009, %4, %cst_303 {dimension_numbers = #tpu.dot_dimension_numbers<[1], [0], [0], [1], [0, 0, 1, 1], [], []>} : vector<16x128xbf16>, vector<128x384xbf16>, vector<16x384xf32> -> vector<16x384xf32>
    %1011 = arith.truncf %988 : vector<16x128xf32> to vector<16x128xbf16>
    %cst_304 = arith.constant dense<0.000000e+00> : vector<16x384xf32>
    %1012 = tpu.matmul %1011, %6, %cst_304 {dimension_numbers = #tpu.dot_dimension_numbers<[1], [0], [0], [1], [0, 0, 1, 1], [], []>} : vector<16x128xbf16>, vector<128x384xbf16>, vector<16x384xf32> -> vector<16x384xf32>
    %c0_305 = arith.constant 0 : index
    %1013 = arith.index_cast %c11_i32 : i32 to index
    %c0_306 = arith.constant 0 : index
    %c0_307 = arith.constant 0 : index
    %1014 = vector.load %arg1[%c0_305, %1013, %c0_306, %c0_307] : memref<1x16x16x384xf32, #tpu.memory_space<vmem>>, vector<1x1x16x384xf32>
    %1015 = vector.shape_cast %1014 : vector<1x1x16x384xf32> to vector<16x384xf32>
    %1016 = vector.extract_strided_slice %1015 {offsets = [0, 0], sizes = [16, 128], strides = [1, 1]} : vector<16x384xf32> to vector<16x128xf32>
    %1017 = vector.extract_strided_slice %1010 {offsets = [0, 0], sizes = [16, 128], strides = [1, 1]} : vector<16x384xf32> to vector<16x128xf32>
    %1018 = arith.addf %1016, %1017 : vector<16x128xf32>
    %1019 = arith.negf %1018 : vector<16x128xf32>
    %1020 = math.exp %1019 : vector<16x128xf32>
    %cst_308 = arith.constant 1.000000e+00 : f32
    %1021 = vector.broadcast %cst_308 : f32 to vector<16x128xf32>
    %1022 = arith.addf %1021, %1020 : vector<16x128xf32>
    %1023 = arith.divf %1021, %1022 : vector<16x128xf32>
    %1024 = vector.extract_strided_slice %1015 {offsets = [0, 128], sizes = [16, 128], strides = [1, 1]} : vector<16x384xf32> to vector<16x128xf32>
    %1025 = vector.extract_strided_slice %1010 {offsets = [0, 128], sizes = [16, 128], strides = [1, 1]} : vector<16x384xf32> to vector<16x128xf32>
    %1026 = arith.addf %1024, %1025 : vector<16x128xf32>
    %1027 = arith.negf %1026 : vector<16x128xf32>
    %1028 = math.exp %1027 : vector<16x128xf32>
    %cst_309 = arith.constant 1.000000e+00 : f32
    %1029 = vector.broadcast %cst_309 : f32 to vector<16x128xf32>
    %1030 = arith.addf %1029, %1028 : vector<16x128xf32>
    %1031 = arith.divf %1029, %1030 : vector<16x128xf32>
    %1032 = vector.extract_strided_slice %1015 {offsets = [0, 256], sizes = [16, 128], strides = [1, 1]} : vector<16x384xf32> to vector<16x128xf32>
    %1033 = vector.extract_strided_slice %1010 {offsets = [0, 256], sizes = [16, 128], strides = [1, 1]} : vector<16x384xf32> to vector<16x128xf32>
    %1034 = vector.broadcast %8 : vector<1x128xf32> to vector<16x128xf32>
    %1035 = arith.addf %1033, %1034 : vector<16x128xf32>
    %1036 = arith.mulf %1023, %1035 : vector<16x128xf32>
    %1037 = arith.addf %1032, %1036 : vector<16x128xf32>
    %1038 = math.tanh %1037 : vector<16x128xf32>
    %cst_310 = arith.constant 1.000000e+00 : f32
    %1039 = vector.broadcast %cst_310 : f32 to vector<16x128xf32>
    %1040 = arith.subf %1039, %1031 : vector<16x128xf32>
    %1041 = arith.mulf %1040, %1038 : vector<16x128xf32>
    %1042 = arith.mulf %1031, %987 : vector<16x128xf32>
    %1043 = arith.addf %1041, %1042 : vector<16x128xf32>
    %c0_311 = arith.constant 0 : index
    %1044 = arith.index_cast %1003 : i32 to index
    %c0_312 = arith.constant 0 : index
    %c0_313 = arith.constant 0 : index
    %1045 = vector.load %arg2[%c0_311, %1044, %c0_312, %c0_313] : memref<1x16x16x384xf32, #tpu.memory_space<vmem>>, vector<1x1x16x384xf32>
    %1046 = vector.shape_cast %1045 : vector<1x1x16x384xf32> to vector<16x384xf32>
    %1047 = vector.extract_strided_slice %1046 {offsets = [0, 0], sizes = [16, 128], strides = [1, 1]} : vector<16x384xf32> to vector<16x128xf32>
    %1048 = vector.extract_strided_slice %1012 {offsets = [0, 0], sizes = [16, 128], strides = [1, 1]} : vector<16x384xf32> to vector<16x128xf32>
    %1049 = arith.addf %1047, %1048 : vector<16x128xf32>
    %1050 = arith.negf %1049 : vector<16x128xf32>
    %1051 = math.exp %1050 : vector<16x128xf32>
    %cst_314 = arith.constant 1.000000e+00 : f32
    %1052 = vector.broadcast %cst_314 : f32 to vector<16x128xf32>
    %1053 = arith.addf %1052, %1051 : vector<16x128xf32>
    %1054 = arith.divf %1052, %1053 : vector<16x128xf32>
    %1055 = vector.extract_strided_slice %1046 {offsets = [0, 128], sizes = [16, 128], strides = [1, 1]} : vector<16x384xf32> to vector<16x128xf32>
    %1056 = vector.extract_strided_slice %1012 {offsets = [0, 128], sizes = [16, 128], strides = [1, 1]} : vector<16x384xf32> to vector<16x128xf32>
    %1057 = arith.addf %1055, %1056 : vector<16x128xf32>
    %1058 = arith.negf %1057 : vector<16x128xf32>
    %1059 = math.exp %1058 : vector<16x128xf32>
    %cst_315 = arith.constant 1.000000e+00 : f32
    %1060 = vector.broadcast %cst_315 : f32 to vector<16x128xf32>
    %1061 = arith.addf %1060, %1059 : vector<16x128xf32>
    %1062 = arith.divf %1060, %1061 : vector<16x128xf32>
    %1063 = vector.extract_strided_slice %1046 {offsets = [0, 256], sizes = [16, 128], strides = [1, 1]} : vector<16x384xf32> to vector<16x128xf32>
    %1064 = vector.extract_strided_slice %1012 {offsets = [0, 256], sizes = [16, 128], strides = [1, 1]} : vector<16x384xf32> to vector<16x128xf32>
    %1065 = vector.broadcast %10 : vector<1x128xf32> to vector<16x128xf32>
    %1066 = arith.addf %1064, %1065 : vector<16x128xf32>
    %1067 = arith.mulf %1054, %1066 : vector<16x128xf32>
    %1068 = arith.addf %1063, %1067 : vector<16x128xf32>
    %1069 = math.tanh %1068 : vector<16x128xf32>
    %cst_316 = arith.constant 1.000000e+00 : f32
    %1070 = vector.broadcast %cst_316 : f32 to vector<16x128xf32>
    %1071 = arith.subf %1070, %1062 : vector<16x128xf32>
    %1072 = arith.mulf %1071, %1069 : vector<16x128xf32>
    %1073 = arith.mulf %1062, %988 : vector<16x128xf32>
    %1074 = arith.addf %1072, %1073 : vector<16x128xf32>
    %c7_i32_317 = arith.constant 7 : i32
    %1075 = arith.cmpi slt, %1005, %c7_i32_317 : i32
    %c7_i32_318 = arith.constant 7 : i32
    %1076 = arith.cmpi slt, %1008, %c7_i32_318 : i32
    %1077 = arith.select %1075, %1043, %987 : vector<16x128xf32>
    %1078 = arith.select %1076, %1074, %988 : vector<16x128xf32>
    %cst_319 = arith.constant 0.000000e+00 : f32
    %1079 = vector.broadcast %cst_319 : f32 to vector<16x128xf32>
    %1080 = arith.select %1075, %1077, %1079 : vector<16x128xf32>
    %1081 = arith.truncf %1080 : vector<16x128xf32> to vector<16x128xbf16>
    %1082 = arith.index_cast %c11_i32 : i32 to index
    %c0_320 = arith.constant 0 : index
    %c0_321 = arith.constant 0 : index
    %1083 = vector.load %arg5[%1082, %c0_320, %c0_321] : memref<16x16x128xbf16, #tpu.memory_space<vmem>>, vector<1x16x128xbf16>
    %1084 = vector.shape_cast %1083 : vector<1x16x128xbf16> to vector<16x128xbf16>
    %1085 = vector.shape_cast %1081 : vector<16x128xbf16> to vector<1x16x128xbf16>
    tpu.vector_store %arg5[%1082, %c0_320, %c0_321], %1085 {strides = array<i32>} : memref<16x16x128xbf16, #tpu.memory_space<vmem>>, vector<1x16x128xbf16>,
    %cst_322 = arith.constant 0.000000e+00 : f32
    %1086 = vector.broadcast %cst_322 : f32 to vector<16x128xf32>
    %1087 = arith.select %1076, %1078, %1086 : vector<16x128xf32>
    %1088 = arith.truncf %1087 : vector<16x128xf32> to vector<16x128xbf16>
    %1089 = arith.index_cast %1003 : i32 to index
    %c0_323 = arith.constant 0 : index
    %c0_324 = arith.constant 0 : index
    %1090 = vector.load %arg6[%1089, %c0_323, %c0_324] : memref<16x16x128xbf16, #tpu.memory_space<vmem>>, vector<1x16x128xbf16>
    %1091 = vector.shape_cast %1090 : vector<1x16x128xbf16> to vector<16x128xbf16>
    %1092 = vector.shape_cast %1088 : vector<16x128xbf16> to vector<1x16x128xbf16>
    tpu.vector_store %arg6[%1089, %c0_323, %c0_324], %1092 {strides = array<i32>} : memref<16x16x128xbf16, #tpu.memory_space<vmem>>, vector<1x16x128xbf16>,
    %c12_i32 = arith.constant 12 : i32
    %c15_i32_325 = arith.constant 15 : i32
    %1093 = arith.subi %c15_i32_325, %c12_i32 : i32
    %c16_i32_326 = arith.constant 16 : i32
    %1094 = arith.muli %arg0, %c16_i32_326 : i32
    %1095 = arith.addi %1094, %c12_i32 : i32
    %c0_i32_327 = arith.constant 0 : i32
    %1096 = arith.subi %c0_i32_327, %arg0 : i32
    %c16_i32_328 = arith.constant 16 : i32
    %1097 = arith.muli %1096, %c16_i32_328 : i32
    %1098 = arith.addi %1097, %1093 : i32
    %1099 = arith.truncf %1077 : vector<16x128xf32> to vector<16x128xbf16>
    %cst_329 = arith.constant dense<0.000000e+00> : vector<16x384xf32>
    %1100 = tpu.matmul %1099, %4, %cst_329 {dimension_numbers = #tpu.dot_dimension_numbers<[1], [0], [0], [1], [0, 0, 1, 1], [], []>} : vector<16x128xbf16>, vector<128x384xbf16>, vector<16x384xf32> -> vector<16x384xf32>
    %1101 = arith.truncf %1078 : vector<16x128xf32> to vector<16x128xbf16>
    %cst_330 = arith.constant dense<0.000000e+00> : vector<16x384xf32>
    %1102 = tpu.matmul %1101, %6, %cst_330 {dimension_numbers = #tpu.dot_dimension_numbers<[1], [0], [0], [1], [0, 0, 1, 1], [], []>} : vector<16x128xbf16>, vector<128x384xbf16>, vector<16x384xf32> -> vector<16x384xf32>
    %c0_331 = arith.constant 0 : index
    %1103 = arith.index_cast %c12_i32 : i32 to index
    %c0_332 = arith.constant 0 : index
    %c0_333 = arith.constant 0 : index
    %1104 = vector.load %arg1[%c0_331, %1103, %c0_332, %c0_333] : memref<1x16x16x384xf32, #tpu.memory_space<vmem>>, vector<1x1x16x384xf32>
    %1105 = vector.shape_cast %1104 : vector<1x1x16x384xf32> to vector<16x384xf32>
    %1106 = vector.extract_strided_slice %1105 {offsets = [0, 0], sizes = [16, 128], strides = [1, 1]} : vector<16x384xf32> to vector<16x128xf32>
    %1107 = vector.extract_strided_slice %1100 {offsets = [0, 0], sizes = [16, 128], strides = [1, 1]} : vector<16x384xf32> to vector<16x128xf32>
    %1108 = arith.addf %1106, %1107 : vector<16x128xf32>
    %1109 = arith.negf %1108 : vector<16x128xf32>
    %1110 = math.exp %1109 : vector<16x128xf32>
    %cst_334 = arith.constant 1.000000e+00 : f32
    %1111 = vector.broadcast %cst_334 : f32 to vector<16x128xf32>
    %1112 = arith.addf %1111, %1110 : vector<16x128xf32>
    %1113 = arith.divf %1111, %1112 : vector<16x128xf32>
    %1114 = vector.extract_strided_slice %1105 {offsets = [0, 128], sizes = [16, 128], strides = [1, 1]} : vector<16x384xf32> to vector<16x128xf32>
    %1115 = vector.extract_strided_slice %1100 {offsets = [0, 128], sizes = [16, 128], strides = [1, 1]} : vector<16x384xf32> to vector<16x128xf32>
    %1116 = arith.addf %1114, %1115 : vector<16x128xf32>
    %1117 = arith.negf %1116 : vector<16x128xf32>
    %1118 = math.exp %1117 : vector<16x128xf32>
    %cst_335 = arith.constant 1.000000e+00 : f32
    %1119 = vector.broadcast %cst_335 : f32 to vector<16x128xf32>
    %1120 = arith.addf %1119, %1118 : vector<16x128xf32>
    %1121 = arith.divf %1119, %1120 : vector<16x128xf32>
    %1122 = vector.extract_strided_slice %1105 {offsets = [0, 256], sizes = [16, 128], strides = [1, 1]} : vector<16x384xf32> to vector<16x128xf32>
    %1123 = vector.extract_strided_slice %1100 {offsets = [0, 256], sizes = [16, 128], strides = [1, 1]} : vector<16x384xf32> to vector<16x128xf32>
    %1124 = vector.broadcast %8 : vector<1x128xf32> to vector<16x128xf32>
    %1125 = arith.addf %1123, %1124 : vector<16x128xf32>
    %1126 = arith.mulf %1113, %1125 : vector<16x128xf32>
    %1127 = arith.addf %1122, %1126 : vector<16x128xf32>
    %1128 = math.tanh %1127 : vector<16x128xf32>
    %cst_336 = arith.constant 1.000000e+00 : f32
    %1129 = vector.broadcast %cst_336 : f32 to vector<16x128xf32>
    %1130 = arith.subf %1129, %1121 : vector<16x128xf32>
    %1131 = arith.mulf %1130, %1128 : vector<16x128xf32>
    %1132 = arith.mulf %1121, %1077 : vector<16x128xf32>
    %1133 = arith.addf %1131, %1132 : vector<16x128xf32>
    %c0_337 = arith.constant 0 : index
    %1134 = arith.index_cast %1093 : i32 to index
    %c0_338 = arith.constant 0 : index
    %c0_339 = arith.constant 0 : index
    %1135 = vector.load %arg2[%c0_337, %1134, %c0_338, %c0_339] : memref<1x16x16x384xf32, #tpu.memory_space<vmem>>, vector<1x1x16x384xf32>
    %1136 = vector.shape_cast %1135 : vector<1x1x16x384xf32> to vector<16x384xf32>
    %1137 = vector.extract_strided_slice %1136 {offsets = [0, 0], sizes = [16, 128], strides = [1, 1]} : vector<16x384xf32> to vector<16x128xf32>
    %1138 = vector.extract_strided_slice %1102 {offsets = [0, 0], sizes = [16, 128], strides = [1, 1]} : vector<16x384xf32> to vector<16x128xf32>
    %1139 = arith.addf %1137, %1138 : vector<16x128xf32>
    %1140 = arith.negf %1139 : vector<16x128xf32>
    %1141 = math.exp %1140 : vector<16x128xf32>
    %cst_340 = arith.constant 1.000000e+00 : f32
    %1142 = vector.broadcast %cst_340 : f32 to vector<16x128xf32>
    %1143 = arith.addf %1142, %1141 : vector<16x128xf32>
    %1144 = arith.divf %1142, %1143 : vector<16x128xf32>
    %1145 = vector.extract_strided_slice %1136 {offsets = [0, 128], sizes = [16, 128], strides = [1, 1]} : vector<16x384xf32> to vector<16x128xf32>
    %1146 = vector.extract_strided_slice %1102 {offsets = [0, 128], sizes = [16, 128], strides = [1, 1]} : vector<16x384xf32> to vector<16x128xf32>
    %1147 = arith.addf %1145, %1146 : vector<16x128xf32>
    %1148 = arith.negf %1147 : vector<16x128xf32>
    %1149 = math.exp %1148 : vector<16x128xf32>
    %cst_341 = arith.constant 1.000000e+00 : f32
    %1150 = vector.broadcast %cst_341 : f32 to vector<16x128xf32>
    %1151 = arith.addf %1150, %1149 : vector<16x128xf32>
    %1152 = arith.divf %1150, %1151 : vector<16x128xf32>
    %1153 = vector.extract_strided_slice %1136 {offsets = [0, 256], sizes = [16, 128], strides = [1, 1]} : vector<16x384xf32> to vector<16x128xf32>
    %1154 = vector.extract_strided_slice %1102 {offsets = [0, 256], sizes = [16, 128], strides = [1, 1]} : vector<16x384xf32> to vector<16x128xf32>
    %1155 = vector.broadcast %10 : vector<1x128xf32> to vector<16x128xf32>
    %1156 = arith.addf %1154, %1155 : vector<16x128xf32>
    %1157 = arith.mulf %1144, %1156 : vector<16x128xf32>
    %1158 = arith.addf %1153, %1157 : vector<16x128xf32>
    %1159 = math.tanh %1158 : vector<16x128xf32>
    %cst_342 = arith.constant 1.000000e+00 : f32
    %1160 = vector.broadcast %cst_342 : f32 to vector<16x128xf32>
    %1161 = arith.subf %1160, %1152 : vector<16x128xf32>
    %1162 = arith.mulf %1161, %1159 : vector<16x128xf32>
    %1163 = arith.mulf %1152, %1078 : vector<16x128xf32>
    %1164 = arith.addf %1162, %1163 : vector<16x128xf32>
    %c7_i32_343 = arith.constant 7 : i32
    %1165 = arith.cmpi slt, %1095, %c7_i32_343 : i32
    %c7_i32_344 = arith.constant 7 : i32
    %1166 = arith.cmpi slt, %1098, %c7_i32_344 : i32
    %1167 = arith.select %1165, %1133, %1077 : vector<16x128xf32>
    %1168 = arith.select %1166, %1164, %1078 : vector<16x128xf32>
    %cst_345 = arith.constant 0.000000e+00 : f32
    %1169 = vector.broadcast %cst_345 : f32 to vector<16x128xf32>
    %1170 = arith.select %1165, %1167, %1169 : vector<16x128xf32>
    %1171 = arith.truncf %1170 : vector<16x128xf32> to vector<16x128xbf16>
    %1172 = arith.index_cast %c12_i32 : i32 to index
    %c0_346 = arith.constant 0 : index
    %c0_347 = arith.constant 0 : index
    %1173 = vector.load %arg5[%1172, %c0_346, %c0_347] : memref<16x16x128xbf16, #tpu.memory_space<vmem>>, vector<1x16x128xbf16>
    %1174 = vector.shape_cast %1173 : vector<1x16x128xbf16> to vector<16x128xbf16>
    %1175 = vector.shape_cast %1171 : vector<16x128xbf16> to vector<1x16x128xbf16>
    tpu.vector_store %arg5[%1172, %c0_346, %c0_347], %1175 {strides = array<i32>} : memref<16x16x128xbf16, #tpu.memory_space<vmem>>, vector<1x16x128xbf16>,
    %cst_348 = arith.constant 0.000000e+00 : f32
    %1176 = vector.broadcast %cst_348 : f32 to vector<16x128xf32>
    %1177 = arith.select %1166, %1168, %1176 : vector<16x128xf32>
    %1178 = arith.truncf %1177 : vector<16x128xf32> to vector<16x128xbf16>
    %1179 = arith.index_cast %1093 : i32 to index
    %c0_349 = arith.constant 0 : index
    %c0_350 = arith.constant 0 : index
    %1180 = vector.load %arg6[%1179, %c0_349, %c0_350] : memref<16x16x128xbf16, #tpu.memory_space<vmem>>, vector<1x16x128xbf16>
    %1181 = vector.shape_cast %1180 : vector<1x16x128xbf16> to vector<16x128xbf16>
    %1182 = vector.shape_cast %1178 : vector<16x128xbf16> to vector<1x16x128xbf16>
    tpu.vector_store %arg6[%1179, %c0_349, %c0_350], %1182 {strides = array<i32>} : memref<16x16x128xbf16, #tpu.memory_space<vmem>>, vector<1x16x128xbf16>,
    %c13_i32 = arith.constant 13 : i32
    %c15_i32_351 = arith.constant 15 : i32
    %1183 = arith.subi %c15_i32_351, %c13_i32 : i32
    %c16_i32_352 = arith.constant 16 : i32
    %1184 = arith.muli %arg0, %c16_i32_352 : i32
    %1185 = arith.addi %1184, %c13_i32 : i32
    %c0_i32_353 = arith.constant 0 : i32
    %1186 = arith.subi %c0_i32_353, %arg0 : i32
    %c16_i32_354 = arith.constant 16 : i32
    %1187 = arith.muli %1186, %c16_i32_354 : i32
    %1188 = arith.addi %1187, %1183 : i32
    %1189 = arith.truncf %1167 : vector<16x128xf32> to vector<16x128xbf16>
    %cst_355 = arith.constant dense<0.000000e+00> : vector<16x384xf32>
    %1190 = tpu.matmul %1189, %4, %cst_355 {dimension_numbers = #tpu.dot_dimension_numbers<[1], [0], [0], [1], [0, 0, 1, 1], [], []>} : vector<16x128xbf16>, vector<128x384xbf16>, vector<16x384xf32> -> vector<16x384xf32>
    %1191 = arith.truncf %1168 : vector<16x128xf32> to vector<16x128xbf16>
    %cst_356 = arith.constant dense<0.000000e+00> : vector<16x384xf32>
    %1192 = tpu.matmul %1191, %6, %cst_356 {dimension_numbers = #tpu.dot_dimension_numbers<[1], [0], [0], [1], [0, 0, 1, 1], [], []>} : vector<16x128xbf16>, vector<128x384xbf16>, vector<16x384xf32> -> vector<16x384xf32>
    %c0_357 = arith.constant 0 : index
    %1193 = arith.index_cast %c13_i32 : i32 to index
    %c0_358 = arith.constant 0 : index
    %c0_359 = arith.constant 0 : index
    %1194 = vector.load %arg1[%c0_357, %1193, %c0_358, %c0_359] : memref<1x16x16x384xf32, #tpu.memory_space<vmem>>, vector<1x1x16x384xf32>
    %1195 = vector.shape_cast %1194 : vector<1x1x16x384xf32> to vector<16x384xf32>
    %1196 = vector.extract_strided_slice %1195 {offsets = [0, 0], sizes = [16, 128], strides = [1, 1]} : vector<16x384xf32> to vector<16x128xf32>
    %1197 = vector.extract_strided_slice %1190 {offsets = [0, 0], sizes = [16, 128], strides = [1, 1]} : vector<16x384xf32> to vector<16x128xf32>
    %1198 = arith.addf %1196, %1197 : vector<16x128xf32>
    %1199 = arith.negf %1198 : vector<16x128xf32>
    %1200 = math.exp %1199 : vector<16x128xf32>
    %cst_360 = arith.constant 1.000000e+00 : f32
    %1201 = vector.broadcast %cst_360 : f32 to vector<16x128xf32>
    %1202 = arith.addf %1201, %1200 : vector<16x128xf32>
    %1203 = arith.divf %1201, %1202 : vector<16x128xf32>
    %1204 = vector.extract_strided_slice %1195 {offsets = [0, 128], sizes = [16, 128], strides = [1, 1]} : vector<16x384xf32> to vector<16x128xf32>
    %1205 = vector.extract_strided_slice %1190 {offsets = [0, 128], sizes = [16, 128], strides = [1, 1]} : vector<16x384xf32> to vector<16x128xf32>
    %1206 = arith.addf %1204, %1205 : vector<16x128xf32>
    %1207 = arith.negf %1206 : vector<16x128xf32>
    %1208 = math.exp %1207 : vector<16x128xf32>
    %cst_361 = arith.constant 1.000000e+00 : f32
    %1209 = vector.broadcast %cst_361 : f32 to vector<16x128xf32>
    %1210 = arith.addf %1209, %1208 : vector<16x128xf32>
    %1211 = arith.divf %1209, %1210 : vector<16x128xf32>
    %1212 = vector.extract_strided_slice %1195 {offsets = [0, 256], sizes = [16, 128], strides = [1, 1]} : vector<16x384xf32> to vector<16x128xf32>
    %1213 = vector.extract_strided_slice %1190 {offsets = [0, 256], sizes = [16, 128], strides = [1, 1]} : vector<16x384xf32> to vector<16x128xf32>
    %1214 = vector.broadcast %8 : vector<1x128xf32> to vector<16x128xf32>
    %1215 = arith.addf %1213, %1214 : vector<16x128xf32>
    %1216 = arith.mulf %1203, %1215 : vector<16x128xf32>
    %1217 = arith.addf %1212, %1216 : vector<16x128xf32>
    %1218 = math.tanh %1217 : vector<16x128xf32>
    %cst_362 = arith.constant 1.000000e+00 : f32
    %1219 = vector.broadcast %cst_362 : f32 to vector<16x128xf32>
    %1220 = arith.subf %1219, %1211 : vector<16x128xf32>
    %1221 = arith.mulf %1220, %1218 : vector<16x128xf32>
    %1222 = arith.mulf %1211, %1167 : vector<16x128xf32>
    %1223 = arith.addf %1221, %1222 : vector<16x128xf32>
    %c0_363 = arith.constant 0 : index
    %1224 = arith.index_cast %1183 : i32 to index
    %c0_364 = arith.constant 0 : index
    %c0_365 = arith.constant 0 : index
    %1225 = vector.load %arg2[%c0_363, %1224, %c0_364, %c0_365] : memref<1x16x16x384xf32, #tpu.memory_space<vmem>>, vector<1x1x16x384xf32>
    %1226 = vector.shape_cast %1225 : vector<1x1x16x384xf32> to vector<16x384xf32>
    %1227 = vector.extract_strided_slice %1226 {offsets = [0, 0], sizes = [16, 128], strides = [1, 1]} : vector<16x384xf32> to vector<16x128xf32>
    %1228 = vector.extract_strided_slice %1192 {offsets = [0, 0], sizes = [16, 128], strides = [1, 1]} : vector<16x384xf32> to vector<16x128xf32>
    %1229 = arith.addf %1227, %1228 : vector<16x128xf32>
    %1230 = arith.negf %1229 : vector<16x128xf32>
    %1231 = math.exp %1230 : vector<16x128xf32>
    %cst_366 = arith.constant 1.000000e+00 : f32
    %1232 = vector.broadcast %cst_366 : f32 to vector<16x128xf32>
    %1233 = arith.addf %1232, %1231 : vector<16x128xf32>
    %1234 = arith.divf %1232, %1233 : vector<16x128xf32>
    %1235 = vector.extract_strided_slice %1226 {offsets = [0, 128], sizes = [16, 128], strides = [1, 1]} : vector<16x384xf32> to vector<16x128xf32>
    %1236 = vector.extract_strided_slice %1192 {offsets = [0, 128], sizes = [16, 128], strides = [1, 1]} : vector<16x384xf32> to vector<16x128xf32>
    %1237 = arith.addf %1235, %1236 : vector<16x128xf32>
    %1238 = arith.negf %1237 : vector<16x128xf32>
    %1239 = math.exp %1238 : vector<16x128xf32>
    %cst_367 = arith.constant 1.000000e+00 : f32
    %1240 = vector.broadcast %cst_367 : f32 to vector<16x128xf32>
    %1241 = arith.addf %1240, %1239 : vector<16x128xf32>
    %1242 = arith.divf %1240, %1241 : vector<16x128xf32>
    %1243 = vector.extract_strided_slice %1226 {offsets = [0, 256], sizes = [16, 128], strides = [1, 1]} : vector<16x384xf32> to vector<16x128xf32>
    %1244 = vector.extract_strided_slice %1192 {offsets = [0, 256], sizes = [16, 128], strides = [1, 1]} : vector<16x384xf32> to vector<16x128xf32>
    %1245 = vector.broadcast %10 : vector<1x128xf32> to vector<16x128xf32>
    %1246 = arith.addf %1244, %1245 : vector<16x128xf32>
    %1247 = arith.mulf %1234, %1246 : vector<16x128xf32>
    %1248 = arith.addf %1243, %1247 : vector<16x128xf32>
    %1249 = math.tanh %1248 : vector<16x128xf32>
    %cst_368 = arith.constant 1.000000e+00 : f32
    %1250 = vector.broadcast %cst_368 : f32 to vector<16x128xf32>
    %1251 = arith.subf %1250, %1242 : vector<16x128xf32>
    %1252 = arith.mulf %1251, %1249 : vector<16x128xf32>
    %1253 = arith.mulf %1242, %1168 : vector<16x128xf32>
    %1254 = arith.addf %1252, %1253 : vector<16x128xf32>
    %c7_i32_369 = arith.constant 7 : i32
    %1255 = arith.cmpi slt, %1185, %c7_i32_369 : i32
    %c7_i32_370 = arith.constant 7 : i32
    %1256 = arith.cmpi slt, %1188, %c7_i32_370 : i32
    %1257 = arith.select %1255, %1223, %1167 : vector<16x128xf32>
    %1258 = arith.select %1256, %1254, %1168 : vector<16x128xf32>
    %cst_371 = arith.constant 0.000000e+00 : f32
    %1259 = vector.broadcast %cst_371 : f32 to vector<16x128xf32>
    %1260 = arith.select %1255, %1257, %1259 : vector<16x128xf32>
    %1261 = arith.truncf %1260 : vector<16x128xf32> to vector<16x128xbf16>
    %1262 = arith.index_cast %c13_i32 : i32 to index
    %c0_372 = arith.constant 0 : index
    %c0_373 = arith.constant 0 : index
    %1263 = vector.load %arg5[%1262, %c0_372, %c0_373] : memref<16x16x128xbf16, #tpu.memory_space<vmem>>, vector<1x16x128xbf16>
    %1264 = vector.shape_cast %1263 : vector<1x16x128xbf16> to vector<16x128xbf16>
    %1265 = vector.shape_cast %1261 : vector<16x128xbf16> to vector<1x16x128xbf16>
    tpu.vector_store %arg5[%1262, %c0_372, %c0_373], %1265 {strides = array<i32>} : memref<16x16x128xbf16, #tpu.memory_space<vmem>>, vector<1x16x128xbf16>,
    %cst_374 = arith.constant 0.000000e+00 : f32
    %1266 = vector.broadcast %cst_374 : f32 to vector<16x128xf32>
    %1267 = arith.select %1256, %1258, %1266 : vector<16x128xf32>
    %1268 = arith.truncf %1267 : vector<16x128xf32> to vector<16x128xbf16>
    %1269 = arith.index_cast %1183 : i32 to index
    %c0_375 = arith.constant 0 : index
    %c0_376 = arith.constant 0 : index
    %1270 = vector.load %arg6[%1269, %c0_375, %c0_376] : memref<16x16x128xbf16, #tpu.memory_space<vmem>>, vector<1x16x128xbf16>
    %1271 = vector.shape_cast %1270 : vector<1x16x128xbf16> to vector<16x128xbf16>
    %1272 = vector.shape_cast %1268 : vector<16x128xbf16> to vector<1x16x128xbf16>
    tpu.vector_store %arg6[%1269, %c0_375, %c0_376], %1272 {strides = array<i32>} : memref<16x16x128xbf16, #tpu.memory_space<vmem>>, vector<1x16x128xbf16>,
    %c14_i32 = arith.constant 14 : i32
    %c15_i32_377 = arith.constant 15 : i32
    %1273 = arith.subi %c15_i32_377, %c14_i32 : i32
    %c16_i32_378 = arith.constant 16 : i32
    %1274 = arith.muli %arg0, %c16_i32_378 : i32
    %1275 = arith.addi %1274, %c14_i32 : i32
    %c0_i32_379 = arith.constant 0 : i32
    %1276 = arith.subi %c0_i32_379, %arg0 : i32
    %c16_i32_380 = arith.constant 16 : i32
    %1277 = arith.muli %1276, %c16_i32_380 : i32
    %1278 = arith.addi %1277, %1273 : i32
    %1279 = arith.truncf %1257 : vector<16x128xf32> to vector<16x128xbf16>
    %cst_381 = arith.constant dense<0.000000e+00> : vector<16x384xf32>
    %1280 = tpu.matmul %1279, %4, %cst_381 {dimension_numbers = #tpu.dot_dimension_numbers<[1], [0], [0], [1], [0, 0, 1, 1], [], []>} : vector<16x128xbf16>, vector<128x384xbf16>, vector<16x384xf32> -> vector<16x384xf32>
    %1281 = arith.truncf %1258 : vector<16x128xf32> to vector<16x128xbf16>
    %cst_382 = arith.constant dense<0.000000e+00> : vector<16x384xf32>
    %1282 = tpu.matmul %1281, %6, %cst_382 {dimension_numbers = #tpu.dot_dimension_numbers<[1], [0], [0], [1], [0, 0, 1, 1], [], []>} : vector<16x128xbf16>, vector<128x384xbf16>, vector<16x384xf32> -> vector<16x384xf32>
    %c0_383 = arith.constant 0 : index
    %1283 = arith.index_cast %c14_i32 : i32 to index
    %c0_384 = arith.constant 0 : index
    %c0_385 = arith.constant 0 : index
    %1284 = vector.load %arg1[%c0_383, %1283, %c0_384, %c0_385] : memref<1x16x16x384xf32, #tpu.memory_space<vmem>>, vector<1x1x16x384xf32>
    %1285 = vector.shape_cast %1284 : vector<1x1x16x384xf32> to vector<16x384xf32>
    %1286 = vector.extract_strided_slice %1285 {offsets = [0, 0], sizes = [16, 128], strides = [1, 1]} : vector<16x384xf32> to vector<16x128xf32>
    %1287 = vector.extract_strided_slice %1280 {offsets = [0, 0], sizes = [16, 128], strides = [1, 1]} : vector<16x384xf32> to vector<16x128xf32>
    %1288 = arith.addf %1286, %1287 : vector<16x128xf32>
    %1289 = arith.negf %1288 : vector<16x128xf32>
    %1290 = math.exp %1289 : vector<16x128xf32>
    %cst_386 = arith.constant 1.000000e+00 : f32
    %1291 = vector.broadcast %cst_386 : f32 to vector<16x128xf32>
    %1292 = arith.addf %1291, %1290 : vector<16x128xf32>
    %1293 = arith.divf %1291, %1292 : vector<16x128xf32>
    %1294 = vector.extract_strided_slice %1285 {offsets = [0, 128], sizes = [16, 128], strides = [1, 1]} : vector<16x384xf32> to vector<16x128xf32>
    %1295 = vector.extract_strided_slice %1280 {offsets = [0, 128], sizes = [16, 128], strides = [1, 1]} : vector<16x384xf32> to vector<16x128xf32>
    %1296 = arith.addf %1294, %1295 : vector<16x128xf32>
    %1297 = arith.negf %1296 : vector<16x128xf32>
    %1298 = math.exp %1297 : vector<16x128xf32>
    %cst_387 = arith.constant 1.000000e+00 : f32
    %1299 = vector.broadcast %cst_387 : f32 to vector<16x128xf32>
    %1300 = arith.addf %1299, %1298 : vector<16x128xf32>
    %1301 = arith.divf %1299, %1300 : vector<16x128xf32>
    %1302 = vector.extract_strided_slice %1285 {offsets = [0, 256], sizes = [16, 128], strides = [1, 1]} : vector<16x384xf32> to vector<16x128xf32>
    %1303 = vector.extract_strided_slice %1280 {offsets = [0, 256], sizes = [16, 128], strides = [1, 1]} : vector<16x384xf32> to vector<16x128xf32>
    %1304 = vector.broadcast %8 : vector<1x128xf32> to vector<16x128xf32>
    %1305 = arith.addf %1303, %1304 : vector<16x128xf32>
    %1306 = arith.mulf %1293, %1305 : vector<16x128xf32>
    %1307 = arith.addf %1302, %1306 : vector<16x128xf32>
    %1308 = math.tanh %1307 : vector<16x128xf32>
    %cst_388 = arith.constant 1.000000e+00 : f32
    %1309 = vector.broadcast %cst_388 : f32 to vector<16x128xf32>
    %1310 = arith.subf %1309, %1301 : vector<16x128xf32>
    %1311 = arith.mulf %1310, %1308 : vector<16x128xf32>
    %1312 = arith.mulf %1301, %1257 : vector<16x128xf32>
    %1313 = arith.addf %1311, %1312 : vector<16x128xf32>
    %c0_389 = arith.constant 0 : index
    %1314 = arith.index_cast %1273 : i32 to index
    %c0_390 = arith.constant 0 : index
    %c0_391 = arith.constant 0 : index
    %1315 = vector.load %arg2[%c0_389, %1314, %c0_390, %c0_391] : memref<1x16x16x384xf32, #tpu.memory_space<vmem>>, vector<1x1x16x384xf32>
    %1316 = vector.shape_cast %1315 : vector<1x1x16x384xf32> to vector<16x384xf32>
    %1317 = vector.extract_strided_slice %1316 {offsets = [0, 0], sizes = [16, 128], strides = [1, 1]} : vector<16x384xf32> to vector<16x128xf32>
    %1318 = vector.extract_strided_slice %1282 {offsets = [0, 0], sizes = [16, 128], strides = [1, 1]} : vector<16x384xf32> to vector<16x128xf32>
    %1319 = arith.addf %1317, %1318 : vector<16x128xf32>
    %1320 = arith.negf %1319 : vector<16x128xf32>
    %1321 = math.exp %1320 : vector<16x128xf32>
    %cst_392 = arith.constant 1.000000e+00 : f32
    %1322 = vector.broadcast %cst_392 : f32 to vector<16x128xf32>
    %1323 = arith.addf %1322, %1321 : vector<16x128xf32>
    %1324 = arith.divf %1322, %1323 : vector<16x128xf32>
    %1325 = vector.extract_strided_slice %1316 {offsets = [0, 128], sizes = [16, 128], strides = [1, 1]} : vector<16x384xf32> to vector<16x128xf32>
    %1326 = vector.extract_strided_slice %1282 {offsets = [0, 128], sizes = [16, 128], strides = [1, 1]} : vector<16x384xf32> to vector<16x128xf32>
    %1327 = arith.addf %1325, %1326 : vector<16x128xf32>
    %1328 = arith.negf %1327 : vector<16x128xf32>
    %1329 = math.exp %1328 : vector<16x128xf32>
    %cst_393 = arith.constant 1.000000e+00 : f32
    %1330 = vector.broadcast %cst_393 : f32 to vector<16x128xf32>
    %1331 = arith.addf %1330, %1329 : vector<16x128xf32>
    %1332 = arith.divf %1330, %1331 : vector<16x128xf32>
    %1333 = vector.extract_strided_slice %1316 {offsets = [0, 256], sizes = [16, 128], strides = [1, 1]} : vector<16x384xf32> to vector<16x128xf32>
    %1334 = vector.extract_strided_slice %1282 {offsets = [0, 256], sizes = [16, 128], strides = [1, 1]} : vector<16x384xf32> to vector<16x128xf32>
    %1335 = vector.broadcast %10 : vector<1x128xf32> to vector<16x128xf32>
    %1336 = arith.addf %1334, %1335 : vector<16x128xf32>
    %1337 = arith.mulf %1324, %1336 : vector<16x128xf32>
    %1338 = arith.addf %1333, %1337 : vector<16x128xf32>
    %1339 = math.tanh %1338 : vector<16x128xf32>
    %cst_394 = arith.constant 1.000000e+00 : f32
    %1340 = vector.broadcast %cst_394 : f32 to vector<16x128xf32>
    %1341 = arith.subf %1340, %1332 : vector<16x128xf32>
    %1342 = arith.mulf %1341, %1339 : vector<16x128xf32>
    %1343 = arith.mulf %1332, %1258 : vector<16x128xf32>
    %1344 = arith.addf %1342, %1343 : vector<16x128xf32>
    %c7_i32_395 = arith.constant 7 : i32
    %1345 = arith.cmpi slt, %1275, %c7_i32_395 : i32
    %c7_i32_396 = arith.constant 7 : i32
    %1346 = arith.cmpi slt, %1278, %c7_i32_396 : i32
    %1347 = arith.select %1345, %1313, %1257 : vector<16x128xf32>
    %1348 = arith.select %1346, %1344, %1258 : vector<16x128xf32>
    %cst_397 = arith.constant 0.000000e+00 : f32
    %1349 = vector.broadcast %cst_397 : f32 to vector<16x128xf32>
    %1350 = arith.select %1345, %1347, %1349 : vector<16x128xf32>
    %1351 = arith.truncf %1350 : vector<16x128xf32> to vector<16x128xbf16>
    %1352 = arith.index_cast %c14_i32 : i32 to index
    %c0_398 = arith.constant 0 : index
    %c0_399 = arith.constant 0 : index
    %1353 = vector.load %arg5[%1352, %c0_398, %c0_399] : memref<16x16x128xbf16, #tpu.memory_space<vmem>>, vector<1x16x128xbf16>
    %1354 = vector.shape_cast %1353 : vector<1x16x128xbf16> to vector<16x128xbf16>
    %1355 = vector.shape_cast %1351 : vector<16x128xbf16> to vector<1x16x128xbf16>
    tpu.vector_store %arg5[%1352, %c0_398, %c0_399], %1355 {strides = array<i32>} : memref<16x16x128xbf16, #tpu.memory_space<vmem>>, vector<1x16x128xbf16>,
    %cst_400 = arith.constant 0.000000e+00 : f32
    %1356 = vector.broadcast %cst_400 : f32 to vector<16x128xf32>
    %1357 = arith.select %1346, %1348, %1356 : vector<16x128xf32>
    %1358 = arith.truncf %1357 : vector<16x128xf32> to vector<16x128xbf16>
    %1359 = arith.index_cast %1273 : i32 to index
    %c0_401 = arith.constant 0 : index
    %c0_402 = arith.constant 0 : index
    %1360 = vector.load %arg6[%1359, %c0_401, %c0_402] : memref<16x16x128xbf16, #tpu.memory_space<vmem>>, vector<1x16x128xbf16>
    %1361 = vector.shape_cast %1360 : vector<1x16x128xbf16> to vector<16x128xbf16>
    %1362 = vector.shape_cast %1358 : vector<16x128xbf16> to vector<1x16x128xbf16>
    tpu.vector_store %arg6[%1359, %c0_401, %c0_402], %1362 {strides = array<i32>} : memref<16x16x128xbf16, #tpu.memory_space<vmem>>, vector<1x16x128xbf16>,
    %c15_i32_403 = arith.constant 15 : i32
    %c15_i32_404 = arith.constant 15 : i32
    %1363 = arith.subi %c15_i32_404, %c15_i32_403 : i32
    %c16_i32_405 = arith.constant 16 : i32
    %1364 = arith.muli %arg0, %c16_i32_405 : i32
    %1365 = arith.addi %1364, %c15_i32_403 : i32
    %c0_i32_406 = arith.constant 0 : i32
    %1366 = arith.subi %c0_i32_406, %arg0 : i32
    %c16_i32_407 = arith.constant 16 : i32
    %1367 = arith.muli %1366, %c16_i32_407 : i32
    %1368 = arith.addi %1367, %1363 : i32
    %1369 = arith.truncf %1347 : vector<16x128xf32> to vector<16x128xbf16>
    %cst_408 = arith.constant dense<0.000000e+00> : vector<16x384xf32>
    %1370 = tpu.matmul %1369, %4, %cst_408 {dimension_numbers = #tpu.dot_dimension_numbers<[1], [0], [0], [1], [0, 0, 1, 1], [], []>} : vector<16x128xbf16>, vector<128x384xbf16>, vector<16x384xf32> -> vector<16x384xf32>
    %1371 = arith.truncf %1348 : vector<16x128xf32> to vector<16x128xbf16>
    %cst_409 = arith.constant dense<0.000000e+00> : vector<16x384xf32>
    %1372 = tpu.matmul %1371, %6, %cst_409 {dimension_numbers = #tpu.dot_dimension_numbers<[1], [0], [0], [1], [0, 0, 1, 1], [], []>} : vector<16x128xbf16>, vector<128x384xbf16>, vector<16x384xf32> -> vector<16x384xf32>
    %c0_410 = arith.constant 0 : index
    %1373 = arith.index_cast %c15_i32_403 : i32 to index
    %c0_411 = arith.constant 0 : index
    %c0_412 = arith.constant 0 : index
    %1374 = vector.load %arg1[%c0_410, %1373, %c0_411, %c0_412] : memref<1x16x16x384xf32, #tpu.memory_space<vmem>>, vector<1x1x16x384xf32>
    %1375 = vector.shape_cast %1374 : vector<1x1x16x384xf32> to vector<16x384xf32>
    %1376 = vector.extract_strided_slice %1375 {offsets = [0, 0], sizes = [16, 128], strides = [1, 1]} : vector<16x384xf32> to vector<16x128xf32>
    %1377 = vector.extract_strided_slice %1370 {offsets = [0, 0], sizes = [16, 128], strides = [1, 1]} : vector<16x384xf32> to vector<16x128xf32>
    %1378 = arith.addf %1376, %1377 : vector<16x128xf32>
    %1379 = arith.negf %1378 : vector<16x128xf32>
    %1380 = math.exp %1379 : vector<16x128xf32>
    %cst_413 = arith.constant 1.000000e+00 : f32
    %1381 = vector.broadcast %cst_413 : f32 to vector<16x128xf32>
    %1382 = arith.addf %1381, %1380 : vector<16x128xf32>
    %1383 = arith.divf %1381, %1382 : vector<16x128xf32>
    %1384 = vector.extract_strided_slice %1375 {offsets = [0, 128], sizes = [16, 128], strides = [1, 1]} : vector<16x384xf32> to vector<16x128xf32>
    %1385 = vector.extract_strided_slice %1370 {offsets = [0, 128], sizes = [16, 128], strides = [1, 1]} : vector<16x384xf32> to vector<16x128xf32>
    %1386 = arith.addf %1384, %1385 : vector<16x128xf32>
    %1387 = arith.negf %1386 : vector<16x128xf32>
    %1388 = math.exp %1387 : vector<16x128xf32>
    %cst_414 = arith.constant 1.000000e+00 : f32
    %1389 = vector.broadcast %cst_414 : f32 to vector<16x128xf32>
    %1390 = arith.addf %1389, %1388 : vector<16x128xf32>
    %1391 = arith.divf %1389, %1390 : vector<16x128xf32>
    %1392 = vector.extract_strided_slice %1375 {offsets = [0, 256], sizes = [16, 128], strides = [1, 1]} : vector<16x384xf32> to vector<16x128xf32>
    %1393 = vector.extract_strided_slice %1370 {offsets = [0, 256], sizes = [16, 128], strides = [1, 1]} : vector<16x384xf32> to vector<16x128xf32>
    %1394 = vector.broadcast %8 : vector<1x128xf32> to vector<16x128xf32>
    %1395 = arith.addf %1393, %1394 : vector<16x128xf32>
    %1396 = arith.mulf %1383, %1395 : vector<16x128xf32>
    %1397 = arith.addf %1392, %1396 : vector<16x128xf32>
    %1398 = math.tanh %1397 : vector<16x128xf32>
    %cst_415 = arith.constant 1.000000e+00 : f32
    %1399 = vector.broadcast %cst_415 : f32 to vector<16x128xf32>
    %1400 = arith.subf %1399, %1391 : vector<16x128xf32>
    %1401 = arith.mulf %1400, %1398 : vector<16x128xf32>
    %1402 = arith.mulf %1391, %1347 : vector<16x128xf32>
    %1403 = arith.addf %1401, %1402 : vector<16x128xf32>
    %c0_416 = arith.constant 0 : index
    %1404 = arith.index_cast %1363 : i32 to index
    %c0_417 = arith.constant 0 : index
    %c0_418 = arith.constant 0 : index
    %1405 = vector.load %arg2[%c0_416, %1404, %c0_417, %c0_418] : memref<1x16x16x384xf32, #tpu.memory_space<vmem>>, vector<1x1x16x384xf32>
    %1406 = vector.shape_cast %1405 : vector<1x1x16x384xf32> to vector<16x384xf32>
    %1407 = vector.extract_strided_slice %1406 {offsets = [0, 0], sizes = [16, 128], strides = [1, 1]} : vector<16x384xf32> to vector<16x128xf32>
    %1408 = vector.extract_strided_slice %1372 {offsets = [0, 0], sizes = [16, 128], strides = [1, 1]} : vector<16x384xf32> to vector<16x128xf32>
    %1409 = arith.addf %1407, %1408 : vector<16x128xf32>
    %1410 = arith.negf %1409 : vector<16x128xf32>
    %1411 = math.exp %1410 : vector<16x128xf32>
    %cst_419 = arith.constant 1.000000e+00 : f32
    %1412 = vector.broadcast %cst_419 : f32 to vector<16x128xf32>
    %1413 = arith.addf %1412, %1411 : vector<16x128xf32>
    %1414 = arith.divf %1412, %1413 : vector<16x128xf32>
    %1415 = vector.extract_strided_slice %1406 {offsets = [0, 128], sizes = [16, 128], strides = [1, 1]} : vector<16x384xf32> to vector<16x128xf32>
    %1416 = vector.extract_strided_slice %1372 {offsets = [0, 128], sizes = [16, 128], strides = [1, 1]} : vector<16x384xf32> to vector<16x128xf32>
    %1417 = arith.addf %1415, %1416 : vector<16x128xf32>
    %1418 = arith.negf %1417 : vector<16x128xf32>
    %1419 = math.exp %1418 : vector<16x128xf32>
    %cst_420 = arith.constant 1.000000e+00 : f32
    %1420 = vector.broadcast %cst_420 : f32 to vector<16x128xf32>
    %1421 = arith.addf %1420, %1419 : vector<16x128xf32>
    %1422 = arith.divf %1420, %1421 : vector<16x128xf32>
    %1423 = vector.extract_strided_slice %1406 {offsets = [0, 256], sizes = [16, 128], strides = [1, 1]} : vector<16x384xf32> to vector<16x128xf32>
    %1424 = vector.extract_strided_slice %1372 {offsets = [0, 256], sizes = [16, 128], strides = [1, 1]} : vector<16x384xf32> to vector<16x128xf32>
    %1425 = vector.broadcast %10 : vector<1x128xf32> to vector<16x128xf32>
    %1426 = arith.addf %1424, %1425 : vector<16x128xf32>
    %1427 = arith.mulf %1414, %1426 : vector<16x128xf32>
    %1428 = arith.addf %1423, %1427 : vector<16x128xf32>
    %1429 = math.tanh %1428 : vector<16x128xf32>
    %cst_421 = arith.constant 1.000000e+00 : f32
    %1430 = vector.broadcast %cst_421 : f32 to vector<16x128xf32>
    %1431 = arith.subf %1430, %1422 : vector<16x128xf32>
    %1432 = arith.mulf %1431, %1429 : vector<16x128xf32>
    %1433 = arith.mulf %1422, %1348 : vector<16x128xf32>
    %1434 = arith.addf %1432, %1433 : vector<16x128xf32>
    %c7_i32_422 = arith.constant 7 : i32
    %1435 = arith.cmpi slt, %1365, %c7_i32_422 : i32
    %c7_i32_423 = arith.constant 7 : i32
    %1436 = arith.cmpi slt, %1368, %c7_i32_423 : i32
    %1437 = arith.select %1435, %1403, %1347 : vector<16x128xf32>
    %1438 = arith.select %1436, %1434, %1348 : vector<16x128xf32>
    %cst_424 = arith.constant 0.000000e+00 : f32
    %1439 = vector.broadcast %cst_424 : f32 to vector<16x128xf32>
    %1440 = arith.select %1435, %1437, %1439 : vector<16x128xf32>
    %1441 = arith.truncf %1440 : vector<16x128xf32> to vector<16x128xbf16>
    %1442 = arith.index_cast %c15_i32_403 : i32 to index
    %c0_425 = arith.constant 0 : index
    %c0_426 = arith.constant 0 : index
    %1443 = vector.load %arg5[%1442, %c0_425, %c0_426] : memref<16x16x128xbf16, #tpu.memory_space<vmem>>, vector<1x16x128xbf16>
    %1444 = vector.shape_cast %1443 : vector<1x16x128xbf16> to vector<16x128xbf16>
    %1445 = vector.shape_cast %1441 : vector<16x128xbf16> to vector<1x16x128xbf16>
    tpu.vector_store %arg5[%1442, %c0_425, %c0_426], %1445 {strides = array<i32>} : memref<16x16x128xbf16, #tpu.memory_space<vmem>>, vector<1x16x128xbf16>,
    %cst_427 = arith.constant 0.000000e+00 : f32
    %1446 = vector.broadcast %cst_427 : f32 to vector<16x128xf32>
    %1447 = arith.select %1436, %1438, %1446 : vector<16x128xf32>
    %1448 = arith.truncf %1447 : vector<16x128xf32> to vector<16x128xbf16>
    %1449 = arith.index_cast %1363 : i32 to index
    %c0_428 = arith.constant 0 : index
    %c0_429 = arith.constant 0 : index
    %1450 = vector.load %arg6[%1449, %c0_428, %c0_429] : memref<16x16x128xbf16, #tpu.memory_space<vmem>>, vector<1x16x128xbf16>
    %1451 = vector.shape_cast %1450 : vector<1x16x128xbf16> to vector<16x128xbf16>
    %1452 = vector.shape_cast %1448 : vector<16x128xbf16> to vector<1x16x128xbf16>
    tpu.vector_store %arg6[%1449, %c0_428, %c0_429], %1452 {strides = array<i32>} : memref<16x16x128xbf16, #tpu.memory_space<vmem>>, vector<1x16x128xbf16>,
    %c16_i32_430 = arith.constant 16 : i32
    %c0_431 = arith.constant 0 : index
    %c0_432 = arith.constant 0 : index
    %1453 = vector.load %arg7[%c0_431, %c0_432] : memref<16x128xf32, #tpu.memory_space<vmem>>, vector<16x128xf32>
    tpu.vector_store %arg7[%c0_431, %c0_432], %1437 {strides = array<i32>} : memref<16x128xf32, #tpu.memory_space<vmem>>, vector<16x128xf32>,
    %c0_433 = arith.constant 0 : index
    %c0_434 = arith.constant 0 : index
    %1454 = vector.load %arg8[%c0_433, %c0_434] : memref<16x128xf32, #tpu.memory_space<vmem>>, vector<16x128xf32>
    tpu.vector_store %arg8[%c0_433, %c0_434], %1438 {strides = array<i32>} : memref<16x128xf32, #tpu.memory_space<vmem>>, vector<16x128xf32>,
    return
  }
  func.func @transform_0(%arg0: i32) -> (i32, i32, i32, i32) {
    %c0_i32 = arith.constant 0 : i32
    %c0_i32_0 = arith.constant 0 : i32
    %c0_i32_1 = arith.constant 0 : i32
    %c0_i32_2 = arith.constant 0 : i32
    return %c0_i32, %arg0, %c0_i32_0, %c0_i32_1 : i32, i32, i32, i32
  }
  func.func @transform_1(%arg0: i32) -> (i32, i32, i32, i32) {
    %c0_i32 = arith.constant 0 : i32
    %0 = arith.subi %c0_i32, %arg0 : i32
    %c1_i32 = arith.constant 1 : i32
    %c0_i32_0 = arith.constant 0 : i32
    %c0_i32_1 = arith.constant 0 : i32
    %c0_i32_2 = arith.constant 0 : i32
    return %c1_i32, %0, %c0_i32_0, %c0_i32_1 : i32, i32, i32, i32
  }
  func.func @transform_2(%arg0: i32) -> (i32, i32, i32) {
    %c0_i32 = arith.constant 0 : i32
    %c0_i32_0 = arith.constant 0 : i32
    %c0_i32_1 = arith.constant 0 : i32
    %c0_i32_2 = arith.constant 0 : i32
    return %c0_i32, %c0_i32_0, %c0_i32_1 : i32, i32, i32
  }
  func.func @transform_3(%arg0: i32) -> (i32, i32, i32) {
    %c0_i32 = arith.constant 0 : i32
    %c0_i32_0 = arith.constant 0 : i32
    %c0_i32_1 = arith.constant 0 : i32
    %c0_i32_2 = arith.constant 0 : i32
    return %c0_i32, %c0_i32_0, %c0_i32_1 : i32, i32, i32
  }
  func.func @transform_4(%arg0: i32) -> (i32, i32, i32) {
    %c0_i32 = arith.constant 0 : i32
    %c0_i32_0 = arith.constant 0 : i32
    %c0_i32_1 = arith.constant 0 : i32
    return %arg0, %c0_i32, %c0_i32_0 : i32, i32, i32
  }
  func.func @transform_5(%arg0: i32) -> (i32, i32, i32) {
    %c0_i32 = arith.constant 0 : i32
    %0 = arith.subi %c0_i32, %arg0 : i32
    %c0_i32_0 = arith.constant 0 : i32
    %c0_i32_1 = arith.constant 0 : i32
    %c0_i32_2 = arith.constant 0 : i32
    return %0, %c0_i32_0, %c0_i32_1 : i32, i32, i32
  }
}

module attributes {stable_mosaic.version = 11 : i64} {
  func.func @_proj_logsoftmax_kernel(%arg0: i32, %arg1: memref<128x128xbf16, #tpu.memory_space<vmem>>, %arg2: memref<128x128xbf16, #tpu.memory_space<vmem>>, %arg3: memref<128x128xbf16, #tpu.memory_space<vmem>>, %arg4: memref<128x128xbf16, #tpu.memory_space<vmem>>, %arg5: memref<1x128xf32, #tpu.memory_space<vmem>>, %arg6: memref<128x128xf32, #tpu.memory_space<vmem>>) attributes {dimension_semantics = [#tpu.dimension_semantics<parallel>], iteration_bounds = array<i64: 2>, scalar_prefetch = 0 : i64, scratch_operands = 0 : i64, tpu.core_type = #tpu.core_type<tc>, window_params = [{transform_indices = @transform_0, window_bounds = array<i64: 128, 128>}, {transform_indices = @transform_1, window_bounds = array<i64: 128, 128>}, {pipeline_mode = #tpu.pipeline_mode<synchronous>, transform_indices = @transform_2, window_bounds = array<i64: 128, 128>}, {pipeline_mode = #tpu.pipeline_mode<synchronous>, transform_indices = @transform_3, window_bounds = array<i64: 128, 128>}, {pipeline_mode = #tpu.pipeline_mode<synchronous>, transform_indices = @transform_4, window_bounds = array<i64: 1, 128>}, {transform_indices = @transform_5, window_bounds = array<i64: 128, 128>}]} {
    %c0 = arith.constant 0 : index
    %c0_0 = arith.constant 0 : index
    %0 = vector.load %arg1[%c0, %c0_0] : memref<128x128xbf16, #tpu.memory_space<vmem>>, vector<128x128xbf16>
    %c0_1 = arith.constant 0 : index
    %c0_2 = arith.constant 0 : index
    %1 = vector.load %arg3[%c0_1, %c0_2] : memref<128x128xbf16, #tpu.memory_space<vmem>>, vector<128x128xbf16>
    %cst = arith.constant dense<0.000000e+00> : vector<128x128xf32>
    %2 = tpu.matmul %0, %1, %cst {dimension_numbers = #tpu.dot_dimension_numbers<[1], [0], [0], [1], [0, 0, 1, 1], [], []>} : vector<128x128xbf16>, vector<128x128xbf16>, vector<128x128xf32> -> vector<128x128xf32>
    %c0_3 = arith.constant 0 : index
    %c0_4 = arith.constant 0 : index
    %3 = vector.load %arg2[%c0_3, %c0_4] : memref<128x128xbf16, #tpu.memory_space<vmem>>, vector<128x128xbf16>
    %c0_5 = arith.constant 0 : index
    %c0_6 = arith.constant 0 : index
    %4 = vector.load %arg4[%c0_5, %c0_6] : memref<128x128xbf16, #tpu.memory_space<vmem>>, vector<128x128xbf16>
    %cst_7 = arith.constant dense<0.000000e+00> : vector<128x128xf32>
    %5 = tpu.matmul %3, %4, %cst_7 {dimension_numbers = #tpu.dot_dimension_numbers<[1], [0], [0], [1], [0, 0, 1, 1], [], []>} : vector<128x128xbf16>, vector<128x128xbf16>, vector<128x128xf32> -> vector<128x128xf32>
    %6 = arith.addf %2, %5 : vector<128x128xf32>
    %c0_8 = arith.constant 0 : index
    %c0_9 = arith.constant 0 : index
    %7 = vector.load %arg5[%c0_8, %c0_9] : memref<1x128xf32, #tpu.memory_space<vmem>>, vector<1x128xf32>
    %8 = vector.broadcast %7 : vector<1x128xf32> to vector<128x128xf32>
    %9 = arith.addf %6, %8 : vector<128x128xf32>
    %10 = tpu.iota {dimensions = array<i32: 1>} : vector<128x128xi32>
    %c16_i32 = arith.constant 16 : i32
    %11 = vector.broadcast %c16_i32 : i32 to vector<128x128xi32>
    %12 = arith.cmpi slt, %10, %11 : vector<128x128xi32>
    %cst_10 = arith.constant -1.000000e+30 : f32
    %13 = vector.broadcast %cst_10 : f32 to vector<128x128xf32>
    %14 = arith.select %12, %9, %13 : vector<128x128xi1>, vector<128x128xf32>
    %cst_11 = arith.constant dense<0xFF800000> : vector<128xf32>
    %15 = vector.multi_reduction <maximumf>, %14, %cst_11 [1] : vector<128x128xf32> to vector<128xf32>
    %16 = vector.shape_cast %15 : vector<128xf32> to vector<128x1xf32>
    %17 = vector.broadcast %16 : vector<128x1xf32> to vector<128x128xf32>
    %18 = arith.subf %14, %17 : vector<128x128xf32>
    %19 = math.exp %18 : vector<128x128xf32>
    %cst_12 = arith.constant dense<0.000000e+00> : vector<128xf32>
    %20 = vector.multi_reduction <add>, %19, %cst_12 [1] : vector<128x128xf32> to vector<128xf32>
    %21 = vector.shape_cast %20 : vector<128xf32> to vector<128x1xf32>
    %22 = math.log %21 : vector<128x1xf32>
    %23 = vector.broadcast %22 : vector<128x1xf32> to vector<128x128xf32>
    %24 = arith.subf %18, %23 : vector<128x128xf32>
    %c0_13 = arith.constant 0 : index
    %c0_14 = arith.constant 0 : index
    %25 = vector.load %arg6[%c0_13, %c0_14] : memref<128x128xf32, #tpu.memory_space<vmem>>, vector<128x128xf32>
    tpu.vector_store %arg6[%c0_13, %c0_14], %24 {strides = array<i32>} : memref<128x128xf32, #tpu.memory_space<vmem>>, vector<128x128xf32>,
    return
  }
  func.func @transform_0(%arg0: i32) -> (i32, i32) {
    %c0_i32 = arith.constant 0 : i32
    %c0_i32_0 = arith.constant 0 : i32
    return %arg0, %c0_i32 : i32, i32
  }
  func.func @transform_1(%arg0: i32) -> (i32, i32) {
    %c0_i32 = arith.constant 0 : i32
    %c0_i32_0 = arith.constant 0 : i32
    return %arg0, %c0_i32 : i32, i32
  }
  func.func @transform_2(%arg0: i32) -> (i32, i32) {
    %c0_i32 = arith.constant 0 : i32
    %c0_i32_0 = arith.constant 0 : i32
    %c0_i32_1 = arith.constant 0 : i32
    return %c0_i32, %c0_i32_0 : i32, i32
  }
  func.func @transform_3(%arg0: i32) -> (i32, i32) {
    %c0_i32 = arith.constant 0 : i32
    %c0_i32_0 = arith.constant 0 : i32
    %c0_i32_1 = arith.constant 0 : i32
    return %c0_i32, %c0_i32_0 : i32, i32
  }
  func.func @transform_4(%arg0: i32) -> (i32, i32) {
    %c0_i32 = arith.constant 0 : i32
    %c0_i32_0 = arith.constant 0 : i32
    %c0_i32_1 = arith.constant 0 : i32
    return %c0_i32, %c0_i32_0 : i32, i32
  }
  func.func @transform_5(%arg0: i32) -> (i32, i32) {
    %c0_i32 = arith.constant 0 : i32
    %c0_i32_0 = arith.constant 0 : i32
    return %arg0, %c0_i32 : i32, i32
  }
}

</mosaic_0001>

<bundles_post_ra>
// kernel: decoder_forward.6
= control target key start
LH: loop header
LB: loop body
LE: loop exit
PB: predicated region body
PF: predicated region fallthrough
CT: control target
= control target key end

     0   :  { %vm131_vm0 = vcmask 1043456   ;;  %vm82_vm1 = vcmask 195584   ;;  %s687_s1 = inlined_call_operand.vmem [shape: bf16[24,128], index: 1, kind: input, shape index: {}]   ;;  %s688_s0 = inlined_call_operand.vmem [shape: f32[256,24], index: 0, kind: input, shape index: {}]   ;;  %s689_s2 = inlined_call_operand.vmem [shape: f32[1,128], index: 2, kind: input, shape index: {}]   ;;  %s690_s3 = inlined_call_operand.vmem [shape: f32[256,128], index: 3, kind: output, shape index: {}]  }
   0x1   :  { %v411_v0 = vld [vmem:[%s687_s1] sm:$0xff]   ;;  %v412_v1 = vld [vmem:[%s687_s1 + $0x8] ss:$0 sps:$4 sm:$0xff]   ;;  %v17_v8 = vld [vmem:[%s688_s0 + $0x10] sm:$0xff] }
   0x2   :  { %v15_v2 = vld [vmem:[%s688_s0] sm:$0xff]  ;;  %369 = vmatprep.subr.bf16.mxu0 %v411_v0  ;;  %405 = vmatprep.subr.bf16.mxu1 %v411_v0  ;;  %v16_v3 = vld [vmem:[%s688_s0 + $0x8] sm:$0xff]  ;;  %v18_v9 = vld [vmem:[%s688_s0 + $0x18] sm:$0xff]  ;;  %v133_v11 = vsel %vm131_vm0, %v412_v1, 0 }
   0x3   :  { %v31_v4 = vld [vmem:[%s688_s0 + $0x80] sm:$0xff]  ;;  %v32_v5 = vld [vmem:[%s688_s0 + $0x88] sm:$0xff]  ;;  %370 = vmatpush3.bf16.msra.mxu0 %v411_v0  ;;  %407 = vmatpush3.bf16.msra.mxu1 %v411_v0  ;;  %v47_v6 = vpack.c.bf16 %v16_v3, %v15_v2  ;;  %v33_v10 = vld [vmem:[%s688_s0 + $0x90] sm:$0xff]  ;;  %v48_v17 = vpack.c.bf16 %v18_v9, %v17_v8 }
   0x4   :  { %v55_v7 = vpack.c.bf16 %v32_v5, %v31_v4  ;;  %409 = vmatprep.subr.msk.bf16.mxu0 %vm131_vm0, %v412_v1  ;;  %410 = vmatprep.subr.msk.bf16.mxu1 %vm131_vm0, %v412_v1  ;;  %v34_v12 = vld [vmem:[%s688_s0 + $0x98] sm:$0xff]  ;;  %v19_v13 = vld [vmem:[%s688_s0 + $0x20] sm:$0xff]  ;;  %v20_v14 = vld [vmem:[%s688_s0 + $0x28] sm:$0xff] }
   0x5   :  { %373 = vmatprep.mubr.msk.bf16.mxu0 %vm82_vm1, %v47_v6  ;;  %v35_v15 = vld [vmem:[%s688_s0 + $0xa0] sm:$0xff]  ;;  %v36_v16 = vld [vmem:[%s688_s0 + $0xa8] sm:$0xff]  ;;  %v56_v18 = vpack.c.bf16 %v34_v12, %v33_v10  ;;  %v49_v19 = vpack.c.bf16 %v20_v14, %v19_v13  ;;  %v21_v21 = vld [vmem:[%s688_s0 + $0x30] sm:$0xff] }
   0x6   :  { %389 = vmatprep.mubr.msk.bf16.mxu1 %vm82_vm1, %v55_v7  ;;  %v57_v20 = vpack.c.bf16 %v36_v16, %v35_v15  ;;  %v22_v22 = vld [vmem:[%s688_s0 + $0x38] sm:$0xff]  ;;  %v37_v23 = vld [vmem:[%s688_s0 + $0xb0] sm:$0xff]  ;;  %v23_v25 = vld [vmem:[%s688_s0 + $0x40] sm:$0xff] }
   0x7   :  { %372 = vmatpush3.bf16.msra.mxu0 %v133_v11  ;;  %408 = vmatpush3.bf16.msra.mxu1 %v133_v11  ;;  %v38_v24 = vld [vmem:[%s688_s0 + $0xb8] sm:$0xff]  ;;  %v24_v26 = vld [vmem:[%s688_s0 + $0x48] sm:$0xff]  ;;  %v39_v27 = vld [vmem:[%s688_s0 + $0xc0] sm:$0xff]  ;;  %v50_v29 = vpack.c.bf16 %v22_v22, %v21_v21 }
   0x8   :  { %v40_v28 = vld [vmem:[%s688_s0 + $0xc8] sm:$0xff]  ;;  %v58_v30 = vpack.c.bf16 %v38_v24, %v37_v23  ;;  %v51_v31 = vpack.c.bf16 %v24_v26, %v23_v25  ;;  %v25_v33 = vld [vmem:[%s688_s0 + $0x50] sm:$0xff]  ;;  %v26_v34 = vld [vmem:[%s688_s0 + $0x58] sm:$0xff] }
   0x9   :  { %v59_v32 = vpack.c.bf16 %v40_v28, %v39_v27  ;;  %v41_v35 = vld [vmem:[%s688_s0 + $0xd0] sm:$0xff]  ;;  %v42_v36 = vld [vmem:[%s688_s0 + $0xd8] sm:$0xff]  ;;  %v27_v37 = vld [vmem:[%s688_s0 + $0x60] sm:$0xff]  ;;  %v52_v41 = vpack.c.bf16 %v26_v34, %v25_v33 }
   0xa   :  { %374 = vmatmul.mubr.msk.bf16.vlgmr.msra.gmra.mrb[0].mxu0 %vm82_vm1, %v48_v17  ;;  %390 = vmatmul.mubr.msk.bf16.vlgmr.msra.gmra.mrb[0].mxu1 %vm82_vm1, %v56_v18  ;;  %v28_v38 = vld [vmem:[%s688_s0 + $0x68] sm:$0xff]  ;;  %v43_v39 = vld [vmem:[%s688_s0 + $0xe0] sm:$0xff]  ;;  %v60_v42 = vpack.c.bf16 %v42_v36, %v41_v35  ;;  %v29_v45 = vld [vmem:[%s688_s0 + $0x70] sm:$0xff] }
   0xb   :  { %377 = vmatprep.mubr.msk.bf16.mxu0 %vm82_vm1, %v49_v19  ;;  %393 = vmatprep.mubr.msk.bf16.mxu1 %vm82_vm1, %v57_v20  ;;  %v44_v40 = vld [vmem:[%s688_s0 + $0xe8] sm:$0xff]  ;;  %v53_v43 = vpack.c.bf16 %v28_v38, %v27_v37  ;;  %v30_v46 = vld [vmem:[%s688_s0 + $0x78] sm:$0xff]  ;;  %v45_v47 = vld [vmem:[%s688_s0 + $0xf0] sm:$0xff] }
   0xc   :  { %v61_v44 = vpack.c.bf16 %v44_v40, %v43_v39  ;;  %v46_v48 = vld [vmem:[%s688_s0 + $0xf8] sm:$0xff]  ;;  %v54_v49 = vpack.c.bf16 %v30_v46, %v29_v45  ;;  %v557_v51 = vld [vmem:[%s689_s2] ss:$0 sm:$0xff] }
   0xd   :  { %v62_v50 = vpack.c.bf16 %v46_v48, %v45_v47 }
  0x12   :  { %378 = vmatmul.mubr.msk.bf16.gmra.mrb[4].mxu0 %vm82_vm1, %v50_v29  ;;  %394 = vmatmul.mubr.msk.bf16.gmra.mrb[4].mxu1 %vm82_vm1, %v58_v30 }
  0x13   :  { %381 = vmatprep.mubr.msk.bf16.mxu0 %vm82_vm1, %v51_v31  ;;  %397 = vmatprep.mubr.msk.bf16.mxu1 %vm82_vm1, %v59_v32 }
  0x1a   :  { %382 = vmatmul.mubr.msk.bf16.gmra.mrb[8].mxu0 %vm82_vm1, %v52_v41  ;;  %398 = vmatmul.mubr.msk.bf16.gmra.mrb[8].mxu1 %vm82_vm1, %v60_v42 }
  0x1b   :  { %385 = vmatprep.mubr.msk.bf16.mxu0 %vm82_vm1, %v53_v43  ;;  %401 = vmatprep.mubr.msk.bf16.mxu1 %vm82_vm1, %v61_v44 }
  0x22   :  { %386 = vmatmul.mubr.msk.bf16.gmra.mrb[12].mxu0 %vm82_vm1, %v54_v49  ;;  %402 = vmatmul.mubr.msk.bf16.gmra.mrb[12].mxu1 %vm82_vm1, %v62_v50 }
  0xdd   :  { %v375_v52 = vpop.f32.mrb[0].mxu0  ;;  %v391_v53 = vpop.f32.mrb[0].mxu1 }
  0xde   :  { %v178_v54 = vadd.f32 %v375_v52, %v557_v51  ;;  %v242_v55 = vadd.f32 %v391_v53, %v557_v51  ;;  %v169_v56 = vpop.f32.mrb[1].mxu0  ;;  %v233_v57 = vpop.f32.mrb[1].mxu1 }
  0xdf   :  { %v170_v58 = vadd.f32 %v557_v51, %v169_v56  ;;  %v234_v59 = vadd.f32 %v557_v51, %v233_v57  ;;  %v376_v60 = vpop.f32.mrb[2].mxu0  ;;  %v392_v61 = vpop.f32.mrb[2].mxu1 }
  0xe0   :  { %298 = vst [vmem:[%s690_s3 + $0x10] sm:$0xff] %v178_v54  ;;  %314 = vst [vmem:[%s690_s3 + $0x90] sm:$0xff] %v242_v55  ;;  %v181_v62 = vadd.f32 %v376_v60, %v557_v51  ;;  %v245_v63 = vadd.f32 %v392_v61, %v557_v51  ;;  %v172_v0 = vpop.f32.mrb[3].mxu0  ;;  %v236_v1 = vpop.f32.mrb[3].mxu1 }
  0xe1   :  { %296 = vst [vmem:[%s690_s3] sm:$0xff] %v170_v58  ;;  %312 = vst [vmem:[%s690_s3 + $0x80] sm:$0xff] %v234_v59  ;;  %v173_v2 = vadd.f32 %v557_v51, %v172_v0  ;;  %v237_v3 = vadd.f32 %v557_v51, %v236_v1 }
  0xe2   :  { %299 = vst [vmem:[%s690_s3 + $0x18] sm:$0xff] %v181_v62  ;;  %315 = vst [vmem:[%s690_s3 + $0x98] sm:$0xff] %v245_v63 }
  0xe3   :  { %297 = vst [vmem:[%s690_s3 + $0x8] sm:$0xff] %v173_v2  ;;  %313 = vst [vmem:[%s690_s3 + $0x88] sm:$0xff] %v237_v3 }
  0xe5   :  { %v379_v4 = vpop.f32.mrb[4].mxu0  ;;  %v395_v5 = vpop.f32.mrb[4].mxu1 }
  0xe6   :  { %v194_v6 = vadd.f32 %v379_v4, %v557_v51  ;;  %v258_v7 = vadd.f32 %v395_v5, %v557_v51  ;;  %v185_v8 = vpop.f32.mrb[5].mxu0  ;;  %v249_v9 = vpop.f32.mrb[5].mxu1 }
  0xe7   :  { %v186_v10 = vadd.f32 %v557_v51, %v185_v8  ;;  %v250_v11 = vadd.f32 %v557_v51, %v249_v9  ;;  %v380_v12 = vpop.f32.mrb[6].mxu0  ;;  %v396_v13 = vpop.f32.mrb[6].mxu1 }
  0xe8   :  { %302 = vst [vmem:[%s690_s3 + $0x30] sm:$0xff] %v194_v6  ;;  %318 = vst [vmem:[%s690_s3 + $0xb0] sm:$0xff] %v258_v7  ;;  %v197_v14 = vadd.f32 %v380_v12, %v557_v51  ;;  %v261_v15 = vadd.f32 %v396_v13, %v557_v51  ;;  %v188_v16 = vpop.f32.mrb[7].mxu0  ;;  %v252_v17 = vpop.f32.mrb[7].mxu1 }
  0xe9   :  { %300 = vst [vmem:[%s690_s3 + $0x20] sm:$0xff] %v186_v10  ;;  %316 = vst [vmem:[%s690_s3 + $0xa0] sm:$0xff] %v250_v11  ;;  %v189_v18 = vadd.f32 %v557_v51, %v188_v16  ;;  %v253_v19 = vadd.f32 %v557_v51, %v252_v17 }
  0xea   :  { %303 = vst [vmem:[%s690_s3 + $0x38] sm:$0xff] %v197_v14  ;;  %319 = vst [vmem:[%s690_s3 + $0xb8] sm:$0xff] %v261_v15 }
  0xeb   :  { %301 = vst [vmem:[%s690_s3 + $0x28] sm:$0xff] %v189_v18  ;;  %317 = vst [vmem:[%s690_s3 + $0xa8] sm:$0xff] %v253_v19 }
  0xed   :  { %v383_v20 = vpop.f32.mrb[8].mxu0  ;;  %v399_v21 = vpop.f32.mrb[8].mxu1 }
  0xee   :  { %v210_v22 = vadd.f32 %v383_v20, %v557_v51  ;;  %v274_v23 = vadd.f32 %v399_v21, %v557_v51  ;;  %v201_v24 = vpop.f32.mrb[9].mxu0  ;;  %v265_v25 = vpop.f32.mrb[9].mxu1 }
  0xef   :  { %v202_v26 = vadd.f32 %v557_v51, %v201_v24  ;;  %v266_v27 = vadd.f32 %v557_v51, %v265_v25  ;;  %v384_v28 = vpop.f32.mrb[10].mxu0  ;;  %v400_v29 = vpop.f32.mrb[10].mxu1 }
  0xf0   :  { %306 = vst [vmem:[%s690_s3 + $0x50] sm:$0xff] %v210_v22  ;;  %322 = vst [vmem:[%s690_s3 + $0xd0] sm:$0xff] %v274_v23  ;;  %v213_v30 = vadd.f32 %v384_v28, %v557_v51  ;;  %v277_v31 = vadd.f32 %v400_v29, %v557_v51  ;;  %v204_v32 = vpop.f32.mrb[11].mxu0  ;;  %v268_v33 = vpop.f32.mrb[11].mxu1 }
  0xf1   :  { %304 = vst [vmem:[%s690_s3 + $0x40] sm:$0xff] %v202_v26  ;;  %320 = vst [vmem:[%s690_s3 + $0xc0] sm:$0xff] %v266_v27  ;;  %v205_v34 = vadd.f32 %v557_v51, %v204_v32  ;;  %v269_v35 = vadd.f32 %v557_v51, %v268_v33 }
  0xf2   :  { %307 = vst [vmem:[%s690_s3 + $0x58] sm:$0xff] %v213_v30  ;;  %323 = vst [vmem:[%s690_s3 + $0xd8] sm:$0xff] %v277_v31 }
  0xf3   :  { %305 = vst [vmem:[%s690_s3 + $0x48] sm:$0xff] %v205_v34  ;;  %321 = vst [vmem:[%s690_s3 + $0xc8] sm:$0xff] %v269_v35 }
  0xf5   :  { %v387_v36 = vpop.f32.mrb[12].mxu0  ;;  %v403_v37 = vpop.f32.mrb[12].mxu1 }
  0xf6   :  { %v226_v38 = vadd.f32 %v387_v36, %v557_v51  ;;  %v290_v39 = vadd.f32 %v403_v37, %v557_v51  ;;  %v217_v40 = vpop.f32.mrb[13].mxu0  ;;  %v281_v41 = vpop.f32.mrb[13].mxu1 }
  0xf7   :  { %v218_v42 = vadd.f32 %v557_v51, %v217_v40  ;;  %v282_v43 = vadd.f32 %v557_v51, %v281_v41  ;;  %v388_v44 = vpop.f32.mrb[14].mxu0  ;;  %v404_v45 = vpop.f32.mrb[14].mxu1 }
  0xf8   :  { %310 = vst [vmem:[%s690_s3 + $0x70] sm:$0xff] %v226_v38  ;;  %326 = vst [vmem:[%s690_s3 + $0xf0] sm:$0xff] %v290_v39  ;;  %v229_v46 = vadd.f32 %v388_v44, %v557_v51  ;;  %v293_v47 = vadd.f32 %v404_v45, %v557_v51  ;;  %v220_v48 = vpop.f32.mrb[15].mxu0  ;;  %v284_v49 = vpop.f32.mrb[15].mxu1 }
  0xf9   :  { %308 = vst [vmem:[%s690_s3 + $0x60] sm:$0xff] %v218_v42  ;;  %324 = vst [vmem:[%s690_s3 + $0xe0] sm:$0xff] %v282_v43  ;;  %v221_v50 = vadd.f32 %v557_v51, %v220_v48  ;;  %v285_v52 = vadd.f32 %v557_v51, %v284_v49 }
  0xfa   :  { %311 = vst [vmem:[%s690_s3 + $0x78] sm:$0xff] %v229_v46  ;;  %327 = vst [vmem:[%s690_s3 + $0xf8] sm:$0xff] %v293_v47 }
  0xfb   :  { %309 = vst [vmem:[%s690_s3 + $0x68] sm:$0xff] %v221_v50  ;;  %325 = vst [vmem:[%s690_s3 + $0xe8] sm:$0xff] %v285_v52 }

// kernel: decoder_forward.7
= control target key start
LH: loop header
LB: loop body
LE: loop exit
PB: predicated region body
PF: predicated region fallthrough
CT: control target
= control target key end

     0   :  { %s1252_s12 = smov 0   ;;  %s1254_s13 = smov 0   ;;  %s1657_s0 = inlined_call_operand.vmem [shape: f32[256,128], index: 0, kind: input, shape index: {}]   ;;  %s1658_s1 = inlined_call_operand.vmem [shape: bf16[2,128,384], index: 1, kind: input, shape index: {}]   ;;  %s1659_s2 = inlined_call_operand.vmem [shape: f32[2,1,384], index: 2, kind: input, shape index: {}]   ;;  %s1660_s3 = inlined_call_operand.vmem [shape: f32[2,256,384], index: 3, kind: output, shape index: {}]  }
   0x1   :  { %s1256_s14 = smov 0  }
   0x2 LB: > { %s25_s15 = sadd.s32 1, %s1225_s13  ;;  %p1030_p0 = scmp.ge.s32.totalorder %s1229_s14, 1  ;;  %s1229_s14 = sphi %s1256_s14, %s13_s14   ;;  %s1225_s13 = sphi %s1254_s13, %s1662_s13   ;;  %s1221_s12 = sphi %s1252_s12, %s1661_s12  }
   0x3   : > { %p27_p1 = scmp.ge.s32.totalorder %s25_s15, 2  ;;  %p171_p2 = scmp.lt.s32.totalorder %s1229_s14, 3 }
   0x5   : > { %s1664_s15 = smov (%p27_p1, %s25_s15), 0  ;;  %p172_p3 = pnand %p1030_p0, %p171_p2 }
   0x6   : > { %p215_p4 = scmp.lt.s32.totalorder (!%p172_p3), %s1221_s12, 1  ;;  %v1231_v0 = vmov (!%p172_p3), 0   ;;  %v236_v16 = vld [vmem:[%s1657_s0] sm:$0xff] (!%p172_p3)  ;;  %v237_v17 = vld [vmem:[%s1657_s0 + $0x8] sm:$0xff] (!%p172_p3)  ;;  %v238_v25 = vld [vmem:[%s1657_s0 + $0x10] sm:$0xff] (!%p172_p3) }
   0x7   : > { %175 = sbr.rel (%p172_p3) target bundleno = 357 (0x165), region = 32  ;;  %493 = vmatprep.mubr.bf16.mxu0 (!%p172_p3), %v1231_v0  ;;  %613 = vmatprep.mubr.bf16.mxu1 (!%p172_p3), %v1231_v0  ;;  %v260_v19 = vld [vmem:[%s1657_s0 + $0xc0] sm:$0xff] (!%p172_p3)  ;;  %v261_v20 = vld [vmem:[%s1657_s0 + $0xc8] sm:$0xff] (!%p172_p3)  ;;  %v268_v22 = vpack.c.bf16 (!%p172_p3), %v237_v17, %v236_v16  ;;  %v239_v26 = vld [vmem:[%s1657_s0 + $0x18] sm:$0xff] (!%p172_p3) }
   0x8   : > { %v1309_v23 = vpack.c.bf16 (!%p172_p3), %v261_v20, %v260_v19  ;;  %v262_v27 = vld [vmem:[%s1657_s0 + $0xd0] sm:$0xff] (!%p172_p3)  ;;  %v263_v28 = vld [vmem:[%s1657_s0 + $0xd8] sm:$0xff] (!%p172_p3)  ;;  %v269_v30 = vpack.c.bf16 (!%p172_p3), %v239_v26, %v238_v25  ;;  %v240_v33 = vld [vmem:[%s1657_s0 + $0x20] sm:$0xff] (!%p172_p3) }
   0x9   : > { %v1328_v31 = vpack.c.bf16 (!%p172_p3), %v263_v28, %v262_v27  ;;  %v241_v34 = vld [vmem:[%s1657_s0 + $0x28] sm:$0xff] (!%p172_p3)  ;;  %v264_v35 = vld [vmem:[%s1657_s0 + $0xe0] sm:$0xff] (!%p172_p3)  ;;  %v242_v41 = vld [vmem:[%s1657_s0 + $0x30] sm:$0xff] (!%p172_p3) }
   0xa   : > { %v265_v36 = vld [vmem:[%s1657_s0 + $0xe8] sm:$0xff] (!%p172_p3)  ;;  %v270_v38 = vpack.c.bf16 (!%p172_p3), %v241_v34, %v240_v33  ;;  %v243_v42 = vld [vmem:[%s1657_s0 + $0x38] sm:$0xff] (!%p172_p3)  ;;  %v266_v43 = vld [vmem:[%s1657_s0 + $0xf0] sm:$0xff] (!%p172_p3) }
   0xb   : > { %v1347_v39 = vpack.c.bf16 (!%p172_p3), %v265_v36, %v264_v35  ;;  %v267_v44 = vld [vmem:[%s1657_s0 + $0xf8] sm:$0xff] (!%p172_p3)  ;;  %v271_v46 = vpack.c.bf16 (!%p172_p3), %v243_v42, %v242_v41  ;;  %v244_v49 = vld [vmem:[%s1657_s0 + $0x40] sm:$0xff] (!%p172_p3)  ;;  %v245_v50 = vld [vmem:[%s1657_s0 + $0x48] sm:$0xff] (!%p172_p3) }
   0xc   : > { %v1366_v47 = vpack.c.bf16 (!%p172_p3), %v267_v44, %v266_v43  ;;  %v272_v51 = vpack.c.bf16 (!%p172_p3), %v245_v50, %v244_v49  ;;  %v246_v52 = vld [vmem:[%s1657_s0 + $0x50] sm:$0xff] (!%p172_p3)  ;;  %v247_v53 = vld [vmem:[%s1657_s0 + $0x58] sm:$0xff] (!%p172_p3)  ;;  %v248_v55 = vld [vmem:[%s1657_s0 + $0x60] sm:$0xff] (!%p172_p3) }
   0xd   : > { %v273_v54 = vpack.c.bf16 (!%p172_p3), %v247_v53, %v246_v52  ;;  %v249_v56 = vld [vmem:[%s1657_s0 + $0x68] sm:$0xff] (!%p172_p3)  ;;  %v250_v58 = vld [vmem:[%s1657_s0 + $0x70] sm:$0xff] (!%p172_p3)  ;;  %v251_v59 = vld [vmem:[%s1657_s0 + $0x78] sm:$0xff] (!%p172_p3) }
   0xe   : > { %s1666_s12 = smov (!%p215_p4, %s1221_s12), 1  ;;  %v274_v57 = vpack.c.bf16 %v249_v56, %v248_v55  ;;  %v252_v60 = vld [vmem:[%s1657_s0 + $0x80] sm:$0xff]  ;;  %v253_v61 = vld [vmem:[%s1657_s0 + $0x88] sm:$0xff]  ;;  %v275_v62 = vpack.c.bf16 %v251_v59, %v250_v58 }
   0xf   : > { %s1147_s16 = smul.u32 192, %s1666_s12  ;;  %v276_v63 = vpack.c.bf16 %v253_v61, %v252_v60 }
  0x10   : > { %s1148_s11 = smul.u32 3, %s1666_s12 }
  0x11   : > { %s1278_s19 = scalar_lea.vmem %s1658_s1, %s1147_s16  ;;  %s1149_s20 = smul.u32 768, %s1666_s12 }
  0x12   : > { %v1175_v1 = vld [vmem:[%s1278_s19 + $0x4] ss:$12 sps:$4 sm:$0xff]   ;;  %v1177_v2 = vld [vmem:[%s1278_s19] ss:$12 sps:$4 sm:$0xff]   ;;  %v1178_v3 = vld [vmem:[%s1278_s19 + $0x1c] ss:$12 sps:$4 sm:$0xff]   ;;  %s223_s18 = scalar_lea.vmem %s1659_s2, %s1148_s11 }
  0x13   : > { %461 = vmatprep.subr.bf16.mxu0 %v1175_v1  ;;  %1131 = vmatprep.subr.bf16.mxu1 %v1175_v1  ;;  %v1180_v4 = vld [vmem:[%s1278_s19 + $0x18] ss:$12 sps:$4 sm:$0xff]   ;;  %v1181_v5 = vld [vmem:[%s1278_s19 + $0x34] ss:$12 sps:$4 sm:$0xff]   ;;  %v1183_v6 = vld [vmem:[%s1278_s19 + $0x30] ss:$12 sps:$4 sm:$0xff]   ;;  %s1450_s23 = scalar_lea.vmem %s1660_s3, %s1149_s20 }
  0x14   : > { %462 = vmatpush1.bf16.msra.mxu0 %v1177_v2  ;;  %1139 = vmatpush1.bf16.msra.mxu1 %v1177_v2  ;;  %v1184_v7 = vld [vmem:[%s1278_s19 + $0x4c] ss:$12 sps:$4 sm:$0xff]   ;;  %v1186_v8 = vld [vmem:[%s1278_s19 + $0x48] ss:$12 sps:$4 sm:$0xff]   ;;  %v1187_v9 = vld [vmem:[%s1278_s19 + $0x64] ss:$12 sps:$4 sm:$0xff]  }
  0x15   : > { %463 = vmatprep.subr.bf16.mxu0 %v1178_v3  ;;  %1132 = vmatprep.subr.bf16.mxu1 %v1178_v3  ;;  %v1189_v10 = vld [vmem:[%s1278_s19 + $0x60] ss:$12 sps:$4 sm:$0xff]   ;;  %v1190_v11 = vld [vmem:[%s1278_s19 + $0x7c] ss:$12 sps:$4 sm:$0xff]   ;;  %v1192_v12 = vld [vmem:[%s1278_s19 + $0x78] ss:$12 sps:$4 sm:$0xff]  }
  0x16   : > { %v1193_v13 = vld [vmem:[%s1278_s19 + $0x94] ss:$12 sps:$4 sm:$0xff]   ;;  %v1195_v14 = vld [vmem:[%s1278_s19 + $0x90] ss:$12 sps:$4 sm:$0xff]   ;;  %v1196_v15 = vld [vmem:[%s1278_s19 + $0xac] ss:$12 sps:$4 sm:$0xff]  }
  0x17   : > { %v1198_v18 = vld [vmem:[%s1278_s19 + $0xa8] ss:$12 sps:$4 sm:$0xff]   ;;  %v1200_v24 = vld [vmem:[%s1278_s19 + $0x20] ss:$12 sps:$4 sm:$0xff]   ;;  %v1201_v29 = vld [vmem:[%s1278_s19 + $0x38] ss:$12 sps:$4 sm:$0xff]  }
  0x18   : > { %464 = vmatpush1.bf16.msra.mxu0 %v1180_v4  ;;  %1140 = vmatpush1.bf16.msra.mxu1 %v1180_v4  ;;  %v1199_v21 = vld [vmem:[%s1278_s19 + $0x8] ss:$12 sps:$4 sm:$0xff]   ;;  %v1202_v32 = vld [vmem:[%s1278_s19 + $0x50] ss:$12 sps:$4 sm:$0xff]   ;;  %v1204_v40 = vld [vmem:[%s1278_s19 + $0x80] ss:$12 sps:$4 sm:$0xff]  }
  0x19   : > { %465 = vmatprep.subr.bf16.mxu0 %v1181_v5  ;;  %1133 = vmatprep.subr.bf16.mxu1 %v1181_v5  ;;  %v1203_v37 = vld [vmem:[%s1278_s19 + $0x68] ss:$12 sps:$4 sm:$0xff]   ;;  %v1205_v45 = vld [vmem:[%s1278_s19 + $0x98] ss:$12 sps:$4 sm:$0xff]   ;;  %v1206_v48 = vld [vmem:[%s1278_s19 + $0xb0] ss:$12 sps:$4 sm:$0xff]  }
  0x1a   : > { %v254_v1 = vld [vmem:[%s1657_s0 + $0x90] sm:$0xff]  ;;  %v255_v2 = vld [vmem:[%s1657_s0 + $0x98] sm:$0xff]  ;;  %v256_v3 = vld [vmem:[%s1657_s0 + $0xa0] sm:$0xff] }
  0x1b   : > { %v257_v4 = vld [vmem:[%s1657_s0 + $0xa8] sm:$0xff]  ;;  %v277_v5 = vpack.c.bf16 %v255_v2, %v254_v1 }
  0x1c   : > { %466 = vmatpush1.bf16.msra.mxu0 %v1183_v6  ;;  %1141 = vmatpush1.bf16.msra.mxu1 %v1183_v6  ;;  %v278_v6 = vpack.c.bf16 %v257_v4, %v256_v3 }
  0x1d   : > { %467 = vmatprep.subr.bf16.mxu0 %v1184_v7  ;;  %1134 = vmatprep.subr.bf16.mxu1 %v1184_v7  ;;  %v258_v7 = vld [vmem:[%s1657_s0 + $0xb0] sm:$0xff] }
  0x20   : > { %468 = vmatpush1.bf16.msra.mxu0 %v1186_v8  ;;  %1142 = vmatpush1.bf16.msra.mxu1 %v1186_v8  ;;  %v259_v8 = vld [vmem:[%s1657_s0 + $0xb8] sm:$0xff] }
  0x21   : > { %469 = vmatprep.subr.bf16.mxu0 %v1187_v9  ;;  %1135 = vmatprep.subr.bf16.mxu1 %v1187_v9  ;;  %v279_v9 = vpack.c.bf16 %v259_v8, %v258_v7 }
  0x24   : > { %470 = vmatpush1.bf16.msra.mxu0 %v1189_v10  ;;  %1143 = vmatpush1.bf16.msra.mxu1 %v1189_v10  ;;  %v318_v10 = vlaneseq }
  0x25   : > { %471 = vmatprep.subr.bf16.mxu0 %v1190_v11  ;;  %1136 = vmatprep.subr.bf16.mxu1 %v1190_v11 }
  0x26   : > { %v1431_v11 = vshrl.u32 %v318_v10, 7 }
  0x28   : > { %472 = vmatpush1.bf16.msra.mxu0 %v1192_v12  ;;  %1144 = vmatpush1.bf16.msra.mxu1 %v1192_v12  ;;  %v320_v12 = vsub.s32 0, %v1431_v11  ;;  %v328_v7 = vsub.s32 2, %v1431_v11 }
  0x29   : > { %473 = vmatprep.subr.bf16.mxu0 %v1193_v13  ;;  %1137 = vmatprep.subr.bf16.mxu1 %v1193_v13  ;;  %v1437_v13 = vld [vmem:[%s223_s18] sm:$0x7] }
  0x2c   : > { %474 = vmatpush1.bf16.msra.mxu0 %v1195_v14  ;;  %1145 = vmatpush1.bf16.msra.mxu1 %v1195_v14  ;;  %v324_v14 = vsub.s32 1, %v1431_v11 }
  0x2d   : > { %475 = vmatprep.subr.bf16.mxu0 %v1196_v15  ;;  %1138 = vmatprep.subr.bf16.mxu1 %v1196_v15 }
  0x2e   : > { %v1445_v15 = vrot.slane %v1437_v13, %v324_v14 }
  0x30   : > { %476 = vmatpush1.bf16.msra.mxu0 %v1198_v18  ;;  %1146 = vmatpush1.bf16.msra.mxu1 %v1198_v18 }
  0x31   : > { %1083 = vmatprep.subr.bf16.mxu1 %v1199_v21 }
  0x33   : > { %494 = vmatmul.mubr.bf16.vlgmr.msra.gmra.mrb[0].mxu0 %v268_v22  ;;  %614 = vmatmul.mubr.bf16.vlgmr.msra.gmra.mrb[0].mxu1 %v1309_v23 }
  0x34   : > { %1084 = vmatpush3.bf16.msra.mxu1 %v1199_v21  ;;  %503 = vmatprep.mubr.bf16.mxu0 %v1231_v0 }
  0x35   : > { %1085 = vmatprep.subr.bf16.mxu1 %v1200_v24  ;;  %623 = vmatprep.mubr.bf16.mxu1 %v1231_v0 }
  0x38   : > { %1086 = vmatpush3.bf16.msra.mxu1 %v1200_v24 }
  0x39   : > { %1087 = vmatprep.subr.bf16.mxu1 %v1201_v29 }
  0x3b   : > { %504 = vmatmul.mubr.bf16.gmra.mrb[4].mxu0 %v269_v30  ;;  %624 = vmatmul.mubr.bf16.gmra.mrb[4].mxu1 %v1328_v31 }
  0x3c   : > { %1088 = vmatpush3.bf16.msra.mxu1 %v1201_v29  ;;  %513 = vmatprep.mubr.bf16.mxu0 %v1231_v0 }
  0x3d   : > { %1089 = vmatprep.subr.bf16.mxu1 %v1202_v32  ;;  %633 = vmatprep.mubr.bf16.mxu1 %v1231_v0 }
  0x40   : > { %1090 = vmatpush3.bf16.msra.mxu1 %v1202_v32 }
  0x41   : > { %1091 = vmatprep.subr.bf16.mxu1 %v1203_v37 }
  0x43   : > { %514 = vmatmul.mubr.bf16.gmra.mrb[8].mxu0 %v270_v38  ;;  %634 = vmatmul.mubr.bf16.gmra.mrb[8].mxu1 %v1347_v39 }
  0x44   : > { %1092 = vmatpush3.bf16.msra.mxu1 %v1203_v37  ;;  %523 = vmatprep.mubr.bf16.mxu0 %v1231_v0 }
  0x45   : > { %1093 = vmatprep.subr.bf16.mxu1 %v1204_v40  ;;  %643 = vmatprep.mubr.bf16.mxu1 %v1231_v0 }
  0x48   : > { %1094 = vmatpush3.bf16.msra.mxu1 %v1204_v40 }
  0x49   : > { %1095 = vmatprep.subr.bf16.mxu1 %v1205_v45 }
  0x4b   : > { %524 = vmatmul.mubr.bf16.gmra.mrb[12].mxu0 %v271_v46  ;;  %644 = vmatmul.mubr.bf16.gmra.mrb[12].mxu1 %v1366_v47 }
  0x4c   : > { %1096 = vmatpush3.bf16.msra.mxu1 %v1205_v45  ;;  %533 = vmatprep.mubr.bf16.mxu0 %v1231_v0 }
  0x4d   : > { %1097 = vmatprep.subr.bf16.mxu1 %v1206_v48  ;;  %1099 = vmatprep.mubr.bf16.mxu1 %v268_v22 }
  0x50   : > { %1098 = vmatpush3.bf16.msra.mxu1 %v1206_v48 }
  0x53   : > { %534 = vmatmul.mubr.bf16.gmra.mrb[16].mxu0 %v272_v51  ;;  %1100 = vmatmul.mubr.bf16.vlgmr.msra.gmra.mrb[16].mxu1 %v269_v30 }
  0x54   : > { %543 = vmatprep.mubr.bf16.mxu0 %v1231_v0  ;;  %1103 = vmatprep.mubr.bf16.mxu1 %v270_v38 }
  0x5b   : > { %544 = vmatmul.mubr.bf16.gmra.mrb[20].mxu0 %v273_v54  ;;  %1104 = vmatmul.mubr.bf16.gmra.mrb[20].mxu1 %v271_v46 }
  0x5c   : > { %553 = vmatprep.mubr.bf16.mxu0 %v1231_v0  ;;  %1107 = vmatprep.mubr.bf16.mxu1 %v272_v51 }
  0x63   : > { %554 = vmatmul.mubr.bf16.gmra.mrb[24].mxu0 %v274_v57  ;;  %1108 = vmatmul.mubr.bf16.gmra.mrb[24].mxu1 %v273_v54 }
  0x64   : > { %563 = vmatprep.mubr.bf16.mxu0 %v1231_v0  ;;  %1111 = vmatprep.mubr.bf16.mxu1 %v274_v57 }
  0x6b   : > { %564 = vmatmul.mubr.bf16.gmra.mrb[28].mxu0 %v275_v62  ;;  %1112 = vmatmul.mubr.bf16.gmra.mrb[28].mxu1 %v275_v62 }
  0x6c   : > { %573 = vmatprep.mubr.bf16.mxu0 %v1231_v0  ;;  %1115 = vmatprep.mubr.bf16.mxu1 %v276_v63 }
  0x73   : > { %574 = vmatmul.mubr.bf16.gmra.mrb[32].mxu0 %v276_v63  ;;  %1116 = vmatmul.mubr.bf16.gmra.mrb[32].mxu1 %v277_v5 }
  0x74   : > { %583 = vmatprep.mubr.bf16.mxu0 %v1231_v0  ;;  %1119 = vmatprep.mubr.bf16.mxu1 %v278_v6 }
  0x7b   : > { %584 = vmatmul.mubr.bf16.gmra.mrb[36].mxu0 %v277_v5  ;;  %1120 = vmatmul.mubr.bf16.gmra.mrb[36].mxu1 %v279_v9 }
  0x7c   : > { %593 = vmatprep.mubr.bf16.mxu0 %v1231_v0  ;;  %1123 = vmatprep.mubr.bf16.mxu1 %v1309_v23 }
  0x83   : > { %594 = vmatmul.mubr.bf16.gmra.mrb[40].mxu0 %v278_v6  ;;  %1124 = vmatmul.mubr.bf16.gmra.mrb[40].mxu1 %v1328_v31 }
  0x84   : > { %603 = vmatprep.mubr.bf16.mxu0 %v1231_v0  ;;  %1127 = vmatprep.mubr.bf16.mxu1 %v1347_v39  ;;  %v1442_v0 = vrot.slane %v1437_v13, %v320_v12 }
  0x8b   : > { %604 = vmatmul.mubr.bf16.gmra.mrb[44].mxu0 %v279_v9  ;;  %1128 = vmatmul.mubr.bf16.gmra.mrb[44].mxu1 %v1366_v47 }
 0x106   : > { %v495_v16 = vpop.f32.mrb[0].mxu0  ;;  %v615_v17 = vpop.f32.mrb[0].mxu1 }
 0x107   : > { %v496_v18 = vadd.f32 %v495_v16, %v1442_v0  ;;  %v616_v19 = vadd.f32 %v615_v17, %v1442_v0  ;;  %v497_v20 = vpop.f32.mrb[1].mxu0  ;;  %v617_v21 = vpop.f32.mrb[1].mxu1 }
 0x108   : > { %v498_v22 = vadd.f32 %v497_v20, %v1445_v15  ;;  %v618_v23 = vadd.f32 %v617_v21, %v1445_v15  ;;  %v499_v24 = vpop.f32.mrb[2].mxu0  ;;  %v619_v25 = vpop.f32.mrb[2].mxu1  ;;  %v1516_v20 = vrot.slane %v1437_v13, %v328_v7 }
 0x109   : > { %815 = vst [vmem:[%s1450_s23] sm:$0xff] %v496_v18  ;;  %887 = vst [vmem:[%s1450_s23 + $0x240] sm:$0xff] %v616_v19  ;;  %v500_v26 = vadd.f32 %v499_v24, %v1442_v0  ;;  %v620_v27 = vadd.f32 %v619_v25, %v1442_v0  ;;  %v501_v28 = vpop.f32.mrb[3].mxu0  ;;  %v621_v29 = vpop.f32.mrb[3].mxu1 }
 0x10a   : > { %816 = vst [vmem:[%s1450_s23 + $0x8] sm:$0xff] %v498_v22  ;;  %888 = vst [vmem:[%s1450_s23 + $0x248] sm:$0xff] %v618_v23  ;;  %v502_v30 = vadd.f32 %v501_v28, %v1445_v15  ;;  %v622_v31 = vadd.f32 %v621_v29, %v1445_v15 }
 0x10b   : > { %818 = vst [vmem:[%s1450_s23 + $0x18] sm:$0xff] %v500_v26  ;;  %890 = vst [vmem:[%s1450_s23 + $0x258] sm:$0xff] %v620_v27 }
 0x10c   : > { %819 = vst [vmem:[%s1450_s23 + $0x20] sm:$0xff] %v502_v30  ;;  %891 = vst [vmem:[%s1450_s23 + $0x260] sm:$0xff] %v622_v31 }
 0x10e   : > { %v505_v32 = vpop.f32.mrb[4].mxu0  ;;  %v625_v33 = vpop.f32.mrb[4].mxu1 }
 0x10f   : > { %v506_v34 = vadd.f32 %v505_v32, %v1442_v0  ;;  %v626_v35 = vadd.f32 %v625_v33, %v1442_v0  ;;  %v507_v36 = vpop.f32.mrb[5].mxu0  ;;  %v627_v37 = vpop.f32.mrb[5].mxu1 }
 0x110   : > { %v508_v38 = vadd.f32 %v507_v36, %v1445_v15  ;;  %v628_v39 = vadd.f32 %v627_v37, %v1445_v15  ;;  %v509_v40 = vpop.f32.mrb[6].mxu0  ;;  %v629_v41 = vpop.f32.mrb[6].mxu1 }
 0x111   : > { %821 = vst [vmem:[%s1450_s23 + $0x30] sm:$0xff] %v506_v34  ;;  %893 = vst [vmem:[%s1450_s23 + $0x270] sm:$0xff] %v626_v35  ;;  %v510_v42 = vadd.f32 %v509_v40, %v1442_v0  ;;  %v630_v43 = vadd.f32 %v629_v41, %v1442_v0  ;;  %v511_v44 = vpop.f32.mrb[7].mxu0  ;;  %v631_v45 = vpop.f32.mrb[7].mxu1 }
 0x112   : > { %822 = vst [vmem:[%s1450_s23 + $0x38] sm:$0xff] %v508_v38  ;;  %894 = vst [vmem:[%s1450_s23 + $0x278] sm:$0xff] %v628_v39  ;;  %v512_v46 = vadd.f32 %v511_v44, %v1445_v15  ;;  %v632_v47 = vadd.f32 %v631_v45, %v1445_v15 }
 0x113   : > { %824 = vst [vmem:[%s1450_s23 + $0x48] sm:$0xff] %v510_v42  ;;  %896 = vst [vmem:[%s1450_s23 + $0x288] sm:$0xff] %v630_v43 }
 0x114   : > { %825 = vst [vmem:[%s1450_s23 + $0x50] sm:$0xff] %v512_v46  ;;  %897 = vst [vmem:[%s1450_s23 + $0x290] sm:$0xff] %v632_v47 }
 0x116   : > { %v515_v48 = vpop.f32.mrb[8].mxu0  ;;  %v635_v49 = vpop.f32.mrb[8].mxu1 }
 0x117   : > { %v516_v50 = vadd.f32 %v515_v48, %v1442_v0  ;;  %v636_v51 = vadd.f32 %v635_v49, %v1442_v0  ;;  %v517_v52 = vpop.f32.mrb[9].mxu0  ;;  %v637_v53 = vpop.f32.mrb[9].mxu1 }
 0x118   : > { %v518_v54 = vadd.f32 %v517_v52, %v1445_v15  ;;  %v638_v55 = vadd.f32 %v637_v53, %v1445_v15  ;;  %v519_v56 = vpop.f32.mrb[10].mxu0  ;;  %v639_v57 = vpop.f32.mrb[10].mxu1 }
 0x119   : > { %827 = vst [vmem:[%s1450_s23 + $0x60] sm:$0xff] %v516_v50  ;;  %899 = vst [vmem:[%s1450_s23 + $0x2a0] sm:$0xff] %v636_v51  ;;  %v520_v58 = vadd.f32 %v519_v56, %v1442_v0  ;;  %v640_v59 = vadd.f32 %v639_v57, %v1442_v0  ;;  %v521_v60 = vpop.f32.mrb[11].mxu0  ;;  %v641_v61 = vpop.f32.mrb[11].mxu1 }
 0x11a   : > { %828 = vst [vmem:[%s1450_s23 + $0x68] sm:$0xff] %v518_v54  ;;  %900 = vst [vmem:[%s1450_s23 + $0x2a8] sm:$0xff] %v638_v55  ;;  %v522_v62 = vadd.f32 %v521_v60, %v1445_v15  ;;  %v642_v63 = vadd.f32 %v641_v61, %v1445_v15 }
 0x11b   : > { %830 = vst [vmem:[%s1450_s23 + $0x78] sm:$0xff] %v520_v58  ;;  %902 = vst [vmem:[%s1450_s23 + $0x2b8] sm:$0xff] %v640_v59 }
 0x11c   : > { %831 = vst [vmem:[%s1450_s23 + $0x80] sm:$0xff] %v522_v62  ;;  %903 = vst [vmem:[%s1450_s23 + $0x2c0] sm:$0xff] %v642_v63 }
 0x11e   : > { %v525_v1 = vpop.f32.mrb[12].mxu0  ;;  %v645_v2 = vpop.f32.mrb[12].mxu1 }
 0x11f   : > { %v526_v3 = vadd.f32 %v525_v1, %v1442_v0  ;;  %v646_v4 = vadd.f32 %v645_v2, %v1442_v0  ;;  %v527_v5 = vpop.f32.mrb[13].mxu0  ;;  %v647_v6 = vpop.f32.mrb[13].mxu1 }
 0x120   : > { %v528_v8 = vadd.f32 %v527_v5, %v1445_v15  ;;  %v648_v9 = vadd.f32 %v647_v6, %v1445_v15  ;;  %v529_v10 = vpop.f32.mrb[14].mxu0  ;;  %v649_v12 = vpop.f32.mrb[14].mxu1 }
 0x121   : > { %833 = vst [vmem:[%s1450_s23 + $0x90] sm:$0xff] %v526_v3  ;;  %905 = vst [vmem:[%s1450_s23 + $0x2d0] sm:$0xff] %v646_v4  ;;  %v530_v14 = vadd.f32 %v529_v10, %v1442_v0  ;;  %v650_v16 = vadd.f32 %v649_v12, %v1442_v0  ;;  %v531_v17 = vpop.f32.mrb[15].mxu0  ;;  %v651_v18 = vpop.f32.mrb[15].mxu1 }
 0x122   : > { %834 = vst [vmem:[%s1450_s23 + $0x98] sm:$0xff] %v528_v8  ;;  %906 = vst [vmem:[%s1450_s23 + $0x2d8] sm:$0xff] %v648_v9  ;;  %v532_v11 = vadd.f32 %v531_v17, %v1445_v15  ;;  %v652_v19 = vadd.f32 %v651_v18, %v1445_v15 }
 0x123   : > { %836 = vst [vmem:[%s1450_s23 + $0xa8] sm:$0xff] %v530_v14  ;;  %908 = vst [vmem:[%s1450_s23 + $0x2e8] sm:$0xff] %v650_v16 }
 0x124   : > { %837 = vst [vmem:[%s1450_s23 + $0xb0] sm:$0xff] %v532_v11  ;;  %909 = vst [vmem:[%s1450_s23 + $0x2f0] sm:$0xff] %v652_v19 }
 0x126   : > { %v535_v21 = vpop.f32.mrb[16].mxu0  ;;  %v1101_v22 = vpop.f32.mrb[16].mxu1 }
 0x127   : > { %v536_v23 = vadd.f32 %v535_v21, %v1442_v0  ;;  %v697_v24 = vadd.f32 %v1101_v22, %v1516_v20  ;;  %v537_v25 = vpop.f32.mrb[17].mxu0  ;;  %v688_v26 = vpop.f32.mrb[17].mxu1 }
 0x128   : > { %v538_v27 = vadd.f32 %v537_v25, %v1445_v15  ;;  %v689_v13 = vadd.f32 %v688_v26, %v1516_v20  ;;  %v539_v28 = vpop.f32.mrb[18].mxu0  ;;  %v1102_v29 = vpop.f32.mrb[18].mxu1 }
 0x129   : > { %839 = vst [vmem:[%s1450_s23 + $0xc0] sm:$0xff] %v536_v23  ;;  %823 = vst [vmem:[%s1450_s23 + $0x40] sm:$0xff] %v697_v24  ;;  %v540_v30 = vadd.f32 %v539_v28, %v1442_v0  ;;  %v700_v31 = vadd.f32 %v1102_v29, %v1516_v20  ;;  %v541_v32 = vpop.f32.mrb[19].mxu0  ;;  %v691_v33 = vpop.f32.mrb[19].mxu1 }
 0x12a   : > { %840 = vst [vmem:[%s1450_s23 + $0xc8] sm:$0xff] %v538_v27  ;;  %817 = vst [vmem:[%s1450_s23 + $0x10] sm:$0xff] %v689_v13  ;;  %v542_v34 = vadd.f32 %v541_v32, %v1445_v15  ;;  %v692_v35 = vadd.f32 %v691_v33, %v1516_v20 }
 0x12b   : > { %842 = vst [vmem:[%s1450_s23 + $0xd8] sm:$0xff] %v540_v30  ;;  %826 = vst [vmem:[%s1450_s23 + $0x58] sm:$0xff] %v700_v31 }
 0x12c   : > { %843 = vst [vmem:[%s1450_s23 + $0xe0] sm:$0xff] %v542_v34  ;;  %820 = vst [vmem:[%s1450_s23 + $0x28] sm:$0xff] %v692_v35 }
 0x12e   : > { %v545_v36 = vpop.f32.mrb[20].mxu0  ;;  %v1105_v37 = vpop.f32.mrb[20].mxu1 }
 0x12f   : > { %v546_v38 = vadd.f32 %v545_v36, %v1442_v0  ;;  %v713_v39 = vadd.f32 %v1105_v37, %v1516_v20  ;;  %v547_v40 = vpop.f32.mrb[21].mxu0  ;;  %v704_v41 = vpop.f32.mrb[21].mxu1 }
 0x130   : > { %v548_v42 = vadd.f32 %v547_v40, %v1445_v15  ;;  %v705_v43 = vadd.f32 %v704_v41, %v1516_v20  ;;  %v549_v44 = vpop.f32.mrb[22].mxu0  ;;  %v1106_v45 = vpop.f32.mrb[22].mxu1 }
 0x131   : > { %845 = vst [vmem:[%s1450_s23 + $0xf0] sm:$0xff] %v546_v38  ;;  %835 = vst [vmem:[%s1450_s23 + $0xa0] sm:$0xff] %v713_v39  ;;  %v550_v46 = vadd.f32 %v549_v44, %v1442_v0  ;;  %v716_v47 = vadd.f32 %v1106_v45, %v1516_v20  ;;  %v551_v48 = vpop.f32.mrb[23].mxu0  ;;  %v707_v49 = vpop.f32.mrb[23].mxu1 }
 0x132   : > { %846 = vst [vmem:[%s1450_s23 + $0xf8] sm:$0xff] %v548_v42  ;;  %829 = vst [vmem:[%s1450_s23 + $0x70] sm:$0xff] %v705_v43  ;;  %v552_v50 = vadd.f32 %v551_v48, %v1445_v15  ;;  %v708_v51 = vadd.f32 %v707_v49, %v1516_v20 }
 0x133   : > { %848 = vst [vmem:[%s1450_s23 + $0x108] sm:$0xff] %v550_v46  ;;  %838 = vst [vmem:[%s1450_s23 + $0xb8] sm:$0xff] %v716_v47 }
 0x134   : > { %849 = vst [vmem:[%s1450_s23 + $0x110] sm:$0xff] %v552_v50  ;;  %832 = vst [vmem:[%s1450_s23 + $0x88] sm:$0xff] %v708_v51 }
 0x136   : > { %v555_v52 = vpop.f32.mrb[24].mxu0  ;;  %v1109_v53 = vpop.f32.mrb[24].mxu1 }
 0x137   : > { %v556_v54 = vadd.f32 %v555_v52, %v1442_v0  ;;  %v729_v55 = vadd.f32 %v1109_v53, %v1516_v20  ;;  %v557_v56 = vpop.f32.mrb[25].mxu0  ;;  %v720_v57 = vpop.f32.mrb[25].mxu1 }
 0x138   : > { %v558_v58 = vadd.f32 %v557_v56, %v1445_v15  ;;  %v721_v59 = vadd.f32 %v720_v57, %v1516_v20  ;;  %v559_v60 = vpop.f32.mrb[26].mxu0  ;;  %v1110_v61 = vpop.f32.mrb[26].mxu1 }
 0x139   : > { %851 = vst [vmem:[%s1450_s23 + $0x120] sm:$0xff] %v556_v54  ;;  %847 = vst [vmem:[%s1450_s23 + $0x100] sm:$0xff] %v729_v55  ;;  %v560_v62 = vadd.f32 %v559_v60, %v1442_v0  ;;  %v732_v63 = vadd.f32 %v1110_v61, %v1516_v20  ;;  %v561_v1 = vpop.f32.mrb[27].mxu0  ;;  %v723_v2 = vpop.f32.mrb[27].mxu1 }
 0x13a   : > { %852 = vst [vmem:[%s1450_s23 + $0x128] sm:$0xff] %v558_v58  ;;  %841 = vst [vmem:[%s1450_s23 + $0xd0] sm:$0xff] %v721_v59  ;;  %v562_v3 = vadd.f32 %v561_v1, %v1445_v15  ;;  %v724_v4 = vadd.f32 %v723_v2, %v1516_v20 }
 0x13b   : > { %854 = vst [vmem:[%s1450_s23 + $0x138] sm:$0xff] %v560_v62  ;;  %850 = vst [vmem:[%s1450_s23 + $0x118] sm:$0xff] %v732_v63 }
 0x13c   : > { %855 = vst [vmem:[%s1450_s23 + $0x140] sm:$0xff] %v562_v3  ;;  %844 = vst [vmem:[%s1450_s23 + $0xe8] sm:$0xff] %v724_v4 }
 0x13e   : > { %v565_v5 = vpop.f32.mrb[28].mxu0  ;;  %v1113_v6 = vpop.f32.mrb[28].mxu1 }
 0x13f   : > { %v566_v7 = vadd.f32 %v565_v5, %v1442_v0  ;;  %v745_v8 = vadd.f32 %v1113_v6, %v1516_v20  ;;  %v567_v9 = vpop.f32.mrb[29].mxu0  ;;  %v736_v10 = vpop.f32.mrb[29].mxu1 }
 0x140   : > { %v568_v12 = vadd.f32 %v567_v9, %v1445_v15  ;;  %v737_v14 = vadd.f32 %v736_v10, %v1516_v20  ;;  %v569_v16 = vpop.f32.mrb[30].mxu0  ;;  %v1114_v17 = vpop.f32.mrb[30].mxu1 }
 0x141   : > { %857 = vst [vmem:[%s1450_s23 + $0x150] sm:$0xff] %v566_v7  ;;  %859 = vst [vmem:[%s1450_s23 + $0x160] sm:$0xff] %v745_v8  ;;  %v570_v18 = vadd.f32 %v569_v16, %v1442_v0  ;;  %v748_v11 = vadd.f32 %v1114_v17, %v1516_v20  ;;  %v571_v19 = vpop.f32.mrb[31].mxu0  ;;  %v739_v21 = vpop.f32.mrb[31].mxu1 }
 0x142   : > { %858 = vst [vmem:[%s1450_s23 + $0x158] sm:$0xff] %v568_v12  ;;  %853 = vst [vmem:[%s1450_s23 + $0x130] sm:$0xff] %v737_v14  ;;  %v572_v22 = vadd.f32 %v571_v19, %v1445_v15  ;;  %v740_v23 = vadd.f32 %v739_v21, %v1516_v20 }
 0x143   : > { %860 = vst [vmem:[%s1450_s23 + $0x168] sm:$0xff] %v570_v18  ;;  %862 = vst [vmem:[%s1450_s23 + $0x178] sm:$0xff] %v748_v11 }
 0x144   : > { %861 = vst [vmem:[%s1450_s23 + $0x170] sm:$0xff] %v572_v22  ;;  %856 = vst [vmem:[%s1450_s23 + $0x148] sm:$0xff] %v740_v23 }
 0x146   : > { %v575_v24 = vpop.f32.mrb[32].mxu0  ;;  %v1117_v25 = vpop.f32.mrb[32].mxu1 }
 0x147   : > { %v576_v26 = vadd.f32 %v575_v24, %v1442_v0  ;;  %v761_v27 = vadd.f32 %v1117_v25, %v1516_v20  ;;  %v577_v13 = vpop.f32.mrb[33].mxu0  ;;  %v752_v28 = vpop.f32.mrb[33].mxu1 }
 0x148   : > { %v578_v29 = vadd.f32 %v577_v13, %v1445_v15  ;;  %v753_v30 = vadd.f32 %v752_v28, %v1516_v20  ;;  %v579_v31 = vpop.f32.mrb[34].mxu0  ;;  %v1118_v32 = vpop.f32.mrb[34].mxu1 }
 0x149   : > { %863 = vst [vmem:[%s1450_s23 + $0x180] sm:$0xff] %v576_v26  ;;  %871 = vst [vmem:[%s1450_s23 + $0x1c0] sm:$0xff] %v761_v27  ;;  %v580_v33 = vadd.f32 %v579_v31, %v1442_v0  ;;  %v764_v34 = vadd.f32 %v1118_v32, %v1516_v20  ;;  %v581_v35 = vpop.f32.mrb[35].mxu0  ;;  %v755_v36 = vpop.f32.mrb[35].mxu1 }
 0x14a   : > { %864 = vst [vmem:[%s1450_s23 + $0x188] sm:$0xff] %v578_v29  ;;  %865 = vst [vmem:[%s1450_s23 + $0x190] sm:$0xff] %v753_v30  ;;  %v582_v37 = vadd.f32 %v581_v35, %v1445_v15  ;;  %v756_v38 = vadd.f32 %v755_v36, %v1516_v20 }
 0x14b   : > { %866 = vst [vmem:[%s1450_s23 + $0x198] sm:$0xff] %v580_v33  ;;  %874 = vst [vmem:[%s1450_s23 + $0x1d8] sm:$0xff] %v764_v34 }
 0x14c   : > { %867 = vst [vmem:[%s1450_s23 + $0x1a0] sm:$0xff] %v582_v37  ;;  %868 = vst [vmem:[%s1450_s23 + $0x1a8] sm:$0xff] %v756_v38 }
 0x14e   : > { %v585_v39 = vpop.f32.mrb[36].mxu0  ;;  %v1121_v40 = vpop.f32.mrb[36].mxu1 }
 0x14f   : > { %v586_v41 = vadd.f32 %v585_v39, %v1442_v0  ;;  %v777_v42 = vadd.f32 %v1121_v40, %v1516_v20  ;;  %v587_v43 = vpop.f32.mrb[37].mxu0  ;;  %v768_v44 = vpop.f32.mrb[37].mxu1 }
 0x150   : > { %v588_v45 = vadd.f32 %v587_v43, %v1445_v15  ;;  %v769_v46 = vadd.f32 %v768_v44, %v1516_v20  ;;  %v589_v47 = vpop.f32.mrb[38].mxu0  ;;  %v1122_v48 = vpop.f32.mrb[38].mxu1 }
 0x151   : > { %869 = vst [vmem:[%s1450_s23 + $0x1b0] sm:$0xff] %v586_v41  ;;  %883 = vst [vmem:[%s1450_s23 + $0x220] sm:$0xff] %v777_v42  ;;  %v590_v49 = vadd.f32 %v589_v47, %v1442_v0  ;;  %v780_v50 = vadd.f32 %v1122_v48, %v1516_v20  ;;  %v591_v51 = vpop.f32.mrb[39].mxu0  ;;  %v771_v52 = vpop.f32.mrb[39].mxu1 }
 0x152   : > { %870 = vst [vmem:[%s1450_s23 + $0x1b8] sm:$0xff] %v588_v45  ;;  %877 = vst [vmem:[%s1450_s23 + $0x1f0] sm:$0xff] %v769_v46  ;;  %v592_v53 = vadd.f32 %v591_v51, %v1445_v15  ;;  %v772_v54 = vadd.f32 %v771_v52, %v1516_v20 }
 0x153   : > { %872 = vst [vmem:[%s1450_s23 + $0x1c8] sm:$0xff] %v590_v49  ;;  %886 = vst [vmem:[%s1450_s23 + $0x238] sm:$0xff] %v780_v50 }
 0x154   : > { %873 = vst [vmem:[%s1450_s23 + $0x1d0] sm:$0xff] %v592_v53  ;;  %880 = vst [vmem:[%s1450_s23 + $0x208] sm:$0xff] %v772_v54 }
 0x156   : > { %v595_v55 = vpop.f32.mrb[40].mxu0  ;;  %v1125_v56 = vpop.f32.mrb[40].mxu1 }
 0x157   : > { %v596_v57 = vadd.f32 %v595_v55, %v1442_v0  ;;  %v793_v58 = vadd.f32 %v1125_v56, %v1516_v20  ;;  %v597_v59 = vpop.f32.mrb[41].mxu0  ;;  %v784_v60 = vpop.f32.mrb[41].mxu1 }
 0x158   : > { %v598_v61 = vadd.f32 %v597_v59, %v1445_v15  ;;  %v785_v62 = vadd.f32 %v784_v60, %v1516_v20  ;;  %v599_v63 = vpop.f32.mrb[42].mxu0  ;;  %v1126_v1 = vpop.f32.mrb[42].mxu1 }
 0x159   : > { %875 = vst [vmem:[%s1450_s23 + $0x1e0] sm:$0xff] %v596_v57  ;;  %895 = vst [vmem:[%s1450_s23 + $0x280] sm:$0xff] %v793_v58  ;;  %v600_v2 = vadd.f32 %v599_v63, %v1442_v0  ;;  %v796_v3 = vadd.f32 %v1126_v1, %v1516_v20  ;;  %v601_v4 = vpop.f32.mrb[43].mxu0  ;;  %v787_v5 = vpop.f32.mrb[43].mxu1 }
 0x15a   : > { %876 = vst [vmem:[%s1450_s23 + $0x1e8] sm:$0xff] %v598_v61  ;;  %889 = vst [vmem:[%s1450_s23 + $0x250] sm:$0xff] %v785_v62  ;;  %v602_v6 = vadd.f32 %v601_v4, %v1445_v15  ;;  %v788_v7 = vadd.f32 %v787_v5, %v1516_v20 }
 0x15b   : > { %878 = vst [vmem:[%s1450_s23 + $0x1f8] sm:$0xff] %v600_v2  ;;  %898 = vst [vmem:[%s1450_s23 + $0x298] sm:$0xff] %v796_v3 }
 0x15c   : > { %879 = vst [vmem:[%s1450_s23 + $0x200] sm:$0xff] %v602_v6  ;;  %892 = vst [vmem:[%s1450_s23 + $0x268] sm:$0xff] %v788_v7 }
 0x15e   : > { %v605_v8 = vpop.f32.mrb[44].mxu0  ;;  %v1129_v9 = vpop.f32.mrb[44].mxu1 }
 0x15f   : > { %v606_v10 = vadd.f32 %v605_v8, %v1442_v0  ;;  %v809_v12 = vadd.f32 %v1129_v9, %v1516_v20  ;;  %v607_v14 = vpop.f32.mrb[45].mxu0  ;;  %v800_v16 = vpop.f32.mrb[45].mxu1 }
 0x160   : > { %v608_v17 = vadd.f32 %v607_v14, %v1445_v15  ;;  %v801_v18 = vadd.f32 %v800_v16, %v1516_v20  ;;  %v609_v11 = vpop.f32.mrb[46].mxu0  ;;  %v1130_v19 = vpop.f32.mrb[46].mxu1 }
 0x161   : > { %881 = vst [vmem:[%s1450_s23 + $0x210] sm:$0xff] %v606_v10  ;;  %907 = vst [vmem:[%s1450_s23 + $0x2e0] sm:$0xff] %v809_v12  ;;  %v610_v21 = vadd.f32 %v609_v11, %v1442_v0  ;;  %v812_v22 = vadd.f32 %v1130_v19, %v1516_v20  ;;  %v611_v23 = vpop.f32.mrb[47].mxu0  ;;  %v803_v24 = vpop.f32.mrb[47].mxu1 }
 0x162   : > { %882 = vst [vmem:[%s1450_s23 + $0x218] sm:$0xff] %v608_v17  ;;  %901 = vst [vmem:[%s1450_s23 + $0x2b0] sm:$0xff] %v801_v18  ;;  %v612_v25 = vadd.f32 %v611_v23, %v1445_v15  ;;  %v804_v26 = vadd.f32 %v803_v24, %v1516_v20 }
 0x163   : > { %884 = vst [vmem:[%s1450_s23 + $0x228] sm:$0xff] %v610_v21  ;;  %910 = vst [vmem:[%s1450_s23 + $0x2f8] sm:$0xff] %v812_v22 }
 0x164   : > { %885 = vst [vmem:[%s1450_s23 + $0x230] sm:$0xff] %v612_v25  ;;  %904 = vst [vmem:[%s1450_s23 + $0x2c8] sm:$0xff] %v804_v26 }
 0x165 PF: > { %s13_s14 = sadd.s32 1, %s1229_s14   ;;  %s1661_s12 = smov %s1225_s13 }
 0x166   : > { %p10_p5 = scmp.ge.s32.totalorder %s13_s14, 4   ;;  %s1662_s13 = smov %s1664_s15 }
 0x168   :  { %12 = sbr.rel (!%p10_p5) target bundleno = 2 (0x2), region = 68 }

// kernel: decoder_forward.9
= control target key start
LH: loop header
LB: loop body
LE: loop exit
PB: predicated region body
PF: predicated region fallthrough
CT: control target
= control target key end

     0   :  { %s2493_s18 = smov 0   ;;  %s2495_s19 = smov 0   ;;  %s3057_s0 = inlined_call_operand.vmem [shape: bf16[256,128], index: 0, kind: input, shape index: {}]   ;;  %s3058_s1 = inlined_call_operand.vmem [shape: bf16[256,128], index: 1, kind: input, shape index: {}]   ;;  %s3059_s2 = inlined_call_operand.vmem [shape: bf16[2,128,384], index: 2, kind: input, shape index: {}]   ;;  %s3060_s3 = inlined_call_operand.vmem [shape: bf16[2,128,384], index: 3, kind: input, shape index: {}]   ;;  %s3061_s4 = inlined_call_operand.vmem [shape: f32[2,1,384], index: 4, kind: input, shape index: {}]   ;;  %s3062_s5 = inlined_call_operand.vmem [shape: f32[2,256,384], index: 5, kind: output, shape index: {}]  }
   0x1   :  { %s2497_s20 = smov 0  }
   0x2 LB: > { %s27_s21 = sadd.s32 1, %s2456_s19  ;;  %p1972_p0 = scmp.ge.s32.totalorder %s2460_s20, 1  ;;  %s2460_s20 = sphi %s2497_s20, %s15_s20   ;;  %s2456_s19 = sphi %s2495_s19, %s3064_s19   ;;  %s2452_s18 = sphi %s2493_s18, %s3063_s18  }
   0x3   : > { %p29_p1 = scmp.ge.s32.totalorder %s27_s21, 2  ;;  %p242_p2 = scmp.lt.s32.totalorder %s2460_s20, 3 }
   0x5   : > { %s3066_s21 = smov (%p29_p1, %s27_s21), 0  ;;  %p243_p3 = pnand %p1972_p0, %p242_p2 }
   0x6   : > { %p306_p4 = scmp.lt.s32.totalorder (!%p243_p3), %s2452_s18, 1  ;;  %v2462_v0 = vmov (!%p243_p3), 0   ;;  %v2547_v19 = vld [vmem:[%s3058_s1] sm:$0xff] (!%p243_p3)   ;;  %v2567_v27 = vld [vmem:[%s3058_s1 + $0x8] sm:$0xff] (!%p243_p3)   ;;  %v2585_v33 = vld [vmem:[%s3058_s1 + $0x10] sm:$0xff] (!%p243_p3)  }
   0x7   : > { %246 = sbr.rel (%p243_p3) target bundleno = 455 (0x1c7), region = 40  ;;  %716 = vmatprep.mubr.bf16.mxu0 (!%p243_p3), %v2462_v0  ;;  %796 = vmatprep.mubr.bf16.mxu1 (!%p243_p3), %v2462_v0  ;;  %v2552_v20 = vld [vmem:[%s3058_s1 + $0x40] sm:$0xff] (!%p243_p3)   ;;  %v2572_v28 = vld [vmem:[%s3058_s1 + $0x48] sm:$0xff] (!%p243_p3)   ;;  %v2592_v36 = vld [vmem:[%s3058_s1 + $0x50] sm:$0xff] (!%p243_p3)  }
   0x8   : > { %v2605_v41 = vld [vmem:[%s3058_s1 + $0x18] sm:$0xff] (!%p243_p3)   ;;  %v2390_v50 = vld [vmem:[%s3058_s1 + $0x20] sm:$0xff] (!%p243_p3)   ;;  %v2396_v52 = vld [vmem:[%s3058_s1 + $0x28] sm:$0xff] (!%p243_p3)  }
   0x9   : > { %v2612_v44 = vld [vmem:[%s3058_s1 + $0x58] sm:$0xff] (!%p243_p3)   ;;  %v2629_v51 = vld [vmem:[%s3058_s1 + $0x60] sm:$0xff] (!%p243_p3)   ;;  %v2640_v53 = vld [vmem:[%s3058_s1 + $0x68] sm:$0xff] (!%p243_p3)  }
   0xa   : > { %v2402_v54 = vld [vmem:[%s3058_s1 + $0x30] sm:$0xff] (!%p243_p3)   ;;  %v2408_v56 = vld [vmem:[%s3058_s1 + $0x38] sm:$0xff] (!%p243_p3)   ;;  %v2414_v58 = vld [vmem:[%s3057_s0] sm:$0xff] (!%p243_p3)  }
   0xb   : > { %v2651_v55 = vld [vmem:[%s3058_s1 + $0x70] sm:$0xff] (!%p243_p3)   ;;  %v2409_v57 = vld [vmem:[%s3058_s1 + $0x78] sm:$0xff] (!%p243_p3)   ;;  %v2416_v61 = vld [vmem:[%s3057_s0 + $0x8] sm:$0xff] (!%p243_p3)  }
   0xe   : > { %s3068_s18 = smov (!%p306_p4, %s2452_s18), 1 }
   0xf   : > { %s2314_s22 = smul.u32 192, %s3068_s18 }
  0x10   : > { %s2315_s6 = smul.u32 3, %s3068_s18 }
  0x11   : > { %s2519_s25 = scalar_lea.vmem %s3060_s3, %s2314_s22  ;;  %s2531_s28 = scalar_lea.vmem %s3059_s2, %s2314_s22 }
  0x12   : > { %v2342_v1 = vld [vmem:[%s2519_s25 + $0x4] ss:$12 sps:$4 sm:$0xff]   ;;  %v2344_v2 = vld [vmem:[%s2519_s25] ss:$12 sps:$4 sm:$0xff]   ;;  %v2345_v3 = vld [vmem:[%s2519_s25 + $0x1c] ss:$12 sps:$4 sm:$0xff]   ;;  %s319_s9 = scalar_lea.vmem %s3061_s4, %s2315_s6 }
  0x13   : > { %684 = vmatprep.subr.bf16.mxu0 %v2342_v1  ;;  %2202 = vmatprep.subr.bf16.mxu1 %v2342_v1  ;;  %v2347_v4 = vld [vmem:[%s2519_s25 + $0x18] ss:$12 sps:$4 sm:$0xff]   ;;  %v2348_v5 = vld [vmem:[%s2519_s25 + $0x34] ss:$12 sps:$4 sm:$0xff]   ;;  %v2350_v6 = vld [vmem:[%s2519_s25 + $0x30] ss:$12 sps:$4 sm:$0xff]  }
  0x14   : > { %685 = vmatpush1.bf16.msra.mxu0 %v2344_v2  ;;  %2210 = vmatpush1.bf16.msra.mxu1 %v2344_v2  ;;  %v2351_v7 = vld [vmem:[%s2519_s25 + $0x4c] ss:$12 sps:$4 sm:$0xff]   ;;  %v2353_v8 = vld [vmem:[%s2519_s25 + $0x48] ss:$12 sps:$4 sm:$0xff]   ;;  %v2354_v9 = vld [vmem:[%s2519_s25 + $0x64] ss:$12 sps:$4 sm:$0xff]  }
  0x15   : > { %686 = vmatprep.subr.bf16.mxu0 %v2345_v3  ;;  %2203 = vmatprep.subr.bf16.mxu1 %v2345_v3  ;;  %v2356_v10 = vld [vmem:[%s2519_s25 + $0x60] ss:$12 sps:$4 sm:$0xff]   ;;  %v2357_v11 = vld [vmem:[%s2519_s25 + $0x7c] ss:$12 sps:$4 sm:$0xff]   ;;  %v2359_v12 = vld [vmem:[%s2519_s25 + $0x78] ss:$12 sps:$4 sm:$0xff]  }
  0x16   : > { %v2360_v13 = vld [vmem:[%s2519_s25 + $0x94] ss:$12 sps:$4 sm:$0xff]   ;;  %v2362_v14 = vld [vmem:[%s2519_s25 + $0x90] ss:$12 sps:$4 sm:$0xff]   ;;  %v2363_v15 = vld [vmem:[%s2519_s25 + $0xac] ss:$12 sps:$4 sm:$0xff]  }
  0x17   : > { %v2365_v16 = vld [vmem:[%s2519_s25 + $0xa8] ss:$12 sps:$4 sm:$0xff]   ;;  %v2370_v17 = vld [vmem:[%s2531_s28 + $0x4] ss:$12 sps:$4 sm:$0xff]   ;;  %v2368_v21 = vld [vmem:[%s2531_s28] ss:$12 sps:$4 sm:$0xff]  }
  0x18   : > { %687 = vmatpush1.bf16.msra.mxu0 %v2347_v4  ;;  %2211 = vmatpush1.bf16.msra.mxu1 %v2347_v4  ;;  %v2371_v18 = vld [vmem:[%s2519_s25 + $0x8] ss:$12 sps:$4 sm:$0xff]   ;;  %v2377_v23 = vld [vmem:[%s2519_s25 + $0x20] ss:$12 sps:$4 sm:$0xff]   ;;  %v2374_v24 = vld [vmem:[%s2531_s28 + $0x18] ss:$12 sps:$4 sm:$0xff]  }
  0x19   : > { %688 = vmatprep.subr.bf16.mxu0 %v2348_v5  ;;  %2204 = vmatprep.subr.bf16.mxu1 %v2348_v5  ;;  %v2376_v22 = vld [vmem:[%s2531_s28 + $0x1c] ss:$12 sps:$4 sm:$0xff]   ;;  %v2382_v25 = vld [vmem:[%s2531_s28 + $0x34] ss:$12 sps:$4 sm:$0xff]   ;;  %v2383_v26 = vld [vmem:[%s2519_s25 + $0x38] ss:$12 sps:$4 sm:$0xff]  }
  0x1a   : > { %v2380_v29 = vld [vmem:[%s2531_s28 + $0x30] ss:$12 sps:$4 sm:$0xff]   ;;  %v2388_v30 = vld [vmem:[%s2531_s28 + $0x4c] ss:$12 sps:$4 sm:$0xff]   ;;  %v2386_v32 = vld [vmem:[%s2531_s28 + $0x48] ss:$12 sps:$4 sm:$0xff]  }
  0x1b   : > { %v2389_v31 = vld [vmem:[%s2519_s25 + $0x50] ss:$12 sps:$4 sm:$0xff]   ;;  %v2395_v35 = vld [vmem:[%s2519_s25 + $0x68] ss:$12 sps:$4 sm:$0xff]   ;;  %v2392_v37 = vld [vmem:[%s2531_s28 + $0x60] ss:$12 sps:$4 sm:$0xff]  }
  0x1c   : > { %689 = vmatpush1.bf16.msra.mxu0 %v2350_v6  ;;  %2212 = vmatpush1.bf16.msra.mxu1 %v2350_v6  ;;  %v2394_v34 = vld [vmem:[%s2531_s28 + $0x64] ss:$12 sps:$4 sm:$0xff]   ;;  %v2400_v38 = vld [vmem:[%s2531_s28 + $0x7c] ss:$12 sps:$4 sm:$0xff]   ;;  %v2401_v39 = vld [vmem:[%s2519_s25 + $0x80] ss:$12 sps:$4 sm:$0xff]  }
  0x1d   : > { %690 = vmatprep.subr.bf16.mxu0 %v2351_v7  ;;  %2205 = vmatprep.subr.bf16.mxu1 %v2351_v7  ;;  %v2398_v40 = vld [vmem:[%s2531_s28 + $0x78] ss:$12 sps:$4 sm:$0xff]   ;;  %v2406_v42 = vld [vmem:[%s2531_s28 + $0x94] ss:$12 sps:$4 sm:$0xff]   ;;  %v2404_v45 = vld [vmem:[%s2531_s28 + $0x90] ss:$12 sps:$4 sm:$0xff]  }
  0x1e   : > { %v2407_v43 = vld [vmem:[%s2519_s25 + $0x98] ss:$12 sps:$4 sm:$0xff]   ;;  %v2413_v47 = vld [vmem:[%s2519_s25 + $0xb0] ss:$12 sps:$4 sm:$0xff]   ;;  %v2410_v48 = vld [vmem:[%s2531_s28 + $0xa8] ss:$12 sps:$4 sm:$0xff]  }
  0x1f   : > { %v2412_v46 = vld [vmem:[%s2531_s28 + $0xac] ss:$12 sps:$4 sm:$0xff]   ;;  %v2415_v49 = vld [vmem:[%s2531_s28 + $0x8] ss:$12 sps:$4 sm:$0xff]   ;;  %v2421_v62 = vld [vmem:[%s2531_s28 + $0x50] ss:$12 sps:$4 sm:$0xff]  }
  0x20   : > { %691 = vmatpush1.bf16.msra.mxu0 %v2353_v8  ;;  %2213 = vmatpush1.bf16.msra.mxu1 %v2353_v8  ;;  %v2417_v59 = vld [vmem:[%s2531_s28 + $0x20] ss:$12 sps:$4 sm:$0xff]   ;;  %v2419_v60 = vld [vmem:[%s2531_s28 + $0x38] ss:$12 sps:$4 sm:$0xff]   ;;  %v2423_v63 = vld [vmem:[%s2531_s28 + $0x68] ss:$12 sps:$4 sm:$0xff]  }
  0x21   : > { %692 = vmatprep.subr.bf16.mxu0 %v2354_v9  ;;  %2206 = vmatprep.subr.bf16.mxu1 %v2354_v9  ;;  %v2418_v1 = vld [vmem:[%s3057_s0 + $0x10] sm:$0xff]   ;;  %v2425_v2 = vld [vmem:[%s2531_s28 + $0x80] ss:$12 sps:$4 sm:$0xff]   ;;  %v2427_v3 = vld [vmem:[%s2531_s28 + $0x98] ss:$12 sps:$4 sm:$0xff]   ;;  %s2316_s10 = smul.u32 768, %s3068_s18 }
  0x22   : > { %v2420_v4 = vld [vmem:[%s3057_s0 + $0x18] sm:$0xff]   ;;  %v2422_v6 = vld [vmem:[%s3057_s0 + $0x20] sm:$0xff]   ;;  %v2424_v7 = vld [vmem:[%s3057_s0 + $0x28] sm:$0xff]  }
  0x23   : > { %v2429_v5 = vld [vmem:[%s2531_s28 + $0xb0] ss:$12 sps:$4 sm:$0xff]   ;;  %s2822_s13 = scalar_lea.vmem %s3062_s5, %s2316_s10 }
  0x24   : > { %693 = vmatpush1.bf16.msra.mxu0 %v2356_v10  ;;  %2214 = vmatpush1.bf16.msra.mxu1 %v2356_v10  ;;  %v2426_v8 = vld [vmem:[%s3057_s0 + $0x30] sm:$0xff]   ;;  %v2428_v9 = vld [vmem:[%s3057_s0 + $0x38] sm:$0xff]   ;;  %v2430_v10 = vld [vmem:[%s3057_s0 + $0x40] sm:$0xff]  }
  0x25   : > { %694 = vmatprep.subr.bf16.mxu0 %v2357_v11  ;;  %2207 = vmatprep.subr.bf16.mxu1 %v2357_v11  ;;  %v2431_v11 = vld [vmem:[%s3057_s0 + $0x48] sm:$0xff]  }
  0x28   : > { %695 = vmatpush1.bf16.msra.mxu0 %v2359_v12  ;;  %2215 = vmatpush1.bf16.msra.mxu1 %v2359_v12  ;;  %v2432_v12 = vld [vmem:[%s3057_s0 + $0x50] sm:$0xff]  }
  0x29   : > { %696 = vmatprep.subr.bf16.mxu0 %v2360_v13  ;;  %2208 = vmatprep.subr.bf16.mxu1 %v2360_v13  ;;  %v2433_v13 = vld [vmem:[%s3057_s0 + $0x58] sm:$0xff]  }
  0x2c   : > { %697 = vmatpush1.bf16.msra.mxu0 %v2362_v14  ;;  %2216 = vmatpush1.bf16.msra.mxu1 %v2362_v14  ;;  %v2434_v14 = vld [vmem:[%s3057_s0 + $0x60] sm:$0xff]  }
  0x2d   : > { %698 = vmatprep.subr.bf16.mxu0 %v2363_v15  ;;  %2209 = vmatprep.subr.bf16.mxu1 %v2363_v15  ;;  %v2435_v15 = vld [vmem:[%s3057_s0 + $0x68] sm:$0xff]  }
  0x30   : > { %699 = vmatpush1.bf16.msra.mxu0 %v2365_v16  ;;  %2217 = vmatpush1.bf16.msra.mxu1 %v2365_v16  ;;  %v2436_v16 = vld [vmem:[%s3057_s0 + $0x70] sm:$0xff]  }
  0x31   : > { %1262 = vmatprep.subr.bf16.mxu0 %v2370_v17  ;;  %2106 = vmatprep.subr.bf16.mxu1 %v2371_v18  ;;  %v2437_v17 = vld [vmem:[%s3057_s0 + $0x78] sm:$0xff]  }
  0x33   : > { %717 = vmatmul.mubr.bf16.vlgmr.msra.gmra.mrb[0].mxu0 %v2547_v19  ;;  %797 = vmatmul.mubr.bf16.vlgmr.msra.gmra.mrb[0].mxu1 %v2552_v20 }
  0x34   : > { %1263 = vmatpush1.bf16.msra.mxu0 %v2368_v21  ;;  %2107 = vmatpush3.bf16.msra.mxu1 %v2371_v18  ;;  %v1618_v18 = vlaneseq  ;;  %v1616_v21 = vld [vmem:[%s319_s9] sm:$0x7] }
  0x35   : > { %726 = vmatprep.mubr.bf16.mxu0 %v2462_v0  ;;  %806 = vmatprep.mubr.bf16.mxu1 %v2462_v0 }
  0x36   : > { %1264 = vmatprep.subr.bf16.mxu0 %v2376_v22  ;;  %2108 = vmatprep.subr.bf16.mxu1 %v2377_v23 }
  0x38   : > { %1265 = vmatpush1.bf16.msra.mxu0 %v2374_v24  ;;  %2109 = vmatpush3.bf16.msra.mxu1 %v2377_v23 }
  0x39   : > { %1266 = vmatprep.subr.bf16.mxu0 %v2382_v25  ;;  %2110 = vmatprep.subr.bf16.mxu1 %v2383_v26 }
  0x3b   : > { %727 = vmatmul.mubr.bf16.gmra.mrb[4].mxu0 %v2567_v27  ;;  %807 = vmatmul.mubr.bf16.gmra.mrb[4].mxu1 %v2572_v28 }
  0x3c   : > { %736 = vmatprep.mubr.bf16.mxu0 %v2462_v0  ;;  %816 = vmatprep.mubr.bf16.mxu1 %v2462_v0 }
  0x3d   : > { %1267 = vmatpush1.bf16.msra.mxu0 %v2380_v29  ;;  %2111 = vmatpush3.bf16.msra.mxu1 %v2383_v26 }
  0x3e   : > { %1268 = vmatprep.subr.bf16.mxu0 %v2388_v30  ;;  %2112 = vmatprep.subr.bf16.mxu1 %v2389_v31 }
  0x41   : > { %1269 = vmatpush1.bf16.msra.mxu0 %v2386_v32  ;;  %2113 = vmatpush3.bf16.msra.mxu1 %v2389_v31 }
  0x42   : > { %1270 = vmatprep.subr.bf16.mxu0 %v2394_v34  ;;  %2114 = vmatprep.subr.bf16.mxu1 %v2395_v35 }
  0x43   : > { %737 = vmatmul.mubr.bf16.gmra.mrb[8].mxu0 %v2585_v33  ;;  %817 = vmatmul.mubr.bf16.gmra.mrb[8].mxu1 %v2592_v36 }
  0x44   : > { %746 = vmatprep.mubr.bf16.mxu0 %v2462_v0  ;;  %826 = vmatprep.mubr.bf16.mxu1 %v2462_v0 }
  0x45   : > { %1271 = vmatpush1.bf16.msra.mxu0 %v2392_v37  ;;  %2115 = vmatpush3.bf16.msra.mxu1 %v2395_v35 }
  0x46   : > { %1272 = vmatprep.subr.bf16.mxu0 %v2400_v38  ;;  %2116 = vmatprep.subr.bf16.mxu1 %v2401_v39 }
  0x49   : > { %1273 = vmatpush1.bf16.msra.mxu0 %v2398_v40  ;;  %2117 = vmatpush3.bf16.msra.mxu1 %v2401_v39 }
  0x4a   : > { %1274 = vmatprep.subr.bf16.mxu0 %v2406_v42  ;;  %2118 = vmatprep.subr.bf16.mxu1 %v2407_v43 }
  0x4b   : > { %747 = vmatmul.mubr.bf16.gmra.mrb[12].mxu0 %v2605_v41  ;;  %827 = vmatmul.mubr.bf16.gmra.mrb[12].mxu1 %v2612_v44 }
  0x4c   : > { %756 = vmatprep.mubr.bf16.mxu0 %v2462_v0  ;;  %836 = vmatprep.mubr.bf16.mxu1 %v2462_v0 }
  0x4d   : > { %1275 = vmatpush1.bf16.msra.mxu0 %v2404_v45  ;;  %2119 = vmatpush3.bf16.msra.mxu1 %v2407_v43 }
  0x4e   : > { %1276 = vmatprep.subr.bf16.mxu0 %v2412_v46  ;;  %2120 = vmatprep.subr.bf16.mxu1 %v2413_v47 }
  0x51   : > { %1277 = vmatpush1.bf16.msra.mxu0 %v2410_v48  ;;  %2121 = vmatpush3.bf16.msra.mxu1 %v2413_v47 }
  0x52   : > { %2154 = vmatprep.subr.bf16.mxu1 %v2415_v49 }
  0x53   : > { %757 = vmatmul.mubr.bf16.gmra.mrb[16].mxu0 %v2390_v50  ;;  %837 = vmatmul.mubr.bf16.gmra.mrb[16].mxu1 %v2629_v51 }
  0x54   : > { %766 = vmatprep.mubr.bf16.mxu0 %v2462_v0  ;;  %846 = vmatprep.mubr.bf16.mxu1 %v2462_v0 }
  0x5b   : > { %767 = vmatmul.mubr.bf16.gmra.mrb[20].mxu0 %v2396_v52  ;;  %847 = vmatmul.mubr.bf16.gmra.mrb[20].mxu1 %v2640_v53 }
  0x5c   : > { %776 = vmatprep.mubr.bf16.mxu0 %v2462_v0  ;;  %856 = vmatprep.mubr.bf16.mxu1 %v2462_v0 }
  0x63   : > { %777 = vmatmul.mubr.bf16.gmra.mrb[24].mxu0 %v2402_v54  ;;  %857 = vmatmul.mubr.bf16.gmra.mrb[24].mxu1 %v2651_v55 }
  0x64   : > { %786 = vmatprep.mubr.bf16.mxu0 %v2462_v0  ;;  %866 = vmatprep.mubr.bf16.mxu1 %v2462_v0 }
  0x6b   : > { %787 = vmatmul.mubr.bf16.gmra.mrb[28].mxu0 %v2408_v56  ;;  %867 = vmatmul.mubr.bf16.gmra.mrb[28].mxu1 %v2409_v57 }
  0x6c   : > { %2122 = vmatprep.mubr.bf16.mxu1 %v2547_v19  ;;  %1294 = vmatprep.mubr.bf16.mxu0 %v2462_v0  ;;  %v1619_v19 = vshrl.u32 %v1618_v18, 7 }
  0x73   : > { %2123 = vmatmul.mubr.bf16.vlgmr.msra.gmra.mrb[32].mxu1 %v2567_v27  ;;  %1295 = vmatmul.mubr.bf16.vlgmr.msra.gmra.mrb[0].mxu0 %v2414_v58 }
  0x74   : > { %2155 = vmatpush3.bf16.msra.mxu1 %v2415_v49  ;;  %2126 = vmatprep.mubr.bf16.mxu1 %v2585_v33 }
  0x75   : > { %1304 = vmatprep.mubr.bf16.mxu0 %v2462_v0  ;;  %2156 = vmatprep.subr.bf16.mxu1 %v2417_v59 }
  0x78   : > { %2157 = vmatpush3.bf16.msra.mxu1 %v2417_v59 }
  0x79   : > { %2158 = vmatprep.subr.bf16.mxu1 %v2419_v60 }
  0x7b   : > { %2127 = vmatmul.mubr.bf16.gmra.mrb[36].mxu1 %v2605_v41  ;;  %1305 = vmatmul.mubr.bf16.gmra.mrb[4].mxu0 %v2416_v61 }
  0x7c   : > { %2130 = vmatprep.mubr.bf16.mxu1 %v2390_v50  ;;  %1314 = vmatprep.mubr.bf16.mxu0 %v2462_v0 }
  0x7d   : > { %2159 = vmatpush3.bf16.msra.mxu1 %v2419_v60 }
  0x7e   : > { %2160 = vmatprep.subr.bf16.mxu1 %v2421_v62 }
  0x81   : > { %2161 = vmatpush3.bf16.msra.mxu1 %v2421_v62 }
  0x82   : > { %2162 = vmatprep.subr.bf16.mxu1 %v2423_v63 }
  0x83   : > { %2131 = vmatmul.mubr.bf16.gmra.mrb[40].mxu1 %v2396_v52  ;;  %1315 = vmatmul.mubr.bf16.gmra.mrb[8].mxu0 %v2418_v1  ;;  %v1620_v52 = vsub.s32 0, %v1619_v19 }
  0x84   : > { %2134 = vmatprep.mubr.bf16.mxu1 %v2402_v54  ;;  %1324 = vmatprep.mubr.bf16.mxu0 %v2462_v0  ;;  %v1624_v54 = vsub.s32 1, %v1619_v19 }
  0x85   : > { %2163 = vmatpush3.bf16.msra.mxu1 %v2423_v63 }
  0x86   : > { %2164 = vmatprep.subr.bf16.mxu1 %v2425_v2 }
  0x89   : > { %2165 = vmatpush3.bf16.msra.mxu1 %v2425_v2 }
  0x8a   : > { %2166 = vmatprep.subr.bf16.mxu1 %v2427_v3 }
  0x8b   : > { %2135 = vmatmul.mubr.bf16.gmra.mrb[44].mxu1 %v2408_v56  ;;  %1325 = vmatmul.mubr.bf16.gmra.mrb[12].mxu0 %v2420_v4  ;;  %v2815_v56 = vrot.slane %v1616_v21, %v1620_v52 }
  0x8c   : > { %2138 = vmatprep.mubr.bf16.mxu1 %v2552_v20  ;;  %1334 = vmatprep.mubr.bf16.mxu0 %v2462_v0  ;;  %v1628_v20 = vsub.s32 2, %v1619_v19 }
  0x8d   : > { %2167 = vmatpush3.bf16.msra.mxu1 %v2427_v3 }
  0x8e   : > { %2168 = vmatprep.subr.bf16.mxu1 %v2429_v5  ;;  %v2748_v22 = vrot.slane %v1616_v21, %v1628_v20 }
  0x91   : > { %2169 = vmatpush3.bf16.msra.mxu1 %v2429_v5 }
  0x93   : > { %2139 = vmatmul.mubr.bf16.gmra.mrb[48].mxu1 %v2572_v28  ;;  %1335 = vmatmul.mubr.bf16.gmra.mrb[16].mxu0 %v2422_v6 }
  0x94   : > { %2142 = vmatprep.mubr.bf16.mxu1 %v2592_v36  ;;  %1344 = vmatprep.mubr.bf16.mxu0 %v2462_v0 }
  0x9b   : > { %2143 = vmatmul.mubr.bf16.gmra.mrb[52].mxu1 %v2612_v44  ;;  %1345 = vmatmul.mubr.bf16.gmra.mrb[20].mxu0 %v2424_v7 }
  0x9c   : > { %2146 = vmatprep.mubr.bf16.mxu1 %v2629_v51  ;;  %1354 = vmatprep.mubr.bf16.mxu0 %v2462_v0 }
  0xa3   : > { %2147 = vmatmul.mubr.bf16.gmra.mrb[56].mxu1 %v2640_v53  ;;  %1355 = vmatmul.mubr.bf16.gmra.mrb[24].mxu0 %v2426_v8 }
  0xa4   : > { %2150 = vmatprep.mubr.bf16.mxu1 %v2651_v55  ;;  %1364 = vmatprep.mubr.bf16.mxu0 %v2462_v0 }
  0xab   : > { %2151 = vmatmul.mubr.bf16.gmra.mrb[60].mxu1 %v2409_v57  ;;  %1365 = vmatmul.mubr.bf16.gmra.mrb[28].mxu0 %v2428_v9  ;;  %v2817_v57 = vrot.slane %v1616_v21, %v1624_v54 }
  0xac   : > { %1374 = vmatprep.mubr.bf16.mxu0 %v2462_v0  ;;  %2170 = vmatprep.mubr.bf16.mxu1 %v2414_v58 }
  0xb3   : > { %1375 = vmatmul.mubr.bf16.gmra.mrb[32].mxu0 %v2430_v10  ;;  %2171 = vmatmul.mubr.bf16.vlgmr.msra.gmra.mrb[32].mxu1 %v2416_v61 }
  0xb4   : > { %1384 = vmatprep.mubr.bf16.mxu0 %v2462_v0  ;;  %2174 = vmatprep.mubr.bf16.mxu1 %v2418_v1 }
  0xbb   : > { %1385 = vmatmul.mubr.bf16.gmra.mrb[36].mxu0 %v2431_v11  ;;  %2175 = vmatmul.mubr.bf16.gmra.mrb[36].mxu1 %v2420_v4 }
  0xbc   : > { %1394 = vmatprep.mubr.bf16.mxu0 %v2462_v0  ;;  %2178 = vmatprep.mubr.bf16.mxu1 %v2422_v6 }
  0xc3   : > { %1395 = vmatmul.mubr.bf16.gmra.mrb[40].mxu0 %v2432_v12  ;;  %2179 = vmatmul.mubr.bf16.gmra.mrb[40].mxu1 %v2424_v7 }
  0xc4   : > { %1404 = vmatprep.mubr.bf16.mxu0 %v2462_v0  ;;  %2182 = vmatprep.mubr.bf16.mxu1 %v2426_v8 }
  0xcb   : > { %1405 = vmatmul.mubr.bf16.gmra.mrb[44].mxu0 %v2433_v13  ;;  %2183 = vmatmul.mubr.bf16.gmra.mrb[44].mxu1 %v2428_v9 }
  0xcc   : > { %1414 = vmatprep.mubr.bf16.mxu0 %v2462_v0  ;;  %2186 = vmatprep.mubr.bf16.mxu1 %v2430_v10 }
  0xd3   : > { %1415 = vmatmul.mubr.bf16.gmra.mrb[48].mxu0 %v2434_v14  ;;  %2187 = vmatmul.mubr.bf16.gmra.mrb[48].mxu1 %v2431_v11 }
  0xd4   : > { %1424 = vmatprep.mubr.bf16.mxu0 %v2462_v0  ;;  %2190 = vmatprep.mubr.bf16.mxu1 %v2432_v12 }
  0xdb   : > { %1425 = vmatmul.mubr.bf16.gmra.mrb[52].mxu0 %v2435_v15  ;;  %2191 = vmatmul.mubr.bf16.gmra.mrb[52].mxu1 %v2433_v13 }
  0xdc   : > { %1434 = vmatprep.mubr.bf16.mxu0 %v2462_v0  ;;  %2194 = vmatprep.mubr.bf16.mxu1 %v2434_v14 }
  0xe3   : > { %1435 = vmatmul.mubr.bf16.gmra.mrb[56].mxu0 %v2436_v16  ;;  %2195 = vmatmul.mubr.bf16.gmra.mrb[56].mxu1 %v2435_v15 }
  0xe4   : > { %1444 = vmatprep.mubr.bf16.mxu0 %v2462_v0  ;;  %2198 = vmatprep.mubr.bf16.mxu1 %v2436_v16 }
  0xeb   : > { %1445 = vmatmul.mubr.bf16.gmra.mrb[60].mxu0 %v2437_v17  ;;  %2199 = vmatmul.mubr.bf16.gmra.mrb[60].mxu1 %v2437_v17 }
 0x106   : > { %v2750_v23 = vpop.f32.mrb[0].mxu1 }
 0x107   : > { %v2752_v0 = vpop.f32.mrb[1].mxu1 }
 0x108   : > { %v2754_v24 = vpop.f32.mrb[2].mxu1 }
 0x109   : > { %v2756_v25 = vpop.f32.mrb[3].mxu1 }
 0x10e   : > { %v2758_v26 = vpop.f32.mrb[4].mxu1 }
 0x10f   : > { %v2760_v27 = vpop.f32.mrb[5].mxu1 }
 0x110   : > { %v2762_v28 = vpop.f32.mrb[6].mxu1 }
 0x111   : > { %v2764_v29 = vpop.f32.mrb[7].mxu1 }
 0x116   : > { %v2766_v30 = vpop.f32.mrb[8].mxu1 }
 0x117   : > { %v2768_v31 = vpop.f32.mrb[9].mxu1 }
 0x118   : > { %v2770_v32 = vpop.f32.mrb[10].mxu1 }
 0x119   : > { %v2772_v33 = vpop.f32.mrb[11].mxu1 }
 0x11e   : > { %v2774_v34 = vpop.f32.mrb[12].mxu1 }
 0x11f   : > { %v2776_v35 = vpop.f32.mrb[13].mxu1 }
 0x120   : > { %v2778_v36 = vpop.f32.mrb[14].mxu1 }
 0x121   : > { %v2780_v37 = vpop.f32.mrb[15].mxu1 }
 0x126   : > { %v2782_v38 = vpop.f32.mrb[16].mxu1 }
 0x127   : > { %v2784_v39 = vpop.f32.mrb[17].mxu1 }
 0x128   : > { %v2786_v40 = vpop.f32.mrb[18].mxu1 }
 0x129   : > { %v2788_v41 = vpop.f32.mrb[19].mxu1 }
 0x12e   : > { %v2790_v42 = vpop.f32.mrb[20].mxu1 }
 0x12f   : > { %v2792_v43 = vpop.f32.mrb[21].mxu1 }
 0x130   : > { %v2794_v44 = vpop.f32.mrb[22].mxu1 }
 0x131   : > { %v2796_v45 = vpop.f32.mrb[23].mxu1 }
 0x136   : > { %v2798_v46 = vpop.f32.mrb[24].mxu1 }
 0x137   : > { %v2800_v47 = vpop.f32.mrb[25].mxu1 }
 0x138   : > { %v2802_v48 = vpop.f32.mrb[26].mxu1 }
 0x139   : > { %v2804_v49 = vpop.f32.mrb[27].mxu1 }
 0x13e   : > { %v2806_v50 = vpop.f32.mrb[28].mxu1 }
 0x13f   : > { %v2808_v51 = vpop.f32.mrb[29].mxu1 }
 0x140   : > { %v2810_v53 = vpop.f32.mrb[30].mxu1 }
 0x141   : > { %v2812_v55 = vpop.f32.mrb[31].mxu1 }
 0x146   : > { %v1296_v58 = vpop.f32.mrb[0].mxu0 }
 0x147   : > { %v1633_v59 = vadd.f32 %v2815_v56, %v1296_v58  ;;  %v1298_v60 = vpop.f32.mrb[1].mxu0 }
 0x148   : > { %v1634_v61 = vadd.f32 %v2817_v57, %v1298_v60  ;;  %v1300_v62 = vpop.f32.mrb[2].mxu0 }
 0x149   : > { %1729 = vst [vmem:[%s2822_s13] sm:$0xff] %v1633_v59  ;;  %v1636_v63 = vadd.f32 %v2815_v56, %v1300_v62  ;;  %v1302_v1 = vpop.f32.mrb[3].mxu0 }
 0x14a   : > { %1730 = vst [vmem:[%s2822_s13 + $0x8] sm:$0xff] %v1634_v61  ;;  %v1637_v2 = vadd.f32 %v2817_v57, %v1302_v1 }
 0x14b   : > { %1732 = vst [vmem:[%s2822_s13 + $0x18] sm:$0xff] %v1636_v63 }
 0x14c   : > { %1733 = vst [vmem:[%s2822_s13 + $0x20] sm:$0xff] %v1637_v2 }
 0x14e   : > { %v1306_v3 = vpop.f32.mrb[4].mxu0 }
 0x14f   : > { %v1639_v4 = vadd.f32 %v2815_v56, %v1306_v3  ;;  %v1308_v5 = vpop.f32.mrb[5].mxu0 }
 0x150   : > { %v1640_v6 = vadd.f32 %v2817_v57, %v1308_v5  ;;  %v1310_v7 = vpop.f32.mrb[6].mxu0 }
 0x151   : > { %1735 = vst [vmem:[%s2822_s13 + $0x30] sm:$0xff] %v1639_v4  ;;  %v1642_v8 = vadd.f32 %v2815_v56, %v1310_v7  ;;  %v1312_v9 = vpop.f32.mrb[7].mxu0 }
 0x152   : > { %1736 = vst [vmem:[%s2822_s13 + $0x38] sm:$0xff] %v1640_v6  ;;  %v1643_v10 = vadd.f32 %v2817_v57, %v1312_v9 }
 0x153   : > { %1738 = vst [vmem:[%s2822_s13 + $0x48] sm:$0xff] %v1642_v8 }
 0x154   : > { %1739 = vst [vmem:[%s2822_s13 + $0x50] sm:$0xff] %v1643_v10 }
 0x156   : > { %v1316_v11 = vpop.f32.mrb[8].mxu0 }
 0x157   : > { %v1645_v12 = vadd.f32 %v2815_v56, %v1316_v11  ;;  %v1318_v13 = vpop.f32.mrb[9].mxu0 }
 0x158   : > { %v1646_v14 = vadd.f32 %v2817_v57, %v1318_v13  ;;  %v1320_v15 = vpop.f32.mrb[10].mxu0 }
 0x159   : > { %1741 = vst [vmem:[%s2822_s13 + $0x60] sm:$0xff] %v1645_v12  ;;  %v1648_v16 = vadd.f32 %v2815_v56, %v1320_v15  ;;  %v1322_v17 = vpop.f32.mrb[11].mxu0 }
 0x15a   : > { %1742 = vst [vmem:[%s2822_s13 + $0x68] sm:$0xff] %v1646_v14  ;;  %v1649_v18 = vadd.f32 %v2817_v57, %v1322_v17 }
 0x15b   : > { %1744 = vst [vmem:[%s2822_s13 + $0x78] sm:$0xff] %v1648_v16 }
 0x15c   : > { %1745 = vst [vmem:[%s2822_s13 + $0x80] sm:$0xff] %v1649_v18 }
 0x15e   : > { %v1326_v19 = vpop.f32.mrb[12].mxu0 }
 0x15f   : > { %v1651_v20 = vadd.f32 %v2815_v56, %v1326_v19  ;;  %v1328_v21 = vpop.f32.mrb[13].mxu0 }
 0x160   : > { %v1652_v52 = vadd.f32 %v2817_v57, %v1328_v21  ;;  %v1330_v54 = vpop.f32.mrb[14].mxu0 }
 0x161   : > { %1747 = vst [vmem:[%s2822_s13 + $0x90] sm:$0xff] %v1651_v20  ;;  %v1654_v58 = vadd.f32 %v2815_v56, %v1330_v54  ;;  %v1332_v59 = vpop.f32.mrb[15].mxu0 }
 0x162   : > { %1748 = vst [vmem:[%s2822_s13 + $0x98] sm:$0xff] %v1652_v52  ;;  %v1655_v60 = vadd.f32 %v2817_v57, %v1332_v59 }
 0x163   : > { %1750 = vst [vmem:[%s2822_s13 + $0xa8] sm:$0xff] %v1654_v58 }
 0x164   : > { %1751 = vst [vmem:[%s2822_s13 + $0xb0] sm:$0xff] %v1655_v60 }
 0x166   : > { %v1336_v61 = vpop.f32.mrb[16].mxu0 }
 0x167   : > { %v1657_v62 = vadd.f32 %v2815_v56, %v1336_v61  ;;  %v1338_v63 = vpop.f32.mrb[17].mxu0 }
 0x168   : > { %v1658_v1 = vadd.f32 %v2817_v57, %v1338_v63  ;;  %v1340_v2 = vpop.f32.mrb[18].mxu0 }
 0x169   : > { %1753 = vst [vmem:[%s2822_s13 + $0xc0] sm:$0xff] %v1657_v62  ;;  %v1660_v3 = vadd.f32 %v2815_v56, %v1340_v2  ;;  %v1342_v4 = vpop.f32.mrb[19].mxu0 }
 0x16a   : > { %1754 = vst [vmem:[%s2822_s13 + $0xc8] sm:$0xff] %v1658_v1  ;;  %v1661_v5 = vadd.f32 %v2817_v57, %v1342_v4 }
 0x16b   : > { %1756 = vst [vmem:[%s2822_s13 + $0xd8] sm:$0xff] %v1660_v3 }
 0x16c   : > { %1757 = vst [vmem:[%s2822_s13 + $0xe0] sm:$0xff] %v1661_v5 }
 0x16e   : > { %v1346_v6 = vpop.f32.mrb[20].mxu0 }
 0x16f   : > { %v1663_v7 = vadd.f32 %v2815_v56, %v1346_v6  ;;  %v1348_v8 = vpop.f32.mrb[21].mxu0 }
 0x170   : > { %v1664_v9 = vadd.f32 %v2817_v57, %v1348_v8  ;;  %v1350_v10 = vpop.f32.mrb[22].mxu0 }
 0x171   : > { %1759 = vst [vmem:[%s2822_s13 + $0xf0] sm:$0xff] %v1663_v7  ;;  %v1666_v11 = vadd.f32 %v2815_v56, %v1350_v10  ;;  %v1352_v12 = vpop.f32.mrb[23].mxu0 }
 0x172   : > { %1760 = vst [vmem:[%s2822_s13 + $0xf8] sm:$0xff] %v1664_v9  ;;  %v1667_v13 = vadd.f32 %v2817_v57, %v1352_v12 }
 0x173   : > { %1762 = vst [vmem:[%s2822_s13 + $0x108] sm:$0xff] %v1666_v11 }
 0x174   : > { %1763 = vst [vmem:[%s2822_s13 + $0x110] sm:$0xff] %v1667_v13 }
 0x176   : > { %v1356_v14 = vpop.f32.mrb[24].mxu0 }
 0x177   : > { %v1669_v15 = vadd.f32 %v2815_v56, %v1356_v14  ;;  %v1358_v16 = vpop.f32.mrb[25].mxu0 }
 0x178   : > { %v1670_v17 = vadd.f32 %v2817_v57, %v1358_v16  ;;  %v1360_v18 = vpop.f32.mrb[26].mxu0 }
 0x179   : > { %1765 = vst [vmem:[%s2822_s13 + $0x120] sm:$0xff] %v1669_v15  ;;  %v1672_v19 = vadd.f32 %v2815_v56, %v1360_v18  ;;  %v1362_v20 = vpop.f32.mrb[27].mxu0 }
 0x17a   : > { %1766 = vst [vmem:[%s2822_s13 + $0x128] sm:$0xff] %v1670_v17  ;;  %v1673_v21 = vadd.f32 %v2817_v57, %v1362_v20 }
 0x17b   : > { %1768 = vst [vmem:[%s2822_s13 + $0x138] sm:$0xff] %v1672_v19 }
 0x17c   : > { %1769 = vst [vmem:[%s2822_s13 + $0x140] sm:$0xff] %v1673_v21 }
 0x17e   : > { %v1366_v52 = vpop.f32.mrb[28].mxu0 }
 0x17f   : > { %v1675_v54 = vadd.f32 %v2815_v56, %v1366_v52  ;;  %v1368_v58 = vpop.f32.mrb[29].mxu0 }
 0x180   : > { %v1676_v59 = vadd.f32 %v2817_v57, %v1368_v58  ;;  %v1370_v60 = vpop.f32.mrb[30].mxu0 }
 0x181   : > { %1771 = vst [vmem:[%s2822_s13 + $0x150] sm:$0xff] %v1675_v54  ;;  %v1678_v61 = vadd.f32 %v2815_v56, %v1370_v60  ;;  %v1372_v62 = vpop.f32.mrb[31].mxu0 }
 0x182   : > { %1772 = vst [vmem:[%s2822_s13 + $0x158] sm:$0xff] %v1676_v59  ;;  %v1679_v63 = vadd.f32 %v2817_v57, %v1372_v62 }
 0x183   : > { %1774 = vst [vmem:[%s2822_s13 + $0x168] sm:$0xff] %v1678_v61 }
 0x184   : > { %1775 = vst [vmem:[%s2822_s13 + $0x170] sm:$0xff] %v1679_v63 }
 0x186   : > { %v1376_v1 = vpop.f32.mrb[32].mxu0  ;;  %v2172_v2 = vpop.f32.mrb[32].mxu1 }
 0x187   : > { %v1377_v3 = vadd.f32 %v1376_v1, %v2750_v23  ;;  %v1641_v4 = vadd.f32 %v2172_v2, %v2748_v22  ;;  %v1378_v5 = vpop.f32.mrb[33].mxu0  ;;  %v1489_v6 = vpop.f32.mrb[33].mxu1 }
 0x188   : > { %v1379_v7 = vadd.f32 %v1378_v5, %v2752_v0  ;;  %v1635_v8 = vadd.f32 %v2748_v22, %v1489_v6  ;;  %v1380_v9 = vpop.f32.mrb[34].mxu0  ;;  %v2173_v10 = vpop.f32.mrb[34].mxu1 }
 0x189   : > { %v1681_v11 = vadd.f32 %v2815_v56, %v1377_v3  ;;  %1737 = vst [vmem:[%s2822_s13 + $0x40] sm:$0xff] %v1641_v4  ;;  %v1381_v23 = vadd.f32 %v1380_v9, %v2754_v24  ;;  %v1644_v12 = vadd.f32 %v2173_v10, %v2748_v22  ;;  %v1382_v13 = vpop.f32.mrb[35].mxu0  ;;  %v1492_v14 = vpop.f32.mrb[35].mxu1 }
 0x18a   : > { %v1682_v0 = vadd.f32 %v2817_v57, %v1379_v7  ;;  %1731 = vst [vmem:[%s2822_s13 + $0x10] sm:$0xff] %v1635_v8  ;;  %v1383_v15 = vadd.f32 %v1382_v13, %v2756_v25  ;;  %v1638_v16 = vadd.f32 %v2748_v22, %v1492_v14 }
 0x18b   : > { %1777 = vst [vmem:[%s2822_s13 + $0x180] sm:$0xff] %v1681_v11  ;;  %v1684_v17 = vadd.f32 %v2815_v56, %v1381_v23  ;;  %1740 = vst [vmem:[%s2822_s13 + $0x58] sm:$0xff] %v1644_v12 }
 0x18c   : > { %1778 = vst [vmem:[%s2822_s13 + $0x188] sm:$0xff] %v1682_v0  ;;  %v1685_v18 = vadd.f32 %v2817_v57, %v1383_v15  ;;  %1734 = vst [vmem:[%s2822_s13 + $0x28] sm:$0xff] %v1638_v16 }
 0x18d   : > { %1780 = vst [vmem:[%s2822_s13 + $0x198] sm:$0xff] %v1684_v17 }
 0x18e   : > { %1781 = vst [vmem:[%s2822_s13 + $0x1a0] sm:$0xff] %v1685_v18  ;;  %v1386_v24 = vpop.f32.mrb[36].mxu0  ;;  %v2176_v19 = vpop.f32.mrb[36].mxu1 }
 0x18f   : > { %v1387_v20 = vadd.f32 %v1386_v24, %v2758_v26  ;;  %v1653_v25 = vadd.f32 %v2176_v19, %v2748_v22  ;;  %v1388_v21 = vpop.f32.mrb[37].mxu0  ;;  %v1505_v52 = vpop.f32.mrb[37].mxu1 }
 0x190   : > { %v1389_v54 = vadd.f32 %v1388_v21, %v2760_v27  ;;  %v1647_v58 = vadd.f32 %v2748_v22, %v1505_v52  ;;  %v1390_v59 = vpop.f32.mrb[38].mxu0  ;;  %v2177_v60 = vpop.f32.mrb[38].mxu1 }
 0x191   : > { %v1687_v61 = vadd.f32 %v2815_v56, %v1387_v20  ;;  %1749 = vst [vmem:[%s2822_s13 + $0xa0] sm:$0xff] %v1653_v25  ;;  %v1391_v26 = vadd.f32 %v1390_v59, %v2762_v28  ;;  %v1656_v62 = vadd.f32 %v2177_v60, %v2748_v22  ;;  %v1392_v63 = vpop.f32.mrb[39].mxu0  ;;  %v1508_v1 = vpop.f32.mrb[39].mxu1 }
 0x192   : > { %v1688_v27 = vadd.f32 %v2817_v57, %v1389_v54  ;;  %1743 = vst [vmem:[%s2822_s13 + $0x70] sm:$0xff] %v1647_v58  ;;  %v1393_v2 = vadd.f32 %v1392_v63, %v2764_v29  ;;  %v1650_v3 = vadd.f32 %v2748_v22, %v1508_v1 }
 0x193   : > { %1783 = vst [vmem:[%s2822_s13 + $0x1b0] sm:$0xff] %v1687_v61  ;;  %v1690_v4 = vadd.f32 %v2815_v56, %v1391_v26  ;;  %1752 = vst [vmem:[%s2822_s13 + $0xb8] sm:$0xff] %v1656_v62 }
 0x194   : > { %1784 = vst [vmem:[%s2822_s13 + $0x1b8] sm:$0xff] %v1688_v27  ;;  %v1691_v5 = vadd.f32 %v2817_v57, %v1393_v2  ;;  %1746 = vst [vmem:[%s2822_s13 + $0x88] sm:$0xff] %v1650_v3 }
 0x195   : > { %1786 = vst [vmem:[%s2822_s13 + $0x1c8] sm:$0xff] %v1690_v4 }
 0x196   : > { %1787 = vst [vmem:[%s2822_s13 + $0x1d0] sm:$0xff] %v1691_v5  ;;  %v1396_v28 = vpop.f32.mrb[40].mxu0  ;;  %v2180_v6 = vpop.f32.mrb[40].mxu1 }
 0x197   : > { %v1397_v7 = vadd.f32 %v1396_v28, %v2766_v30  ;;  %v1665_v29 = vadd.f32 %v2180_v6, %v2748_v22  ;;  %v1398_v8 = vpop.f32.mrb[41].mxu0  ;;  %v1521_v9 = vpop.f32.mrb[41].mxu1 }
 0x198   : > { %v1399_v10 = vadd.f32 %v1398_v8, %v2768_v31  ;;  %v1659_v11 = vadd.f32 %v2748_v22, %v1521_v9  ;;  %v1400_v23 = vpop.f32.mrb[42].mxu0  ;;  %v2181_v12 = vpop.f32.mrb[42].mxu1 }
 0x199   : > { %v1693_v13 = vadd.f32 %v2815_v56, %v1397_v7  ;;  %1761 = vst [vmem:[%s2822_s13 + $0x100] sm:$0xff] %v1665_v29  ;;  %v1401_v30 = vadd.f32 %v1400_v23, %v2770_v32  ;;  %v1668_v14 = vadd.f32 %v2181_v12, %v2748_v22  ;;  %v1402_v0 = vpop.f32.mrb[43].mxu0  ;;  %v1524_v15 = vpop.f32.mrb[43].mxu1 }
 0x19a   : > { %v1694_v31 = vadd.f32 %v2817_v57, %v1399_v10  ;;  %1755 = vst [vmem:[%s2822_s13 + $0xd0] sm:$0xff] %v1659_v11  ;;  %v1403_v16 = vadd.f32 %v1402_v0, %v2772_v33  ;;  %v1662_v17 = vadd.f32 %v2748_v22, %v1524_v15 }
 0x19b   : > { %1789 = vst [vmem:[%s2822_s13 + $0x1e0] sm:$0xff] %v1693_v13  ;;  %v1696_v18 = vadd.f32 %v2815_v56, %v1401_v30  ;;  %1764 = vst [vmem:[%s2822_s13 + $0x118] sm:$0xff] %v1668_v14 }
 0x19c   : > { %1790 = vst [vmem:[%s2822_s13 + $0x1e8] sm:$0xff] %v1694_v31  ;;  %v1697_v24 = vadd.f32 %v2817_v57, %v1403_v16  ;;  %1758 = vst [vmem:[%s2822_s13 + $0xe8] sm:$0xff] %v1662_v17 }
 0x19d   : > { %1792 = vst [vmem:[%s2822_s13 + $0x1f8] sm:$0xff] %v1696_v18 }
 0x19e   : > { %1793 = vst [vmem:[%s2822_s13 + $0x200] sm:$0xff] %v1697_v24  ;;  %v1406_v32 = vpop.f32.mrb[44].mxu0  ;;  %v2184_v19 = vpop.f32.mrb[44].mxu1 }
 0x19f   : > { %v1407_v20 = vadd.f32 %v1406_v32, %v2774_v34  ;;  %v1677_v33 = vadd.f32 %v2184_v19, %v2748_v22  ;;  %v1408_v25 = vpop.f32.mrb[45].mxu0  ;;  %v1537_v21 = vpop.f32.mrb[45].mxu1 }
 0x1a0   : > { %v1409_v52 = vadd.f32 %v1408_v25, %v2776_v35  ;;  %v1671_v54 = vadd.f32 %v2748_v22, %v1537_v21  ;;  %v1410_v58 = vpop.f32.mrb[46].mxu0  ;;  %v2185_v59 = vpop.f32.mrb[46].mxu1 }
 0x1a1   : > { %v1699_v60 = vadd.f32 %v2815_v56, %v1407_v20  ;;  %1773 = vst [vmem:[%s2822_s13 + $0x160] sm:$0xff] %v1677_v33  ;;  %v1411_v34 = vadd.f32 %v1410_v58, %v2778_v36  ;;  %v1680_v61 = vadd.f32 %v2185_v59, %v2748_v22  ;;  %v1412_v26 = vpop.f32.mrb[47].mxu0  ;;  %v1540_v62 = vpop.f32.mrb[47].mxu1 }
 0x1a2   : > { %v1700_v35 = vadd.f32 %v2817_v57, %v1409_v52  ;;  %1767 = vst [vmem:[%s2822_s13 + $0x130] sm:$0xff] %v1671_v54  ;;  %v1413_v63 = vadd.f32 %v1412_v26, %v2780_v37  ;;  %v1674_v1 = vadd.f32 %v2748_v22, %v1540_v62 }
 0x1a3   : > { %1795 = vst [vmem:[%s2822_s13 + $0x210] sm:$0xff] %v1699_v60  ;;  %v1702_v27 = vadd.f32 %v2815_v56, %v1411_v34  ;;  %1776 = vst [vmem:[%s2822_s13 + $0x178] sm:$0xff] %v1680_v61 }
 0x1a4   : > { %1796 = vst [vmem:[%s2822_s13 + $0x218] sm:$0xff] %v1700_v35  ;;  %v1703_v2 = vadd.f32 %v2817_v57, %v1413_v63  ;;  %1770 = vst [vmem:[%s2822_s13 + $0x148] sm:$0xff] %v1674_v1 }
 0x1a5   : > { %1798 = vst [vmem:[%s2822_s13 + $0x228] sm:$0xff] %v1702_v27 }
 0x1a6   : > { %1799 = vst [vmem:[%s2822_s13 + $0x230] sm:$0xff] %v1703_v2  ;;  %v1416_v36 = vpop.f32.mrb[48].mxu0  ;;  %v2188_v3 = vpop.f32.mrb[48].mxu1 }
 0x1a7   : > { %v1417_v4 = vadd.f32 %v1416_v36, %v2782_v38  ;;  %v1689_v37 = vadd.f32 %v2188_v3, %v2748_v22  ;;  %v1418_v5 = vpop.f32.mrb[49].mxu0  ;;  %v1553_v28 = vpop.f32.mrb[49].mxu1 }
 0x1a8   : > { %v1419_v6 = vadd.f32 %v1418_v5, %v2784_v39  ;;  %v1683_v7 = vadd.f32 %v2748_v22, %v1553_v28  ;;  %v1420_v29 = vpop.f32.mrb[50].mxu0  ;;  %v2189_v8 = vpop.f32.mrb[50].mxu1 }
 0x1a9   : > { %v1705_v9 = vadd.f32 %v2815_v56, %v1417_v4  ;;  %1785 = vst [vmem:[%s2822_s13 + $0x1c0] sm:$0xff] %v1689_v37  ;;  %v1421_v38 = vadd.f32 %v1420_v29, %v2786_v40  ;;  %v1692_v10 = vadd.f32 %v2189_v8, %v2748_v22  ;;  %v1422_v11 = vpop.f32.mrb[51].mxu0  ;;  %v1556_v23 = vpop.f32.mrb[51].mxu1 }
 0x1aa   : > { %v1706_v39 = vadd.f32 %v2817_v57, %v1419_v6  ;;  %1779 = vst [vmem:[%s2822_s13 + $0x190] sm:$0xff] %v1683_v7  ;;  %v1423_v12 = vadd.f32 %v1422_v11, %v2788_v41  ;;  %v1686_v13 = vadd.f32 %v2748_v22, %v1556_v23 }
 0x1ab   : > { %1801 = vst [vmem:[%s2822_s13 + $0x240] sm:$0xff] %v1705_v9  ;;  %v1708_v30 = vadd.f32 %v2815_v56, %v1421_v38  ;;  %1788 = vst [vmem:[%s2822_s13 + $0x1d8] sm:$0xff] %v1692_v10 }
 0x1ac   : > { %1802 = vst [vmem:[%s2822_s13 + $0x248] sm:$0xff] %v1706_v39  ;;  %v1709_v14 = vadd.f32 %v2817_v57, %v1423_v12  ;;  %1782 = vst [vmem:[%s2822_s13 + $0x1a8] sm:$0xff] %v1686_v13 }
 0x1ad   : > { %1804 = vst [vmem:[%s2822_s13 + $0x258] sm:$0xff] %v1708_v30 }
 0x1ae   : > { %1805 = vst [vmem:[%s2822_s13 + $0x260] sm:$0xff] %v1709_v14  ;;  %v1426_v40 = vpop.f32.mrb[52].mxu0  ;;  %v2192_v0 = vpop.f32.mrb[52].mxu1 }
 0x1af   : > { %v1427_v15 = vadd.f32 %v1426_v40, %v2790_v42  ;;  %v1701_v41 = vadd.f32 %v2192_v0, %v2748_v22  ;;  %v1428_v31 = vpop.f32.mrb[53].mxu0  ;;  %v1569_v16 = vpop.f32.mrb[53].mxu1 }
 0x1b0   : > { %v1429_v17 = vadd.f32 %v1428_v31, %v2792_v43  ;;  %v1695_v18 = vadd.f32 %v2748_v22, %v1569_v16  ;;  %v1430_v24 = vpop.f32.mrb[54].mxu0  ;;  %v2193_v32 = vpop.f32.mrb[54].mxu1 }
 0x1b1   : > { %v1711_v19 = vadd.f32 %v2815_v56, %v1427_v15  ;;  %1797 = vst [vmem:[%s2822_s13 + $0x220] sm:$0xff] %v1701_v41  ;;  %v1431_v42 = vadd.f32 %v1430_v24, %v2794_v44  ;;  %v1704_v20 = vadd.f32 %v2193_v32, %v2748_v22  ;;  %v1432_v33 = vpop.f32.mrb[55].mxu0  ;;  %v1572_v25 = vpop.f32.mrb[55].mxu1 }
 0x1b2   : > { %v1712_v43 = vadd.f32 %v2817_v57, %v1429_v17  ;;  %1791 = vst [vmem:[%s2822_s13 + $0x1f0] sm:$0xff] %v1695_v18  ;;  %v1433_v21 = vadd.f32 %v1432_v33, %v2796_v45  ;;  %v1698_v52 = vadd.f32 %v2748_v22, %v1572_v25 }
 0x1b3   : > { %1807 = vst [vmem:[%s2822_s13 + $0x270] sm:$0xff] %v1711_v19  ;;  %v1714_v54 = vadd.f32 %v2815_v56, %v1431_v42  ;;  %1800 = vst [vmem:[%s2822_s13 + $0x238] sm:$0xff] %v1704_v20 }
 0x1b4   : > { %1808 = vst [vmem:[%s2822_s13 + $0x278] sm:$0xff] %v1712_v43  ;;  %v1715_v58 = vadd.f32 %v2817_v57, %v1433_v21  ;;  %1794 = vst [vmem:[%s2822_s13 + $0x208] sm:$0xff] %v1698_v52 }
 0x1b5   : > { %1810 = vst [vmem:[%s2822_s13 + $0x288] sm:$0xff] %v1714_v54 }
 0x1b6   : > { %1811 = vst [vmem:[%s2822_s13 + $0x290] sm:$0xff] %v1715_v58  ;;  %v1436_v44 = vpop.f32.mrb[56].mxu0  ;;  %v2196_v59 = vpop.f32.mrb[56].mxu1 }
 0x1b7   : > { %v1437_v60 = vadd.f32 %v1436_v44, %v2798_v46  ;;  %v1713_v45 = vadd.f32 %v2196_v59, %v2748_v22  ;;  %v1438_v34 = vpop.f32.mrb[57].mxu0  ;;  %v1585_v61 = vpop.f32.mrb[57].mxu1 }
 0x1b8   : > { %v1439_v26 = vadd.f32 %v1438_v34, %v2800_v47  ;;  %v1707_v62 = vadd.f32 %v2748_v22, %v1585_v61  ;;  %v1440_v35 = vpop.f32.mrb[58].mxu0  ;;  %v2197_v63 = vpop.f32.mrb[58].mxu1 }
 0x1b9   : > { %v1717_v1 = vadd.f32 %v2815_v56, %v1437_v60  ;;  %1809 = vst [vmem:[%s2822_s13 + $0x280] sm:$0xff] %v1713_v45  ;;  %v1441_v46 = vadd.f32 %v1440_v35, %v2802_v48  ;;  %v1716_v27 = vadd.f32 %v2197_v63, %v2748_v22  ;;  %v1442_v2 = vpop.f32.mrb[59].mxu0  ;;  %v1588_v36 = vpop.f32.mrb[59].mxu1 }
 0x1ba   : > { %v1718_v47 = vadd.f32 %v2817_v57, %v1439_v26  ;;  %1803 = vst [vmem:[%s2822_s13 + $0x250] sm:$0xff] %v1707_v62  ;;  %v1443_v3 = vadd.f32 %v1442_v2, %v2804_v49  ;;  %v1710_v4 = vadd.f32 %v2748_v22, %v1588_v36 }
 0x1bb   : > { %1813 = vst [vmem:[%s2822_s13 + $0x2a0] sm:$0xff] %v1717_v1  ;;  %v1720_v37 = vadd.f32 %v2815_v56, %v1441_v46  ;;  %1812 = vst [vmem:[%s2822_s13 + $0x298] sm:$0xff] %v1716_v27 }
 0x1bc   : > { %1814 = vst [vmem:[%s2822_s13 + $0x2a8] sm:$0xff] %v1718_v47  ;;  %v1721_v5 = vadd.f32 %v2817_v57, %v1443_v3  ;;  %1806 = vst [vmem:[%s2822_s13 + $0x268] sm:$0xff] %v1710_v4 }
 0x1bd   : > { %1816 = vst [vmem:[%s2822_s13 + $0x2b8] sm:$0xff] %v1720_v37 }
 0x1be   : > { %1817 = vst [vmem:[%s2822_s13 + $0x2c0] sm:$0xff] %v1721_v5  ;;  %v1446_v48 = vpop.f32.mrb[60].mxu0  ;;  %v2200_v28 = vpop.f32.mrb[60].mxu1 }
 0x1bf   : > { %v1447_v6 = vadd.f32 %v1446_v48, %v2806_v50  ;;  %v1725_v49 = vadd.f32 %v2200_v28, %v2748_v22  ;;  %v1448_v7 = vpop.f32.mrb[61].mxu0  ;;  %v1601_v29 = vpop.f32.mrb[61].mxu1 }
 0x1c0   : > { %v1449_v8 = vadd.f32 %v1448_v7, %v2808_v51  ;;  %v1719_v9 = vadd.f32 %v2748_v22, %v1601_v29  ;;  %v1450_v38 = vpop.f32.mrb[62].mxu0  ;;  %v2201_v10 = vpop.f32.mrb[62].mxu1 }
 0x1c1   : > { %v1723_v11 = vadd.f32 %v2815_v56, %v1447_v6  ;;  %1821 = vst [vmem:[%s2822_s13 + $0x2e0] sm:$0xff] %v1725_v49  ;;  %v1451_v50 = vadd.f32 %v1450_v38, %v2810_v53  ;;  %v1728_v23 = vadd.f32 %v2201_v10, %v2748_v22  ;;  %v1452_v39 = vpop.f32.mrb[63].mxu0  ;;  %v1604_v12 = vpop.f32.mrb[63].mxu1 }
 0x1c2   : > { %v1724_v51 = vadd.f32 %v2817_v57, %v1449_v8  ;;  %1815 = vst [vmem:[%s2822_s13 + $0x2b0] sm:$0xff] %v1719_v9  ;;  %v1453_v13 = vadd.f32 %v1452_v39, %v2812_v55  ;;  %v1722_v30 = vadd.f32 %v2748_v22, %v1604_v12 }
 0x1c3   : > { %1819 = vst [vmem:[%s2822_s13 + $0x2d0] sm:$0xff] %v1723_v11  ;;  %v1726_v14 = vadd.f32 %v2815_v56, %v1451_v50  ;;  %1824 = vst [vmem:[%s2822_s13 + $0x2f8] sm:$0xff] %v1728_v23 }
 0x1c4   : > { %1820 = vst [vmem:[%s2822_s13 + $0x2d8] sm:$0xff] %v1724_v51  ;;  %v1727_v40 = vadd.f32 %v2817_v57, %v1453_v13  ;;  %1818 = vst [vmem:[%s2822_s13 + $0x2c8] sm:$0xff] %v1722_v30 }
 0x1c5   : > { %1822 = vst [vmem:[%s2822_s13 + $0x2e8] sm:$0xff] %v1726_v14 }
 0x1c6   : > { %1823 = vst [vmem:[%s2822_s13 + $0x2f0] sm:$0xff] %v1727_v40 }
 0x1c7 PF: > { %s15_s20 = sadd.s32 1, %s2460_s20   ;;  %s3063_s18 = smov %s2456_s19 }
 0x1c8   : > { %p12_p5 = scmp.ge.s32.totalorder %s15_s20, 4   ;;  %s3064_s19 = smov %s3066_s21 }
 0x1ca   :  { %14 = sbr.rel (!%p12_p5) target bundleno = 2 (0x2), region = 82 }

// kernel: decoder_forward.11
= control target key start
LH: loop header
LB: loop body
LE: loop exit
PB: predicated region body
PF: predicated region fallthrough
CT: control target
= control target key end

     0   :  { %s1287_s18 = smov 0   ;;  %s1581_s0 = inlined_call_operand.vmem [shape: bf16[256,128], index: 0, kind: input, shape index: {}]   ;;  %s1582_s1 = inlined_call_operand.vmem [shape: bf16[256,128], index: 1, kind: input, shape index: {}]   ;;  %s1583_s2 = inlined_call_operand.vmem [shape: bf16[128,128], index: 2, kind: input, shape index: {}]   ;;  %s1584_s3 = inlined_call_operand.vmem [shape: bf16[128,128], index: 3, kind: input, shape index: {}]   ;;  %s1585_s4 = inlined_call_operand.vmem [shape: f32[1,128], index: 4, kind: input, shape index: {}]   ;;  %s1586_s5 = inlined_call_operand.vmem [shape: f32[256,128], index: 5, kind: output, shape index: {}]  }
   0x1 LB: > { %s987_s19 = sadd.s32 4294967295, %s1255_s18   ;;  %p991_p0 = scmp.ge.s32.totalorder %s1255_s18, 1  ;;  %s1255_s18 = sphi %s1287_s18, %s15_s18  }
   0x2   : > { %p199_p1 = scmp.lt.s32.totalorder %s1255_s18, 3 }
   0x4   : > { %p200_p2 = pnand %p991_p0, %p199_p1 }
   0x5   : > { %v1153_v0 = vld [vmem:[%s1584_s3] sm:$0xff] (!%p200_p2)   ;;  %s992_s22 = sshll.u32 (!%p200_p2), %s987_s19, 4  ;;  %v1155_v2 = vld [vmem:[%s1584_s3 + $0x8] sm:$0xff] (!%p200_p2)   ;;  %v1157_v4 = vld [vmem:[%s1584_s3 + $0x10] sm:$0xff] (!%p200_p2)   ;;  %v724_v32 = vlaneseq (!%p200_p2) }
   0x6   : > { %203 = sbr.rel (%p200_p2) target bundleno = 603 (0x25b), region = 40  ;;  %v1154_v1 = vld [vmem:[%s1583_s2] sm:$0xff] (!%p200_p2)   ;;  %1065 = vmatprep.subr.bf16.mxu1 (!%p200_p2), %v1153_v0  ;;  %p233_p3 = scmp.lt.s32.totalorder (!%p200_p2), %s992_s22, 31  ;;  %v1156_v3 = vld [vmem:[%s1583_s2 + $0x8] sm:$0xff] (!%p200_p2)   ;;  %v1158_v5 = vld [vmem:[%s1583_s2 + $0x10] sm:$0xff] (!%p200_p2)  }
   0x7   : > { %1097 = vmatprep.subr.bf16.mxu0 (!%p200_p2), %v1154_v1  ;;  %1066 = vmatpush3.bf16.msra.mxu1 (!%p200_p2), %v1153_v0  ;;  %v1159_v6 = vld [vmem:[%s1584_s3 + $0x18] sm:$0xff] (!%p200_p2)   ;;  %v1161_v8 = vld [vmem:[%s1584_s3 + $0x20] sm:$0xff] (!%p200_p2)   ;;  %v1163_v10 = vld [vmem:[%s1584_s3 + $0x28] sm:$0xff] (!%p200_p2)   ;;  %v1372_v33 = vand.u32 (!%p200_p2), 127, %v724_v32 }
   0x8   : > { %1098 = vmatpush3.bf16.msra.mxu0 (!%p200_p2), %v1154_v1  ;;  %1067 = vmatprep.subr.bf16.mxu1 (!%p200_p2), %v1155_v2  ;;  %v1160_v7 = vld [vmem:[%s1583_s2 + $0x18] sm:$0xff] (!%p200_p2)   ;;  %v1162_v9 = vld [vmem:[%s1583_s2 + $0x20] sm:$0xff] (!%p200_p2)   ;;  %v1164_v11 = vld [vmem:[%s1583_s2 + $0x28] sm:$0xff] (!%p200_p2)  }
   0x9   : > { %1099 = vmatprep.subr.bf16.mxu0 (!%p200_p2), %v1156_v3  ;;  %v1165_v14 = vld [vmem:[%s1584_s3 + $0x30] sm:$0xff] (!%p200_p2)   ;;  %v1167_v16 = vld [vmem:[%s1584_s3 + $0x38] sm:$0xff] (!%p200_p2)   ;;  %v1377_v37 = vld [vmem:[%s1585_s4] ss:$0 sm:$0xff] (!%p200_p2)  ;;  %vm726_vm0 = vcmp.lt.s32.totalorder (!%p200_p2), %v1372_v33, 16 }
   0xa   : > { %v1166_v15 = vld [vmem:[%s1583_s2 + $0x30] sm:$0xff] (!%p200_p2)   ;;  %v1168_v17 = vld [vmem:[%s1583_s2 + $0x38] sm:$0xff] (!%p200_p2)  }
   0xb   : > { %1068 = vmatpush3.bf16.msra.mxu1 (!%p200_p2), %v1155_v2 }
   0xc   : > { %1100 = vmatpush3.bf16.msra.mxu0 (!%p200_p2), %v1156_v3  ;;  %1069 = vmatprep.subr.bf16.mxu1 (!%p200_p2), %v1157_v4 }
   0xd   : > { %s1588_s22 = smov (!%p233_p3, %s992_s22), 31  ;;  %1101 = vmatprep.subr.bf16.mxu0 %v1158_v5 }
   0xe   : > { %s993_s12 = sshll.u32 %s1588_s22, 2  ;;  %s997_s14 = sshll.u32 %s1588_s22, 3 }
   0xf   : > { %1070 = vmatpush3.bf16.msra.mxu1 %v1157_v4  ;;  %s1331_s20 = scalar_lea.vmem %s1582_s1, %s993_s12  ;;  %s1339_s26 = scalar_lea.vmem %s1581_s0, %s993_s12 }
  0x10   : > { %1102 = vmatpush3.bf16.msra.mxu0 %v1158_v5  ;;  %1071 = vmatprep.subr.bf16.mxu1 %v1159_v6  ;;  %v1169_v12 = vld [vmem:[%s1331_s20] sm:$0xff]   ;;  %v1171_v18 = vld [vmem:[%s1331_s20 + $0x8] sm:$0xff]   ;;  %v1173_v20 = vld [vmem:[%s1331_s20 + $0x10] sm:$0xff]   ;;  %s1544_s17 = scalar_lea.vmem %s1586_s5, %s997_s14 }
  0x11   : > { %1103 = vmatprep.subr.bf16.mxu0 %v1160_v7  ;;  %v1170_v13 = vld [vmem:[%s1339_s26] sm:$0xff]   ;;  %1081 = vmatprep.mubr.bf16.mxu1 %v1169_v12  ;;  %v1172_v19 = vld [vmem:[%s1339_s26 + $0x8] sm:$0xff]   ;;  %v1174_v21 = vld [vmem:[%s1339_s26 + $0x10] sm:$0xff]  }
  0x12   : > { %1113 = vmatprep.mubr.bf16.mxu0 %v1170_v13  ;;  %v1175_v22 = vld [vmem:[%s1331_s20 + $0x18] sm:$0xff]   ;;  %v1177_v24 = vld [vmem:[%s1331_s20 + $0x20] sm:$0xff]   ;;  %v1179_v26 = vld [vmem:[%s1331_s20 + $0x28] sm:$0xff]  }
  0x13   : > { %1072 = vmatpush3.bf16.msra.mxu1 %v1159_v6  ;;  %v1176_v23 = vld [vmem:[%s1339_s26 + $0x18] sm:$0xff]   ;;  %v1178_v25 = vld [vmem:[%s1339_s26 + $0x20] sm:$0xff]   ;;  %v1180_v27 = vld [vmem:[%s1339_s26 + $0x28] sm:$0xff]  }
  0x14   : > { %1104 = vmatpush3.bf16.msra.mxu0 %v1160_v7  ;;  %1073 = vmatprep.subr.bf16.mxu1 %v1161_v8  ;;  %v1181_v28 = vld [vmem:[%s1331_s20 + $0x30] sm:$0xff]   ;;  %v1183_v30 = vld [vmem:[%s1331_s20 + $0x38] sm:$0xff]  }
  0x15   : > { %1105 = vmatprep.subr.bf16.mxu0 %v1162_v9  ;;  %v1182_v29 = vld [vmem:[%s1339_s26 + $0x30] sm:$0xff]   ;;  %v1184_v31 = vld [vmem:[%s1339_s26 + $0x38] sm:$0xff]  }
  0x17   : > { %1074 = vmatpush3.bf16.msra.mxu1 %v1161_v8 }
  0x18   : > { %1106 = vmatpush3.bf16.msra.mxu0 %v1162_v9  ;;  %1075 = vmatprep.subr.bf16.mxu1 %v1163_v10 }
  0x19   : > { %1107 = vmatprep.subr.bf16.mxu0 %v1164_v11 }
  0x1b   : > { %1076 = vmatpush3.bf16.msra.mxu1 %v1163_v10 }
  0x1c   : > { %1108 = vmatpush3.bf16.msra.mxu0 %v1164_v11  ;;  %1077 = vmatprep.subr.bf16.mxu1 %v1165_v14 }
  0x1d   : > { %1109 = vmatprep.subr.bf16.mxu0 %v1166_v15 }
  0x1f   : > { %1078 = vmatpush3.bf16.msra.mxu1 %v1165_v14 }
  0x20   : > { %1110 = vmatpush3.bf16.msra.mxu0 %v1166_v15  ;;  %1079 = vmatprep.subr.bf16.mxu1 %v1167_v16 }
  0x21   : > { %1111 = vmatprep.subr.bf16.mxu0 %v1168_v17 }
  0x23   : > { %1080 = vmatpush3.bf16.msra.mxu1 %v1167_v16 }
  0x24   : > { %1112 = vmatpush3.bf16.msra.mxu0 %v1168_v17 }
  0x26   : > { %1082 = vmatmul.mubr.bf16.vlgmr.msra.gmra.mrb[0].mxu1 %v1171_v18 }
  0x27   : > { %1114 = vmatmul.mubr.bf16.vlgmr.msra.gmra.mrb[0].mxu0 %v1172_v19  ;;  %1085 = vmatprep.mubr.bf16.mxu1 %v1173_v20 }
  0x28   : > { %1117 = vmatprep.mubr.bf16.mxu0 %v1174_v21 }
  0x2e   : > { %1086 = vmatmul.mubr.bf16.gmra.mrb[4].mxu1 %v1175_v22 }
  0x2f   : > { %1118 = vmatmul.mubr.bf16.gmra.mrb[4].mxu0 %v1176_v23  ;;  %1089 = vmatprep.mubr.bf16.mxu1 %v1177_v24 }
  0x30   : > { %1121 = vmatprep.mubr.bf16.mxu0 %v1178_v25 }
  0x36   : > { %1090 = vmatmul.mubr.bf16.gmra.mrb[8].mxu1 %v1179_v26 }
  0x37   : > { %1122 = vmatmul.mubr.bf16.gmra.mrb[8].mxu0 %v1180_v27  ;;  %1093 = vmatprep.mubr.bf16.mxu1 %v1181_v28 }
  0x38   : > { %1125 = vmatprep.mubr.bf16.mxu0 %v1182_v29 }
  0x3e   : > { %1094 = vmatmul.mubr.bf16.gmra.mrb[12].mxu1 %v1183_v30 }
  0x3f   : > { %1126 = vmatmul.mubr.bf16.gmra.mrb[12].mxu0 %v1184_v31 }
  0xf9   : > { %v1083_v34 = vpop.f32.mrb[0].mxu1 }
  0xfa   : > { %v1115_v35 = vpop.f32.mrb[0].mxu0  ;;  %v445_v36 = vpop.f32.mrb[1].mxu1 }
  0xfb   : > { %v647_v38 = vadd.f32 %v1115_v35, %v1083_v34  ;;  %v638_v39 = vpop.f32.mrb[1].mxu0  ;;  %v1084_v40 = vpop.f32.mrb[2].mxu1 }
  0xfc   : > { %v639_v41 = vadd.f32 %v638_v39, %v445_v36  ;;  %v1116_v42 = vpop.f32.mrb[2].mxu0  ;;  %v448_v43 = vpop.f32.mrb[3].mxu1 }
  0xfd   : > { %v650_v44 = vadd.f32 %v1116_v42, %v1084_v40  ;;  %v641_v45 = vpop.f32.mrb[3].mxu0  ;;  %v710_v46 = vadd.f32 %v1377_v37, %v647_v38 }
  0xfe   : > { %v642_v47 = vadd.f32 %v641_v45, %v448_v43  ;;  %v708_v48 = vadd.f32 %v1377_v37, %v639_v41 }
  0xff   : > { %v1384_v49 = vsel %vm726_vm0, %v710_v46, -1e+30  ;;  %v711_v50 = vadd.f32 %v1377_v37, %v650_v44 }
 0x100   : > { %747 = vmax.xlane.f32.xlu1 %v1384_v49  ;;  %v1390_v51 = vsel %vm726_vm0, %v708_v48, -1e+30  ;;  %v709_v52 = vadd.f32 %v1377_v37, %v642_v47 }
 0x101   : > { %743 = vmax.xlane.f32.xlu0 %v1390_v51  ;;  %v1087_v53 = vpop.f32.mrb[4].mxu1  ;;  %v1396_v59 = vsel %vm726_vm0, %v711_v50, -1e+30 }
 0x102   : > { %v1119_v54 = vpop.f32.mrb[4].mxu0  ;;  %v461_v55 = vpop.f32.mrb[5].mxu1  ;;  %v1401_v63 = vsel %vm726_vm0, %v709_v52, -1e+30 }
 0x103   : > { %v663_v56 = vadd.f32 %v1119_v54, %v1087_v53  ;;  %v654_v57 = vpop.f32.mrb[5].mxu0  ;;  %v1088_v58 = vpop.f32.mrb[6].mxu1 }
 0x104   : > { %v655_v60 = vadd.f32 %v654_v57, %v461_v55  ;;  %749 = vmax.xlane.f32.xlu1 %v1396_v59  ;;  %v1120_v61 = vpop.f32.mrb[6].mxu0  ;;  %v464_v62 = vpop.f32.mrb[7].mxu1 }
 0x105   : > { %v666_v0 = vadd.f32 %v1120_v61, %v1088_v58  ;;  %v657_v1 = vpop.f32.mrb[7].mxu0  ;;  %745 = vmax.xlane.f32.xlu0 %v1401_v63  ;;  %v714_v2 = vadd.f32 %v1377_v37, %v663_v56 }
 0x106   : > { %v658_v3 = vadd.f32 %v657_v1, %v464_v62  ;;  %v712_v6 = vadd.f32 %v1377_v37, %v655_v60 }
 0x107   : > { %v1407_v4 = vsel %vm726_vm0, %v714_v2, -1e+30  ;;  %v715_v5 = vadd.f32 %v1377_v37, %v666_v0 }
 0x108   : > { %v713_v9 = vadd.f32 %v1377_v37, %v658_v3  ;;  %v1420_v18 = vsel %vm726_vm0, %v712_v6, -1e+30 }
 0x109   : > { %755 = vmax.xlane.f32.xlu0 %v1407_v4  ;;  %v1091_v7 = vpop.f32.mrb[8].mxu1  ;;  %v1414_v8 = vsel %vm726_vm0, %v715_v5, -1e+30 }
 0x10a   : > { %757 = vmax.xlane.f32.xlu1 %v1414_v8  ;;  %v1123_v10 = vpop.f32.mrb[8].mxu0  ;;  %v477_v11 = vpop.f32.mrb[9].mxu1  ;;  %v1425_v21 = vsel %vm726_vm0, %v713_v9, -1e+30 }
 0x10b   : > { %v679_v12 = vadd.f32 %v1123_v10, %v1091_v7  ;;  %v670_v13 = vpop.f32.mrb[9].mxu0  ;;  %v1092_v14 = vpop.f32.mrb[10].mxu1 }
 0x10c   : > { %v671_v15 = vadd.f32 %v670_v13, %v477_v11  ;;  %v1124_v16 = vpop.f32.mrb[10].mxu0  ;;  %v480_v17 = vpop.f32.mrb[11].mxu1 }
 0x10d   : > { %v682_v19 = vadd.f32 %v1124_v16, %v1092_v14  ;;  %v673_v20 = vpop.f32.mrb[11].mxu0  ;;  %751 = vmax.xlane.f32.xlu0 %v1420_v18  ;;  %v718_v22 = vadd.f32 %v1377_v37, %v679_v12 }
 0x10e   : > { %v674_v23 = vadd.f32 %v673_v20, %v480_v17  ;;  %753 = vmax.xlane.f32.xlu1 %v1425_v21  ;;  %v716_v26 = vadd.f32 %v1377_v37, %v671_v15 }
 0x10f   : > { %v1431_v24 = vsel %vm726_vm0, %v718_v22, -1e+30  ;;  %v719_v25 = vadd.f32 %v1377_v37, %v682_v19 }
 0x110   : > { %v717_v29 = vadd.f32 %v1377_v37, %v674_v23  ;;  %v1444_v40 = vsel %vm726_vm0, %v716_v26, -1e+30 }
 0x111   : > { %763 = vmax.xlane.f32.xlu0 %v1431_v24  ;;  %v1095_v27 = vpop.f32.mrb[12].mxu1  ;;  %v1438_v28 = vsel %vm726_vm0, %v719_v25, -1e+30 }
 0x112   : > { %v1127_v30 = vpop.f32.mrb[12].mxu0  ;;  %765 = vmax.xlane.f32.xlu1 %v1438_v28  ;;  %v493_v31 = vpop.f32.mrb[13].mxu1  ;;  %v1449_v43 = vsel %vm726_vm0, %v717_v29, -1e+30 }
 0x113   : > { %v695_v32 = vadd.f32 %v1127_v30, %v1095_v27  ;;  %v686_v34 = vpop.f32.mrb[13].mxu0  ;;  %v1096_v35 = vpop.f32.mrb[14].mxu1 }
 0x114   : > { %v687_v36 = vadd.f32 %v686_v34, %v493_v31  ;;  %v1128_v38 = vpop.f32.mrb[14].mxu0  ;;  %v496_v39 = vpop.f32.mrb[15].mxu1 }
 0x115   : > { %v698_v41 = vadd.f32 %v1128_v38, %v1096_v35  ;;  %v689_v42 = vpop.f32.mrb[15].mxu0  ;;  %759 = vmax.xlane.f32.xlu0 %v1444_v40  ;;  %v722_v48 = vadd.f32 %v1377_v37, %v695_v32 }
 0x116   : > { %v690_v44 = vadd.f32 %v689_v42, %v496_v39  ;;  %761 = vmax.xlane.f32.xlu1 %v1449_v43  ;;  %v720_v45 = vadd.f32 %v1377_v37, %v687_v36 }
 0x117   : > { %v723_v52 = vadd.f32 %v1377_v37, %v698_v41  ;;  %v1468_v53 = vsel %vm726_vm0, %v722_v48, -1e+30 }
 0x118   : > { %v1455_v46 = vsel %vm726_vm0, %v720_v45, -1e+30  ;;  %v721_v47 = vadd.f32 %v1377_v37, %v690_v44 }
 0x119   : > { %767 = vmax.xlane.f32.xlu0 %v1455_v46  ;;  %v1473_v54 = vsel %vm726_vm0, %v723_v52, -1e+30 }
 0x11a   : > { %v1462_v50 = vsel %vm726_vm0, %v721_v47, -1e+30 }
 0x11b   : > { %769 = vmax.xlane.f32.xlu1 %v1462_v50 }
 0x11d   : > { %771 = vmax.xlane.f32.xlu0 %v1468_v53 }
 0x11f   : > { %773 = vmax.xlane.f32.xlu1 %v1473_v54 }
 0x18d   : > { %v748_v55 = vpop.xlane.xlu1 %747 }
 0x18e   : > { %v1477_v56 = vsub.f32 %v1384_v49, %v748_v55  ;;  %v744_v57 = vpop.xlane.xlu0 %743 }
 0x18f   : > { %v1480_v37 = vsub.f32 %v1390_v51, %v744_v57 }
 0x190   : > { %v795_v58 = vmul.f32 1.442695, %v1477_v56 }
 0x191   : > { %v791_v60 = vmul.f32 1.442695, %v1480_v37  ;;  %v750_v61 = vpop.xlane.xlu1 %749 }
 0x192   : > { %1185 = vpow2.f32 %v795_v58  ;;  %v1485_v33 = vsub.f32 %v1396_v59, %v750_v61  ;;  %v746_v62 = vpop.xlane.xlu0 %745 }
 0x193   : > { %v1488_v0 = vsub.f32 %v1401_v63, %v746_v62  ;;  %1187 = vpow2.f32 %v791_v60 }
 0x194   : > { %v797_v49 = vmul.f32 1.442695, %v1485_v33 }
 0x195   : > { %v793_v51 = vmul.f32 1.442695, %v1488_v0 }
 0x196   : > { %1189 = vpow2.f32 %v797_v49  ;;  %v756_v1 = vpop.xlane.xlu0 %755 }
 0x197   : > { %v1493_v2 = vsub.f32 %v1407_v4, %v756_v1  ;;  %v758_v3 = vpop.xlane.xlu1 %757  ;;  %1191 = vpow2.f32 %v793_v51 }
 0x198   : > { %v1496_v5 = vsub.f32 %v1414_v8, %v758_v3 }
 0x199   : > { %v803_v59 = vmul.f32 1.442695, %v1493_v2 }
 0x19a   : > { %v805_v63 = vmul.f32 1.442695, %v1496_v5  ;;  %v752_v6 = vpop.xlane.xlu0 %751 }
 0x19b   : > { %1193 = vpow2.f32 %v803_v59  ;;  %v1501_v7 = vsub.f32 %v1420_v18, %v752_v6  ;;  %v754_v9 = vpop.xlane.xlu1 %753 }
 0x19c   : > { %v1186_v10 = vpop.eup %1185  ;;  %v1504_v11 = vsub.f32 %v1425_v21, %v754_v9  ;;  %1195 = vpow2.f32 %v805_v63 }
 0x19d   : > { %v799_v4 = vmul.f32 1.442695, %v1501_v7  ;;  %827 = vadd.xlane.f32.xlu0 %v1186_v10  ;;  %v1188_v13 = vpop.eup %1187 }
 0x19e   : > { %v801_v8 = vmul.f32 1.442695, %v1504_v11  ;;  %v764_v12 = vpop.xlane.xlu0 %763 }
 0x19f   : > { %1197 = vpow2.f32 %v799_v4  ;;  %v1509_v14 = vsub.f32 %v1431_v24, %v764_v12  ;;  %v766_v15 = vpop.xlane.xlu1 %765 }
 0x1a0   : > { %v1190_v16 = vpop.eup %1189  ;;  %v1512_v17 = vsub.f32 %v1438_v28, %v766_v15  ;;  %1199 = vpow2.f32 %v801_v8 }
 0x1a1   : > { %v811_v18 = vmul.f32 1.442695, %v1509_v14  ;;  %829 = vadd.xlane.f32.xlu1 %v1190_v16  ;;  %823 = vadd.xlane.f32.xlu0 %v1188_v13  ;;  %v1192_v23 = vpop.eup %1191 }
 0x1a2   : > { %v813_v19 = vmul.f32 1.442695, %v1512_v17  ;;  %v760_v20 = vpop.xlane.xlu0 %759 }
 0x1a3   : > { %1201 = vpow2.f32 %v811_v18  ;;  %v1517_v21 = vsub.f32 %v1444_v40, %v760_v20  ;;  %v762_v22 = vpop.xlane.xlu1 %761 }
 0x1a4   : > { %v1520_v24 = vsub.f32 %v1449_v43, %v762_v22  ;;  %1203 = vpow2.f32 %v813_v19 }
 0x1a5   : > { %v1194_v25 = vpop.eup %1193  ;;  %v807_v26 = vmul.f32 1.442695, %v1517_v21  ;;  %825 = vadd.xlane.f32.xlu1 %v1192_v23 }
 0x1a6   : > { %v809_v27 = vmul.f32 1.442695, %v1520_v24  ;;  %835 = vadd.xlane.f32.xlu0 %v1194_v25  ;;  %v768_v28 = vpop.xlane.xlu0 %767  ;;  %v1196_v30 = vpop.eup %1195 }
 0x1a7   : > { %1205 = vpow2.f32 %v807_v26  ;;  %v1525_v29 = vsub.f32 %v1455_v46, %v768_v28 }
 0x1a8   : > { %v770_v31 = vpop.xlane.xlu1 %769  ;;  %1207 = vpow2.f32 %v809_v27 }
 0x1a9   : > { %v1198_v32 = vpop.eup %1197  ;;  %v815_v34 = vmul.f32 1.442695, %v1525_v29  ;;  %v1529_v35 = vsub.f32 %v1462_v50, %v770_v31  ;;  %837 = vadd.xlane.f32.xlu1 %v1196_v30 }
 0x1aa   : > { %831 = vadd.xlane.f32.xlu0 %v1198_v32  ;;  %v772_v36 = vpop.xlane.xlu0 %771  ;;  %v1200_v40 = vpop.eup %1199 }
 0x1ab   : > { %1209 = vpow2.f32 %v815_v34  ;;  %v817_v38 = vmul.f32 1.442695, %v1529_v35  ;;  %v1533_v39 = vsub.f32 %v1468_v53, %v772_v36 }
 0x1ac   : > { %v774_v41 = vpop.xlane.xlu1 %773 }
 0x1ad   : > { %v1202_v42 = vpop.eup %1201  ;;  %1211 = vpow2.f32 %v817_v38  ;;  %v819_v43 = vmul.f32 1.442695, %v1533_v39  ;;  %v1537_v44 = vsub.f32 %v1473_v54, %v774_v41  ;;  %833 = vadd.xlane.f32.xlu1 %v1200_v40 }
 0x1ae   : > { %843 = vadd.xlane.f32.xlu0 %v1202_v42  ;;  %v1204_v46 = vpop.eup %1203 }
 0x1af   : > { %1213 = vpow2.f32 %v819_v43  ;;  %v821_v45 = vmul.f32 1.442695, %v1537_v44 }
 0x1b1   : > { %v1206_v47 = vpop.eup %1205  ;;  %1215 = vpow2.f32 %v821_v45  ;;  %845 = vadd.xlane.f32.xlu1 %v1204_v46 }
 0x1b2   : > { %839 = vadd.xlane.f32.xlu0 %v1206_v47  ;;  %v1208_v48 = vpop.eup %1207 }
 0x1b5   : > { %v1210_v50 = vpop.eup %1209  ;;  %841 = vadd.xlane.f32.xlu1 %v1208_v48 }
 0x1b6   : > { %847 = vadd.xlane.f32.xlu0 %v1210_v50 }
 0x1b7   : > { %v1212_v52 = vpop.eup %1211 }
 0x1b9   : > { %v1214_v53 = vpop.eup %1213  ;;  %849 = vadd.xlane.f32.xlu1 %v1212_v52 }
 0x1ba   : > { %851 = vadd.xlane.f32.xlu0 %v1214_v53 }
 0x1bb   : > { %v1216_v54 = vpop.eup %1215 }
 0x1bd   : > { %853 = vadd.xlane.f32.xlu1 %v1216_v54 }
 0x22a   : > { %v828_v55 = vpop.xlane.xlu0 %827 }
 0x22b   : > { %1217 = vlog2.f32 %v828_v55 }
 0x22e   : > { %v830_v57 = vpop.xlane.xlu1 %829  ;;  %v824_v58 = vpop.xlane.xlu0 %823 }
 0x22f   : > { %1219 = vlog2.f32 %v830_v57 }
 0x230   : > { %1221 = vlog2.f32 %v824_v58 }
 0x232   : > { %v826_v60 = vpop.xlane.xlu1 %825 }
 0x233   : > { %1223 = vlog2.f32 %v826_v60  ;;  %v836_v61 = vpop.xlane.xlu0 %835 }
 0x234   : > { %1225 = vlog2.f32 %v836_v61 }
 0x235   : > { %v1218_v62 = vpop.eup %1217 }
 0x236   : > { %v860_v49 = vmul.f32 0.6931472, %v1218_v62  ;;  %v838_v51 = vpop.xlane.xlu1 %837 }
 0x237   : > { %1227 = vlog2.f32 %v838_v51  ;;  %v832_v1 = vpop.xlane.xlu0 %831 }
 0x238   : > { %v889_v3 = vsub.f32 %v1477_v56, %v860_v49  ;;  %1229 = vlog2.f32 %v832_v1 }
 0x239   : > { %v1220_v59 = vpop.eup %1219 }
 0x23a   : > { %v1222_v63 = vpop.eup %1221  ;;  %905 = vst [vmem:[%s1544_s17 + $0x10] sm:$0xff] %v889_v3  ;;  %v862_v6 = vmul.f32 0.6931472, %v1220_v59  ;;  %v834_v9 = vpop.xlane.xlu1 %833 }
 0x23b   : > { %v856_v10 = vmul.f32 0.6931472, %v1222_v63  ;;  %1231 = vlog2.f32 %v834_v9  ;;  %v844_v4 = vpop.xlane.xlu0 %843 }
 0x23c   : > { %v890_v8 = vsub.f32 %v1485_v33, %v862_v6  ;;  %1233 = vlog2.f32 %v844_v4 }
 0x23d   : > { %v1224_v12 = vpop.eup %1223  ;;  %v887_v13 = vsub.f32 %v1480_v37, %v856_v10 }
 0x23e   : > { %v1226_v15 = vpop.eup %1225  ;;  %906 = vst [vmem:[%s1544_s17 + $0x18] sm:$0xff] %v890_v8  ;;  %v858_v56 = vmul.f32 0.6931472, %v1224_v12  ;;  %v846_v16 = vpop.xlane.xlu1 %845 }
 0x23f   : > { %903 = vst [vmem:[%s1544_s17] sm:$0xff] %v887_v13  ;;  %v868_v18 = vmul.f32 0.6931472, %v1226_v15  ;;  %1235 = vlog2.f32 %v846_v16  ;;  %v840_v19 = vpop.xlane.xlu0 %839 }
 0x240   : > { %v888_v20 = vsub.f32 %v1488_v0, %v858_v56  ;;  %1237 = vlog2.f32 %v840_v19 }
 0x241   : > { %v1228_v22 = vpop.eup %1227  ;;  %v893_v33 = vsub.f32 %v1493_v2, %v868_v18 }
 0x242   : > { %v1230_v23 = vpop.eup %1229  ;;  %904 = vst [vmem:[%s1544_s17 + $0x8] sm:$0xff] %v888_v20  ;;  %v870_v37 = vmul.f32 0.6931472, %v1228_v22  ;;  %v842_v25 = vpop.xlane.xlu1 %841 }
 0x243   : > { %909 = vst [vmem:[%s1544_s17 + $0x30] sm:$0xff] %v893_v33  ;;  %v864_v26 = vmul.f32 0.6931472, %v1230_v23  ;;  %1239 = vlog2.f32 %v842_v25  ;;  %v848_v27 = vpop.xlane.xlu0 %847 }
 0x244   : > { %v894_v28 = vsub.f32 %v1496_v5, %v870_v37  ;;  %1241 = vlog2.f32 %v848_v27 }
 0x245   : > { %v1232_v30 = vpop.eup %1231  ;;  %v891_v0 = vsub.f32 %v1501_v7, %v864_v26 }
 0x246   : > { %v1234_v31 = vpop.eup %1233  ;;  %910 = vst [vmem:[%s1544_s17 + $0x38] sm:$0xff] %v894_v28  ;;  %v866_v2 = vmul.f32 0.6931472, %v1232_v30  ;;  %v850_v32 = vpop.xlane.xlu1 %849 }
 0x247   : > { %907 = vst [vmem:[%s1544_s17 + $0x20] sm:$0xff] %v891_v0  ;;  %v876_v34 = vmul.f32 0.6931472, %v1234_v31  ;;  %1243 = vlog2.f32 %v850_v32  ;;  %v852_v36 = vpop.xlane.xlu0 %851 }
 0x248   : > { %v892_v38 = vsub.f32 %v1504_v11, %v866_v2  ;;  %1245 = vlog2.f32 %v852_v36 }
 0x249   : > { %v1236_v5 = vpop.eup %1235  ;;  %v897_v40 = vsub.f32 %v1509_v14, %v876_v34 }
 0x24a   : > { %v1238_v41 = vpop.eup %1237  ;;  %908 = vst [vmem:[%s1544_s17 + $0x28] sm:$0xff] %v892_v38  ;;  %v878_v7 = vmul.f32 0.6931472, %v1236_v5  ;;  %v854_v42 = vpop.xlane.xlu1 %853 }
 0x24b   : > { %913 = vst [vmem:[%s1544_s17 + $0x50] sm:$0xff] %v897_v40  ;;  %v872_v43 = vmul.f32 0.6931472, %v1238_v41  ;;  %1247 = vlog2.f32 %v854_v42 }
 0x24c   : > { %v898_v45 = vsub.f32 %v1512_v17, %v878_v7 }
 0x24d   : > { %v1240_v46 = vpop.eup %1239  ;;  %v895_v47 = vsub.f32 %v1517_v21, %v872_v43 }
 0x24e   : > { %v1242_v11 = vpop.eup %1241  ;;  %914 = vst [vmem:[%s1544_s17 + $0x58] sm:$0xff] %v898_v45  ;;  %v874_v48 = vmul.f32 0.6931472, %v1240_v46 }
 0x24f   : > { %911 = vst [vmem:[%s1544_s17 + $0x40] sm:$0xff] %v895_v47  ;;  %v880_v14 = vmul.f32 0.6931472, %v1242_v11 }
 0x250   : > { %v896_v50 = vsub.f32 %v1520_v24, %v874_v48 }
 0x251   : > { %v1244_v52 = vpop.eup %1243  ;;  %v899_v53 = vsub.f32 %v1525_v29, %v880_v14 }
 0x252   : > { %v1246_v54 = vpop.eup %1245  ;;  %912 = vst [vmem:[%s1544_s17 + $0x48] sm:$0xff] %v896_v50  ;;  %v882_v55 = vmul.f32 0.6931472, %v1244_v52 }
 0x253   : > { %915 = vst [vmem:[%s1544_s17 + $0x60] sm:$0xff] %v899_v53  ;;  %v884_v17 = vmul.f32 0.6931472, %v1246_v54 }
 0x254   : > { %v900_v21 = vsub.f32 %v1529_v35, %v882_v55 }
 0x255   : > { %v1248_v57 = vpop.eup %1247  ;;  %v901_v58 = vsub.f32 %v1533_v39, %v884_v17 }
 0x256   : > { %916 = vst [vmem:[%s1544_s17 + $0x68] sm:$0xff] %v900_v21  ;;  %v886_v60 = vmul.f32 0.6931472, %v1248_v57 }
 0x257   : > { %917 = vst [vmem:[%s1544_s17 + $0x70] sm:$0xff] %v901_v58 }
 0x258   : > { %v902_v61 = vsub.f32 %v1537_v44, %v886_v60 }
 0x25a   : > { %918 = vst [vmem:[%s1544_s17 + $0x78] sm:$0xff] %v902_v61 }
 0x25b PF: > { %s15_s18 = sadd.s32 1, %s1255_s18  }
 0x25c   : > { %p12_p4 = scmp.ge.s32.totalorder %s15_s18, 4  }
 0x25e   :  { %14 = sbr.rel (!%p12_p4) target bundleno = 1 (0x1), region = 73 }

// kernel: decoder_forward.8
= control target key start
LH: loop header
LB: loop body
LE: loop exit
PB: predicated region body
PF: predicated region fallthrough
CT: control target
= control target key end

     0   :  { %v10276_v1 = vmov 0.0   ;;  %v10274_v2 = vmov 0   ;;  %vm7520_vm0 = vmmov 0   ;;  %v10272_v28 = vmov 0.0|0.0   ;;  %s10266_s2 = inlined_call_operand.vmem [shape: bf16[2,128,384], index: 2, kind: input, shape index: {}]   ;;  %s10267_s4 = inlined_call_operand.vmem [shape: bf16[16,16,128], index: 4, kind: output, shape index: {0}]   ;;  %s10268_s0 = inlined_call_operand.vmem [shape: f32[2,16,16,384], index: 0, kind: input, shape index: {}, may-alias: {0,1}]   ;;  %s10269_s3 = inlined_call_operand.vmem [shape: f32[2,1,128], index: 3, kind: input, shape index: {}]   ;;  %s10270_s5 = inlined_call_operand.vmem [shape: bf16[16,16,128], index: 5, kind: output, shape index: {1}]   ;;  %s10271_s1 = inlined_call_operand.vmem [shape: f32[2,16,16,384], index: 1, kind: input, shape index: {}, may-alias: {0,1}]  }
   0x1   :  { %v7555_v0 = vld [vmem:[%s10266_s2 + $0x4] ss:$12 sps:$4 sm:$0xff]   ;;  %6383 = vmatprep.subr.bf16.mxu1 %v10276_v1  ;;  %309 = vmatprep.mubr.bf16.mxu0 %v10274_v2  ;;  %v7562_v3 = vld [vmem:[%s10266_s2] ss:$12 sps:$4 sm:$0xff]   ;;  %v7570_v4 = vld [vmem:[%s10266_s2 + $0x1c] ss:$12 sps:$4 sm:$0xff]   ;;  %v7886_v51 = vcombine.low %v10272_v28, %v10272_v28  ;;  %v7890_v52 = vcombine.high %v10272_v28, %v10272_v28 }
   0x2   :  { %6399 = vmatprep.mubr.msk.bf16.mxu1 %vm7520_vm0, %v10276_v1  ;;  %277 = vmatprep.subr.bf16.mxu0 %v7555_v0  ;;  %v7576_v5 = vld [vmem:[%s10266_s2 + $0x18] ss:$12 sps:$4 sm:$0xff]   ;;  %v7582_v6 = vld [vmem:[%s10266_s2 + $0x34] ss:$12 sps:$4 sm:$0xff]   ;;  %v7588_v7 = vld [vmem:[%s10266_s2 + $0x30] ss:$12 sps:$4 sm:$0xff]  }
   0x3   :  { %278 = vmatpush1.bf16.msra.mxu0 %v7562_v3  ;;  %v7594_v8 = vld [vmem:[%s10266_s2 + $0x4c] ss:$12 sps:$4 sm:$0xff]   ;;  %v7599_v9 = vld [vmem:[%s10266_s2 + $0x8] ss:$12 sps:$4 sm:$0xff]   ;;  %v7612_v11 = vld [vmem:[%s10266_s2 + $0x64] ss:$12 sps:$4 sm:$0xff]  }
   0x4   :  { %279 = vmatprep.subr.bf16.mxu0 %v7570_v4  ;;  %v7605_v10 = vld [vmem:[%s10266_s2 + $0x48] ss:$12 sps:$4 sm:$0xff]   ;;  %6384 = vmatpush3.bf16.msra.mxu1 %v7599_v9  ;;  %v7618_v12 = vld [vmem:[%s10266_s2 + $0x20] ss:$12 sps:$4 sm:$0xff]   ;;  %v7630_v14 = vld [vmem:[%s10266_s2 + $0x38] ss:$12 sps:$4 sm:$0xff]  }
   0x5   :  { %6385 = vmatprep.subr.bf16.mxu1 %v10276_v1  ;;  %v7623_v13 = vld [vmem:[%s10266_s2 + $0x60] ss:$12 sps:$4 sm:$0xff]   ;;  %v7636_v15 = vld [vmem:[%s10266_s2 + $0x7c] ss:$12 sps:$4 sm:$0xff]   ;;  %v7643_v16 = vld [vmem:[%s10266_s2 + $0x78] ss:$12 sps:$4 sm:$0xff]  }
   0x6   :  { %10377 = vst [vmem:[#allocation4_spill] sm:$0xff] %v7623_v13  ;;  %10378 = vst [vmem:[#allocation5_spill] sm:$0xff] %v7636_v15  ;;  %v7649_v17 = vld [vmem:[%s10266_s2 + $0x50] ss:$12 sps:$4 sm:$0xff]   ;;  %v7655_v18 = vld [vmem:[%s10266_s2 + $0x94] ss:$12 sps:$4 sm:$0xff]  }
   0x7   :  { %280 = vmatpush1.bf16.msra.mxu0 %v7576_v5  ;;  %10379 = vst [vmem:[#allocation6_spill] sm:$0xff] %v7643_v16  ;;  %10380 = vst [vmem:[#allocation7_spill] sm:$0xff] %v7655_v18  ;;  %v7661_v19 = vld [vmem:[%s10266_s2 + $0x90] ss:$12 sps:$4 sm:$0xff]   ;;  %v7668_v20 = vld [vmem:[%s10266_s2 + $0x68] ss:$12 sps:$4 sm:$0xff]  }
   0x8   :  { %281 = vmatprep.subr.bf16.mxu0 %v7582_v6  ;;  %6386 = vmatpush3.bf16.msra.mxu1 %v7618_v12  ;;  %10381 = vst [vmem:[#allocation8_spill] sm:$0xff] %v7661_v19  ;;  %10382 = vst [vmem:[#allocation9_spill] sm:$0xff] %v7668_v20  ;;  %v7674_v21 = vld [vmem:[%s10266_s2 + $0xac] ss:$12 sps:$4 sm:$0xff]   ;;  %v7680_v22 = vld [vmem:[%s10266_s2 + $0xa8] ss:$12 sps:$4 sm:$0xff]  }
   0x9   :  { %6387 = vmatprep.subr.bf16.mxu1 %v10276_v1  ;;  %10383 = vst [vmem:[#allocation10_spill] sm:$0xff] %v7674_v21  ;;  %10384 = vst [vmem:[#allocation11_spill] sm:$0xff] %v7680_v22  ;;  %v7685_v23 = vld [vmem:[%s10266_s2 + $0x80] ss:$12 sps:$4 sm:$0xff]   ;;  %v7690_v24 = vld [vmem:[%s10266_s2 + $0xc4] ss:$12 sps:$4 sm:$0xff]  }
   0xa   :  { %10385 = vst [vmem:[#allocation12_spill] sm:$0xff] %v7685_v23  ;;  %10386 = vst [vmem:[#allocation13_spill] sm:$0xff] %v7690_v24  ;;  %v7699_v25 = vld [vmem:[%s10266_s2 + $0x98] ss:$12 sps:$4 sm:$0xff]   ;;  %v7704_v26 = vld [vmem:[%s10266_s2 + $0xc0] ss:$12 sps:$4 sm:$0xff]  }
   0xb   :  { %282 = vmatpush1.bf16.msra.mxu0 %v7588_v7  ;;  %10387 = vst [vmem:[#allocation14_spill] sm:$0xff] %v7699_v25  ;;  %v7709_v27 = vld [vmem:[%s10266_s2 + $0xdc] ss:$12 sps:$4 sm:$0xff]   ;;  %v7726_v30 = vld [vmem:[%s10266_s2 + $0xd8] ss:$12 sps:$4 sm:$0xff]   ;;  %10389 = vst [vmem:[#allocation16_spill] sm:$0xff] %v7886_v51 }
   0xc   :  { %283 = vmatprep.subr.bf16.mxu0 %v7594_v8  ;;  %6388 = vmatpush3.bf16.msra.mxu1 %v7630_v14  ;;  %v7720_v29 = vld [vmem:[%s10266_s2 + $0xb0] ss:$12 sps:$4 sm:$0xff]   ;;  %v7733_v31 = vld [vmem:[%s10266_s2 + $0xf4] ss:$12 sps:$4 sm:$0xff]   ;;  %v7753_v34 = vld [vmem:[%s10266_s2 + $0x10c] ss:$12 sps:$4 sm:$0xff]  }
   0xd   :  { %6389 = vmatprep.subr.bf16.mxu1 %v10276_v1  ;;  %10388 = vst [vmem:[#allocation15_spill] sm:$0xff] %v7720_v29  ;;  %v7740_v32 = vld [vmem:[%s10266_s2 + $0xc8] ss:$12 sps:$4 sm:$0xff]   ;;  %v7746_v33 = vld [vmem:[%s10266_s2 + $0xf0] ss:$12 sps:$4 sm:$0xff]   ;;  %10390 = vst [vmem:[#allocation17_spill] sm:$0xff] %v7890_v52 }
   0xe   :  { %v7760_v35 = vld [vmem:[%s10266_s2 + $0xe0] ss:$12 sps:$4 sm:$0xff]   ;;  %v7766_v36 = vld [vmem:[%s10266_s2 + $0x108] ss:$12 sps:$4 sm:$0xff]   ;;  %v7776_v37 = vld [vmem:[%s10266_s2 + $0xf8] ss:$12 sps:$4 sm:$0xff]  }
   0xf   :  { %284 = vmatpush1.bf16.msra.mxu0 %v7605_v10  ;;  %v7785_v38 = vld [vmem:[%s10266_s2 + $0x110] ss:$12 sps:$4 sm:$0xff]   ;;  %v7796_v40 = vld [vmem:[%s10266_s2 + $0x120] ss:$12 sps:$4 sm:$0xff]   ;;  %v7804_v41 = vld [vmem:[%s10266_s2 + $0x128] ss:$12 sps:$4 sm:$0xff]  }
  0x10   :  { %285 = vmatprep.subr.bf16.mxu0 %v7612_v11  ;;  %6390 = vmatpush3.bf16.msra.mxu1 %v7649_v17  ;;  %v7790_v39 = vld [vmem:[%s10266_s2 + $0x124] ss:$12 sps:$4 sm:$0xff]   ;;  %v7809_v42 = vld [vmem:[%s10266_s2 + $0x13c] ss:$12 sps:$4 sm:$0xff]   ;;  %v7823_v44 = vld [vmem:[%s10266_s2 + $0x140] ss:$12 sps:$4 sm:$0xff]  }
  0x11   :  { %6391 = vmatprep.subr.bf16.mxu1 %v10276_v1  ;;  %v7815_v43 = vld [vmem:[%s10266_s2 + $0x138] ss:$12 sps:$4 sm:$0xff]   ;;  %v7828_v45 = vld [vmem:[%s10266_s2 + $0x154] ss:$12 sps:$4 sm:$0xff]   ;;  %v7834_v46 = vld [vmem:[%s10266_s2 + $0x150] ss:$12 sps:$4 sm:$0xff]  }
  0x12   :  { %v7842_v47 = vld [vmem:[%s10266_s2 + $0x158] ss:$12 sps:$4 sm:$0xff]   ;;  %v7853_v49 = vld [vmem:[%s10266_s2 + $0x168] ss:$12 sps:$4 sm:$0xff]   ;;  %v7861_v50 = vld [vmem:[%s10266_s2 + $0x170] ss:$12 sps:$4 sm:$0xff]  }
  0x13   :  { %286 = vmatpush1.bf16.msra.mxu0 %v7623_v13  ;;  %v7847_v48 = vld [vmem:[%s10266_s2 + $0x16c] ss:$12 sps:$4 sm:$0xff]   ;;  %5757 = vst [vmem:[%s10267_s4 + $0x38] sm:$0xf] %v7886_v51  ;;  %5758 = vst [vmem:[%s10267_s4 + $0x3c] sm:$0xf] %v7890_v52 }
  0x14   :  { %287 = vmatprep.subr.bf16.mxu0 %v7636_v15  ;;  %6392 = vmatpush3.bf16.msra.mxu1 %v7668_v20  ;;  %5785 = vst [vmem:[%s10267_s4 + $0x40] sm:$0xf] %v7886_v51  ;;  %5786 = vst [vmem:[%s10267_s4 + $0x44] sm:$0xf] %v7890_v52  ;;  %v574_v53 = vld [vmem:[%s10268_s0] sm:$0xff]  ;;  %v577_v55 = vld [vmem:[%s10268_s0 + $0x18] sm:$0xff] }
  0x15   :  { %6393 = vmatprep.subr.bf16.mxu1 %v10276_v1  ;;  %5813 = vst [vmem:[%s10267_s4 + $0x48] sm:$0xf] %v7886_v51  ;;  %5814 = vst [vmem:[%s10267_s4 + $0x4c] sm:$0xf] %v7890_v52  ;;  %v575_v58 = vld [vmem:[%s10268_s0 + $0x8] sm:$0xff]  ;;  %v578_v63 = vld [vmem:[%s10268_s0 + $0x20] sm:$0xff] }
  0x16   :  { %5841 = vst [vmem:[%s10267_s4 + $0x50] sm:$0xf] %v7886_v51  ;;  %5842 = vst [vmem:[%s10267_s4 + $0x54] sm:$0xf] %v7890_v52 }
  0x17   :  { %288 = vmatpush1.bf16.msra.mxu0 %v7643_v16  ;;  %5869 = vst [vmem:[%s10267_s4 + $0x58] sm:$0xf] %v7886_v51  ;;  %5870 = vst [vmem:[%s10267_s4 + $0x5c] sm:$0xf] %v7890_v52 }
  0x18   :  { %289 = vmatprep.subr.bf16.mxu0 %v7655_v18  ;;  %6394 = vmatpush3.bf16.msra.mxu1 %v7685_v23  ;;  %5897 = vst [vmem:[%s10267_s4 + $0x60] sm:$0xf] %v7886_v51  ;;  %5898 = vst [vmem:[%s10267_s4 + $0x64] sm:$0xf] %v7890_v52 }
  0x19   :  { %6395 = vmatprep.subr.bf16.mxu1 %v10276_v1  ;;  %5925 = vst [vmem:[%s10267_s4 + $0x68] sm:$0xf] %v7886_v51  ;;  %5926 = vst [vmem:[%s10267_s4 + $0x6c] sm:$0xf] %v7890_v52 }
  0x1a   :  { %5953 = vst [vmem:[%s10267_s4 + $0x70] sm:$0xf] %v7886_v51  ;;  %5954 = vst [vmem:[%s10267_s4 + $0x74] sm:$0xf] %v7890_v52 }
  0x1b   :  { %290 = vmatpush1.bf16.msra.mxu0 %v7661_v19  ;;  %5981 = vst [vmem:[%s10267_s4 + $0x78] sm:$0xf] %v7886_v51  ;;  %5982 = vst [vmem:[%s10267_s4 + $0x7c] sm:$0xf] %v7890_v52 }
  0x1c   :  { %291 = vmatprep.subr.bf16.mxu0 %v7674_v21  ;;  %6396 = vmatpush3.bf16.msra.mxu1 %v7699_v25 }
  0x1d   :  { %6397 = vmatprep.subr.bf16.mxu1 %v10276_v1 }
  0x1f   :  { %292 = vmatpush1.bf16.msra.mxu0 %v7680_v22 }
  0x20   :  { %490 = vmatprep.subr.bf16.mxu0 %v7690_v24  ;;  %6398 = vmatpush3.bf16.msra.mxu1 %v7720_v29 }
  0x21   :  { %6403 = vmatprep.subr.bf16.mxu1 %v10276_v1 }
  0x22   :  { %310 = vmatmul.mubr.bf16.vlgmr.msra.gmra.mrb[0].mxu0 %v10272_v28 }
  0x23   :  { %491 = vmatpush1.bf16.msra.mxu0 %v7704_v26  ;;  %522 = vmatprep.mubr.bf16.mxu0 %v10274_v2 }
  0x24   :  { %492 = vmatprep.subr.bf16.mxu0 %v7709_v27  ;;  %6400 = vmatmul.mubr.bf16.vlgmr.msra.gmra.mrb[0].mxu1 %v10272_v28 }
  0x25   :  { %6404 = vmatpush3.bf16.msra.mxu1 %v7740_v32  ;;  %6419 = vmatprep.mubr.msk.bf16.mxu1 %vm7520_vm0, %v10276_v1 }
  0x26   :  { %6405 = vmatprep.subr.bf16.mxu1 %v10276_v1 }
  0x27   :  { %493 = vmatpush1.bf16.msra.mxu0 %v7726_v30 }
  0x28   :  { %494 = vmatprep.subr.bf16.mxu0 %v7733_v31 }
  0x29   :  { %6406 = vmatpush3.bf16.msra.mxu1 %v7760_v35 }
  0x2a   :  { %6407 = vmatprep.subr.bf16.mxu1 %v10276_v1 }
  0x2b   :  { %495 = vmatpush1.bf16.msra.mxu0 %v7746_v33 }
  0x2c   :  { %496 = vmatprep.subr.bf16.mxu0 %v7753_v34 }
  0x2d   :  { %6408 = vmatpush3.bf16.msra.mxu1 %v7776_v37 }
  0x2e   :  { %6409 = vmatprep.subr.bf16.mxu1 %v10276_v1 }
  0x2f   :  { %497 = vmatpush1.bf16.msra.mxu0 %v7766_v36 }
  0x30   :  { %498 = vmatprep.subr.bf16.mxu0 %v7790_v39 }
  0x31   :  { %6410 = vmatpush3.bf16.msra.mxu1 %v7785_v38 }
  0x32   :  { %6411 = vmatprep.subr.bf16.mxu1 %v10276_v1 }
  0x33   :  { %499 = vmatpush1.bf16.msra.mxu0 %v7796_v40 }
  0x34   :  { %500 = vmatprep.subr.bf16.mxu0 %v7809_v42 }
  0x35   :  { %6412 = vmatpush3.bf16.msra.mxu1 %v7804_v41 }
  0x36   :  { %6413 = vmatprep.subr.bf16.mxu1 %v10276_v1 }
  0x37   :  { %501 = vmatpush1.bf16.msra.mxu0 %v7815_v43 }
  0x38   :  { %502 = vmatprep.subr.bf16.mxu0 %v7828_v45 }
  0x39   :  { %6414 = vmatpush3.bf16.msra.mxu1 %v7823_v44 }
  0x3a   :  { %6415 = vmatprep.subr.bf16.mxu1 %v10276_v1 }
  0x3b   :  { %503 = vmatpush1.bf16.msra.mxu0 %v7834_v46 }
  0x3c   :  { %504 = vmatprep.subr.bf16.mxu0 %v7847_v48 }
  0x3d   :  { %6416 = vmatpush3.bf16.msra.mxu1 %v7842_v47 }
  0x3e   :  { %6417 = vmatprep.subr.bf16.mxu1 %v10276_v1 }
  0x3f   :  { %505 = vmatpush1.bf16.msra.mxu0 %v7853_v49 }
  0x40   :  { %727 = vmatprep.subr.bf16.mxu0 %v7555_v0 }
  0x41   :  { %6418 = vmatpush3.bf16.msra.mxu1 %v7861_v50 }
  0x42   :  { %523 = vmatmul.mubr.bf16.vlgmr.msra.gmra.mrb[4].mxu0 %v10272_v28  ;;  %6423 = vmatprep.subr.bf16.mxu1 %v10276_v1 }
  0x43   :  { %728 = vmatpush1.bf16.msra.mxu0 %v7562_v3  ;;  %759 = vmatprep.mubr.bf16.mxu0 %v10274_v2 }
  0x44   :  { %6420 = vmatmul.mubr.bf16.vlgmr.msra.gmra.mrb[4].mxu1 %v10272_v28  ;;  %729 = vmatprep.subr.bf16.mxu0 %v7570_v4 }
  0x45   :  { %6424 = vmatpush3.bf16.msra.mxu1 %v7599_v9  ;;  %6439 = vmatprep.mubr.msk.bf16.mxu1 %vm7520_vm0, %v10276_v1 }
  0x46   :  { %6425 = vmatprep.subr.bf16.mxu1 %v10276_v1 }
  0x47   :  { %730 = vmatpush1.bf16.msra.mxu0 %v7576_v5 }
  0x48   :  { %731 = vmatprep.subr.bf16.mxu0 %v7582_v6 }
  0x49   :  { %6426 = vmatpush3.bf16.msra.mxu1 %v7618_v12 }
  0x4a   :  { %6427 = vmatprep.subr.bf16.mxu1 %v10276_v1 }
  0x4b   :  { %732 = vmatpush1.bf16.msra.mxu0 %v7588_v7 }
  0x4c   :  { %733 = vmatprep.subr.bf16.mxu0 %v7594_v8 }
  0x4d   :  { %6428 = vmatpush3.bf16.msra.mxu1 %v7630_v14 }
  0x4e   :  { %6429 = vmatprep.subr.bf16.mxu1 %v10276_v1 }
  0x4f   :  { %734 = vmatpush1.bf16.msra.mxu0 %v7605_v10 }
  0x50   :  { %735 = vmatprep.subr.bf16.mxu0 %v7612_v11 }
  0x51   :  { %6430 = vmatpush3.bf16.msra.mxu1 %v7649_v17 }
  0x52   :  { %6431 = vmatprep.subr.bf16.mxu1 %v10276_v1 }
  0x53   :  { %736 = vmatpush1.bf16.msra.mxu0 %v7623_v13 }
  0x54   :  { %737 = vmatprep.subr.bf16.mxu0 %v7636_v15 }
  0x55   :  { %6432 = vmatpush3.bf16.msra.mxu1 %v7668_v20 }
  0x56   :  { %6433 = vmatprep.subr.bf16.mxu1 %v10276_v1 }
  0x57   :  { %738 = vmatpush1.bf16.msra.mxu0 %v7643_v16 }
  0x58   :  { %739 = vmatprep.subr.bf16.mxu0 %v7655_v18 }
  0x59   :  { %6434 = vmatpush3.bf16.msra.mxu1 %v7685_v23 }
  0x5a   :  { %6435 = vmatprep.subr.bf16.mxu1 %v10276_v1 }
  0x5b   :  { %740 = vmatpush1.bf16.msra.mxu0 %v7661_v19 }
  0x5c   :  { %741 = vmatprep.subr.bf16.mxu0 %v7674_v21 }
  0x5d   :  { %6436 = vmatpush3.bf16.msra.mxu1 %v7699_v25 }
  0x5e   :  { %6437 = vmatprep.subr.bf16.mxu1 %v10276_v1 }
  0x5f   :  { %742 = vmatpush1.bf16.msra.mxu0 %v7680_v22 }
  0x60   :  { %812 = vmatprep.subr.bf16.mxu0 %v7690_v24 }
  0x61   :  { %6438 = vmatpush3.bf16.msra.mxu1 %v7720_v29 }
  0x62   :  { %6443 = vmatprep.subr.bf16.mxu1 %v10276_v1 }
  0xf5   :  { %v311_v54 = vpop.f32.mrb[0].mxu0 }
  0xf6   :  { %v580_v56 = vadd.f32 %v574_v53, %v311_v54  ;;  %v313_v57 = vpop.f32.mrb[1].mxu0 }
  0xf7   :  { %v315_v59 = vpop.f32.mrb[2].mxu0  ;;  %v594_v28 = vadd.f32 %v575_v58, %v313_v57  ;;  %v354_v53 = vpop.f32.mrb[0].mxu1  ;;  %v7998_v57 = vld [vmem:[%s10269_s3] ss:$0 sm:$0xff] }
  0xf8   :  { %v5545_v60 = vmul.f32 -1.442695, %v580_v56  ;;  %v581_v61 = vadd.f32 %v577_v55, %v315_v59  ;;  %v317_v62 = vpop.f32.mrb[3].mxu0  ;;  %v6401_v54 = vpop.f32.mrb[1].mxu1  ;;  %10391 = vst [vmem:[#allocation18_spill] sm:$0xff] %v7998_v57 }
  0xf9   :  { %v595_v1 = vadd.f32 %v578_v63, %v317_v62  ;;  %v5547_v52 = vmul.f32 -1.442695, %v594_v28  ;;  %v357_v24 = vpop.f32.mrb[2].mxu1 }
  0xfa   :  { %7091 = vpow2.f32 %v5545_v60  ;;  %v5546_v2 = vmul.f32 -1.442695, %v581_v61  ;;  %v6402_v29 = vpop.f32.mrb[3].mxu1  ;;  %v579_v61 = vld [vmem:[%s10268_s0 + $0x28] sm:$0xff] }
  0xfb   :  { %v5548_v51 = vmul.f32 -1.442695, %v595_v1  ;;  %v614_v1 = vadd.f32 %v7998_v57, %v354_v53 }
  0xfc   :  { %7093 = vpow2.f32 %v5546_v2 }
  0xfd   :  { %7095 = vpow2.f32 %v5547_v52 }
  0xfe   :  { %7097 = vpow2.f32 %v5548_v51  ;;  %v576_v51 = vld [vmem:[%s10268_s0 + $0x10] sm:$0xff] }
 0x104   :  { %v7092_v56 = vpop.eup %7091 }
 0x105   :  { %v588_v55 = vadd.f32 1.0, %v7092_v56 }
 0x106   :  { %v7094_v59 = vpop.eup %7093 }
 0x107   :  { %7099 = vrcp.f32 %v588_v55  ;;  %v589_v22 = vadd.f32 1.0, %v7094_v59  ;;  %v7096_v21 = vpop.eup %7095 }
 0x108   :  { %v7098_v2 = vpop.eup %7097  ;;  %v602_v28 = vadd.f32 1.0, %v7096_v21 }
 0x109   :  { %7101 = vrcp.f32 %v589_v22  ;;  %v603_v58 = vadd.f32 1.0, %v7098_v2  ;;  %v615_v22 = vadd.f32 %v7998_v57, %v357_v24 }
 0x10a   :  { %7103 = vrcp.f32 %v602_v28 }
 0x10b   :  { %7105 = vrcp.f32 %v603_v58 }
 0x111   :  { %v7100_v29 = vpop.eup %7099 }
 0x112   :  { %v616_v52 = vmul.f32 %v7100_v29, %v614_v1 }
 0x113   :  { %v7102_v60 = vpop.eup %7101 }
 0x114   :  { %v618_v62 = vadd.f32 %v616_v52, %v576_v51  ;;  %v617_v21 = vmul.f32 %v7102_v60, %v615_v22  ;;  %v7104_v53 = vpop.eup %7103  ;;  %v10392_v51 = vmov 0.0   ;;  %v10393_v52 = vmov 0  }
 0x115   :  { %v7106_v54 = vpop.eup %7105  ;;  %v622_v56 = vsub.f32 1.0, %v7104_v53  ;;  %v626_v28 = vmul.f32 0.0, %v7104_v53  ;;  %v10394_v22 = vmov 0.0|0.0   ;;  %v524_v60 = vpop.f32.mrb[4].mxu0 }
 0x116   :  { %7107 = vtanh.f32 %v618_v62  ;;  %v619_v63 = vadd.f32 %v617_v21, %v579_v61  ;;  %v623_v59 = vsub.f32 1.0, %v7106_v54  ;;  %v627_v29 = vmul.f32 0.0, %v7106_v54  ;;  %v526_v61 = vpop.f32.mrb[5].mxu0  ;;  %v5570_v60 = vld [vmem:[%s10268_s0 + $0x48] sm:$0xff] }
 0x117   :  { %v528_v62 = vpop.f32.mrb[6].mxu0  ;;  %v567_v21 = vpop.f32.mrb[4].mxu1 }
 0x118   :  { %7109 = vtanh.f32 %v619_v63  ;;  %v530_v63 = vpop.f32.mrb[7].mxu0  ;;  %v6421_v53 = vpop.f32.mrb[5].mxu1  ;;  %v5568_v21 = vld [vmem:[%s10268_s0 + $0x38] sm:$0xff] }
 0x119   :  { %v570_v54 = vpop.f32.mrb[6].mxu1 }
 0x120   :  { %v7108_v55 = vpop.eup %7107 }
 0x121   :  { %v624_v2 = vmul.f32 %v7108_v55, %v622_v56  ;;  %v6422_v56 = vpop.f32.mrb[7].mxu1  ;;  %v10395_v55 = vld [vmem:[#allocation14_spill] sm:$0xff] }
 0x122   :  { %v7110_v1 = vpop.eup %7109 }
 0x123   :  { %v625_v24 = vmul.f32 %v7110_v1, %v623_v59  ;;  %v8008_v57 = vadd.f32 %v626_v28, %v624_v2  ;;  %v10396_v59 = vld [vmem:[#allocation10_spill] sm:$0xff]  ;;  %v10397_v2 = vld [vmem:[#allocation11_spill] sm:$0xff]  ;;  %v10399_v1 = vld [vmem:[#allocation13_spill] sm:$0xff] }
 0x124   :  { %v10398_v28 = vld [vmem:[#allocation15_spill] sm:$0xff] }
 0x125   :  { %v8010_v25 = vadd.f32 %v627_v29, %v625_v24  ;;  %v5567_v24 = vld [vmem:[%s10268_s0 + $0x30] sm:$0xff] }
 0x127   :  { %v6016_v58 = vpack.c.bf16 %v8010_v25, %v8008_v57 }
 0x129   :  { %6017 = vst [vmem:[%s10267_s4] sm:$0xff] %v6016_v58   ;;  %760 = vmatmul.mubr.bf16.vlgmr.msra.gmra.mrb[8].mxu0 %v6016_v58  ;;  %6440 = vmatmul.mubr.bf16.vlgmr.msra.gmra.mrb[8].mxu1 %v6016_v58 }
 0x12a   :  { %813 = vmatpush1.bf16.msra.mxu0 %v7704_v26  ;;  %6444 = vmatpush3.bf16.msra.mxu1 %v7740_v32 }
 0x12b   :  { %814 = vmatprep.subr.bf16.mxu0 %v7709_v27  ;;  %6445 = vmatprep.subr.bf16.mxu1 %v10392_v51 }
 0x12c   :  { %844 = vmatprep.mubr.bf16.mxu0 %v10393_v52  ;;  %6459 = vmatprep.mubr.msk.bf16.mxu1 %vm7520_vm0, %v10392_v51 }
 0x12e   :  { %815 = vmatpush1.bf16.msra.mxu0 %v7726_v30  ;;  %6446 = vmatpush3.bf16.msra.mxu1 %v7760_v35 }
 0x12f   :  { %816 = vmatprep.subr.bf16.mxu0 %v7733_v31  ;;  %6447 = vmatprep.subr.bf16.mxu1 %v10392_v51 }
 0x132   :  { %817 = vmatpush1.bf16.msra.mxu0 %v7746_v33  ;;  %6448 = vmatpush3.bf16.msra.mxu1 %v7776_v37 }
 0x133   :  { %818 = vmatprep.subr.bf16.mxu0 %v7753_v34  ;;  %6449 = vmatprep.subr.bf16.mxu1 %v10392_v51 }
 0x136   :  { %819 = vmatpush1.bf16.msra.mxu0 %v7766_v36  ;;  %6450 = vmatpush3.bf16.msra.mxu1 %v7785_v38 }
 0x137   :  { %820 = vmatprep.subr.bf16.mxu0 %v7790_v39  ;;  %6451 = vmatprep.subr.bf16.mxu1 %v10392_v51 }
 0x13a   :  { %821 = vmatpush1.bf16.msra.mxu0 %v7796_v40  ;;  %6452 = vmatpush3.bf16.msra.mxu1 %v7804_v41 }
 0x13b   :  { %822 = vmatprep.subr.bf16.mxu0 %v7809_v42  ;;  %6453 = vmatprep.subr.bf16.mxu1 %v10392_v51 }
 0x13e   :  { %823 = vmatpush1.bf16.msra.mxu0 %v7815_v43  ;;  %6454 = vmatpush3.bf16.msra.mxu1 %v7823_v44 }
 0x13f   :  { %824 = vmatprep.subr.bf16.mxu0 %v7828_v45  ;;  %6455 = vmatprep.subr.bf16.mxu1 %v10392_v51 }
 0x142   :  { %825 = vmatpush1.bf16.msra.mxu0 %v7834_v46  ;;  %6456 = vmatpush3.bf16.msra.mxu1 %v7842_v47 }
 0x143   :  { %826 = vmatprep.subr.bf16.mxu0 %v7847_v48  ;;  %6457 = vmatprep.subr.bf16.mxu1 %v10392_v51 }
 0x146   :  { %827 = vmatpush1.bf16.msra.mxu0 %v7853_v49  ;;  %6458 = vmatpush3.bf16.msra.mxu1 %v7861_v50 }
 0x147   :  { %1039 = vmatprep.subr.bf16.mxu0 %v7555_v0  ;;  %6463 = vmatprep.subr.bf16.mxu1 %v10392_v51 }
 0x149   :  { %845 = vmatmul.mubr.bf16.vlgmr.msra.gmra.mrb[12].mxu0 %v10394_v22  ;;  %6460 = vmatmul.mubr.bf16.vlgmr.msra.gmra.mrb[12].mxu1 %v10394_v22 }
 0x14a   :  { %1040 = vmatpush1.bf16.msra.mxu0 %v7562_v3  ;;  %6464 = vmatpush3.bf16.msra.mxu1 %v7599_v9 }
 0x14b   :  { %1041 = vmatprep.subr.bf16.mxu0 %v7570_v4  ;;  %6465 = vmatprep.subr.bf16.mxu1 %v10392_v51 }
 0x14c   :  { %1071 = vmatprep.mubr.bf16.mxu0 %v10393_v52  ;;  %6479 = vmatprep.mubr.msk.bf16.mxu1 %vm7520_vm0, %v10392_v51 }
 0x14e   :  { %1042 = vmatpush1.bf16.msra.mxu0 %v7576_v5  ;;  %6466 = vmatpush3.bf16.msra.mxu1 %v7618_v12 }
 0x14f   :  { %1043 = vmatprep.subr.bf16.mxu0 %v7582_v6  ;;  %6467 = vmatprep.subr.bf16.mxu1 %v10392_v51 }
 0x152   :  { %1044 = vmatpush1.bf16.msra.mxu0 %v7588_v7  ;;  %6468 = vmatpush3.bf16.msra.mxu1 %v7630_v14 }
 0x153   :  { %1045 = vmatprep.subr.bf16.mxu0 %v7594_v8  ;;  %6469 = vmatprep.subr.bf16.mxu1 %v10392_v51 }
 0x156   :  { %1046 = vmatpush1.bf16.msra.mxu0 %v7605_v10  ;;  %6470 = vmatpush3.bf16.msra.mxu1 %v7649_v17 }
 0x157   :  { %1047 = vmatprep.subr.bf16.mxu0 %v7612_v11  ;;  %6471 = vmatprep.subr.bf16.mxu1 %v10392_v51 }
 0x15a   :  { %1048 = vmatpush1.bf16.msra.mxu0 %v7623_v13  ;;  %6472 = vmatpush3.bf16.msra.mxu1 %v7668_v20  ;;  %v10400_v20 = vld [vmem:[#allocation18_spill] sm:$0xff] }
 0x15b   :  { %1049 = vmatprep.subr.bf16.mxu0 %v7636_v15  ;;  %6473 = vmatprep.subr.bf16.mxu1 %v10392_v51 }
 0x15e   :  { %1050 = vmatpush1.bf16.msra.mxu0 %v7643_v16  ;;  %6474 = vmatpush3.bf16.msra.mxu1 %v7685_v23 }
 0x15f   :  { %1051 = vmatprep.subr.bf16.mxu0 %v7655_v18  ;;  %6475 = vmatprep.subr.bf16.mxu1 %v10392_v51 }
 0x162   :  { %1052 = vmatpush1.bf16.msra.mxu0 %v7661_v19  ;;  %6476 = vmatpush3.bf16.msra.mxu1 %v10395_v55 }
 0x163   :  { %1053 = vmatprep.subr.bf16.mxu0 %v10396_v59  ;;  %6477 = vmatprep.subr.bf16.mxu1 %v10392_v51 }
 0x166   :  { %1054 = vmatpush1.bf16.msra.mxu0 %v10397_v2  ;;  %6478 = vmatpush3.bf16.msra.mxu1 %v10398_v28  ;;  %v5571_v2 = vld [vmem:[%s10268_s0 + $0x50] sm:$0xff] }
 0x167   :  { %1124 = vmatprep.subr.bf16.mxu0 %v10399_v1  ;;  %6483 = vmatprep.subr.bf16.mxu1 %v10392_v51 }
 0x1fc   :  { %v761_v29 = vpop.f32.mrb[8].mxu0  ;;  %v804_v58 = vpop.f32.mrb[8].mxu1 }
 0x1fd   :  { %v903_v61 = vadd.f32 %v5567_v24, %v761_v29  ;;  %v763_v62 = vpop.f32.mrb[9].mxu0  ;;  %v6441_v63 = vpop.f32.mrb[9].mxu1 }
 0x1fe   :  { %v765_v53 = vpop.f32.mrb[10].mxu0  ;;  %v807_v54 = vpop.f32.mrb[10].mxu1  ;;  %v917_v55 = vadd.f32 %v5568_v21, %v763_v62 }
 0x1ff   :  { %v5573_v56 = vmul.f32 -1.442695, %v903_v61  ;;  %v904_v1 = vadd.f32 %v5570_v60, %v765_v53  ;;  %v767_v28 = vpop.f32.mrb[11].mxu0  ;;  %v6442_v59 = vpop.f32.mrb[11].mxu1 }
 0x200   :  { %v918_v24 = vadd.f32 %v5571_v2, %v767_v28  ;;  %v5575_v29 = vmul.f32 -1.442695, %v917_v55  ;;  %v931_v59 = vadd.f32 %v10400_v20, %v804_v58 }
 0x201   :  { %7111 = vpow2.f32 %v5573_v56  ;;  %v5574_v19 = vmul.f32 -1.442695, %v904_v1 }
 0x202   :  { %v5576_v18 = vmul.f32 -1.442695, %v918_v24 }
 0x203   :  { %7113 = vpow2.f32 %v5574_v19  ;;  %v5569_v19 = vld [vmem:[%s10268_s0 + $0x40] sm:$0xff] }
 0x204   :  { %7115 = vpow2.f32 %v5575_v29 }
 0x205   :  { %7117 = vpow2.f32 %v5576_v18  ;;  %v932_v18 = vadd.f32 %v10400_v20, %v807_v54 }
 0x20b   :  { %v7112_v63 = vpop.eup %7111 }
 0x20c   :  { %v911_v23 = vadd.f32 1.0, %v7112_v63 }
 0x20d   :  { %v7114_v16 = vpop.eup %7113 }
 0x20e   :  { %7119 = vrcp.f32 %v911_v23  ;;  %v912_v60 = vadd.f32 1.0, %v7114_v16  ;;  %v7116_v61 = vpop.eup %7115  ;;  %v5572_v16 = vld [vmem:[%s10268_s0 + $0x58] sm:$0xff] }
 0x20f   :  { %v7118_v53 = vpop.eup %7117  ;;  %v925_v15 = vadd.f32 1.0, %v7116_v61 }
 0x210   :  { %7121 = vrcp.f32 %v912_v60  ;;  %v926_v62 = vadd.f32 1.0, %v7118_v53 }
 0x211   :  { %7123 = vrcp.f32 %v925_v15 }
 0x212   :  { %7125 = vrcp.f32 %v926_v62 }
 0x218   :  { %v7120_v21 = vpop.eup %7119 }
 0x219   :  { %v933_v55 = vmul.f32 %v7120_v21, %v931_v59 }
 0x21a   :  { %v7122_v2 = vpop.eup %7121 }
 0x21b   :  { %v935_v23 = vadd.f32 %v5569_v19, %v933_v55  ;;  %v934_v28 = vmul.f32 %v7122_v2, %v932_v18  ;;  %v7124_v54 = vpop.eup %7123 }
 0x21c   :  { %v846_v1 = vpop.f32.mrb[12].mxu0  ;;  %v889_v58 = vpop.f32.mrb[12].mxu1  ;;  %v939_v59 = vsub.f32 1.0, %v7124_v54  ;;  %v943_v19 = vmul.f32 %v7124_v54, %v8008_v57 }
 0x21d   :  { %7127 = vtanh.f32 %v935_v23  ;;  %v936_v56 = vadd.f32 %v5572_v16, %v934_v28  ;;  %v848_v24 = vpop.f32.mrb[13].mxu0  ;;  %v6461_v29 = vpop.f32.mrb[13].mxu1  ;;  %v5596_v1 = vld [vmem:[%s10268_s0 + $0x68] sm:$0xff] }
 0x21e   :  { %v850_v63 = vpop.f32.mrb[14].mxu0  ;;  %v892_v60 = vpop.f32.mrb[14].mxu1 }
 0x21f   :  { %7129 = vtanh.f32 %v936_v56  ;;  %v852_v15 = vpop.f32.mrb[15].mxu0  ;;  %v6462_v61 = vpop.f32.mrb[15].mxu1 }
 0x220   :  { %v7126_v53 = vpop.eup %7125  ;;  %v5599_v15 = vld [vmem:[%s10268_s0 + $0x80] sm:$0xff] }
 0x221   :  { %v940_v20 = vsub.f32 1.0, %v7126_v53  ;;  %v944_v18 = vmul.f32 %v7126_v53, %v8010_v25  ;;  %v5598_v25 = vld [vmem:[%s10268_s0 + $0x78] sm:$0xff] }
 0x227   :  { %v7128_v21 = vpop.eup %7127 }
 0x228   :  { %v941_v13 = vmul.f32 %v7128_v21, %v939_v59 }
 0x229   :  { %v7130_v62 = vpop.eup %7129 }
 0x22a   :  { %v942_v55 = vmul.f32 %v7130_v62, %v940_v20  ;;  %v8111_v2 = vadd.f32 %v943_v19, %v941_v13  ;;  %v10412_v13 = vld [vmem:[#allocation13_spill] sm:$0xff] }
 0x22c   :  { %v8113_v16 = vadd.f32 %v944_v18, %v942_v55 }
 0x22e   :  { %v6021_v23 = vpack.c.bf16 %v8113_v16, %v8111_v2 }
 0x230   :  { %6083 = vst [vmem:[%s10267_s4 + $0x8] sm:$0xff] %v6021_v23   ;;  %1072 = vmatmul.mubr.bf16.vlgmr.msra.gmra.mrb[16].mxu0 %v6021_v23  ;;  %6480 = vmatmul.mubr.bf16.vlgmr.msra.gmra.mrb[16].mxu1 %v6021_v23 }
 0x231   :  { %1125 = vmatpush1.bf16.msra.mxu0 %v7704_v26  ;;  %6484 = vmatpush3.bf16.msra.mxu1 %v7740_v32 }
 0x232   :  { %1126 = vmatprep.subr.bf16.mxu0 %v7709_v27  ;;  %6485 = vmatprep.subr.bf16.mxu1 %v10392_v51 }
 0x233   :  { %1156 = vmatprep.mubr.bf16.mxu0 %v10393_v52  ;;  %6499 = vmatprep.mubr.msk.bf16.mxu1 %vm7520_vm0, %v10392_v51 }
 0x235   :  { %1127 = vmatpush1.bf16.msra.mxu0 %v7726_v30  ;;  %6486 = vmatpush3.bf16.msra.mxu1 %v7760_v35 }
 0x236   :  { %1128 = vmatprep.subr.bf16.mxu0 %v7733_v31  ;;  %6487 = vmatprep.subr.bf16.mxu1 %v10392_v51 }
 0x239   :  { %1129 = vmatpush1.bf16.msra.mxu0 %v7746_v33  ;;  %6488 = vmatpush3.bf16.msra.mxu1 %v7776_v37 }
 0x23a   :  { %1130 = vmatprep.subr.bf16.mxu0 %v7753_v34  ;;  %6489 = vmatprep.subr.bf16.mxu1 %v10392_v51 }
 0x23d   :  { %1131 = vmatpush1.bf16.msra.mxu0 %v7766_v36  ;;  %6490 = vmatpush3.bf16.msra.mxu1 %v7785_v38 }
 0x23e   :  { %1132 = vmatprep.subr.bf16.mxu0 %v7790_v39  ;;  %6491 = vmatprep.subr.bf16.mxu1 %v10392_v51 }
 0x241   :  { %1133 = vmatpush1.bf16.msra.mxu0 %v7796_v40  ;;  %6492 = vmatpush3.bf16.msra.mxu1 %v7804_v41 }
 0x242   :  { %1134 = vmatprep.subr.bf16.mxu0 %v7809_v42  ;;  %6493 = vmatprep.subr.bf16.mxu1 %v10392_v51 }
 0x245   :  { %1135 = vmatpush1.bf16.msra.mxu0 %v7815_v43  ;;  %6494 = vmatpush3.bf16.msra.mxu1 %v7823_v44 }
 0x246   :  { %1136 = vmatprep.subr.bf16.mxu0 %v7828_v45  ;;  %6495 = vmatprep.subr.bf16.mxu1 %v10392_v51 }
 0x249   :  { %1137 = vmatpush1.bf16.msra.mxu0 %v7834_v46  ;;  %6496 = vmatpush3.bf16.msra.mxu1 %v7842_v47 }
 0x24a   :  { %1138 = vmatprep.subr.bf16.mxu0 %v7847_v48  ;;  %6497 = vmatprep.subr.bf16.mxu1 %v10392_v51 }
 0x24d   :  { %1139 = vmatpush1.bf16.msra.mxu0 %v7853_v49  ;;  %6498 = vmatpush3.bf16.msra.mxu1 %v7861_v50 }
 0x24e   :  { %1351 = vmatprep.subr.bf16.mxu0 %v7555_v0  ;;  %6503 = vmatprep.subr.bf16.mxu1 %v10392_v51  ;;  %v10401_v0 = vld [vmem:[#allocation4_spill] sm:$0xff] }
 0x250   :  { %1157 = vmatmul.mubr.bf16.vlgmr.msra.gmra.mrb[20].mxu0 %v10394_v22  ;;  %6500 = vmatmul.mubr.bf16.vlgmr.msra.gmra.mrb[20].mxu1 %v10394_v22 }
 0x251   :  { %1352 = vmatpush1.bf16.msra.mxu0 %v7562_v3  ;;  %6504 = vmatpush3.bf16.msra.mxu1 %v7599_v9  ;;  %v10402_v3 = vld [vmem:[#allocation9_spill] sm:$0xff]  ;;  %v10408_v9 = vld [vmem:[#allocation14_spill] sm:$0xff] }
 0x252   :  { %1353 = vmatprep.subr.bf16.mxu0 %v7570_v4  ;;  %6505 = vmatprep.subr.bf16.mxu1 %v10392_v51  ;;  %v10403_v4 = vld [vmem:[#allocation5_spill] sm:$0xff] }
 0x253   :  { %1383 = vmatprep.mubr.bf16.mxu0 %v10393_v52  ;;  %6519 = vmatprep.mubr.msk.bf16.mxu1 %vm7520_vm0, %v10392_v51 }
 0x255   :  { %1354 = vmatpush1.bf16.msra.mxu0 %v7576_v5  ;;  %6506 = vmatpush3.bf16.msra.mxu1 %v7618_v12  ;;  %v10404_v5 = vld [vmem:[#allocation6_spill] sm:$0xff]  ;;  %v10411_v12 = vld [vmem:[#allocation15_spill] sm:$0xff] }
 0x256   :  { %1355 = vmatprep.subr.bf16.mxu0 %v7582_v6  ;;  %6507 = vmatprep.subr.bf16.mxu1 %v10392_v51  ;;  %v10405_v6 = vld [vmem:[#allocation12_spill] sm:$0xff] }
 0x259   :  { %1356 = vmatpush1.bf16.msra.mxu0 %v7588_v7  ;;  %6508 = vmatpush3.bf16.msra.mxu1 %v7630_v14  ;;  %v10406_v7 = vld [vmem:[#allocation7_spill] sm:$0xff]  ;;  %v5595_v14 = vld [vmem:[%s10268_s0 + $0x60] sm:$0xff] }
 0x25a   :  { %1357 = vmatprep.subr.bf16.mxu0 %v7594_v8  ;;  %6509 = vmatprep.subr.bf16.mxu1 %v10392_v51  ;;  %v10407_v8 = vld [vmem:[#allocation8_spill] sm:$0xff] }
 0x25d   :  { %1358 = vmatpush1.bf16.msra.mxu0 %v7605_v10  ;;  %6510 = vmatpush3.bf16.msra.mxu1 %v7649_v17  ;;  %v10409_v10 = vld [vmem:[#allocation10_spill] sm:$0xff] }
 0x25e   :  { %1359 = vmatprep.subr.bf16.mxu0 %v7612_v11  ;;  %6511 = vmatprep.subr.bf16.mxu1 %v10392_v51  ;;  %v10410_v11 = vld [vmem:[#allocation11_spill] sm:$0xff] }
 0x261   :  { %1360 = vmatpush1.bf16.msra.mxu0 %v10401_v0  ;;  %6512 = vmatpush3.bf16.msra.mxu1 %v10402_v3 }
 0x262   :  { %1361 = vmatprep.subr.bf16.mxu0 %v10403_v4  ;;  %6513 = vmatprep.subr.bf16.mxu1 %v10392_v51 }
 0x265   :  { %1362 = vmatpush1.bf16.msra.mxu0 %v10404_v5  ;;  %6514 = vmatpush3.bf16.msra.mxu1 %v10405_v6  ;;  %v10413_v5 = vld [vmem:[#allocation18_spill] sm:$0xff] }
 0x266   :  { %1363 = vmatprep.subr.bf16.mxu0 %v10406_v7  ;;  %6515 = vmatprep.subr.bf16.mxu1 %v10392_v51 }
 0x269   :  { %1364 = vmatpush1.bf16.msra.mxu0 %v10407_v8  ;;  %6516 = vmatpush3.bf16.msra.mxu1 %v10408_v9  ;;  %v5597_v9 = vld [vmem:[%s10268_s0 + $0x70] sm:$0xff] }
 0x26a   :  { %1365 = vmatprep.subr.bf16.mxu0 %v10409_v10  ;;  %6517 = vmatprep.subr.bf16.mxu1 %v10392_v51 }
 0x26d   :  { %1366 = vmatpush1.bf16.msra.mxu0 %v10410_v11  ;;  %6518 = vmatpush3.bf16.msra.mxu1 %v10411_v12 }
 0x26e   :  { %1436 = vmatprep.subr.bf16.mxu0 %v10412_v13  ;;  %6523 = vmatprep.subr.bf16.mxu1 %v10392_v51  ;;  %v5600_v13 = vld [vmem:[%s10268_s0 + $0x88] sm:$0xff] }
 0x303   :  { %v1073_v17 = vpop.f32.mrb[16].mxu0  ;;  %v1116_v20 = vpop.f32.mrb[16].mxu1 }
 0x304   :  { %v1215_v57 = vadd.f32 %v5595_v14, %v1073_v17  ;;  %v1075_v28 = vpop.f32.mrb[17].mxu0  ;;  %v6481_v58 = vpop.f32.mrb[17].mxu1  ;;  %v1243_v6 = vadd.f32 %v10413_v5, %v1116_v20 }
 0x305   :  { %v1077_v56 = vpop.f32.mrb[18].mxu0  ;;  %v1119_v24 = vpop.f32.mrb[18].mxu1  ;;  %v1229_v54 = vadd.f32 %v5596_v1, %v1075_v28 }
 0x306   :  { %v5601_v29 = vmul.f32 -1.442695, %v1215_v57  ;;  %v1216_v63 = vadd.f32 %v5598_v25, %v1077_v56  ;;  %v1079_v60 = vpop.f32.mrb[19].mxu0  ;;  %v6482_v61 = vpop.f32.mrb[19].mxu1  ;;  %v1244_v11 = vadd.f32 %v10413_v5, %v1119_v24 }
 0x307   :  { %v1230_v59 = vadd.f32 %v5599_v15, %v1079_v60  ;;  %v5603_v21 = vmul.f32 -1.442695, %v1229_v54 }
 0x308   :  { %7131 = vpow2.f32 %v5601_v29  ;;  %v5602_v53 = vmul.f32 -1.442695, %v1216_v63 }
 0x309   :  { %v5604_v19 = vmul.f32 -1.442695, %v1230_v59 }
 0x30a   :  { %7133 = vpow2.f32 %v5602_v53 }
 0x30b   :  { %7135 = vpow2.f32 %v5603_v21 }
 0x30c   :  { %7137 = vpow2.f32 %v5604_v19 }
 0x312   :  { %v7132_v62 = vpop.eup %7131 }
 0x313   :  { %v1223_v55 = vadd.f32 1.0, %v7132_v62 }
 0x314   :  { %v7134_v18 = vpop.eup %7133 }
 0x315   :  { %7139 = vrcp.f32 %v1223_v55  ;;  %v1224_v23 = vadd.f32 1.0, %v7134_v18  ;;  %v7136_v0 = vpop.eup %7135 }
 0x316   :  { %v7138_v3 = vpop.eup %7137  ;;  %v1237_v4 = vadd.f32 1.0, %v7136_v0  ;;  %v5623_v0 = vld [vmem:[%s10268_s0 + $0x90] sm:$0xff] }
 0x317   :  { %7141 = vrcp.f32 %v1224_v23  ;;  %v1238_v7 = vadd.f32 1.0, %v7138_v3 }
 0x318   :  { %7143 = vrcp.f32 %v1237_v4 }
 0x319   :  { %7145 = vrcp.f32 %v1238_v7 }
 0x31f   :  { %v7140_v8 = vpop.eup %7139 }
 0x320   :  { %v1245_v10 = vmul.f32 %v7140_v8, %v1243_v6  ;;  %v5626_v6 = vld [vmem:[%s10268_s0 + $0xa8] sm:$0xff] }
 0x321   :  { %v7142_v12 = vpop.eup %7141 }
 0x322   :  { %v1247_v14 = vadd.f32 %v5597_v9, %v1245_v10  ;;  %v1246_v17 = vmul.f32 %v7142_v12, %v1244_v11  ;;  %v7144_v24 = vpop.eup %7143  ;;  %v5624_v9 = vld [vmem:[%s10268_s0 + $0x98] sm:$0xff] }
 0x323   :  { %v1158_v25 = vpop.f32.mrb[20].mxu0  ;;  %v1201_v20 = vpop.f32.mrb[20].mxu1  ;;  %v1251_v15 = vsub.f32 1.0, %v7144_v24  ;;  %v1255_v59 = vmul.f32 %v7144_v24, %v8111_v2  ;;  %v8410_v2 = vld [vmem:[%s10266_s2 + $0xb0] ss:$12 sps:$4 sm:$0xff]  }
 0x324   :  { %7147 = vtanh.f32 %v1247_v14  ;;  %v1248_v57 = vadd.f32 %v5600_v13, %v1246_v17  ;;  %v1160_v28 = vpop.f32.mrb[21].mxu0  ;;  %v6501_v1 = vpop.f32.mrb[21].mxu1  ;;  %10424 = vst [vmem:[#allocation15_spill] sm:$0xff] %v8410_v2  ;;  %v5627_v25 = vld [vmem:[%s10268_s0 + $0xb0] sm:$0xff] }
 0x325   :  { %v1162_v58 = vpop.f32.mrb[22].mxu0  ;;  %v1204_v56 = vpop.f32.mrb[22].mxu1 }
 0x326   :  { %7149 = vtanh.f32 %v1248_v57  ;;  %v1164_v29 = vpop.f32.mrb[23].mxu0  ;;  %v6502_v63 = vpop.f32.mrb[23].mxu1 }
 0x327   :  { %v7146_v60 = vpop.eup %7145 }
 0x328   :  { %v1252_v54 = vsub.f32 1.0, %v7146_v60  ;;  %v1256_v62 = vmul.f32 %v7146_v60, %v8113_v16  ;;  %v8416_v16 = vld [vmem:[%s10266_s2 + $0xc4] ss:$12 sps:$4 sm:$0xff]  }
 0x329   :  { %10425 = vst [vmem:[#allocation13_spill] sm:$0xff] %v8416_v16 }
 0x32e   :  { %v7148_v61 = vpop.eup %7147 }
 0x32f   :  { %v1253_v53 = vmul.f32 %v7148_v61, %v1251_v15 }
 0x330   :  { %v7150_v21 = vpop.eup %7149 }
 0x331   :  { %v1254_v19 = vmul.f32 %v7150_v21, %v1252_v54  ;;  %v8214_v55 = vadd.f32 %v1255_v59, %v1253_v53 }
 0x333   :  { %v8216_v18 = vadd.f32 %v1256_v62, %v1254_v19  ;;  %v5625_v19 = vld [vmem:[%s10268_s0 + $0xa0] sm:$0xff] }
 0x335   :  { %v6026_v23 = vpack.c.bf16 %v8216_v18, %v8214_v55 }
 0x337   :  { %6084 = vst [vmem:[%s10267_s4 + $0x10] sm:$0xff] %v6026_v23   ;;  %1384 = vmatmul.mubr.bf16.vlgmr.msra.gmra.mrb[24].mxu0 %v6026_v23  ;;  %6520 = vmatmul.mubr.bf16.vlgmr.msra.gmra.mrb[24].mxu1 %v6026_v23 }
 0x338   :  { %1437 = vmatpush1.bf16.msra.mxu0 %v7704_v26  ;;  %6524 = vmatpush3.bf16.msra.mxu1 %v7740_v32  ;;  %v8259_v26 = vld [vmem:[%s10266_s2 + $0x4] ss:$12 sps:$4 sm:$0xff]  }
 0x339   :  { %1438 = vmatprep.subr.bf16.mxu0 %v7709_v27  ;;  %6525 = vmatprep.subr.bf16.mxu1 %v10392_v51  ;;  %v8268_v27 = vld [vmem:[%s10266_s2] ss:$12 sps:$4 sm:$0xff]   ;;  %v8290_v32 = vld [vmem:[%s10266_s2 + $0x18] ss:$12 sps:$4 sm:$0xff]  }
 0x33a   :  { %1468 = vmatprep.mubr.bf16.mxu0 %v10393_v52  ;;  %6539 = vmatprep.mubr.msk.bf16.mxu1 %vm7520_vm0, %v10392_v51 }
 0x33c   :  { %1439 = vmatpush1.bf16.msra.mxu0 %v7726_v30  ;;  %6526 = vmatpush3.bf16.msra.mxu1 %v7760_v35  ;;  %v8274_v30 = vld [vmem:[%s10266_s2 + $0x8] ss:$12 sps:$4 sm:$0xff]   ;;  %v8309_v35 = vld [vmem:[%s10266_s2 + $0x30] ss:$12 sps:$4 sm:$0xff]  }
 0x33d   :  { %1440 = vmatprep.subr.bf16.mxu0 %v7733_v31  ;;  %6527 = vmatprep.subr.bf16.mxu1 %v10392_v51  ;;  %v8280_v31 = vld [vmem:[%s10266_s2 + $0x1c] ss:$12 sps:$4 sm:$0xff]  }
 0x340   :  { %1441 = vmatpush1.bf16.msra.mxu0 %v7746_v33  ;;  %6528 = vmatpush3.bf16.msra.mxu1 %v7776_v37  ;;  %v8296_v33 = vld [vmem:[%s10266_s2 + $0x20] ss:$12 sps:$4 sm:$0xff]  }
 0x341   :  { %1442 = vmatprep.subr.bf16.mxu0 %v7753_v34  ;;  %6529 = vmatprep.subr.bf16.mxu1 %v10392_v51  ;;  %v8302_v34 = vld [vmem:[%s10266_s2 + $0x34] ss:$12 sps:$4 sm:$0xff]   ;;  %v8321_v37 = vld [vmem:[%s10266_s2 + $0x4c] ss:$12 sps:$4 sm:$0xff]  }
 0x344   :  { %1443 = vmatpush1.bf16.msra.mxu0 %v7766_v36  ;;  %6530 = vmatpush3.bf16.msra.mxu1 %v7785_v38  ;;  %v8315_v36 = vld [vmem:[%s10266_s2 + $0x38] ss:$12 sps:$4 sm:$0xff]   ;;  %v8328_v38 = vld [vmem:[%s10266_s2 + $0x48] ss:$12 sps:$4 sm:$0xff]  }
 0x345   :  { %1444 = vmatprep.subr.bf16.mxu0 %v7790_v39  ;;  %6531 = vmatprep.subr.bf16.mxu1 %v10392_v51  ;;  %v8334_v39 = vld [vmem:[%s10266_s2 + $0x50] ss:$12 sps:$4 sm:$0xff]  }
 0x348   :  { %1445 = vmatpush1.bf16.msra.mxu0 %v7796_v40  ;;  %6532 = vmatpush3.bf16.msra.mxu1 %v7804_v41  ;;  %v8340_v40 = vld [vmem:[%s10266_s2 + $0x64] ss:$12 sps:$4 sm:$0xff]   ;;  %v8347_v41 = vld [vmem:[%s10266_s2 + $0x60] ss:$12 sps:$4 sm:$0xff]  }
 0x349   :  { %1446 = vmatprep.subr.bf16.mxu0 %v7809_v42  ;;  %6533 = vmatprep.subr.bf16.mxu1 %v10392_v51  ;;  %10414 = vst [vmem:[#allocation4_spill] sm:$0xff] %v8347_v41  ;;  %v8353_v42 = vld [vmem:[%s10266_s2 + $0x68] ss:$12 sps:$4 sm:$0xff]  }
 0x34a   :  { %10415 = vst [vmem:[#allocation9_spill] sm:$0xff] %v8353_v42 }
 0x34c   :  { %1447 = vmatpush1.bf16.msra.mxu0 %v7815_v43  ;;  %6534 = vmatpush3.bf16.msra.mxu1 %v7823_v44  ;;  %v8359_v43 = vld [vmem:[%s10266_s2 + $0x7c] ss:$12 sps:$4 sm:$0xff]   ;;  %v8366_v44 = vld [vmem:[%s10266_s2 + $0x78] ss:$12 sps:$4 sm:$0xff]  }
 0x34d   :  { %1448 = vmatprep.subr.bf16.mxu0 %v7828_v45  ;;  %6535 = vmatprep.subr.bf16.mxu1 %v10392_v51  ;;  %10416 = vst [vmem:[#allocation5_spill] sm:$0xff] %v8359_v43  ;;  %10417 = vst [vmem:[#allocation6_spill] sm:$0xff] %v8366_v44  ;;  %v8372_v45 = vld [vmem:[%s10266_s2 + $0x80] ss:$12 sps:$4 sm:$0xff]  }
 0x34e   :  { %10418 = vst [vmem:[#allocation12_spill] sm:$0xff] %v8372_v45 }
 0x350   :  { %1449 = vmatpush1.bf16.msra.mxu0 %v7834_v46  ;;  %6536 = vmatpush3.bf16.msra.mxu1 %v7842_v47  ;;  %v8378_v46 = vld [vmem:[%s10266_s2 + $0x94] ss:$12 sps:$4 sm:$0xff]   ;;  %v8385_v47 = vld [vmem:[%s10266_s2 + $0x90] ss:$12 sps:$4 sm:$0xff]  }
 0x351   :  { %1450 = vmatprep.subr.bf16.mxu0 %v7847_v48  ;;  %6537 = vmatprep.subr.bf16.mxu1 %v10392_v51  ;;  %10419 = vst [vmem:[#allocation7_spill] sm:$0xff] %v8378_v46  ;;  %10420 = vst [vmem:[#allocation8_spill] sm:$0xff] %v8385_v47  ;;  %v8391_v48 = vld [vmem:[%s10266_s2 + $0x98] ss:$12 sps:$4 sm:$0xff]  }
 0x352   :  { %10421 = vst [vmem:[#allocation14_spill] sm:$0xff] %v8391_v48 }
 0x354   :  { %1451 = vmatpush1.bf16.msra.mxu0 %v7853_v49  ;;  %6538 = vmatpush3.bf16.msra.mxu1 %v7861_v50  ;;  %v8397_v49 = vld [vmem:[%s10266_s2 + $0xac] ss:$12 sps:$4 sm:$0xff]   ;;  %v8404_v50 = vld [vmem:[%s10266_s2 + $0xa8] ss:$12 sps:$4 sm:$0xff]  }
 0x355   :  { %1663 = vmatprep.subr.bf16.mxu0 %v8259_v26  ;;  %6543 = vmatprep.subr.bf16.mxu1 %v10392_v51  ;;  %10422 = vst [vmem:[#allocation10_spill] sm:$0xff] %v8397_v49  ;;  %10423 = vst [vmem:[#allocation11_spill] sm:$0xff] %v8404_v50 }
 0x357   :  { %1469 = vmatmul.mubr.bf16.vlgmr.msra.gmra.mrb[28].mxu0 %v10394_v22  ;;  %6540 = vmatmul.mubr.bf16.vlgmr.msra.gmra.mrb[28].mxu1 %v10394_v22 }
 0x358   :  { %1664 = vmatpush1.bf16.msra.mxu0 %v8268_v27  ;;  %6544 = vmatpush3.bf16.msra.mxu1 %v8274_v30 }
 0x359   :  { %1665 = vmatprep.subr.bf16.mxu0 %v8280_v31  ;;  %6545 = vmatprep.subr.bf16.mxu1 %v10392_v51 }
 0x35a   :  { %1695 = vmatprep.mubr.bf16.mxu0 %v10393_v52  ;;  %6559 = vmatprep.mubr.msk.bf16.mxu1 %vm7520_vm0, %v10392_v51 }
 0x35c   :  { %1666 = vmatpush1.bf16.msra.mxu0 %v8290_v32  ;;  %6546 = vmatpush3.bf16.msra.mxu1 %v8296_v33 }
 0x35d   :  { %1667 = vmatprep.subr.bf16.mxu0 %v8302_v34  ;;  %6547 = vmatprep.subr.bf16.mxu1 %v10392_v51 }
 0x360   :  { %1668 = vmatpush1.bf16.msra.mxu0 %v8309_v35  ;;  %6548 = vmatpush3.bf16.msra.mxu1 %v8315_v36 }
 0x361   :  { %1669 = vmatprep.subr.bf16.mxu0 %v8321_v37  ;;  %6549 = vmatprep.subr.bf16.mxu1 %v10392_v51 }
 0x364   :  { %1670 = vmatpush1.bf16.msra.mxu0 %v8328_v38  ;;  %6550 = vmatpush3.bf16.msra.mxu1 %v8334_v39 }
 0x365   :  { %1671 = vmatprep.subr.bf16.mxu0 %v8340_v40  ;;  %6551 = vmatprep.subr.bf16.mxu1 %v10392_v51 }
 0x368   :  { %1672 = vmatpush1.bf16.msra.mxu0 %v8347_v41  ;;  %6552 = vmatpush3.bf16.msra.mxu1 %v8353_v42 }
 0x369   :  { %1673 = vmatprep.subr.bf16.mxu0 %v8359_v43  ;;  %6553 = vmatprep.subr.bf16.mxu1 %v10392_v51 }
 0x36c   :  { %1674 = vmatpush1.bf16.msra.mxu0 %v8366_v44  ;;  %6554 = vmatpush3.bf16.msra.mxu1 %v8372_v45 }
 0x36d   :  { %1675 = vmatprep.subr.bf16.mxu0 %v8378_v46  ;;  %6555 = vmatprep.subr.bf16.mxu1 %v10392_v51 }
 0x370   :  { %1676 = vmatpush1.bf16.msra.mxu0 %v8385_v47  ;;  %6556 = vmatpush3.bf16.msra.mxu1 %v8391_v48 }
 0x371   :  { %1677 = vmatprep.subr.bf16.mxu0 %v8397_v49  ;;  %6557 = vmatprep.subr.bf16.mxu1 %v10392_v51 }
 0x374   :  { %1678 = vmatpush1.bf16.msra.mxu0 %v8404_v50  ;;  %6558 = vmatpush3.bf16.msra.mxu1 %v8410_v2 }
 0x375   :  { %1748 = vmatprep.subr.bf16.mxu0 %v8416_v16  ;;  %6563 = vmatprep.subr.bf16.mxu1 %v10392_v51 }
 0x40a   :  { %v1385_v3 = vpop.f32.mrb[24].mxu0  ;;  %v1428_v4 = vpop.f32.mrb[24].mxu1 }
 0x40b   :  { %v1527_v7 = vadd.f32 %v5623_v0, %v1385_v3  ;;  %v1387_v8 = vpop.f32.mrb[25].mxu0  ;;  %v6521_v10 = vpop.f32.mrb[25].mxu1  ;;  %v1555_v53 = vadd.f32 %v10413_v5, %v1428_v4  ;;  %v5628_v3 = vld [vmem:[%s10268_s0 + $0xb8] sm:$0xff] }
 0x40c   :  { %v1389_v11 = vpop.f32.mrb[26].mxu0  ;;  %v1431_v12 = vpop.f32.mrb[26].mxu1  ;;  %v1541_v57 = vadd.f32 %v5624_v9, %v1387_v8 }
 0x40d   :  { %v5629_v13 = vmul.f32 -1.442695, %v1527_v7  ;;  %v1528_v14 = vadd.f32 %v5626_v6, %v1389_v11  ;;  %v1391_v17 = vpop.f32.mrb[27].mxu0  ;;  %v6522_v20 = vpop.f32.mrb[27].mxu1  ;;  %v1556_v23 = vadd.f32 %v10413_v5, %v1431_v12 }
 0x40e   :  { %v1542_v1 = vadd.f32 %v5627_v25, %v1391_v17  ;;  %v5631_v58 = vmul.f32 -1.442695, %v1541_v57 }
 0x40f   :  { %7151 = vpow2.f32 %v5629_v13  ;;  %v5630_v28 = vmul.f32 -1.442695, %v1528_v14 }
 0x410   :  { %v5632_v56 = vmul.f32 -1.442695, %v1542_v1 }
 0x411   :  { %7153 = vpow2.f32 %v5630_v28 }
 0x412   :  { %7155 = vpow2.f32 %v5631_v58 }
 0x413   :  { %7157 = vpow2.f32 %v5632_v56 }
 0x419   :  { %v7152_v29 = vpop.eup %7151 }
 0x41a   :  { %v1535_v63 = vadd.f32 1.0, %v7152_v29 }
 0x41b   :  { %v7154_v24 = vpop.eup %7153 }
 0x41c   :  { %7159 = vrcp.f32 %v1535_v63  ;;  %v1536_v60 = vadd.f32 1.0, %v7154_v24  ;;  %v7156_v15 = vpop.eup %7155 }
 0x41d   :  { %v7158_v61 = vpop.eup %7157  ;;  %v1549_v54 = vadd.f32 1.0, %v7156_v15 }
 0x41e   :  { %7161 = vrcp.f32 %v1536_v60  ;;  %v1550_v59 = vadd.f32 1.0, %v7158_v61  ;;  %v8466_v61 = vld [vmem:[%s10266_s2 + $0xdc] ss:$12 sps:$4 sm:$0xff]  }
 0x41f   :  { %7163 = vrcp.f32 %v1549_v54  ;;  %v8476_v54 = vld [vmem:[%s10266_s2 + $0xd8] ss:$12 sps:$4 sm:$0xff]  }
 0x420   :  { %7165 = vrcp.f32 %v1550_v59  ;;  %v8488_v59 = vld [vmem:[%s10266_s2 + $0xf4] ss:$12 sps:$4 sm:$0xff]  }
 0x426   :  { %v7160_v21 = vpop.eup %7159 }
 0x427   :  { %v1557_v62 = vmul.f32 %v7160_v21, %v1555_v53  ;;  %v8482_v53 = vld [vmem:[%s10266_s2 + $0xe0] ss:$12 sps:$4 sm:$0xff]   ;;  %v8495_v21 = vld [vmem:[%s10266_s2 + $0xf0] ss:$12 sps:$4 sm:$0xff]  }
 0x428   :  { %v7162_v0 = vpop.eup %7161 }
 0x429   :  { %v1559_v6 = vadd.f32 %v5625_v19, %v1557_v62  ;;  %v1558_v7 = vmul.f32 %v7162_v0, %v1556_v23  ;;  %v7164_v5 = vpop.eup %7163  ;;  %v8501_v19 = vld [vmem:[%s10266_s2 + $0xf8] ss:$12 sps:$4 sm:$0xff]   ;;  %v8514_v23 = vld [vmem:[%s10266_s2 + $0x108] ss:$12 sps:$4 sm:$0xff]   ;;  %v8520_v0 = vld [vmem:[%s10266_s2 + $0x110] ss:$12 sps:$4 sm:$0xff]  }
 0x42a   :  { %v1470_v8 = vpop.f32.mrb[28].mxu0  ;;  %v1513_v4 = vpop.f32.mrb[28].mxu1  ;;  %v1563_v20 = vsub.f32 1.0, %v7164_v5  ;;  %v1567_v58 = vmul.f32 %v7164_v5, %v8214_v55  ;;  %v8454_v55 = vld [vmem:[%s10266_s2 + $0xc0] ss:$12 sps:$4 sm:$0xff]  }
 0x42b   :  { %7167 = vtanh.f32 %v1559_v6  ;;  %v1560_v9 = vadd.f32 %v5628_v3, %v1558_v7  ;;  %v1472_v10 = vpop.f32.mrb[29].mxu0  ;;  %v6541_v11 = vpop.f32.mrb[29].mxu1  ;;  %v8507_v62 = vld [vmem:[%s10266_s2 + $0x10c] ss:$12 sps:$4 sm:$0xff]   ;;  %v8526_v3 = vld [vmem:[%s10266_s2 + $0x124] ss:$12 sps:$4 sm:$0xff]  }
 0x42c   :  { %v1474_v13 = vpop.f32.mrb[30].mxu0  ;;  %v1516_v14 = vpop.f32.mrb[30].mxu1  ;;  %v8533_v6 = vld [vmem:[%s10266_s2 + $0x120] ss:$12 sps:$4 sm:$0xff]   ;;  %v8539_v7 = vld [vmem:[%s10266_s2 + $0x128] ss:$12 sps:$4 sm:$0xff]  }
 0x42d   :  { %7169 = vtanh.f32 %v1560_v9  ;;  %v1476_v17 = vpop.f32.mrb[31].mxu0  ;;  %v6542_v25 = vpop.f32.mrb[31].mxu1  ;;  %v8545_v8 = vld [vmem:[%s10266_s2 + $0x13c] ss:$12 sps:$4 sm:$0xff]   ;;  %v8552_v4 = vld [vmem:[%s10266_s2 + $0x138] ss:$12 sps:$4 sm:$0xff]  }
 0x42e   :  { %v7166_v12 = vpop.eup %7165  ;;  %v8558_v9 = vld [vmem:[%s10266_s2 + $0x140] ss:$12 sps:$4 sm:$0xff]   ;;  %v8571_v11 = vld [vmem:[%s10266_s2 + $0x150] ss:$12 sps:$4 sm:$0xff]   ;;  %v8577_v13 = vld [vmem:[%s10266_s2 + $0x158] ss:$12 sps:$4 sm:$0xff]  }
 0x42f   :  { %v1564_v28 = vsub.f32 1.0, %v7166_v12  ;;  %v1568_v63 = vmul.f32 %v7166_v12, %v8216_v18  ;;  %v8460_v18 = vld [vmem:[%s10266_s2 + $0xc8] ss:$12 sps:$4 sm:$0xff]   ;;  %v8583_v14 = vld [vmem:[%s10266_s2 + $0x16c] ss:$12 sps:$4 sm:$0xff]   ;;  %v5651_v5 = vld [vmem:[%s10268_s0 + $0xc0] sm:$0xff] }
 0x430   :  { %v8564_v10 = vld [vmem:[%s10266_s2 + $0x154] ss:$12 sps:$4 sm:$0xff]   ;;  %v8596_v25 = vld [vmem:[%s10266_s2 + $0x170] ss:$12 sps:$4 sm:$0xff]  }
 0x431   :  { %v8590_v17 = vld [vmem:[%s10266_s2 + $0x168] ss:$12 sps:$4 sm:$0xff]  }
 0x435   :  { %v7168_v57 = vpop.eup %7167 }
 0x436   :  { %v1565_v1 = vmul.f32 %v7168_v57, %v1563_v20  ;;  %v5654_v57 = vld [vmem:[%s10268_s0 + $0xd8] sm:$0xff] }
 0x437   :  { %v7170_v56 = vpop.eup %7169 }
 0x438   :  { %v1566_v29 = vmul.f32 %v7170_v56, %v1564_v28  ;;  %v8442_v24 = vadd.f32 %v1567_v58, %v1565_v1  ;;  %v5652_v58 = vld [vmem:[%s10268_s0 + $0xc8] sm:$0xff] }
 0x43a   :  { %v8444_v60 = vadd.f32 %v1568_v63, %v1566_v29 }
 0x43c   :  { %v6031_v15 = vpack.c.bf16 %v8444_v60, %v8442_v24 }
 0x43e   :  { %6085 = vst [vmem:[%s10267_s4 + $0x18] sm:$0xff] %v6031_v15   ;;  %1696 = vmatmul.mubr.bf16.vlgmr.msra.gmra.mrb[32].mxu0 %v6031_v15  ;;  %6560 = vmatmul.mubr.bf16.vlgmr.msra.gmra.mrb[32].mxu1 %v6031_v15 }
 0x43f   :  { %1749 = vmatpush1.bf16.msra.mxu0 %v8454_v55  ;;  %6564 = vmatpush3.bf16.msra.mxu1 %v8460_v18 }
 0x440   :  { %1750 = vmatprep.subr.bf16.mxu0 %v8466_v61  ;;  %6565 = vmatprep.subr.bf16.mxu1 %v10392_v51 }
 0x441   :  { %1780 = vmatprep.mubr.bf16.mxu0 %v10393_v52  ;;  %6579 = vmatprep.mubr.msk.bf16.mxu1 %vm7520_vm0, %v10392_v51 }
 0x443   :  { %1751 = vmatpush1.bf16.msra.mxu0 %v8476_v54  ;;  %6566 = vmatpush3.bf16.msra.mxu1 %v8482_v53 }
 0x444   :  { %1752 = vmatprep.subr.bf16.mxu0 %v8488_v59  ;;  %6567 = vmatprep.subr.bf16.mxu1 %v10392_v51 }
 0x447   :  { %1753 = vmatpush1.bf16.msra.mxu0 %v8495_v21  ;;  %6568 = vmatpush3.bf16.msra.mxu1 %v8501_v19 }
 0x448   :  { %1754 = vmatprep.subr.bf16.mxu0 %v8507_v62  ;;  %6569 = vmatprep.subr.bf16.mxu1 %v10392_v51 }
 0x44b   :  { %1755 = vmatpush1.bf16.msra.mxu0 %v8514_v23  ;;  %6570 = vmatpush3.bf16.msra.mxu1 %v8520_v0 }
 0x44c   :  { %1756 = vmatprep.subr.bf16.mxu0 %v8526_v3  ;;  %6571 = vmatprep.subr.bf16.mxu1 %v10392_v51 }
 0x44f   :  { %1757 = vmatpush1.bf16.msra.mxu0 %v8533_v6  ;;  %6572 = vmatpush3.bf16.msra.mxu1 %v8539_v7 }
 0x450   :  { %1758 = vmatprep.subr.bf16.mxu0 %v8545_v8  ;;  %6573 = vmatprep.subr.bf16.mxu1 %v10392_v51 }
 0x453   :  { %1759 = vmatpush1.bf16.msra.mxu0 %v8552_v4  ;;  %6574 = vmatpush3.bf16.msra.mxu1 %v8558_v9 }
 0x454   :  { %1760 = vmatprep.subr.bf16.mxu0 %v8564_v10  ;;  %6575 = vmatprep.subr.bf16.mxu1 %v10392_v51 }
 0x457   :  { %1761 = vmatpush1.bf16.msra.mxu0 %v8571_v11  ;;  %6576 = vmatpush3.bf16.msra.mxu1 %v8577_v13 }
 0x458   :  { %1762 = vmatprep.subr.bf16.mxu0 %v8583_v14  ;;  %6577 = vmatprep.subr.bf16.mxu1 %v10392_v51 }
 0x45b   :  { %1763 = vmatpush1.bf16.msra.mxu0 %v8590_v17  ;;  %6578 = vmatpush3.bf16.msra.mxu1 %v8596_v25 }
 0x45c   :  { %1975 = vmatprep.subr.bf16.mxu0 %v8259_v26  ;;  %6583 = vmatprep.subr.bf16.mxu1 %v10392_v51 }
 0x45e   :  { %1781 = vmatmul.mubr.bf16.vlgmr.msra.gmra.mrb[36].mxu0 %v10394_v22  ;;  %6580 = vmatmul.mubr.bf16.vlgmr.msra.gmra.mrb[36].mxu1 %v10394_v22 }
 0x45f   :  { %1976 = vmatpush1.bf16.msra.mxu0 %v8268_v27  ;;  %6584 = vmatpush3.bf16.msra.mxu1 %v8274_v30 }
 0x460   :  { %1977 = vmatprep.subr.bf16.mxu0 %v8280_v31  ;;  %6585 = vmatprep.subr.bf16.mxu1 %v10392_v51 }
 0x461   :  { %2007 = vmatprep.mubr.bf16.mxu0 %v10393_v52  ;;  %6599 = vmatprep.mubr.msk.bf16.mxu1 %vm7520_vm0, %v10392_v51 }
 0x463   :  { %1978 = vmatpush1.bf16.msra.mxu0 %v8290_v32  ;;  %6586 = vmatpush3.bf16.msra.mxu1 %v8296_v33 }
 0x464   :  { %1979 = vmatprep.subr.bf16.mxu0 %v8302_v34  ;;  %6587 = vmatprep.subr.bf16.mxu1 %v10392_v51 }
 0x467   :  { %1980 = vmatpush1.bf16.msra.mxu0 %v8309_v35  ;;  %6588 = vmatpush3.bf16.msra.mxu1 %v8315_v36 }
 0x468   :  { %1981 = vmatprep.subr.bf16.mxu0 %v8321_v37  ;;  %6589 = vmatprep.subr.bf16.mxu1 %v10392_v51 }
 0x46b   :  { %1982 = vmatpush1.bf16.msra.mxu0 %v8328_v38  ;;  %6590 = vmatpush3.bf16.msra.mxu1 %v8334_v39 }
 0x46c   :  { %1983 = vmatprep.subr.bf16.mxu0 %v8340_v40  ;;  %6591 = vmatprep.subr.bf16.mxu1 %v10392_v51 }
 0x46f   :  { %1984 = vmatpush1.bf16.msra.mxu0 %v8347_v41  ;;  %6592 = vmatpush3.bf16.msra.mxu1 %v8353_v42 }
 0x470   :  { %1985 = vmatprep.subr.bf16.mxu0 %v8359_v43  ;;  %6593 = vmatprep.subr.bf16.mxu1 %v10392_v51 }
 0x473   :  { %1986 = vmatpush1.bf16.msra.mxu0 %v8366_v44  ;;  %6594 = vmatpush3.bf16.msra.mxu1 %v8372_v45 }
 0x474   :  { %1987 = vmatprep.subr.bf16.mxu0 %v8378_v46  ;;  %6595 = vmatprep.subr.bf16.mxu1 %v10392_v51 }
 0x477   :  { %1988 = vmatpush1.bf16.msra.mxu0 %v8385_v47  ;;  %6596 = vmatpush3.bf16.msra.mxu1 %v8391_v48 }
 0x478   :  { %1989 = vmatprep.subr.bf16.mxu0 %v8397_v49  ;;  %6597 = vmatprep.subr.bf16.mxu1 %v10392_v51 }
 0x47b   :  { %1990 = vmatpush1.bf16.msra.mxu0 %v8404_v50  ;;  %6598 = vmatpush3.bf16.msra.mxu1 %v8410_v2  ;;  %v5655_v50 = vld [vmem:[%s10268_s0 + $0xe0] sm:$0xff] }
 0x47c   :  { %2060 = vmatprep.subr.bf16.mxu0 %v8416_v16  ;;  %6603 = vmatprep.subr.bf16.mxu1 %v10392_v51 }
 0x511   :  { %v1697_v12 = vpop.f32.mrb[32].mxu0  ;;  %v1740_v20 = vpop.f32.mrb[32].mxu1 }
 0x512   :  { %v1839_v28 = vadd.f32 %v5651_v5, %v1697_v12  ;;  %v1699_v1 = vpop.f32.mrb[33].mxu0  ;;  %v6561_v56 = vpop.f32.mrb[33].mxu1 }
 0x513   :  { %v1701_v29 = vpop.f32.mrb[34].mxu0  ;;  %v1743_v63 = vpop.f32.mrb[34].mxu1  ;;  %v1853_v48 = vadd.f32 %v5652_v58, %v1699_v1 }
 0x514   :  { %v5657_v15 = vmul.f32 -1.442695, %v1839_v28  ;;  %v1840_v16 = vadd.f32 %v5654_v57, %v1701_v29  ;;  %v1703_v2 = vpop.f32.mrb[35].mxu0  ;;  %v6562_v49 = vpop.f32.mrb[35].mxu1 }
 0x515   :  { %v1854_v5 = vadd.f32 %v5655_v50, %v1703_v2  ;;  %v5659_v12 = vmul.f32 -1.442695, %v1853_v48  ;;  %v8653_v49 = vld [vmem:[%s10269_s3] ss:$0 sm:$0xff] }
 0x516   :  { %7171 = vpow2.f32 %v5657_v15  ;;  %v5658_v47 = vmul.f32 -1.442695, %v1840_v16  ;;  %10426 = vst [vmem:[#allocation18_spill] sm:$0xff] %v8653_v49  ;;  %v5656_v16 = vld [vmem:[%s10268_s0 + $0xe8] sm:$0xff] }
 0x517   :  { %v5660_v46 = vmul.f32 -1.442695, %v1854_v5 }
 0x518   :  { %7173 = vpow2.f32 %v5658_v47  ;;  %v1867_v47 = vadd.f32 %v8653_v49, %v1740_v20 }
 0x519   :  { %7175 = vpow2.f32 %v5659_v12 }
 0x51a   :  { %7177 = vpow2.f32 %v5660_v46  ;;  %v5653_v46 = vld [vmem:[%s10268_s0 + $0xd0] sm:$0xff] }
 0x520   :  { %v7172_v56 = vpop.eup %7171 }
 0x521   :  { %v1847_v45 = vadd.f32 1.0, %v7172_v56 }
 0x522   :  { %v7174_v44 = vpop.eup %7173 }
 0x523   :  { %7179 = vrcp.f32 %v1847_v45  ;;  %v1848_v57 = vadd.f32 1.0, %v7174_v44  ;;  %v7176_v28 = vpop.eup %7175  ;;  %v1868_v44 = vadd.f32 %v8653_v49, %v1743_v63 }
 0x524   :  { %v7178_v29 = vpop.eup %7177  ;;  %v1861_v43 = vadd.f32 1.0, %v7176_v28 }
 0x525   :  { %7181 = vrcp.f32 %v1848_v57  ;;  %v1862_v48 = vadd.f32 1.0, %v7178_v29 }
 0x526   :  { %7183 = vrcp.f32 %v1861_v43 }
 0x527   :  { %7185 = vrcp.f32 %v1862_v48 }
 0x52d   :  { %v7180_v50 = vpop.eup %7179 }
 0x52e   :  { %v1869_v2 = vmul.f32 %v7180_v50, %v1867_v47 }
 0x52f   :  { %v7182_v45 = vpop.eup %7181 }
 0x530   :  { %v1871_v1 = vadd.f32 %v5653_v46, %v1869_v2  ;;  %v1870_v58 = vmul.f32 %v7182_v45, %v1868_v44  ;;  %v7184_v63 = vpop.eup %7183 }
 0x531   :  { %v1782_v15 = vpop.f32.mrb[36].mxu0  ;;  %v1825_v20 = vpop.f32.mrb[36].mxu1  ;;  %v1875_v50 = vsub.f32 1.0, %v7184_v63  ;;  %v1879_v46 = vmul.f32 %v7184_v63, %v8442_v24  ;;  %v10429_v24 = vld [vmem:[#allocation5_spill] sm:$0xff] }
 0x532   :  { %7187 = vtanh.f32 %v1871_v1  ;;  %v1872_v5 = vadd.f32 %v5656_v16, %v1870_v58  ;;  %v1784_v12 = vpop.f32.mrb[37].mxu0  ;;  %v6581_v56 = vpop.f32.mrb[37].mxu1  ;;  %v10432_v58 = vld [vmem:[#allocation7_spill] sm:$0xff]  ;;  %v10433_v15 = vld [vmem:[#allocation8_spill] sm:$0xff]  ;;  %v10434_v20 = vld [vmem:[#allocation14_spill] sm:$0xff] }
 0x533   :  { %v1786_v57 = vpop.f32.mrb[38].mxu0  ;;  %v1828_v28 = vpop.f32.mrb[38].mxu1  ;;  %v10436_v12 = vld [vmem:[#allocation11_spill] sm:$0xff]  ;;  %v5682_v63 = vld [vmem:[%s10268_s0 + $0x108] sm:$0xff] }
 0x534   :  { %7189 = vtanh.f32 %v1872_v5  ;;  %v1788_v43 = vpop.f32.mrb[39].mxu0  ;;  %v6582_v29 = vpop.f32.mrb[39].mxu1  ;;  %v10435_v5 = vld [vmem:[#allocation10_spill] sm:$0xff]  ;;  %v10437_v56 = vld [vmem:[#allocation15_spill] sm:$0xff]  ;;  %v10438_v57 = vld [vmem:[#allocation13_spill] sm:$0xff] }
 0x535   :  { %v7186_v47 = vpop.eup %7185  ;;  %v5679_v28 = vld [vmem:[%s10268_s0 + $0xf0] sm:$0xff] }
 0x536   :  { %v1876_v42 = vsub.f32 1.0, %v7186_v47  ;;  %v1880_v44 = vmul.f32 %v7186_v47, %v8444_v60  ;;  %v10430_v60 = vld [vmem:[#allocation6_spill] sm:$0xff] }
 0x53c   :  { %v7188_v49 = vpop.eup %7187 }
 0x53d   :  { %v1877_v41 = vmul.f32 %v7188_v49, %v1875_v50  ;;  %v10431_v49 = vld [vmem:[#allocation12_spill] sm:$0xff] }
 0x53e   :  { %v7190_v48 = vpop.eup %7189 }
 0x53f   :  { %v1878_v2 = vmul.f32 %v7190_v48, %v1876_v42  ;;  %v8665_v45 = vadd.f32 %v1879_v46, %v1877_v41  ;;  %v10427_v41 = vld [vmem:[#allocation4_spill] sm:$0xff]  ;;  %v10428_v42 = vld [vmem:[#allocation9_spill] sm:$0xff]  ;;  %v5680_v46 = vld [vmem:[%s10268_s0 + $0xf8] sm:$0xff] }
 0x541   :  { %v8667_v16 = vadd.f32 %v1880_v44, %v1878_v2 }
 0x543   :  { %v6036_v1 = vpack.c.bf16 %v8667_v16, %v8665_v45 }
 0x545   :  { %6086 = vst [vmem:[%s10267_s4 + $0x20] sm:$0xff] %v6036_v1   ;;  %2008 = vmatmul.mubr.bf16.vlgmr.msra.gmra.mrb[40].mxu0 %v6036_v1  ;;  %6600 = vmatmul.mubr.bf16.vlgmr.msra.gmra.mrb[40].mxu1 %v6036_v1 }
 0x546   :  { %2061 = vmatpush1.bf16.msra.mxu0 %v8454_v55  ;;  %6604 = vmatpush3.bf16.msra.mxu1 %v8460_v18 }
 0x547   :  { %2062 = vmatprep.subr.bf16.mxu0 %v8466_v61  ;;  %6605 = vmatprep.subr.bf16.mxu1 %v10392_v51 }
 0x548   :  { %2092 = vmatprep.mubr.bf16.mxu0 %v10393_v52  ;;  %6619 = vmatprep.mubr.msk.bf16.mxu1 %vm7520_vm0, %v10392_v51 }
 0x54a   :  { %2063 = vmatpush1.bf16.msra.mxu0 %v8476_v54  ;;  %6606 = vmatpush3.bf16.msra.mxu1 %v8482_v53 }
 0x54b   :  { %2064 = vmatprep.subr.bf16.mxu0 %v8488_v59  ;;  %6607 = vmatprep.subr.bf16.mxu1 %v10392_v51 }
 0x54e   :  { %2065 = vmatpush1.bf16.msra.mxu0 %v8495_v21  ;;  %6608 = vmatpush3.bf16.msra.mxu1 %v8501_v19 }
 0x54f   :  { %2066 = vmatprep.subr.bf16.mxu0 %v8507_v62  ;;  %6609 = vmatprep.subr.bf16.mxu1 %v10392_v51 }
 0x552   :  { %2067 = vmatpush1.bf16.msra.mxu0 %v8514_v23  ;;  %6610 = vmatpush3.bf16.msra.mxu1 %v8520_v0 }
 0x553   :  { %2068 = vmatprep.subr.bf16.mxu0 %v8526_v3  ;;  %6611 = vmatprep.subr.bf16.mxu1 %v10392_v51 }
 0x556   :  { %2069 = vmatpush1.bf16.msra.mxu0 %v8533_v6  ;;  %6612 = vmatpush3.bf16.msra.mxu1 %v8539_v7 }
 0x557   :  { %2070 = vmatprep.subr.bf16.mxu0 %v8545_v8  ;;  %6613 = vmatprep.subr.bf16.mxu1 %v10392_v51 }
 0x55a   :  { %2071 = vmatpush1.bf16.msra.mxu0 %v8552_v4  ;;  %6614 = vmatpush3.bf16.msra.mxu1 %v8558_v9 }
 0x55b   :  { %2072 = vmatprep.subr.bf16.mxu0 %v8564_v10  ;;  %6615 = vmatprep.subr.bf16.mxu1 %v10392_v51 }
 0x55e   :  { %2073 = vmatpush1.bf16.msra.mxu0 %v8571_v11  ;;  %6616 = vmatpush3.bf16.msra.mxu1 %v8577_v13 }
 0x55f   :  { %2074 = vmatprep.subr.bf16.mxu0 %v8583_v14  ;;  %6617 = vmatprep.subr.bf16.mxu1 %v10392_v51 }
 0x562   :  { %2075 = vmatpush1.bf16.msra.mxu0 %v8590_v17  ;;  %6618 = vmatpush3.bf16.msra.mxu1 %v8596_v25 }
 0x563   :  { %2287 = vmatprep.subr.bf16.mxu0 %v8259_v26  ;;  %6623 = vmatprep.subr.bf16.mxu1 %v10392_v51 }
 0x565   :  { %2093 = vmatmul.mubr.bf16.vlgmr.msra.gmra.mrb[44].mxu0 %v10394_v22  ;;  %6620 = vmatmul.mubr.bf16.vlgmr.msra.gmra.mrb[44].mxu1 %v10394_v22 }
 0x566   :  { %2288 = vmatpush1.bf16.msra.mxu0 %v8268_v27  ;;  %6624 = vmatpush3.bf16.msra.mxu1 %v8274_v30 }
 0x567   :  { %2289 = vmatprep.subr.bf16.mxu0 %v8280_v31  ;;  %6625 = vmatprep.subr.bf16.mxu1 %v10392_v51 }
 0x568   :  { %2319 = vmatprep.mubr.bf16.mxu0 %v10393_v52  ;;  %6639 = vmatprep.mubr.msk.bf16.mxu1 %vm7520_vm0, %v10392_v51 }
 0x56a   :  { %2290 = vmatpush1.bf16.msra.mxu0 %v8290_v32  ;;  %6626 = vmatpush3.bf16.msra.mxu1 %v8296_v33 }
 0x56b   :  { %2291 = vmatprep.subr.bf16.mxu0 %v8302_v34  ;;  %6627 = vmatprep.subr.bf16.mxu1 %v10392_v51 }
 0x56e   :  { %2292 = vmatpush1.bf16.msra.mxu0 %v8309_v35  ;;  %6628 = vmatpush3.bf16.msra.mxu1 %v8315_v36 }
 0x56f   :  { %2293 = vmatprep.subr.bf16.mxu0 %v8321_v37  ;;  %6629 = vmatprep.subr.bf16.mxu1 %v10392_v51 }
 0x572   :  { %2294 = vmatpush1.bf16.msra.mxu0 %v8328_v38  ;;  %6630 = vmatpush3.bf16.msra.mxu1 %v8334_v39 }
 0x573   :  { %2295 = vmatprep.subr.bf16.mxu0 %v8340_v40  ;;  %6631 = vmatprep.subr.bf16.mxu1 %v10392_v51 }
 0x576   :  { %2296 = vmatpush1.bf16.msra.mxu0 %v10427_v41  ;;  %6632 = vmatpush3.bf16.msra.mxu1 %v10428_v42  ;;  %v10439_v42 = vld [vmem:[#allocation18_spill] sm:$0xff] }
 0x577   :  { %2297 = vmatprep.subr.bf16.mxu0 %v10429_v24  ;;  %6633 = vmatprep.subr.bf16.mxu1 %v10392_v51 }
 0x57a   :  { %2298 = vmatpush1.bf16.msra.mxu0 %v10430_v60  ;;  %6634 = vmatpush3.bf16.msra.mxu1 %v10431_v49 }
 0x57b   :  { %2299 = vmatprep.subr.bf16.mxu0 %v10432_v58  ;;  %6635 = vmatprep.subr.bf16.mxu1 %v10392_v51 }
 0x57e   :  { %2300 = vmatpush1.bf16.msra.mxu0 %v10433_v15  ;;  %6636 = vmatpush3.bf16.msra.mxu1 %v10434_v20 }
 0x57f   :  { %2301 = vmatprep.subr.bf16.mxu0 %v10435_v5  ;;  %6637 = vmatprep.subr.bf16.mxu1 %v10392_v51 }
 0x582   :  { %2302 = vmatpush1.bf16.msra.mxu0 %v10436_v12  ;;  %6638 = vmatpush3.bf16.msra.mxu1 %v10437_v56  ;;  %v5683_v12 = vld [vmem:[%s10268_s0 + $0x110] sm:$0xff] }
 0x583   :  { %2372 = vmatprep.subr.bf16.mxu0 %v10438_v57  ;;  %6643 = vmatprep.subr.bf16.mxu1 %v10392_v51 }
 0x618   :  { %v2009_v43 = vpop.f32.mrb[40].mxu0  ;;  %v2052_v29 = vpop.f32.mrb[40].mxu1 }
 0x619   :  { %v2151_v47 = vadd.f32 %v5679_v28, %v2009_v43  ;;  %v2011_v50 = vpop.f32.mrb[41].mxu0  ;;  %v6601_v48 = vpop.f32.mrb[41].mxu1 }
 0x61a   :  { %v2013_v2 = vpop.f32.mrb[42].mxu0  ;;  %v2055_v44 = vpop.f32.mrb[42].mxu1  ;;  %v2165_v20 = vadd.f32 %v5680_v46, %v2011_v50 }
 0x61b   :  { %v5685_v1 = vmul.f32 -1.442695, %v2151_v47  ;;  %v2152_v57 = vadd.f32 %v5682_v63, %v2013_v2  ;;  %v2015_v56 = vpop.f32.mrb[43].mxu0  ;;  %v6602_v5 = vpop.f32.mrb[43].mxu1 }
 0x61c   :  { %v2166_v28 = vadd.f32 %v5683_v12, %v2015_v56  ;;  %v5687_v43 = vmul.f32 -1.442695, %v2165_v20  ;;  %v2179_v5 = vadd.f32 %v10439_v42, %v2052_v29 }
 0x61d   :  { %7191 = vpow2.f32 %v5685_v1  ;;  %v5686_v15 = vmul.f32 -1.442695, %v2152_v57 }
 0x61e   :  { %v5688_v58 = vmul.f32 -1.442695, %v2166_v28 }
 0x61f   :  { %7193 = vpow2.f32 %v5686_v15  ;;  %v5681_v15 = vld [vmem:[%s10268_s0 + $0x100] sm:$0xff] }
 0x620   :  { %7195 = vpow2.f32 %v5687_v43 }
 0x621   :  { %7197 = vpow2.f32 %v5688_v58  ;;  %v2180_v58 = vadd.f32 %v10439_v42, %v2055_v44 }
 0x627   :  { %v7192_v48 = vpop.eup %7191 }
 0x628   :  { %v2159_v49 = vadd.f32 1.0, %v7192_v48 }
 0x629   :  { %v7194_v60 = vpop.eup %7193 }
 0x62a   :  { %7199 = vrcp.f32 %v2159_v49  ;;  %v2160_v63 = vadd.f32 1.0, %v7194_v60  ;;  %v7196_v47 = vpop.eup %7195  ;;  %v5684_v60 = vld [vmem:[%s10268_s0 + $0x118] sm:$0xff] }
 0x62b   :  { %v7198_v2 = vpop.eup %7197  ;;  %v2173_v24 = vadd.f32 1.0, %v7196_v47 }
 0x62c   :  { %7201 = vrcp.f32 %v2160_v63  ;;  %v2174_v50 = vadd.f32 1.0, %v7198_v2 }
 0x62d   :  { %7203 = vrcp.f32 %v2173_v24 }
 0x62e   :  { %7205 = vrcp.f32 %v2174_v50 }
 0x634   :  { %v7200_v46 = vpop.eup %7199 }
 0x635   :  { %v2181_v20 = vmul.f32 %v7200_v46, %v2179_v5 }
 0x636   :  { %v7202_v12 = vpop.eup %7201 }
 0x637   :  { %v2183_v49 = vadd.f32 %v5681_v15, %v2181_v20  ;;  %v2182_v56 = vmul.f32 %v7202_v12, %v2180_v58  ;;  %v7204_v44 = vpop.eup %7203 }
 0x638   :  { %v2094_v57 = vpop.f32.mrb[44].mxu0  ;;  %v2137_v29 = vpop.f32.mrb[44].mxu1  ;;  %v2187_v5 = vsub.f32 1.0, %v7204_v44  ;;  %v2191_v15 = vmul.f32 %v7204_v44, %v8665_v45 }
 0x639   :  { %7207 = vtanh.f32 %v2183_v49  ;;  %v2184_v1 = vadd.f32 %v5684_v60, %v2182_v56  ;;  %v2096_v28 = vpop.f32.mrb[45].mxu0  ;;  %v6621_v43 = vpop.f32.mrb[45].mxu1  ;;  %v5708_v57 = vld [vmem:[%s10268_s0 + $0x128] sm:$0xff] }
 0x63a   :  { %v2098_v48 = vpop.f32.mrb[46].mxu0  ;;  %v2140_v63 = vpop.f32.mrb[46].mxu1 }
 0x63b   :  { %7209 = vtanh.f32 %v2184_v1  ;;  %v2100_v24 = vpop.f32.mrb[47].mxu0  ;;  %v6622_v47 = vpop.f32.mrb[47].mxu1 }
 0x63c   :  { %v7206_v2 = vpop.eup %7205  ;;  %v5711_v24 = vld [vmem:[%s10268_s0 + $0x140] sm:$0xff] }
 0x63d   :  { %v2188_v42 = vsub.f32 1.0, %v7206_v2  ;;  %v2192_v58 = vmul.f32 %v7206_v2, %v8667_v16 }
 0x643   :  { %v7208_v46 = vpop.eup %7207 }
 0x644   :  { %v2189_v41 = vmul.f32 %v7208_v46, %v2187_v5 }
 0x645   :  { %v7210_v50 = vpop.eup %7209 }
 0x646   :  { %v2190_v20 = vmul.f32 %v7210_v50, %v2188_v42  ;;  %v8768_v12 = vadd.f32 %v2191_v15, %v2189_v41  ;;  %v5710_v41 = vld [vmem:[%s10268_s0 + $0x138] sm:$0xff] }
 0x648   :  { %v8770_v60 = vadd.f32 %v2192_v58, %v2190_v20 }
 0x64a   :  { %v6041_v49 = vpack.c.bf16 %v8770_v60, %v8768_v12 }
 0x64c   :  { %6087 = vst [vmem:[%s10267_s4 + $0x28] sm:$0xff] %v6041_v49   ;;  %2320 = vmatmul.mubr.bf16.vlgmr.msra.gmra.mrb[48].mxu0 %v6041_v49  ;;  %6640 = vmatmul.mubr.bf16.vlgmr.msra.gmra.mrb[48].mxu1 %v6041_v49 }
 0x64d   :  { %2373 = vmatpush1.bf16.msra.mxu0 %v8454_v55  ;;  %6644 = vmatpush3.bf16.msra.mxu1 %v8460_v18 }
 0x64e   :  { %2374 = vmatprep.subr.bf16.mxu0 %v8466_v61  ;;  %6645 = vmatprep.subr.bf16.mxu1 %v10392_v51 }
 0x64f   :  { %2404 = vmatprep.mubr.bf16.mxu0 %v10393_v52  ;;  %6659 = vmatprep.mubr.msk.bf16.mxu1 %vm7520_vm0, %v10392_v51 }
 0x651   :  { %2375 = vmatpush1.bf16.msra.mxu0 %v8476_v54  ;;  %6646 = vmatpush3.bf16.msra.mxu1 %v8482_v53 }
 0x652   :  { %2376 = vmatprep.subr.bf16.mxu0 %v8488_v59  ;;  %6647 = vmatprep.subr.bf16.mxu1 %v10392_v51 }
 0x655   :  { %2377 = vmatpush1.bf16.msra.mxu0 %v8495_v21  ;;  %6648 = vmatpush3.bf16.msra.mxu1 %v8501_v19 }
 0x656   :  { %2378 = vmatprep.subr.bf16.mxu0 %v8507_v62  ;;  %6649 = vmatprep.subr.bf16.mxu1 %v10392_v51 }
 0x659   :  { %2379 = vmatpush1.bf16.msra.mxu0 %v8514_v23  ;;  %6650 = vmatpush3.bf16.msra.mxu1 %v8520_v0 }
 0x65a   :  { %2380 = vmatprep.subr.bf16.mxu0 %v8526_v3  ;;  %6651 = vmatprep.subr.bf16.mxu1 %v10392_v51 }
 0x65d   :  { %2381 = vmatpush1.bf16.msra.mxu0 %v8533_v6  ;;  %6652 = vmatpush3.bf16.msra.mxu1 %v8539_v7 }
 0x65e   :  { %2382 = vmatprep.subr.bf16.mxu0 %v8545_v8  ;;  %6653 = vmatprep.subr.bf16.mxu1 %v10392_v51 }
 0x661   :  { %2383 = vmatpush1.bf16.msra.mxu0 %v8552_v4  ;;  %6654 = vmatpush3.bf16.msra.mxu1 %v8558_v9 }
 0x662   :  { %2384 = vmatprep.subr.bf16.mxu0 %v8564_v10  ;;  %6655 = vmatprep.subr.bf16.mxu1 %v10392_v51 }
 0x665   :  { %2385 = vmatpush1.bf16.msra.mxu0 %v8571_v11  ;;  %6656 = vmatpush3.bf16.msra.mxu1 %v8577_v13 }
 0x666   :  { %2386 = vmatprep.subr.bf16.mxu0 %v8583_v14  ;;  %6657 = vmatprep.subr.bf16.mxu1 %v10392_v51 }
 0x669   :  { %2387 = vmatpush1.bf16.msra.mxu0 %v8590_v17  ;;  %6658 = vmatpush3.bf16.msra.mxu1 %v8596_v25 }
 0x66a   :  { %2599 = vmatprep.subr.bf16.mxu0 %v8259_v26  ;;  %6663 = vmatprep.subr.bf16.mxu1 %v10392_v51  ;;  %v10440_v26 = vld [vmem:[#allocation4_spill] sm:$0xff] }
 0x66c   :  { %2405 = vmatmul.mubr.bf16.vlgmr.msra.gmra.mrb[52].mxu0 %v10394_v22  ;;  %6660 = vmatmul.mubr.bf16.vlgmr.msra.gmra.mrb[52].mxu1 %v10394_v22 }
 0x66d   :  { %2600 = vmatpush1.bf16.msra.mxu0 %v8268_v27  ;;  %6664 = vmatpush3.bf16.msra.mxu1 %v8274_v30  ;;  %v10441_v27 = vld [vmem:[#allocation9_spill] sm:$0xff] }
 0x66e   :  { %2601 = vmatprep.subr.bf16.mxu0 %v8280_v31  ;;  %6665 = vmatprep.subr.bf16.mxu1 %v10392_v51  ;;  %v10442_v30 = vld [vmem:[#allocation5_spill] sm:$0xff]  ;;  %v10443_v31 = vld [vmem:[#allocation6_spill] sm:$0xff] }
 0x66f   :  { %2631 = vmatprep.mubr.bf16.mxu0 %v10393_v52  ;;  %6679 = vmatprep.mubr.msk.bf16.mxu1 %vm7520_vm0, %v10392_v51 }
 0x671   :  { %2602 = vmatpush1.bf16.msra.mxu0 %v8290_v32  ;;  %6666 = vmatpush3.bf16.msra.mxu1 %v8296_v33  ;;  %v10444_v32 = vld [vmem:[#allocation12_spill] sm:$0xff]  ;;  %v10445_v33 = vld [vmem:[#allocation7_spill] sm:$0xff] }
 0x672   :  { %2603 = vmatprep.subr.bf16.mxu0 %v8302_v34  ;;  %6667 = vmatprep.subr.bf16.mxu1 %v10392_v51  ;;  %v10446_v34 = vld [vmem:[#allocation8_spill] sm:$0xff] }
 0x675   :  { %2604 = vmatpush1.bf16.msra.mxu0 %v8309_v35  ;;  %6668 = vmatpush3.bf16.msra.mxu1 %v8315_v36  ;;  %v10447_v35 = vld [vmem:[#allocation14_spill] sm:$0xff] }
 0x676   :  { %2605 = vmatprep.subr.bf16.mxu0 %v8321_v37  ;;  %6669 = vmatprep.subr.bf16.mxu1 %v10392_v51  ;;  %v10448_v36 = vld [vmem:[#allocation10_spill] sm:$0xff]  ;;  %v10449_v37 = vld [vmem:[#allocation11_spill] sm:$0xff] }
 0x679   :  { %2606 = vmatpush1.bf16.msra.mxu0 %v8328_v38  ;;  %6670 = vmatpush3.bf16.msra.mxu1 %v8334_v39  ;;  %v10450_v38 = vld [vmem:[#allocation15_spill] sm:$0xff]  ;;  %v10451_v39 = vld [vmem:[#allocation13_spill] sm:$0xff] }
 0x67a   :  { %2607 = vmatprep.subr.bf16.mxu0 %v8340_v40  ;;  %6671 = vmatprep.subr.bf16.mxu1 %v10392_v51  ;;  %v5707_v40 = vld [vmem:[%s10268_s0 + $0x120] sm:$0xff] }
 0x67d   :  { %2608 = vmatpush1.bf16.msra.mxu0 %v10440_v26  ;;  %6672 = vmatpush3.bf16.msra.mxu1 %v10441_v27 }
 0x67e   :  { %2609 = vmatprep.subr.bf16.mxu0 %v10442_v30  ;;  %6673 = vmatprep.subr.bf16.mxu1 %v10392_v51 }
 0x681   :  { %2610 = vmatpush1.bf16.msra.mxu0 %v10443_v31  ;;  %6674 = vmatpush3.bf16.msra.mxu1 %v10444_v32  ;;  %v10452_v31 = vld [vmem:[#allocation18_spill] sm:$0xff] }
 0x682   :  { %2611 = vmatprep.subr.bf16.mxu0 %v10445_v33  ;;  %6675 = vmatprep.subr.bf16.mxu1 %v10392_v51 }
 0x685   :  { %2612 = vmatpush1.bf16.msra.mxu0 %v10446_v34  ;;  %6676 = vmatpush3.bf16.msra.mxu1 %v10447_v35  ;;  %v5709_v35 = vld [vmem:[%s10268_s0 + $0x130] sm:$0xff] }
 0x686   :  { %2613 = vmatprep.subr.bf16.mxu0 %v10448_v36  ;;  %6677 = vmatprep.subr.bf16.mxu1 %v10392_v51 }
 0x689   :  { %2614 = vmatpush1.bf16.msra.mxu0 %v10449_v37  ;;  %6678 = vmatpush3.bf16.msra.mxu1 %v10450_v38 }
 0x68a   :  { %2684 = vmatprep.subr.bf16.mxu0 %v10451_v39  ;;  %6683 = vmatprep.subr.bf16.mxu1 %v10392_v51  ;;  %v5712_v39 = vld [vmem:[%s10268_s0 + $0x148] sm:$0xff] }
 0x71f   :  { %v2321_v45 = vpop.f32.mrb[48].mxu0  ;;  %v2364_v16 = vpop.f32.mrb[48].mxu1 }
 0x720   :  { %v2463_v42 = vadd.f32 %v5707_v40, %v2321_v45  ;;  %v2323_v56 = vpop.f32.mrb[49].mxu0  ;;  %v6641_v29 = vpop.f32.mrb[49].mxu1  ;;  %v2491_v32 = vadd.f32 %v10452_v31, %v2364_v16 }
 0x721   :  { %v2325_v1 = vpop.f32.mrb[50].mxu0  ;;  %v2367_v28 = vpop.f32.mrb[50].mxu1  ;;  %v2477_v44 = vadd.f32 %v5708_v57, %v2323_v56 }
 0x722   :  { %v5713_v43 = vmul.f32 -1.442695, %v2463_v42  ;;  %v2464_v48 = vadd.f32 %v5710_v41, %v2325_v1  ;;  %v2327_v63 = vpop.f32.mrb[51].mxu0  ;;  %v6642_v47 = vpop.f32.mrb[51].mxu1  ;;  %v2492_v37 = vadd.f32 %v10452_v31, %v2367_v28  ;;  %v8952_v31 = vld [vmem:[%s10266_s2 + $0x20] ss:$12 sps:$4 sm:$0xff]  }
 0x723   :  { %v2478_v5 = vadd.f32 %v5711_v24, %v2327_v63  ;;  %v5715_v46 = vmul.f32 -1.442695, %v2477_v44 }
 0x724   :  { %7211 = vpow2.f32 %v5713_v43  ;;  %v5714_v2 = vmul.f32 -1.442695, %v2464_v48 }
 0x725   :  { %v5716_v15 = vmul.f32 -1.442695, %v2478_v5 }
 0x726   :  { %7213 = vpow2.f32 %v5714_v2 }
 0x727   :  { %7215 = vpow2.f32 %v5715_v46 }
 0x728   :  { %7217 = vpow2.f32 %v5716_v15 }
 0x72e   :  { %v7212_v50 = vpop.eup %7211 }
 0x72f   :  { %v2471_v20 = vadd.f32 1.0, %v7212_v50 }
 0x730   :  { %v7214_v58 = vpop.eup %7213 }
 0x731   :  { %7219 = vrcp.f32 %v2471_v20  ;;  %v2472_v49 = vadd.f32 1.0, %v7214_v58  ;;  %v7216_v26 = vpop.eup %7215 }
 0x732   :  { %v7218_v27 = vpop.eup %7217  ;;  %v2485_v30 = vadd.f32 1.0, %v7216_v26  ;;  %v8930_v26 = vld [vmem:[%s10266_s2 + $0x8] ss:$12 sps:$4 sm:$0xff]  }
 0x733   :  { %7221 = vrcp.f32 %v2472_v49  ;;  %v2486_v33 = vadd.f32 1.0, %v7218_v27  ;;  %v8936_v27 = vld [vmem:[%s10266_s2 + $0x1c] ss:$12 sps:$4 sm:$0xff]  }
 0x734   :  { %7223 = vrcp.f32 %v2485_v30  ;;  %v8946_v30 = vld [vmem:[%s10266_s2 + $0x18] ss:$12 sps:$4 sm:$0xff]  }
 0x735   :  { %7225 = vrcp.f32 %v2486_v33  ;;  %v8965_v33 = vld [vmem:[%s10266_s2 + $0x30] ss:$12 sps:$4 sm:$0xff]  }
 0x73b   :  { %v7220_v34 = vpop.eup %7219 }
 0x73c   :  { %v2493_v36 = vmul.f32 %v7220_v34, %v2491_v32  ;;  %v8958_v32 = vld [vmem:[%s10266_s2 + $0x34] ss:$12 sps:$4 sm:$0xff]   ;;  %v8971_v34 = vld [vmem:[%s10266_s2 + $0x38] ss:$12 sps:$4 sm:$0xff]  }
 0x73d   :  { %v7222_v38 = vpop.eup %7221 }
 0x73e   :  { %v2495_v40 = vadd.f32 %v5709_v35, %v2493_v36  ;;  %v2494_v45 = vmul.f32 %v7222_v38, %v2492_v37  ;;  %v7224_v28 = vpop.eup %7223  ;;  %v8977_v35 = vld [vmem:[%s10266_s2 + $0x4c] ss:$12 sps:$4 sm:$0xff]   ;;  %v8984_v36 = vld [vmem:[%s10266_s2 + $0x48] ss:$12 sps:$4 sm:$0xff]   ;;  %v8990_v37 = vld [vmem:[%s10266_s2 + $0x50] ss:$12 sps:$4 sm:$0xff]  }
 0x73f   :  { %v2406_v41 = vpop.f32.mrb[52].mxu0  ;;  %v2449_v16 = vpop.f32.mrb[52].mxu1  ;;  %v2499_v24 = vsub.f32 1.0, %v7224_v28  ;;  %v2503_v2 = vmul.f32 %v7224_v28, %v8768_v12  ;;  %v8915_v12 = vld [vmem:[%s10266_s2 + $0x4] ss:$12 sps:$4 sm:$0xff]  }
 0x740   :  { %7227 = vtanh.f32 %v2495_v40  ;;  %v2496_v42 = vadd.f32 %v5712_v39, %v2494_v45  ;;  %v2408_v56 = vpop.f32.mrb[53].mxu0  ;;  %v6661_v57 = vpop.f32.mrb[53].mxu1  ;;  %10453 = vst [vmem:[#allocation4_spill] sm:$0xff] %v8915_v12  ;;  %v8996_v38 = vld [vmem:[%s10266_s2 + $0x64] ss:$12 sps:$4 sm:$0xff]  }
 0x741   :  { %v2410_v29 = vpop.f32.mrb[54].mxu0  ;;  %v2452_v1 = vpop.f32.mrb[54].mxu1  ;;  %v9003_v39 = vld [vmem:[%s10266_s2 + $0x60] ss:$12 sps:$4 sm:$0xff]   ;;  %v9009_v40 = vld [vmem:[%s10266_s2 + $0x68] ss:$12 sps:$4 sm:$0xff]  }
 0x742   :  { %7229 = vtanh.f32 %v2496_v42  ;;  %v2412_v43 = vpop.f32.mrb[55].mxu0  ;;  %v6662_v48 = vpop.f32.mrb[55].mxu1  ;;  %v9015_v45 = vld [vmem:[%s10266_s2 + $0x7c] ss:$12 sps:$4 sm:$0xff]   ;;  %v9022_v41 = vld [vmem:[%s10266_s2 + $0x78] ss:$12 sps:$4 sm:$0xff]  }
 0x743   :  { %v7226_v63 = vpop.eup %7225  ;;  %v9028_v16 = vld [vmem:[%s10266_s2 + $0x80] ss:$12 sps:$4 sm:$0xff]   ;;  %v9041_v56 = vld [vmem:[%s10266_s2 + $0x90] ss:$12 sps:$4 sm:$0xff]   ;;  %v9047_v57 = vld [vmem:[%s10266_s2 + $0x98] ss:$12 sps:$4 sm:$0xff]  }
 0x744   :  { %v2500_v5 = vsub.f32 1.0, %v7226_v63  ;;  %v2504_v20 = vmul.f32 %v7226_v63, %v8770_v60  ;;  %v8924_v60 = vld [vmem:[%s10266_s2] ss:$12 sps:$4 sm:$0xff]   ;;  %v9060_v1 = vld [vmem:[%s10266_s2 + $0xa8] ss:$12 sps:$4 sm:$0xff]  }
 0x745   :  { %v9034_v42 = vld [vmem:[%s10266_s2 + $0x94] ss:$12 sps:$4 sm:$0xff]   ;;  %v9053_v29 = vld [vmem:[%s10266_s2 + $0xac] ss:$12 sps:$4 sm:$0xff]   ;;  %v9066_v43 = vld [vmem:[%s10266_s2 + $0xb0] ss:$12 sps:$4 sm:$0xff]  }
 0x746   :  { %v9072_v48 = vld [vmem:[%s10266_s2 + $0xc4] ss:$12 sps:$4 sm:$0xff]  }
 0x74a   :  { %v7228_v47 = vpop.eup %7227 }
 0x74b   :  { %v2501_v44 = vmul.f32 %v7228_v47, %v2499_v24 }
 0x74c   :  { %v7230_v46 = vpop.eup %7229 }
 0x74d   :  { %v2505_v15 = vadd.f32 %v2503_v2, %v2501_v44  ;;  %v2502_v50 = vmul.f32 %v7230_v46, %v2500_v5 }
 0x74f   :  { %v2506_v58 = vadd.f32 %v2504_v20, %v2502_v50 }
 0x751   :  { %v8871_v49 = vpack.c.bf16 %v2506_v58, %v2505_v15 }
 0x753   :  { %6088 = vst [vmem:[%s10267_s4 + $0x30] sm:$0xff] %v8871_v49   ;;  %2632 = vmatmul.mubr.bf16.vlgmr.msra.gmra.mrb[56].mxu0 %v8871_v49  ;;  %6680 = vmatmul.mubr.bf16.vlgmr.msra.gmra.mrb[56].mxu1 %v8871_v49 }
 0x754   :  { %2685 = vmatpush1.bf16.msra.mxu0 %v8454_v55  ;;  %6684 = vmatpush3.bf16.msra.mxu1 %v8460_v18 }
 0x755   :  { %2686 = vmatprep.subr.bf16.mxu0 %v8466_v61  ;;  %6685 = vmatprep.subr.bf16.mxu1 %v10392_v51 }
 0x756   :  { %2716 = vmatprep.mubr.bf16.mxu0 %v10393_v52  ;;  %6699 = vmatprep.mubr.msk.bf16.mxu1 %vm7520_vm0, %v10392_v51 }
 0x758   :  { %2687 = vmatpush1.bf16.msra.mxu0 %v8476_v54  ;;  %6686 = vmatpush3.bf16.msra.mxu1 %v8482_v53 }
 0x759   :  { %2688 = vmatprep.subr.bf16.mxu0 %v8488_v59  ;;  %6687 = vmatprep.subr.bf16.mxu1 %v10392_v51 }
 0x75c   :  { %2689 = vmatpush1.bf16.msra.mxu0 %v8495_v21  ;;  %6688 = vmatpush3.bf16.msra.mxu1 %v8501_v19 }
 0x75d   :  { %2690 = vmatprep.subr.bf16.mxu0 %v8507_v62  ;;  %6689 = vmatprep.subr.bf16.mxu1 %v10392_v51 }
 0x760   :  { %2691 = vmatpush1.bf16.msra.mxu0 %v8514_v23  ;;  %6690 = vmatpush3.bf16.msra.mxu1 %v8520_v0 }
 0x761   :  { %2692 = vmatprep.subr.bf16.mxu0 %v8526_v3  ;;  %6691 = vmatprep.subr.bf16.mxu1 %v10392_v51 }
 0x764   :  { %2693 = vmatpush1.bf16.msra.mxu0 %v8533_v6  ;;  %6692 = vmatpush3.bf16.msra.mxu1 %v8539_v7 }
 0x765   :  { %2694 = vmatprep.subr.bf16.mxu0 %v8545_v8  ;;  %6693 = vmatprep.subr.bf16.mxu1 %v10392_v51 }
 0x768   :  { %2695 = vmatpush1.bf16.msra.mxu0 %v8552_v4  ;;  %6694 = vmatpush3.bf16.msra.mxu1 %v8558_v9 }
 0x769   :  { %2696 = vmatprep.subr.bf16.mxu0 %v8564_v10  ;;  %6695 = vmatprep.subr.bf16.mxu1 %v10392_v51 }
 0x76c   :  { %2697 = vmatpush1.bf16.msra.mxu0 %v8571_v11  ;;  %6696 = vmatpush3.bf16.msra.mxu1 %v8577_v13 }
 0x76d   :  { %2698 = vmatprep.subr.bf16.mxu0 %v8583_v14  ;;  %6697 = vmatprep.subr.bf16.mxu1 %v10392_v51 }
 0x770   :  { %2699 = vmatpush1.bf16.msra.mxu0 %v8590_v17  ;;  %6698 = vmatpush3.bf16.msra.mxu1 %v8596_v25 }
 0x771   :  { %2911 = vmatprep.subr.bf16.mxu0 %v8915_v12  ;;  %6703 = vmatprep.subr.bf16.mxu1 %v10392_v51 }
 0x773   :  { %2717 = vmatmul.mubr.bf16.vlgmr.msra.gmra.mrb[60].mxu0 %v10394_v22  ;;  %6700 = vmatmul.mubr.bf16.vlgmr.msra.gmra.mrb[60].mxu1 %v10394_v22 }
 0x774   :  { %2912 = vmatpush1.bf16.msra.mxu0 %v8924_v60  ;;  %6704 = vmatpush3.bf16.msra.mxu1 %v8930_v26 }
 0x775   :  { %2913 = vmatprep.subr.bf16.mxu0 %v8936_v27  ;;  %6705 = vmatprep.subr.bf16.mxu1 %v10392_v51 }
 0x776   :  { %2943 = vmatprep.mubr.bf16.mxu0 %v10393_v52  ;;  %6719 = vmatprep.mubr.msk.bf16.mxu1 %vm7520_vm0, %v10392_v51 }
 0x778   :  { %2914 = vmatpush1.bf16.msra.mxu0 %v8946_v30  ;;  %6706 = vmatpush3.bf16.msra.mxu1 %v8952_v31 }
 0x779   :  { %2915 = vmatprep.subr.bf16.mxu0 %v8958_v32  ;;  %6707 = vmatprep.subr.bf16.mxu1 %v10392_v51 }
 0x77c   :  { %2916 = vmatpush1.bf16.msra.mxu0 %v8965_v33  ;;  %6708 = vmatpush3.bf16.msra.mxu1 %v8971_v34 }
 0x77d   :  { %2917 = vmatprep.subr.bf16.mxu0 %v8977_v35  ;;  %6709 = vmatprep.subr.bf16.mxu1 %v10392_v51 }
 0x780   :  { %2918 = vmatpush1.bf16.msra.mxu0 %v8984_v36  ;;  %6710 = vmatpush3.bf16.msra.mxu1 %v8990_v37 }
 0x781   :  { %2919 = vmatprep.subr.bf16.mxu0 %v8996_v38  ;;  %6711 = vmatprep.subr.bf16.mxu1 %v10392_v51 }
 0x784   :  { %2920 = vmatpush1.bf16.msra.mxu0 %v9003_v39  ;;  %6712 = vmatpush3.bf16.msra.mxu1 %v9009_v40 }
 0x785   :  { %2921 = vmatprep.subr.bf16.mxu0 %v9015_v45  ;;  %6713 = vmatprep.subr.bf16.mxu1 %v10392_v51 }
 0x788   :  { %2922 = vmatpush1.bf16.msra.mxu0 %v9022_v41  ;;  %6714 = vmatpush3.bf16.msra.mxu1 %v9028_v16 }
 0x789   :  { %2923 = vmatprep.subr.bf16.mxu0 %v9034_v42  ;;  %6715 = vmatprep.subr.bf16.mxu1 %v10392_v51 }
 0x78c   :  { %2924 = vmatpush1.bf16.msra.mxu0 %v9041_v56  ;;  %6716 = vmatpush3.bf16.msra.mxu1 %v9047_v57 }
 0x78d   :  { %2925 = vmatprep.subr.bf16.mxu0 %v9053_v29  ;;  %6717 = vmatprep.subr.bf16.mxu1 %v10392_v51 }
 0x790   :  { %2926 = vmatpush1.bf16.msra.mxu0 %v9060_v1  ;;  %6718 = vmatpush3.bf16.msra.mxu1 %v9066_v43 }
 0x791   :  { %2996 = vmatprep.subr.bf16.mxu0 %v9072_v48  ;;  %6723 = vmatprep.subr.bf16.mxu1 %v10392_v51 }
 0x793   :  { %2944 = vmatmul.mubr.bf16.vlgmr.msra.gmra.mrb[64].mxu0 %v8871_v49  ;;  %6720 = vmatmul.mubr.bf16.vlgmr.msra.gmra.mrb[64].mxu1 %v8871_v49 }
 0x794   :  { %2997 = vmatpush1.bf16.msra.mxu0 %v8454_v55  ;;  %6724 = vmatpush3.bf16.msra.mxu1 %v8460_v18  ;;  %v9155_v55 = vld [vmem:[%s10266_s2 + $0xc0] ss:$12 sps:$4 sm:$0xff]   ;;  %v9161_v18 = vld [vmem:[%s10266_s2 + $0xc8] ss:$12 sps:$4 sm:$0xff]  }
 0x795   :  { %2998 = vmatprep.subr.bf16.mxu0 %v8466_v61  ;;  %6725 = vmatprep.subr.bf16.mxu1 %v10392_v51  ;;  %v9167_v61 = vld [vmem:[%s10266_s2 + $0xdc] ss:$12 sps:$4 sm:$0xff]  }
 0x796   :  { %3028 = vmatprep.mubr.bf16.mxu0 %v10393_v52  ;;  %6739 = vmatprep.mubr.msk.bf16.mxu1 %vm7520_vm0, %v10392_v51 }
 0x798   :  { %2999 = vmatpush1.bf16.msra.mxu0 %v8476_v54  ;;  %6726 = vmatpush3.bf16.msra.mxu1 %v8482_v53  ;;  %v9177_v54 = vld [vmem:[%s10266_s2 + $0xd8] ss:$12 sps:$4 sm:$0xff]   ;;  %v9183_v53 = vld [vmem:[%s10266_s2 + $0xe0] ss:$12 sps:$4 sm:$0xff]  }
 0x799   :  { %3000 = vmatprep.subr.bf16.mxu0 %v8488_v59  ;;  %6727 = vmatprep.subr.bf16.mxu1 %v10392_v51  ;;  %v9189_v59 = vld [vmem:[%s10266_s2 + $0xf4] ss:$12 sps:$4 sm:$0xff]  }
 0x79c   :  { %3001 = vmatpush1.bf16.msra.mxu0 %v8495_v21  ;;  %6728 = vmatpush3.bf16.msra.mxu1 %v8501_v19  ;;  %v9196_v21 = vld [vmem:[%s10266_s2 + $0xf0] ss:$12 sps:$4 sm:$0xff]   ;;  %v9202_v19 = vld [vmem:[%s10266_s2 + $0xf8] ss:$12 sps:$4 sm:$0xff]  }
 0x79d   :  { %3002 = vmatprep.subr.bf16.mxu0 %v8507_v62  ;;  %6729 = vmatprep.subr.bf16.mxu1 %v10392_v51  ;;  %v9208_v62 = vld [vmem:[%s10266_s2 + $0x10c] ss:$12 sps:$4 sm:$0xff]  }
 0x7a0   :  { %3003 = vmatpush1.bf16.msra.mxu0 %v8514_v23  ;;  %6730 = vmatpush3.bf16.msra.mxu1 %v8520_v0  ;;  %v9215_v23 = vld [vmem:[%s10266_s2 + $0x108] ss:$12 sps:$4 sm:$0xff]   ;;  %v9221_v0 = vld [vmem:[%s10266_s2 + $0x110] ss:$12 sps:$4 sm:$0xff]  }
 0x7a1   :  { %3004 = vmatprep.subr.bf16.mxu0 %v8526_v3  ;;  %6731 = vmatprep.subr.bf16.mxu1 %v10392_v51  ;;  %v9227_v3 = vld [vmem:[%s10266_s2 + $0x124] ss:$12 sps:$4 sm:$0xff]  }
 0x7a4   :  { %3005 = vmatpush1.bf16.msra.mxu0 %v8533_v6  ;;  %6732 = vmatpush3.bf16.msra.mxu1 %v8539_v7  ;;  %v9234_v6 = vld [vmem:[%s10266_s2 + $0x120] ss:$12 sps:$4 sm:$0xff]   ;;  %v9240_v7 = vld [vmem:[%s10266_s2 + $0x128] ss:$12 sps:$4 sm:$0xff]  }
 0x7a5   :  { %3006 = vmatprep.subr.bf16.mxu0 %v8545_v8  ;;  %6733 = vmatprep.subr.bf16.mxu1 %v10392_v51  ;;  %10454 = vst [vmem:[#allocation9_spill] sm:$0xff] %v9240_v7  ;;  %v9246_v8 = vld [vmem:[%s10266_s2 + $0x13c] ss:$12 sps:$4 sm:$0xff]  }
 0x7a6   :  { %10455 = vst [vmem:[#allocation5_spill] sm:$0xff] %v9246_v8 }
 0x7a8   :  { %3007 = vmatpush1.bf16.msra.mxu0 %v8552_v4  ;;  %6734 = vmatpush3.bf16.msra.mxu1 %v8558_v9  ;;  %v9253_v4 = vld [vmem:[%s10266_s2 + $0x138] ss:$12 sps:$4 sm:$0xff]   ;;  %v9259_v9 = vld [vmem:[%s10266_s2 + $0x140] ss:$12 sps:$4 sm:$0xff]  }
 0x7a9   :  { %3008 = vmatprep.subr.bf16.mxu0 %v8564_v10  ;;  %6735 = vmatprep.subr.bf16.mxu1 %v10392_v51  ;;  %10456 = vst [vmem:[#allocation6_spill] sm:$0xff] %v9253_v4  ;;  %10457 = vst [vmem:[#allocation12_spill] sm:$0xff] %v9259_v9  ;;  %v9265_v10 = vld [vmem:[%s10266_s2 + $0x154] ss:$12 sps:$4 sm:$0xff]  }
 0x7aa   :  { %10458 = vst [vmem:[#allocation7_spill] sm:$0xff] %v9265_v10 }
 0x7ac   :  { %3009 = vmatpush1.bf16.msra.mxu0 %v8571_v11  ;;  %6736 = vmatpush3.bf16.msra.mxu1 %v8577_v13  ;;  %v9272_v11 = vld [vmem:[%s10266_s2 + $0x150] ss:$12 sps:$4 sm:$0xff]   ;;  %v9278_v13 = vld [vmem:[%s10266_s2 + $0x158] ss:$12 sps:$4 sm:$0xff]  }
 0x7ad   :  { %3010 = vmatprep.subr.bf16.mxu0 %v8583_v14  ;;  %6737 = vmatprep.subr.bf16.mxu1 %v10392_v51  ;;  %10459 = vst [vmem:[#allocation8_spill] sm:$0xff] %v9272_v11  ;;  %10460 = vst [vmem:[#allocation14_spill] sm:$0xff] %v9278_v13  ;;  %v9284_v14 = vld [vmem:[%s10266_s2 + $0x16c] ss:$12 sps:$4 sm:$0xff]  }
 0x7ae   :  { %10461 = vst [vmem:[#allocation10_spill] sm:$0xff] %v9284_v14 }
 0x7b0   :  { %3011 = vmatpush1.bf16.msra.mxu0 %v8590_v17  ;;  %6738 = vmatpush3.bf16.msra.mxu1 %v8596_v25  ;;  %v9291_v17 = vld [vmem:[%s10266_s2 + $0x168] ss:$12 sps:$4 sm:$0xff]   ;;  %v9297_v25 = vld [vmem:[%s10266_s2 + $0x170] ss:$12 sps:$4 sm:$0xff]  }
 0x7b1   :  { %3223 = vmatprep.subr.bf16.mxu0 %v8915_v12  ;;  %6743 = vmatprep.subr.bf16.mxu1 %v10392_v51  ;;  %10462 = vst [vmem:[#allocation11_spill] sm:$0xff] %v9291_v17  ;;  %10463 = vst [vmem:[#allocation15_spill] sm:$0xff] %v9297_v25 }
 0x7b3   :  { %3029 = vmatmul.mubr.bf16.vlgmr.msra.gmra.mrb[68].mxu0 %v10394_v22  ;;  %6740 = vmatmul.mubr.bf16.vlgmr.msra.gmra.mrb[68].mxu1 %v10394_v22 }
 0x7b4   :  { %3224 = vmatpush1.bf16.msra.mxu0 %v8924_v60  ;;  %6744 = vmatpush3.bf16.msra.mxu1 %v8930_v26 }
 0x7b5   :  { %3225 = vmatprep.subr.bf16.mxu0 %v8936_v27  ;;  %6745 = vmatprep.subr.bf16.mxu1 %v10392_v51 }
 0x7b6   :  { %3255 = vmatprep.mubr.bf16.mxu0 %v10393_v52  ;;  %6759 = vmatprep.mubr.msk.bf16.mxu1 %vm7520_vm0, %v10392_v51 }
 0x7b8   :  { %3226 = vmatpush1.bf16.msra.mxu0 %v8946_v30  ;;  %6746 = vmatpush3.bf16.msra.mxu1 %v8952_v31 }
 0x7b9   :  { %3227 = vmatprep.subr.bf16.mxu0 %v8958_v32  ;;  %6747 = vmatprep.subr.bf16.mxu1 %v10392_v51 }
 0x7bc   :  { %3228 = vmatpush1.bf16.msra.mxu0 %v8965_v33  ;;  %6748 = vmatpush3.bf16.msra.mxu1 %v8971_v34 }
 0x7bd   :  { %3229 = vmatprep.subr.bf16.mxu0 %v8977_v35  ;;  %6749 = vmatprep.subr.bf16.mxu1 %v10392_v51 }
 0x7c0   :  { %3230 = vmatpush1.bf16.msra.mxu0 %v8984_v36  ;;  %6750 = vmatpush3.bf16.msra.mxu1 %v8990_v37 }
 0x7c1   :  { %3231 = vmatprep.subr.bf16.mxu0 %v8996_v38  ;;  %6751 = vmatprep.subr.bf16.mxu1 %v10392_v51 }
 0x7c4   :  { %3232 = vmatpush1.bf16.msra.mxu0 %v9003_v39  ;;  %6752 = vmatpush3.bf16.msra.mxu1 %v9009_v40 }
 0x7c5   :  { %3233 = vmatprep.subr.bf16.mxu0 %v9015_v45  ;;  %6753 = vmatprep.subr.bf16.mxu1 %v10392_v51 }
 0x7c8   :  { %3234 = vmatpush1.bf16.msra.mxu0 %v9022_v41  ;;  %6754 = vmatpush3.bf16.msra.mxu1 %v9028_v16 }
 0x7c9   :  { %3235 = vmatprep.subr.bf16.mxu0 %v9034_v42  ;;  %6755 = vmatprep.subr.bf16.mxu1 %v10392_v51 }
 0x7cc   :  { %3236 = vmatpush1.bf16.msra.mxu0 %v9041_v56  ;;  %6756 = vmatpush3.bf16.msra.mxu1 %v9047_v57 }
 0x7cd   :  { %3237 = vmatprep.subr.bf16.mxu0 %v9053_v29  ;;  %6757 = vmatprep.subr.bf16.mxu1 %v10392_v51 }
 0x7d0   :  { %3238 = vmatpush1.bf16.msra.mxu0 %v9060_v1  ;;  %6758 = vmatpush3.bf16.msra.mxu1 %v9066_v43 }
 0x7d1   :  { %3308 = vmatprep.subr.bf16.mxu0 %v9072_v48  ;;  %6763 = vmatprep.subr.bf16.mxu1 %v10392_v51 }
 0x7d3   :  { %3256 = vmatmul.mubr.bf16.vlgmr.msra.gmra.mrb[72].mxu0 %v8871_v49  ;;  %6760 = vmatmul.mubr.bf16.vlgmr.msra.gmra.mrb[72].mxu1 %v8871_v49 }
 0x7d4   :  { %3309 = vmatpush1.bf16.msra.mxu0 %v9155_v55  ;;  %6764 = vmatpush3.bf16.msra.mxu1 %v9161_v18 }
 0x7d5   :  { %3310 = vmatprep.subr.bf16.mxu0 %v9167_v61  ;;  %6765 = vmatprep.subr.bf16.mxu1 %v10392_v51 }
 0x7d6   :  { %3340 = vmatprep.mubr.bf16.mxu0 %v10393_v52  ;;  %6779 = vmatprep.mubr.msk.bf16.mxu1 %vm7520_vm0, %v10392_v51 }
 0x7d8   :  { %3311 = vmatpush1.bf16.msra.mxu0 %v9177_v54  ;;  %6766 = vmatpush3.bf16.msra.mxu1 %v9183_v53 }
 0x7d9   :  { %3312 = vmatprep.subr.bf16.mxu0 %v9189_v59  ;;  %6767 = vmatprep.subr.bf16.mxu1 %v10392_v51 }
 0x7dc   :  { %3313 = vmatpush1.bf16.msra.mxu0 %v9196_v21  ;;  %6768 = vmatpush3.bf16.msra.mxu1 %v9202_v19 }
 0x7dd   :  { %3314 = vmatprep.subr.bf16.mxu0 %v9208_v62  ;;  %6769 = vmatprep.subr.bf16.mxu1 %v10392_v51 }
 0x7e0   :  { %3315 = vmatpush1.bf16.msra.mxu0 %v9215_v23  ;;  %6770 = vmatpush3.bf16.msra.mxu1 %v9221_v0 }
 0x7e1   :  { %3316 = vmatprep.subr.bf16.mxu0 %v9227_v3  ;;  %6771 = vmatprep.subr.bf16.mxu1 %v10392_v51 }
 0x7e4   :  { %3317 = vmatpush1.bf16.msra.mxu0 %v9234_v6  ;;  %6772 = vmatpush3.bf16.msra.mxu1 %v9240_v7 }
 0x7e5   :  { %3318 = vmatprep.subr.bf16.mxu0 %v9246_v8  ;;  %6773 = vmatprep.subr.bf16.mxu1 %v10392_v51 }
 0x7e8   :  { %3319 = vmatpush1.bf16.msra.mxu0 %v9253_v4  ;;  %6774 = vmatpush3.bf16.msra.mxu1 %v9259_v9 }
 0x7e9   :  { %3320 = vmatprep.subr.bf16.mxu0 %v9265_v10  ;;  %6775 = vmatprep.subr.bf16.mxu1 %v10392_v51 }
 0x7ec   :  { %3321 = vmatpush1.bf16.msra.mxu0 %v9272_v11  ;;  %6776 = vmatpush3.bf16.msra.mxu1 %v9278_v13 }
 0x7ed   :  { %3322 = vmatprep.subr.bf16.mxu0 %v9284_v14  ;;  %6777 = vmatprep.subr.bf16.mxu1 %v10392_v51 }
 0x7f0   :  { %3323 = vmatpush1.bf16.msra.mxu0 %v9291_v17  ;;  %6778 = vmatpush3.bf16.msra.mxu1 %v9297_v25 }
 0x7f1   :  { %3535 = vmatprep.subr.bf16.mxu0 %v8915_v12  ;;  %6783 = vmatprep.subr.bf16.mxu1 %v10392_v51 }
 0x7f3   :  { %3341 = vmatmul.mubr.bf16.vlgmr.msra.gmra.mrb[76].mxu0 %v10394_v22  ;;  %6780 = vmatmul.mubr.bf16.vlgmr.msra.gmra.mrb[76].mxu1 %v10394_v22 }
 0x7f4   :  { %3536 = vmatpush1.bf16.msra.mxu0 %v8924_v60  ;;  %6784 = vmatpush3.bf16.msra.mxu1 %v8930_v26 }
 0x7f5   :  { %3537 = vmatprep.subr.bf16.mxu0 %v8936_v27  ;;  %6785 = vmatprep.subr.bf16.mxu1 %v10392_v51 }
 0x7f6   :  { %3567 = vmatprep.mubr.bf16.mxu0 %v10393_v52  ;;  %6799 = vmatprep.mubr.msk.bf16.mxu1 %vm7520_vm0, %v10392_v51 }
 0x7f8   :  { %3538 = vmatpush1.bf16.msra.mxu0 %v8946_v30  ;;  %6786 = vmatpush3.bf16.msra.mxu1 %v8952_v31 }
 0x7f9   :  { %3539 = vmatprep.subr.bf16.mxu0 %v8958_v32  ;;  %6787 = vmatprep.subr.bf16.mxu1 %v10392_v51 }
 0x7fc   :  { %3540 = vmatpush1.bf16.msra.mxu0 %v8965_v33  ;;  %6788 = vmatpush3.bf16.msra.mxu1 %v8971_v34 }
 0x7fd   :  { %3541 = vmatprep.subr.bf16.mxu0 %v8977_v35  ;;  %6789 = vmatprep.subr.bf16.mxu1 %v10392_v51 }
 0x800   :  { %3542 = vmatpush1.bf16.msra.mxu0 %v8984_v36  ;;  %6790 = vmatpush3.bf16.msra.mxu1 %v8990_v37 }
 0x801   :  { %3543 = vmatprep.subr.bf16.mxu0 %v8996_v38  ;;  %6791 = vmatprep.subr.bf16.mxu1 %v10392_v51 }
 0x804   :  { %3544 = vmatpush1.bf16.msra.mxu0 %v9003_v39  ;;  %6792 = vmatpush3.bf16.msra.mxu1 %v9009_v40 }
 0x805   :  { %3545 = vmatprep.subr.bf16.mxu0 %v9015_v45  ;;  %6793 = vmatprep.subr.bf16.mxu1 %v10392_v51 }
 0x808   :  { %3546 = vmatpush1.bf16.msra.mxu0 %v9022_v41  ;;  %6794 = vmatpush3.bf16.msra.mxu1 %v9028_v16 }
 0x809   :  { %3547 = vmatprep.subr.bf16.mxu0 %v9034_v42  ;;  %6795 = vmatprep.subr.bf16.mxu1 %v10392_v51 }
 0x80c   :  { %3548 = vmatpush1.bf16.msra.mxu0 %v9041_v56  ;;  %6796 = vmatpush3.bf16.msra.mxu1 %v9047_v57 }
 0x80d   :  { %3549 = vmatprep.subr.bf16.mxu0 %v9053_v29  ;;  %6797 = vmatprep.subr.bf16.mxu1 %v10392_v51 }
 0x810   :  { %3550 = vmatpush1.bf16.msra.mxu0 %v9060_v1  ;;  %6798 = vmatpush3.bf16.msra.mxu1 %v9066_v43 }
 0x811   :  { %3620 = vmatprep.subr.bf16.mxu0 %v9072_v48  ;;  %6803 = vmatprep.subr.bf16.mxu1 %v10392_v51 }
 0x813   :  { %3568 = vmatmul.mubr.bf16.vlgmr.msra.gmra.mrb[80].mxu0 %v8871_v49  ;;  %6800 = vmatmul.mubr.bf16.vlgmr.msra.gmra.mrb[80].mxu1 %v8871_v49 }
 0x814   :  { %3621 = vmatpush1.bf16.msra.mxu0 %v9155_v55  ;;  %6804 = vmatpush3.bf16.msra.mxu1 %v9161_v18 }
 0x815   :  { %3622 = vmatprep.subr.bf16.mxu0 %v9167_v61  ;;  %6805 = vmatprep.subr.bf16.mxu1 %v10392_v51 }
 0x816   :  { %3652 = vmatprep.mubr.bf16.mxu0 %v10393_v52  ;;  %6819 = vmatprep.mubr.msk.bf16.mxu1 %vm7520_vm0, %v10392_v51 }
 0x818   :  { %3623 = vmatpush1.bf16.msra.mxu0 %v9177_v54  ;;  %6806 = vmatpush3.bf16.msra.mxu1 %v9183_v53 }
 0x819   :  { %3624 = vmatprep.subr.bf16.mxu0 %v9189_v59  ;;  %6807 = vmatprep.subr.bf16.mxu1 %v10392_v51 }
 0x81c   :  { %3625 = vmatpush1.bf16.msra.mxu0 %v9196_v21  ;;  %6808 = vmatpush3.bf16.msra.mxu1 %v9202_v19 }
 0x81d   :  { %3626 = vmatprep.subr.bf16.mxu0 %v9208_v62  ;;  %6809 = vmatprep.subr.bf16.mxu1 %v10392_v51 }
 0x820   :  { %3627 = vmatpush1.bf16.msra.mxu0 %v9215_v23  ;;  %6810 = vmatpush3.bf16.msra.mxu1 %v9221_v0 }
 0x821   :  { %3628 = vmatprep.subr.bf16.mxu0 %v9227_v3  ;;  %6811 = vmatprep.subr.bf16.mxu1 %v10392_v51 }
 0x824   :  { %3629 = vmatpush1.bf16.msra.mxu0 %v9234_v6  ;;  %6812 = vmatpush3.bf16.msra.mxu1 %v9240_v7 }
 0x825   :  { %3630 = vmatprep.subr.bf16.mxu0 %v9246_v8  ;;  %6813 = vmatprep.subr.bf16.mxu1 %v10392_v51 }
 0x826   :  { %v2633_v22 = vpop.f32.mrb[56].mxu0  ;;  %v2676_v28 = vpop.f32.mrb[56].mxu1 }
 0x827   :  { %v2635_v63 = vpop.f32.mrb[57].mxu0  ;;  %v6681_v24 = vpop.f32.mrb[57].mxu1 }
 0x828   :  { %v2637_v47 = vpop.f32.mrb[58].mxu0  ;;  %v2679_v44 = vpop.f32.mrb[58].mxu1  ;;  %3631 = vmatpush1.bf16.msra.mxu0 %v9253_v4  ;;  %6814 = vmatpush3.bf16.msra.mxu1 %v9259_v9 }
 0x829   :  { %v2639_v2 = vpop.f32.mrb[59].mxu0  ;;  %v6682_v5 = vpop.f32.mrb[59].mxu1  ;;  %3632 = vmatprep.subr.bf16.mxu0 %v9265_v10  ;;  %6815 = vmatprep.subr.bf16.mxu1 %v10392_v51 }
 0x82c   :  { %3633 = vmatpush1.bf16.msra.mxu0 %v9272_v11  ;;  %6816 = vmatpush3.bf16.msra.mxu1 %v9278_v13  ;;  %v10464_v13 = vld [vmem:[#allocation16_spill] sm:$0xff] }
 0x82d   :  { %3634 = vmatprep.subr.bf16.mxu0 %v9284_v14  ;;  %6817 = vmatprep.subr.bf16.mxu1 %v10392_v51  ;;  %5565 = vst [vmem:[%s10270_s5 + $0x78] sm:$0xf] %v10464_v13  ;;  %5593 = vst [vmem:[%s10270_s5 + $0x70] sm:$0xf] %v10464_v13 }
 0x82e   :  { %5621 = vst [vmem:[%s10270_s5 + $0x68] sm:$0xf] %v10464_v13  ;;  %5649 = vst [vmem:[%s10270_s5 + $0x60] sm:$0xf] %v10464_v13 }
 0x82f   :  { %5677 = vst [vmem:[%s10270_s5 + $0x58] sm:$0xf] %v10464_v13  ;;  %5705 = vst [vmem:[%s10270_s5 + $0x50] sm:$0xf] %v10464_v13 }
 0x830   :  { %3635 = vmatpush1.bf16.msra.mxu0 %v9291_v17  ;;  %6818 = vmatpush3.bf16.msra.mxu1 %v9297_v25  ;;  %5733 = vst [vmem:[%s10270_s5 + $0x48] sm:$0xf] %v10464_v13  ;;  %5761 = vst [vmem:[%s10270_s5 + $0x40] sm:$0xf] %v10464_v13 }
 0x831   :  { %3847 = vmatprep.subr.bf16.mxu0 %v8915_v12  ;;  %6823 = vmatprep.subr.bf16.mxu1 %v10392_v51  ;;  %5789 = vst [vmem:[%s10270_s5 + $0x38] sm:$0xf] %v10464_v13 }
 0x846   :  { %v2718_v46 = vpop.f32.mrb[60].mxu0  ;;  %v2761_v15 = vpop.f32.mrb[60].mxu1 }
 0x847   :  { %v2720_v50 = vpop.f32.mrb[61].mxu0  ;;  %v6701_v20 = vpop.f32.mrb[61].mxu1  ;;  %v10465_v46 = vld [vmem:[#allocation17_spill] sm:$0xff] }
 0x848   :  { %v2722_v58 = vpop.f32.mrb[62].mxu0  ;;  %v2764_v22 = vpop.f32.mrb[62].mxu1  ;;  %5566 = vst [vmem:[%s10270_s5 + $0x7c] sm:$0xf] %v10465_v46  ;;  %5594 = vst [vmem:[%s10270_s5 + $0x74] sm:$0xf] %v10465_v46 }
 0x849   :  { %v2724_v28 = vpop.f32.mrb[63].mxu0  ;;  %v6702_v63 = vpop.f32.mrb[63].mxu1  ;;  %5622 = vst [vmem:[%s10270_s5 + $0x6c] sm:$0xf] %v10465_v46  ;;  %5650 = vst [vmem:[%s10270_s5 + $0x64] sm:$0xf] %v10465_v46 }
 0x84a   :  { %5678 = vst [vmem:[%s10270_s5 + $0x5c] sm:$0xf] %v10465_v46  ;;  %5706 = vst [vmem:[%s10270_s5 + $0x54] sm:$0xf] %v10465_v46 }
 0x84b   :  { %5734 = vst [vmem:[%s10270_s5 + $0x4c] sm:$0xf] %v10465_v46  ;;  %5762 = vst [vmem:[%s10270_s5 + $0x44] sm:$0xf] %v10465_v46 }
 0x84c   :  { %5790 = vst [vmem:[%s10270_s5 + $0x3c] sm:$0xf] %v10465_v46  ;;  %v5801_v46 = vld [vmem:[%s10271_s1 + $0x420] sm:$0xff] }
 0x866   :  { %v2945_v24 = vpop.f32.mrb[64].mxu0  ;;  %v2988_v47 = vpop.f32.mrb[64].mxu1 }
 0x867   :  { %v2947_v44 = vpop.f32.mrb[65].mxu0  ;;  %v6721_v2 = vpop.f32.mrb[65].mxu1 }
 0x868   :  { %v2949_v5 = vpop.f32.mrb[66].mxu0  ;;  %v2991_v17 = vpop.f32.mrb[66].mxu1 }
 0x869   :  { %v2951_v14 = vpop.f32.mrb[67].mxu0  ;;  %v6722_v25 = vpop.f32.mrb[67].mxu1 }
 0x886   :  { %v3030_v14 = vpop.f32.mrb[68].mxu0  ;;  %v3073_v17 = vpop.f32.mrb[68].mxu1 }
 0x887   :  { %v3032_v25 = vpop.f32.mrb[69].mxu0  ;;  %v6741_v15 = vpop.f32.mrb[69].mxu1  ;;  %v5804_v17 = vld [vmem:[%s10271_s1 + $0x438] sm:$0xff] }
 0x888   :  { %v3034_v50 = vpop.f32.mrb[70].mxu0  ;;  %v3076_v20 = vpop.f32.mrb[70].mxu1 }
 0x889   :  { %v3036_v58 = vpop.f32.mrb[71].mxu0  ;;  %v6742_v22 = vpop.f32.mrb[71].mxu1  ;;  %v5802_v20 = vld [vmem:[%s10271_s1 + $0x428] sm:$0xff] }
 0x8a6   :  { %v3257_v28 = vpop.f32.mrb[72].mxu0  ;;  %v3300_v63 = vpop.f32.mrb[72].mxu1 }
 0x8a7   :  { %v3259_v24 = vpop.f32.mrb[73].mxu0  ;;  %v6761_v47 = vpop.f32.mrb[73].mxu1 }
 0x8a8   :  { %v3261_v44 = vpop.f32.mrb[74].mxu0  ;;  %v3303_v2 = vpop.f32.mrb[74].mxu1 }
 0x8a9   :  { %v3263_v13 = vpop.f32.mrb[75].mxu0  ;;  %v6762_v5 = vpop.f32.mrb[75].mxu1  ;;  %v5805_v44 = vld [vmem:[%s10271_s1 + $0x440] sm:$0xff] }
 0x8c6   :  { %v3342_v14 = vpop.f32.mrb[76].mxu0  ;;  %v3385_v25 = vpop.f32.mrb[76].mxu1 }
 0x8c7   :  { %v3450_v15 = vadd.f32 %v5801_v46, %v3342_v14  ;;  %v3344_v50 = vpop.f32.mrb[77].mxu0  ;;  %v6781_v58 = vpop.f32.mrb[77].mxu1 }
 0x8c8   :  { %v3346_v22 = vpop.f32.mrb[78].mxu0  ;;  %v3388_v28 = vpop.f32.mrb[78].mxu1  ;;  %v3464_v13 = vadd.f32 %v5802_v20, %v3344_v50 }
 0x8c9   :  { %v5807_v63 = vmul.f32 -1.442695, %v3450_v15  ;;  %v3451_v24 = vadd.f32 %v5804_v17, %v3346_v22  ;;  %v3348_v47 = vpop.f32.mrb[79].mxu0  ;;  %v6782_v2 = vpop.f32.mrb[79].mxu1  ;;  %v9463_v22 = vld [vmem:[%s10269_s3 + $0x1] ss:$0 sm:$0xff] }
 0x8ca   :  { %v3465_v46 = vadd.f32 %v5805_v44, %v3348_v47  ;;  %v5809_v14 = vmul.f32 -1.442695, %v3464_v13  ;;  %10466 = vst [vmem:[#allocation13_spill] sm:$0xff] %v9463_v22  ;;  %v5806_v2 = vld [vmem:[%s10271_s1 + $0x448] sm:$0xff] }
 0x8cb   :  { %7231 = vpow2.f32 %v5807_v63  ;;  %v5808_v5 = vmul.f32 -1.442695, %v3451_v24  ;;  %v3478_v63 = vadd.f32 %v9463_v22, %v3385_v25 }
 0x8cc   :  { %v5810_v12 = vmul.f32 -1.442695, %v3465_v46 }
 0x8cd   :  { %7233 = vpow2.f32 %v5808_v5 }
 0x8ce   :  { %7235 = vpow2.f32 %v5809_v14 }
 0x8cf   :  { %7237 = vpow2.f32 %v5810_v12  ;;  %v5803_v12 = vld [vmem:[%s10271_s1 + $0x430] sm:$0xff] }
 0x8d5   :  { %v7232_v58 = vpop.eup %7231 }
 0x8d6   :  { %v3458_v11 = vadd.f32 1.0, %v7232_v58 }
 0x8d7   :  { %v7234_v10 = vpop.eup %7233 }
 0x8d8   :  { %7239 = vrcp.f32 %v3458_v11  ;;  %v3459_v17 = vadd.f32 1.0, %v7234_v10  ;;  %v7236_v15 = vpop.eup %7235  ;;  %v3479_v10 = vadd.f32 %v9463_v22, %v3388_v28 }
 0x8d9   :  { %v7238_v50 = vpop.eup %7237  ;;  %v3472_v20 = vadd.f32 1.0, %v7236_v15 }
 0x8da   :  { %7241 = vrcp.f32 %v3459_v17  ;;  %v3473_v24 = vadd.f32 1.0, %v7238_v50 }
 0x8db   :  { %7243 = vrcp.f32 %v3472_v20 }
 0x8dc   :  { %7245 = vrcp.f32 %v3473_v24 }
 0x8e2   :  { %v7240_v47 = vpop.eup %7239 }
 0x8e3   :  { %v3480_v11 = vmul.f32 %v7240_v47, %v3478_v63 }
 0x8e4   :  { %v7242_v44 = vpop.eup %7241 }
 0x8e5   :  { %v3482_v13 = vadd.f32 %v5803_v12, %v3480_v11  ;;  %v3481_v5 = vmul.f32 %v7242_v44, %v3479_v10  ;;  %v7244_v28 = vpop.eup %7243 }
 0x8e6   :  { %v3569_v46 = vpop.f32.mrb[80].mxu0  ;;  %v3612_v25 = vpop.f32.mrb[80].mxu1  ;;  %v3486_v22 = vsub.f32 1.0, %v7244_v28  ;;  %v3490_v24 = vmul.f32 0.0, %v7244_v28 }
 0x8e7   :  { %7247 = vtanh.f32 %v3482_v13  ;;  %v3483_v14 = vadd.f32 %v5806_v2, %v3481_v5  ;;  %v3571_v58 = vpop.f32.mrb[81].mxu0  ;;  %v6801_v17 = vpop.f32.mrb[81].mxu1  ;;  %v10472_v5 = vld [vmem:[#allocation14_spill] sm:$0xff]  ;;  %v10474_v25 = vld [vmem:[#allocation11_spill] sm:$0xff] }
 0x8e8   :  { %v3573_v15 = vpop.f32.mrb[82].mxu0  ;;  %v3615_v50 = vpop.f32.mrb[82].mxu1  ;;  %v10473_v46 = vld [vmem:[#allocation10_spill] sm:$0xff]  ;;  %v10476_v58 = vld [vmem:[#allocation4_spill] sm:$0xff] }
 0x8e9   :  { %7249 = vtanh.f32 %v3483_v14  ;;  %v3575_v20 = vpop.f32.mrb[83].mxu0  ;;  %v6802_v63 = vpop.f32.mrb[83].mxu1  ;;  %v10475_v14 = vld [vmem:[#allocation15_spill] sm:$0xff]  ;;  %v5829_v17 = vld [vmem:[%s10271_s1 + $0x3f0] sm:$0xff] }
 0x8ea   :  { %v7246_v47 = vpop.eup %7245  ;;  %v5832_v20 = vld [vmem:[%s10271_s1 + $0x408] sm:$0xff] }
 0x8eb   :  { %v3487_v4 = vsub.f32 1.0, %v7246_v47  ;;  %v3491_v10 = vmul.f32 0.0, %v7246_v47  ;;  %v5830_v47 = vld [vmem:[%s10271_s1 + $0x3f8] sm:$0xff] }
 0x8f1   :  { %v7248_v9 = vpop.eup %7247 }
 0x8f2   :  { %v3488_v8 = vmul.f32 %v7248_v9, %v3486_v22  ;;  %v10470_v9 = vld [vmem:[#allocation7_spill] sm:$0xff]  ;;  %v10471_v22 = vld [vmem:[#allocation8_spill] sm:$0xff] }
 0x8f3   :  { %v7250_v12 = vpop.eup %7249 }
 0x8f4   :  { %v3489_v11 = vmul.f32 %v7250_v12, %v3487_v4  ;;  %v9473_v44 = vadd.f32 %v3490_v24, %v3488_v8  ;;  %v10468_v8 = vld [vmem:[#allocation6_spill] sm:$0xff]  ;;  %v10469_v4 = vld [vmem:[#allocation12_spill] sm:$0xff] }
 0x8f6   :  { %v9475_v2 = vadd.f32 %v3491_v10, %v3489_v11 }
 0x8f8   :  { %v6051_v13 = vpack.c.bf16 %v9475_v2, %v9473_v44 }
 0x8fa   :  { %6089 = vst [vmem:[%s10270_s5 + $0x30] sm:$0xff] %v6051_v13   ;;  %3653 = vmatmul.mubr.bf16.vlgmr.msra.gmra.mrb[84].mxu0 %v6051_v13  ;;  %6820 = vmatmul.mubr.bf16.vlgmr.msra.gmra.mrb[84].mxu1 %v6051_v13 }
 0x8fb   :  { %3848 = vmatpush1.bf16.msra.mxu0 %v8924_v60  ;;  %6824 = vmatpush3.bf16.msra.mxu1 %v8930_v26 }
 0x8fc   :  { %3849 = vmatprep.subr.bf16.mxu0 %v8936_v27  ;;  %6825 = vmatprep.subr.bf16.mxu1 %v10392_v51 }
 0x8fd   :  { %3879 = vmatprep.mubr.bf16.mxu0 %v10393_v52  ;;  %6839 = vmatprep.mubr.msk.bf16.mxu1 %vm7520_vm0, %v10392_v51 }
 0x8ff   :  { %3850 = vmatpush1.bf16.msra.mxu0 %v8946_v30  ;;  %6826 = vmatpush3.bf16.msra.mxu1 %v8952_v31 }
 0x900   :  { %3851 = vmatprep.subr.bf16.mxu0 %v8958_v32  ;;  %6827 = vmatprep.subr.bf16.mxu1 %v10392_v51 }
 0x903   :  { %3852 = vmatpush1.bf16.msra.mxu0 %v8965_v33  ;;  %6828 = vmatpush3.bf16.msra.mxu1 %v8971_v34 }
 0x904   :  { %3853 = vmatprep.subr.bf16.mxu0 %v8977_v35  ;;  %6829 = vmatprep.subr.bf16.mxu1 %v10392_v51 }
 0x907   :  { %3854 = vmatpush1.bf16.msra.mxu0 %v8984_v36  ;;  %6830 = vmatpush3.bf16.msra.mxu1 %v8990_v37 }
 0x908   :  { %3855 = vmatprep.subr.bf16.mxu0 %v8996_v38  ;;  %6831 = vmatprep.subr.bf16.mxu1 %v10392_v51 }
 0x90b   :  { %3856 = vmatpush1.bf16.msra.mxu0 %v9003_v39  ;;  %6832 = vmatpush3.bf16.msra.mxu1 %v9009_v40 }
 0x90c   :  { %3857 = vmatprep.subr.bf16.mxu0 %v9015_v45  ;;  %6833 = vmatprep.subr.bf16.mxu1 %v10392_v51 }
 0x90f   :  { %3858 = vmatpush1.bf16.msra.mxu0 %v9022_v41  ;;  %6834 = vmatpush3.bf16.msra.mxu1 %v9028_v16 }
 0x910   :  { %3859 = vmatprep.subr.bf16.mxu0 %v9034_v42  ;;  %6835 = vmatprep.subr.bf16.mxu1 %v10392_v51 }
 0x913   :  { %3860 = vmatpush1.bf16.msra.mxu0 %v9041_v56  ;;  %6836 = vmatpush3.bf16.msra.mxu1 %v9047_v57 }
 0x914   :  { %3861 = vmatprep.subr.bf16.mxu0 %v9053_v29  ;;  %6837 = vmatprep.subr.bf16.mxu1 %v10392_v51 }
 0x917   :  { %3862 = vmatpush1.bf16.msra.mxu0 %v9060_v1  ;;  %6838 = vmatpush3.bf16.msra.mxu1 %v9066_v43 }
 0x918   :  { %3932 = vmatprep.subr.bf16.mxu0 %v9072_v48  ;;  %6843 = vmatprep.subr.bf16.mxu1 %v10392_v51 }
 0x91a   :  { %3880 = vmatmul.mubr.bf16.vlgmr.msra.gmra.mrb[88].mxu0 %v8871_v49  ;;  %6840 = vmatmul.mubr.bf16.vlgmr.msra.gmra.mrb[88].mxu1 %v8871_v49  ;;  %v10467_v49 = vld [vmem:[#allocation5_spill] sm:$0xff] }
 0x91b   :  { %3933 = vmatpush1.bf16.msra.mxu0 %v9155_v55  ;;  %6844 = vmatpush3.bf16.msra.mxu1 %v9161_v18 }
 0x91c   :  { %3934 = vmatprep.subr.bf16.mxu0 %v9167_v61  ;;  %6845 = vmatprep.subr.bf16.mxu1 %v10392_v51 }
 0x91d   :  { %3964 = vmatprep.mubr.bf16.mxu0 %v10393_v52  ;;  %6859 = vmatprep.mubr.msk.bf16.mxu1 %vm7520_vm0, %v10392_v51 }
 0x91f   :  { %3935 = vmatpush1.bf16.msra.mxu0 %v9177_v54  ;;  %6846 = vmatpush3.bf16.msra.mxu1 %v9183_v53 }
 0x920   :  { %3936 = vmatprep.subr.bf16.mxu0 %v9189_v59  ;;  %6847 = vmatprep.subr.bf16.mxu1 %v10392_v51 }
 0x923   :  { %3937 = vmatpush1.bf16.msra.mxu0 %v9196_v21  ;;  %6848 = vmatpush3.bf16.msra.mxu1 %v9202_v19 }
 0x924   :  { %3938 = vmatprep.subr.bf16.mxu0 %v9208_v62  ;;  %6849 = vmatprep.subr.bf16.mxu1 %v10392_v51 }
 0x927   :  { %3939 = vmatpush1.bf16.msra.mxu0 %v9215_v23  ;;  %6850 = vmatpush3.bf16.msra.mxu1 %v9221_v0 }
 0x928   :  { %3940 = vmatprep.subr.bf16.mxu0 %v9227_v3  ;;  %6851 = vmatprep.subr.bf16.mxu1 %v10392_v51 }
 0x92b   :  { %3941 = vmatpush1.bf16.msra.mxu0 %v9234_v6  ;;  %6852 = vmatpush3.bf16.msra.mxu1 %v9240_v7 }
 0x92c   :  { %3942 = vmatprep.subr.bf16.mxu0 %v10467_v49  ;;  %6853 = vmatprep.subr.bf16.mxu1 %v10392_v51  ;;  %v10477_v49 = vld [vmem:[#allocation13_spill] sm:$0xff] }
 0x92f   :  { %3943 = vmatpush1.bf16.msra.mxu0 %v10468_v8  ;;  %6854 = vmatpush3.bf16.msra.mxu1 %v10469_v4 }
 0x930   :  { %3944 = vmatprep.subr.bf16.mxu0 %v10470_v9  ;;  %6855 = vmatprep.subr.bf16.mxu1 %v10392_v51 }
 0x933   :  { %3945 = vmatpush1.bf16.msra.mxu0 %v10471_v22  ;;  %6856 = vmatpush3.bf16.msra.mxu1 %v10472_v5 }
 0x934   :  { %3946 = vmatprep.subr.bf16.mxu0 %v10473_v46  ;;  %6857 = vmatprep.subr.bf16.mxu1 %v10392_v51 }
 0x937   :  { %3947 = vmatpush1.bf16.msra.mxu0 %v10474_v25  ;;  %6858 = vmatpush3.bf16.msra.mxu1 %v10475_v14  ;;  %v5833_v14 = vld [vmem:[%s10271_s1 + $0x410] sm:$0xff] }
 0x938   :  { %4159 = vmatprep.subr.bf16.mxu0 %v10476_v58  ;;  %6863 = vmatprep.subr.bf16.mxu1 %v10392_v51 }
 0x9cd   :  { %v3654_v15 = vpop.f32.mrb[84].mxu0  ;;  %v3697_v50 = vpop.f32.mrb[84].mxu1 }
 0x9ce   :  { %v3762_v63 = vadd.f32 %v5829_v17, %v3654_v15  ;;  %v3656_v28 = vpop.f32.mrb[85].mxu0  ;;  %v6821_v24 = vpop.f32.mrb[85].mxu1 }
 0x9cf   :  { %v3658_v12 = vpop.f32.mrb[86].mxu0  ;;  %v3700_v11 = vpop.f32.mrb[86].mxu1  ;;  %v3776_v46 = vadd.f32 %v5830_v47, %v3656_v28 }
 0x9d0   :  { %v5835_v10 = vmul.f32 -1.442695, %v3762_v63  ;;  %v3763_v13 = vadd.f32 %v5832_v20, %v3658_v12  ;;  %v3660_v58 = vpop.f32.mrb[87].mxu0  ;;  %v6822_v25 = vpop.f32.mrb[87].mxu1 }
 0x9d1   :  { %v3777_v17 = vadd.f32 %v5833_v14, %v3660_v58  ;;  %v5837_v15 = vmul.f32 -1.442695, %v3776_v46  ;;  %v3790_v25 = vadd.f32 %v10477_v49, %v3697_v50 }
 0x9d2   :  { %7251 = vpow2.f32 %v5835_v10  ;;  %v5836_v5 = vmul.f32 -1.442695, %v3763_v13 }
 0x9d3   :  { %v5838_v22 = vmul.f32 -1.442695, %v3777_v17 }
 0x9d4   :  { %7253 = vpow2.f32 %v5836_v5  ;;  %v5831_v5 = vld [vmem:[%s10271_s1 + $0x400] sm:$0xff] }
 0x9d5   :  { %7255 = vpow2.f32 %v5837_v15 }
 0x9d6   :  { %7257 = vpow2.f32 %v5838_v22  ;;  %v3791_v22 = vadd.f32 %v10477_v49, %v3700_v11 }
 0x9dc   :  { %v7252_v24 = vpop.eup %7251 }
 0x9dd   :  { %v3770_v9 = vadd.f32 1.0, %v7252_v24 }
 0x9de   :  { %v7254_v4 = vpop.eup %7253 }
 0x9df   :  { %7259 = vrcp.f32 %v3770_v9  ;;  %v3771_v20 = vadd.f32 1.0, %v7254_v4  ;;  %v7256_v63 = vpop.eup %7255  ;;  %v5834_v4 = vld [vmem:[%s10271_s1 + $0x418] sm:$0xff] }
 0x9e0   :  { %v7258_v12 = vpop.eup %7257  ;;  %v3784_v8 = vadd.f32 1.0, %v7256_v63 }
 0x9e1   :  { %7261 = vrcp.f32 %v3771_v20  ;;  %v3785_v28 = vadd.f32 1.0, %v7258_v12 }
 0x9e2   :  { %7263 = vrcp.f32 %v3784_v8 }
 0x9e3   :  { %7265 = vrcp.f32 %v3785_v28 }
 0x9e9   :  { %v7260_v47 = vpop.eup %7259 }
 0x9ea   :  { %v3792_v46 = vmul.f32 %v7260_v47, %v3790_v25 }
 0x9eb   :  { %v7262_v14 = vpop.eup %7261 }
 0x9ec   :  { %v3794_v9 = vadd.f32 %v5831_v5, %v3792_v46  ;;  %v3793_v10 = vmul.f32 %v7262_v14, %v3791_v22  ;;  %v7264_v11 = vpop.eup %7263 }
 0x9ed   :  { %v3881_v13 = vpop.f32.mrb[88].mxu0  ;;  %v3924_v50 = vpop.f32.mrb[88].mxu1  ;;  %v3798_v25 = vsub.f32 1.0, %v7264_v11  ;;  %v3802_v5 = vmul.f32 %v7264_v11, %v9473_v44 }
 0x9ee   :  { %7267 = vtanh.f32 %v3794_v9  ;;  %v3795_v58 = vadd.f32 %v5834_v4, %v3793_v10  ;;  %v3883_v17 = vpop.f32.mrb[89].mxu0  ;;  %v6841_v15 = vpop.f32.mrb[89].mxu1  ;;  %v5859_v50 = vld [vmem:[%s10271_s1 + $0x3d0] sm:$0xff] }
 0x9ef   :  { %v3885_v24 = vpop.f32.mrb[90].mxu0  ;;  %v3927_v20 = vpop.f32.mrb[90].mxu1 }
 0x9f0   :  { %7269 = vtanh.f32 %v3795_v58  ;;  %v3887_v8 = vpop.f32.mrb[91].mxu0  ;;  %v6842_v63 = vpop.f32.mrb[91].mxu1  ;;  %v5862_v24 = vld [vmem:[%s10271_s1 + $0x3e8] sm:$0xff] }
 0x9f1   :  { %v7266_v12 = vpop.eup %7265 }
 0x9f2   :  { %v3799_v49 = vsub.f32 1.0, %v7266_v12  ;;  %v3803_v22 = vmul.f32 %v7266_v12, %v9475_v2  ;;  %v10489_v2 = vld [vmem:[#allocation13_spill] sm:$0xff] }
 0x9f8   :  { %v7268_v47 = vpop.eup %7267 }
 0x9f9   :  { %v3800_v7 = vmul.f32 %v7268_v47, %v3798_v25 }
 0x9fa   :  { %v7270_v28 = vpop.eup %7269 }
 0x9fb   :  { %v3801_v46 = vmul.f32 %v7270_v28, %v3799_v49  ;;  %v9576_v14 = vadd.f32 %v3802_v5, %v3800_v7 }
 0x9fd   :  { %v9578_v4 = vadd.f32 %v3803_v22, %v3801_v46 }
 0x9ff   :  { %v6056_v9 = vpack.c.bf16 %v9578_v4, %v9576_v14 }
 0xa01   :  { %6090 = vst [vmem:[%s10270_s5 + $0x28] sm:$0xff] %v6056_v9   ;;  %3965 = vmatmul.mubr.bf16.vlgmr.msra.gmra.mrb[92].mxu0 %v6056_v9  ;;  %6860 = vmatmul.mubr.bf16.vlgmr.msra.gmra.mrb[92].mxu1 %v6056_v9 }
 0xa02   :  { %4160 = vmatpush1.bf16.msra.mxu0 %v8924_v60  ;;  %6864 = vmatpush3.bf16.msra.mxu1 %v8930_v26  ;;  %v9623_v60 = vld [vmem:[%s10267_s4 + $0x30] sm:$0xff]  ;;  %v10478_v26 = vld [vmem:[#allocation9_spill] sm:$0xff] }
 0xa03   :  { %4161 = vmatprep.subr.bf16.mxu0 %v8936_v27  ;;  %6865 = vmatprep.subr.bf16.mxu1 %v10392_v51  ;;  %v10479_v27 = vld [vmem:[#allocation5_spill] sm:$0xff] }
 0xa04   :  { %4191 = vmatprep.mubr.bf16.mxu0 %v10393_v52  ;;  %6879 = vmatprep.mubr.msk.bf16.mxu1 %vm7520_vm0, %v10392_v51 }
 0xa06   :  { %4162 = vmatpush1.bf16.msra.mxu0 %v8946_v30  ;;  %6866 = vmatpush3.bf16.msra.mxu1 %v8952_v31  ;;  %v10480_v30 = vld [vmem:[#allocation6_spill] sm:$0xff]  ;;  %v10481_v31 = vld [vmem:[#allocation12_spill] sm:$0xff] }
 0xa07   :  { %4163 = vmatprep.subr.bf16.mxu0 %v8958_v32  ;;  %6867 = vmatprep.subr.bf16.mxu1 %v10392_v51  ;;  %v10482_v32 = vld [vmem:[#allocation7_spill] sm:$0xff] }
 0xa0a   :  { %4164 = vmatpush1.bf16.msra.mxu0 %v8965_v33  ;;  %6868 = vmatpush3.bf16.msra.mxu1 %v8971_v34  ;;  %v10483_v33 = vld [vmem:[#allocation8_spill] sm:$0xff]  ;;  %v10484_v34 = vld [vmem:[#allocation14_spill] sm:$0xff] }
 0xa0b   :  { %4165 = vmatprep.subr.bf16.mxu0 %v8977_v35  ;;  %6869 = vmatprep.subr.bf16.mxu1 %v10392_v51  ;;  %v10485_v35 = vld [vmem:[#allocation10_spill] sm:$0xff] }
 0xa0e   :  { %4166 = vmatpush1.bf16.msra.mxu0 %v8984_v36  ;;  %6870 = vmatpush3.bf16.msra.mxu1 %v8990_v37  ;;  %v10486_v36 = vld [vmem:[#allocation11_spill] sm:$0xff] }
 0xa0f   :  { %4167 = vmatprep.subr.bf16.mxu0 %v8996_v38  ;;  %6871 = vmatprep.subr.bf16.mxu1 %v10392_v51  ;;  %v10487_v37 = vld [vmem:[#allocation15_spill] sm:$0xff]  ;;  %v9663_v38 = vld [vmem:[%s10266_s2 + $0x4] ss:$12 sps:$4 sm:$0xff]  }
 0xa10   :  { %10488 = vst [vmem:[#allocation18_spill] sm:$0xff] %v9663_v38 }
 0xa12   :  { %4168 = vmatpush1.bf16.msra.mxu0 %v9003_v39  ;;  %6872 = vmatpush3.bf16.msra.mxu1 %v9009_v40  ;;  %v5857_v39 = vld [vmem:[%s10271_s1 + $0x3c0] sm:$0xff] }
 0xa13   :  { %4169 = vmatprep.subr.bf16.mxu0 %v9015_v45  ;;  %6873 = vmatprep.subr.bf16.mxu1 %v10392_v51 }
 0xa16   :  { %4170 = vmatpush1.bf16.msra.mxu0 %v9022_v41  ;;  %6874 = vmatpush3.bf16.msra.mxu1 %v9028_v16  ;;  %v5860_v41 = vld [vmem:[%s10271_s1 + $0x3d8] sm:$0xff] }
 0xa17   :  { %4171 = vmatprep.subr.bf16.mxu0 %v9034_v42  ;;  %6875 = vmatprep.subr.bf16.mxu1 %v10392_v51 }
 0xa1a   :  { %4172 = vmatpush1.bf16.msra.mxu0 %v9041_v56  ;;  %6876 = vmatpush3.bf16.msra.mxu1 %v9047_v57  ;;  %v5858_v56 = vld [vmem:[%s10271_s1 + $0x3c8] sm:$0xff] }
 0xa1b   :  { %4173 = vmatprep.subr.bf16.mxu0 %v9053_v29  ;;  %6877 = vmatprep.subr.bf16.mxu1 %v10392_v51 }
 0xa1e   :  { %4174 = vmatpush1.bf16.msra.mxu0 %v9060_v1  ;;  %6878 = vmatpush3.bf16.msra.mxu1 %v9066_v43 }
 0xa1f   :  { %4244 = vmatprep.subr.bf16.mxu0 %v9072_v48  ;;  %6883 = vmatprep.subr.bf16.mxu1 %v10392_v51 }
 0xa21   :  { %4192 = vmatmul.mubr.bf16.vlgmr.msra.gmra.mrb[96].mxu0 %v9623_v60  ;;  %6880 = vmatmul.mubr.bf16.vlgmr.msra.gmra.mrb[96].mxu1 %v9623_v60 }
 0xa22   :  { %4245 = vmatpush1.bf16.msra.mxu0 %v9155_v55  ;;  %6884 = vmatpush3.bf16.msra.mxu1 %v9161_v18  ;;  %v5861_v18 = vld [vmem:[%s10271_s1 + $0x3e0] sm:$0xff] }
 0xa23   :  { %4246 = vmatprep.subr.bf16.mxu0 %v9167_v61  ;;  %6885 = vmatprep.subr.bf16.mxu1 %v10392_v51 }
 0xa24   :  { %4276 = vmatprep.mubr.bf16.mxu0 %v10393_v52  ;;  %6899 = vmatprep.mubr.msk.bf16.mxu1 %vm7520_vm0, %v10392_v51 }
 0xa26   :  { %4247 = vmatpush1.bf16.msra.mxu0 %v9177_v54  ;;  %6886 = vmatpush3.bf16.msra.mxu1 %v9183_v53 }
 0xa27   :  { %4248 = vmatprep.subr.bf16.mxu0 %v9189_v59  ;;  %6887 = vmatprep.subr.bf16.mxu1 %v10392_v51 }
 0xa2a   :  { %4249 = vmatpush1.bf16.msra.mxu0 %v9196_v21  ;;  %6888 = vmatpush3.bf16.msra.mxu1 %v9202_v19 }
 0xa2b   :  { %4250 = vmatprep.subr.bf16.mxu0 %v9208_v62  ;;  %6889 = vmatprep.subr.bf16.mxu1 %v10392_v51 }
 0xa2e   :  { %4251 = vmatpush1.bf16.msra.mxu0 %v9215_v23  ;;  %6890 = vmatpush3.bf16.msra.mxu1 %v9221_v0 }
 0xa2f   :  { %4252 = vmatprep.subr.bf16.mxu0 %v9227_v3  ;;  %6891 = vmatprep.subr.bf16.mxu1 %v10392_v51 }
 0xa32   :  { %4253 = vmatpush1.bf16.msra.mxu0 %v9234_v6  ;;  %6892 = vmatpush3.bf16.msra.mxu1 %v10478_v26 }
 0xa33   :  { %4254 = vmatprep.subr.bf16.mxu0 %v10479_v27  ;;  %6893 = vmatprep.subr.bf16.mxu1 %v10392_v51 }
 0xa36   :  { %4255 = vmatpush1.bf16.msra.mxu0 %v10480_v30  ;;  %6894 = vmatpush3.bf16.msra.mxu1 %v10481_v31 }
 0xa37   :  { %4256 = vmatprep.subr.bf16.mxu0 %v10482_v32  ;;  %6895 = vmatprep.subr.bf16.mxu1 %v10392_v51 }
 0xa3a   :  { %4257 = vmatpush1.bf16.msra.mxu0 %v10483_v33  ;;  %6896 = vmatpush3.bf16.msra.mxu1 %v10484_v34 }
 0xa3b   :  { %4258 = vmatprep.subr.bf16.mxu0 %v10485_v35  ;;  %6897 = vmatprep.subr.bf16.mxu1 %v10392_v51 }
 0xa3e   :  { %4259 = vmatpush1.bf16.msra.mxu0 %v10486_v36  ;;  %6898 = vmatpush3.bf16.msra.mxu1 %v10487_v37 }
 0xa3f   :  { %4471 = vmatprep.subr.bf16.mxu0 %v9663_v38  ;;  %6903 = vmatprep.subr.bf16.mxu1 %v10392_v51 }
 0xad4   :  { %v3966_v40 = vpop.f32.mrb[92].mxu0  ;;  %v4009_v45 = vpop.f32.mrb[92].mxu1 }
 0xad5   :  { %v4074_v16 = vadd.f32 %v5857_v39, %v3966_v40  ;;  %v3968_v42 = vpop.f32.mrb[93].mxu0  ;;  %v6861_v57 = vpop.f32.mrb[93].mxu1  ;;  %v4102_v49 = vadd.f32 %v10489_v2, %v4009_v45  ;;  %v9713_v45 = vld [vmem:[%s10266_s2 + $0x1c] ss:$12 sps:$4 sm:$0xff]  }
 0xad6   :  { %v3970_v29 = vpop.f32.mrb[94].mxu0  ;;  %v4012_v1 = vpop.f32.mrb[94].mxu1  ;;  %v4088_v54 = vadd.f32 %v5858_v56, %v3968_v42  ;;  %v9735_v42 = vld [vmem:[%s10266_s2 + $0x34] ss:$12 sps:$4 sm:$0xff]   ;;  %v9742_v56 = vld [vmem:[%s10266_s2 + $0x30] ss:$12 sps:$4 sm:$0xff]  }
 0xad7   :  { %v5863_v43 = vmul.f32 -1.442695, %v4074_v16  ;;  %v4075_v48 = vadd.f32 %v5860_v41, %v3970_v29  ;;  %v3972_v55 = vpop.f32.mrb[95].mxu0  ;;  %v6862_v61 = vpop.f32.mrb[95].mxu1  ;;  %v4103_v17 = vadd.f32 %v10489_v2, %v4012_v1  ;;  %v9723_v41 = vld [vmem:[%s10266_s2 + $0x18] ss:$12 sps:$4 sm:$0xff]  }
 0xad8   :  { %v4089_v59 = vadd.f32 %v5861_v18, %v3972_v55  ;;  %v5865_v21 = vmul.f32 -1.442695, %v4088_v54  ;;  %v9729_v16 = vld [vmem:[%s10266_s2 + $0x20] ss:$12 sps:$4 sm:$0xff]   ;;  %v9748_v57 = vld [vmem:[%s10266_s2 + $0x38] ss:$12 sps:$4 sm:$0xff]  }
 0xad9   :  { %7271 = vpow2.f32 %v5863_v43  ;;  %v5864_v53 = vmul.f32 -1.442695, %v4075_v48  ;;  %v9754_v29 = vld [vmem:[%s10266_s2 + $0x4c] ss:$12 sps:$4 sm:$0xff]   ;;  %v9761_v1 = vld [vmem:[%s10266_s2 + $0x48] ss:$12 sps:$4 sm:$0xff]  }
 0xada   :  { %v5866_v19 = vmul.f32 -1.442695, %v4089_v59  ;;  %v9767_v43 = vld [vmem:[%s10266_s2 + $0x50] ss:$12 sps:$4 sm:$0xff]   ;;  %v9780_v55 = vld [vmem:[%s10266_s2 + $0x60] ss:$12 sps:$4 sm:$0xff]  }
 0xadb   :  { %7273 = vpow2.f32 %v5864_v53  ;;  %v9773_v48 = vld [vmem:[%s10266_s2 + $0x64] ss:$12 sps:$4 sm:$0xff]   ;;  %v9786_v18 = vld [vmem:[%s10266_s2 + $0x68] ss:$12 sps:$4 sm:$0xff]   ;;  %v9805_v53 = vld [vmem:[%s10266_s2 + $0x80] ss:$12 sps:$4 sm:$0xff]  }
 0xadc   :  { %7275 = vpow2.f32 %v5865_v21  ;;  %v9792_v61 = vld [vmem:[%s10266_s2 + $0x7c] ss:$12 sps:$4 sm:$0xff]   ;;  %v9799_v54 = vld [vmem:[%s10266_s2 + $0x78] ss:$12 sps:$4 sm:$0xff]   ;;  %v9811_v59 = vld [vmem:[%s10266_s2 + $0x94] ss:$12 sps:$4 sm:$0xff]  }
 0xadd   :  { %7277 = vpow2.f32 %v5866_v19  ;;  %v9818_v21 = vld [vmem:[%s10266_s2 + $0x90] ss:$12 sps:$4 sm:$0xff]   ;;  %v9824_v19 = vld [vmem:[%s10266_s2 + $0x98] ss:$12 sps:$4 sm:$0xff]  }
 0xae3   :  { %v7272_v62 = vpop.eup %7271 }
 0xae4   :  { %v4082_v23 = vadd.f32 1.0, %v7272_v62  ;;  %v9830_v62 = vld [vmem:[%s10266_s2 + $0xac] ss:$12 sps:$4 sm:$0xff]  }
 0xae5   :  { %v7274_v0 = vpop.eup %7273 }
 0xae6   :  { %7279 = vrcp.f32 %v4082_v23  ;;  %v4083_v3 = vadd.f32 1.0, %v7274_v0  ;;  %v7276_v6 = vpop.eup %7275  ;;  %v9837_v23 = vld [vmem:[%s10266_s2 + $0xa8] ss:$12 sps:$4 sm:$0xff]   ;;  %v9843_v0 = vld [vmem:[%s10266_s2 + $0xb0] ss:$12 sps:$4 sm:$0xff]  }
 0xae7   :  { %v7278_v7 = vpop.eup %7277  ;;  %v4096_v44 = vadd.f32 1.0, %v7276_v6  ;;  %v9858_v6 = vld [vmem:[%s10266_s2 + $0xc0] ss:$12 sps:$4 sm:$0xff]  }
 0xae8   :  { %7281 = vrcp.f32 %v4083_v3  ;;  %v4097_v10 = vadd.f32 1.0, %v7278_v7  ;;  %v9849_v3 = vld [vmem:[%s10266_s2 + $0xc4] ss:$12 sps:$4 sm:$0xff]   ;;  %v9864_v7 = vld [vmem:[%s10266_s2 + $0xc8] ss:$12 sps:$4 sm:$0xff]  }
 0xae9   :  { %7283 = vrcp.f32 %v4096_v44  ;;  %v9870_v44 = vld [vmem:[%s10266_s2 + $0xdc] ss:$12 sps:$4 sm:$0xff]  }
 0xaea   :  { %7285 = vrcp.f32 %v4097_v10  ;;  %v9886_v10 = vld [vmem:[%s10266_s2 + $0xe0] ss:$12 sps:$4 sm:$0xff]  }
 0xaf0   :  { %v7280_v13 = vpop.eup %7279 }
 0xaf1   :  { %v4104_v58 = vmul.f32 %v7280_v13, %v4102_v49  ;;  %v9880_v49 = vld [vmem:[%s10266_s2 + $0xd8] ss:$12 sps:$4 sm:$0xff]   ;;  %v9892_v13 = vld [vmem:[%s10266_s2 + $0xf4] ss:$12 sps:$4 sm:$0xff]  }
 0xaf2   :  { %v7282_v15 = vpop.eup %7281 }
 0xaf3   :  { %v4106_v20 = vadd.f32 %v5859_v50, %v4104_v58  ;;  %v4105_v8 = vmul.f32 %v7282_v15, %v4103_v17  ;;  %v7284_v9 = vpop.eup %7283  ;;  %v9899_v50 = vld [vmem:[%s10266_s2 + $0xf0] ss:$12 sps:$4 sm:$0xff]   ;;  %v9905_v58 = vld [vmem:[%s10266_s2 + $0xf8] ss:$12 sps:$4 sm:$0xff]   ;;  %v9918_v15 = vld [vmem:[%s10266_s2 + $0x108] ss:$12 sps:$4 sm:$0xff]  }
 0xaf4   :  { %v4193_v63 = vpop.f32.mrb[96].mxu0  ;;  %v4236_v11 = vpop.f32.mrb[96].mxu1  ;;  %v4110_v27 = vsub.f32 1.0, %v7284_v9  ;;  %v4114_v33 = vmul.f32 %v7284_v9, %v9576_v14  ;;  %v9701_v14 = vld [vmem:[%s10266_s2] ss:$12 sps:$4 sm:$0xff]  }
 0xaf5   :  { %7287 = vtanh.f32 %v4106_v20  ;;  %v4107_v12 = vadd.f32 %v5862_v24, %v4105_v8  ;;  %v4195_v25 = vpop.f32.mrb[97].mxu0  ;;  %v6881_v47 = vpop.f32.mrb[97].mxu1  ;;  %v9911_v17 = vld [vmem:[%s10266_s2 + $0x10c] ss:$12 sps:$4 sm:$0xff]   ;;  %v9924_v24 = vld [vmem:[%s10266_s2 + $0x110] ss:$12 sps:$4 sm:$0xff]  }
 0xaf6   :  { %v4197_v5 = vpop.f32.mrb[98].mxu0  ;;  %v4239_v28 = vpop.f32.mrb[98].mxu1  ;;  %v9930_v20 = vld [vmem:[%s10266_s2 + $0x124] ss:$12 sps:$4 sm:$0xff]   ;;  %v9937_v8 = vld [vmem:[%s10266_s2 + $0x120] ss:$12 sps:$4 sm:$0xff]  }
 0xaf7   :  { %7289 = vtanh.f32 %v4107_v12  ;;  %v4199_v46 = vpop.f32.mrb[99].mxu0  ;;  %v6882_v22 = vpop.f32.mrb[99].mxu1  ;;  %10490 = vst [vmem:[#allocation16_spill] sm:$0xff] %v9937_v8  ;;  %v9943_v63 = vld [vmem:[%s10266_s2 + $0x128] ss:$12 sps:$4 sm:$0xff]  }
 0xaf8   :  { %v7286_v26 = vpop.eup %7285  ;;  %10491 = vst [vmem:[#allocation17_spill] sm:$0xff] %v9943_v63  ;;  %v9949_v11 = vld [vmem:[%s10266_s2 + $0x13c] ss:$12 sps:$4 sm:$0xff]   ;;  %v9956_v12 = vld [vmem:[%s10266_s2 + $0x138] ss:$12 sps:$4 sm:$0xff]  }
 0xaf9   :  { %v4111_v31 = vsub.f32 1.0, %v7286_v26  ;;  %v4115_v36 = vmul.f32 %v7286_v26, %v9578_v4  ;;  %v9707_v4 = vld [vmem:[%s10266_s2 + $0x8] ss:$12 sps:$4 sm:$0xff]   ;;  %10492 = vst [vmem:[#allocation4_spill] sm:$0xff] %v9949_v11  ;;  %10493 = vst [vmem:[#allocation9_spill] sm:$0xff] %v9956_v12 }
 0xafa   :  { %v9962_v25 = vld [vmem:[%s10266_s2 + $0x140] ss:$12 sps:$4 sm:$0xff]   ;;  %v9975_v5 = vld [vmem:[%s10266_s2 + $0x150] ss:$12 sps:$4 sm:$0xff]   ;;  %v9981_v28 = vld [vmem:[%s10266_s2 + $0x158] ss:$12 sps:$4 sm:$0xff]  }
 0xafb   :  { %10494 = vst [vmem:[#allocation5_spill] sm:$0xff] %v9962_v25  ;;  %v9968_v47 = vld [vmem:[%s10266_s2 + $0x154] ss:$12 sps:$4 sm:$0xff]   ;;  %10496 = vst [vmem:[#allocation12_spill] sm:$0xff] %v9975_v5  ;;  %v9987_v46 = vld [vmem:[%s10266_s2 + $0x16c] ss:$12 sps:$4 sm:$0xff]  }
 0xafc   :  { %10495 = vst [vmem:[#allocation6_spill] sm:$0xff] %v9968_v47  ;;  %10497 = vst [vmem:[#allocation7_spill] sm:$0xff] %v9981_v28  ;;  %v9994_v22 = vld [vmem:[%s10266_s2 + $0x168] ss:$12 sps:$4 sm:$0xff]   ;;  %v10000_v9 = vld [vmem:[%s10266_s2 + $0x170] ss:$12 sps:$4 sm:$0xff]  }
 0xafd   :  { %10498 = vst [vmem:[#allocation8_spill] sm:$0xff] %v9987_v46  ;;  %10499 = vst [vmem:[#allocation14_spill] sm:$0xff] %v9994_v22  ;;  %v5885_v26 = vld [vmem:[%s10271_s1 + $0x390] sm:$0xff] }
 0xafe   :  { %10500 = vst [vmem:[#allocation10_spill] sm:$0xff] %v10000_v9 }
 0xaff   :  { %v7288_v30 = vpop.eup %7287 }
 0xb00   :  { %v4112_v32 = vmul.f32 %v7288_v30, %v4110_v27 }
 0xb01   :  { %v7290_v34 = vpop.eup %7289 }
 0xb02   :  { %v4113_v35 = vmul.f32 %v7290_v34, %v4111_v31  ;;  %v9689_v37 = vadd.f32 %v4114_v33, %v4112_v32  ;;  %v5888_v31 = vld [vmem:[%s10271_s1 + $0x3a8] sm:$0xff]  ;;  %v5886_v34 = vld [vmem:[%s10271_s1 + $0x398] sm:$0xff] }
 0xb04   :  { %v9691_v39 = vadd.f32 %v4115_v36, %v4113_v35 }
 0xb06   :  { %v6061_v40 = vpack.c.bf16 %v9691_v39, %v9689_v37 }
 0xb08   :  { %6091 = vst [vmem:[%s10270_s5 + $0x20] sm:$0xff] %v6061_v40   ;;  %4277 = vmatmul.mubr.bf16.vlgmr.msra.gmra.mrb[100].mxu0 %v6061_v40  ;;  %6900 = vmatmul.mubr.bf16.vlgmr.msra.gmra.mrb[100].mxu1 %v6061_v40 }
 0xb09   :  { %4472 = vmatpush1.bf16.msra.mxu0 %v9701_v14  ;;  %6904 = vmatpush3.bf16.msra.mxu1 %v9707_v4 }
 0xb0a   :  { %4473 = vmatprep.subr.bf16.mxu0 %v9713_v45  ;;  %6905 = vmatprep.subr.bf16.mxu1 %v10392_v51 }
 0xb0b   :  { %4503 = vmatprep.mubr.bf16.mxu0 %v10393_v52  ;;  %6919 = vmatprep.mubr.msk.bf16.mxu1 %vm7520_vm0, %v10392_v51 }
 0xb0d   :  { %4474 = vmatpush1.bf16.msra.mxu0 %v9723_v41  ;;  %6906 = vmatpush3.bf16.msra.mxu1 %v9729_v16 }
 0xb0e   :  { %4475 = vmatprep.subr.bf16.mxu0 %v9735_v42  ;;  %6907 = vmatprep.subr.bf16.mxu1 %v10392_v51 }
 0xb11   :  { %4476 = vmatpush1.bf16.msra.mxu0 %v9742_v56  ;;  %6908 = vmatpush3.bf16.msra.mxu1 %v9748_v57 }
 0xb12   :  { %4477 = vmatprep.subr.bf16.mxu0 %v9754_v29  ;;  %6909 = vmatprep.subr.bf16.mxu1 %v10392_v51 }
 0xb15   :  { %4478 = vmatpush1.bf16.msra.mxu0 %v9761_v1  ;;  %6910 = vmatpush3.bf16.msra.mxu1 %v9767_v43 }
 0xb16   :  { %4479 = vmatprep.subr.bf16.mxu0 %v9773_v48  ;;  %6911 = vmatprep.subr.bf16.mxu1 %v10392_v51 }
 0xb19   :  { %4480 = vmatpush1.bf16.msra.mxu0 %v9780_v55  ;;  %6912 = vmatpush3.bf16.msra.mxu1 %v9786_v18 }
 0xb1a   :  { %4481 = vmatprep.subr.bf16.mxu0 %v9792_v61  ;;  %6913 = vmatprep.subr.bf16.mxu1 %v10392_v51 }
 0xb1d   :  { %4482 = vmatpush1.bf16.msra.mxu0 %v9799_v54  ;;  %6914 = vmatpush3.bf16.msra.mxu1 %v9805_v53 }
 0xb1e   :  { %4483 = vmatprep.subr.bf16.mxu0 %v9811_v59  ;;  %6915 = vmatprep.subr.bf16.mxu1 %v10392_v51 }
 0xb21   :  { %4484 = vmatpush1.bf16.msra.mxu0 %v9818_v21  ;;  %6916 = vmatpush3.bf16.msra.mxu1 %v9824_v19 }
 0xb22   :  { %4485 = vmatprep.subr.bf16.mxu0 %v9830_v62  ;;  %6917 = vmatprep.subr.bf16.mxu1 %v10392_v51 }
 0xb25   :  { %4486 = vmatpush1.bf16.msra.mxu0 %v9837_v23  ;;  %6918 = vmatpush3.bf16.msra.mxu1 %v9843_v0 }
 0xb26   :  { %4556 = vmatprep.subr.bf16.mxu0 %v9849_v3  ;;  %6923 = vmatprep.subr.bf16.mxu1 %v10392_v51 }
 0xb28   :  { %4504 = vmatmul.mubr.bf16.vlgmr.msra.gmra.mrb[104].mxu0 %v9623_v60  ;;  %6920 = vmatmul.mubr.bf16.vlgmr.msra.gmra.mrb[104].mxu1 %v9623_v60 }
 0xb29   :  { %4557 = vmatpush1.bf16.msra.mxu0 %v9858_v6  ;;  %6924 = vmatpush3.bf16.msra.mxu1 %v9864_v7 }
 0xb2a   :  { %4558 = vmatprep.subr.bf16.mxu0 %v9870_v44  ;;  %6925 = vmatprep.subr.bf16.mxu1 %v10392_v51 }
 0xb2b   :  { %4588 = vmatprep.mubr.bf16.mxu0 %v10393_v52  ;;  %6939 = vmatprep.mubr.msk.bf16.mxu1 %vm7520_vm0, %v10392_v51 }
 0xb2d   :  { %4559 = vmatpush1.bf16.msra.mxu0 %v9880_v49  ;;  %6926 = vmatpush3.bf16.msra.mxu1 %v9886_v10 }
 0xb2e   :  { %4560 = vmatprep.subr.bf16.mxu0 %v9892_v13  ;;  %6927 = vmatprep.subr.bf16.mxu1 %v10392_v51 }
 0xb31   :  { %4561 = vmatpush1.bf16.msra.mxu0 %v9899_v50  ;;  %6928 = vmatpush3.bf16.msra.mxu1 %v9905_v58 }
 0xb32   :  { %4562 = vmatprep.subr.bf16.mxu0 %v9911_v17  ;;  %6929 = vmatprep.subr.bf16.mxu1 %v10392_v51 }
 0xb35   :  { %4563 = vmatpush1.bf16.msra.mxu0 %v9918_v15  ;;  %6930 = vmatpush3.bf16.msra.mxu1 %v9924_v24 }
 0xb36   :  { %4564 = vmatprep.subr.bf16.mxu0 %v9930_v20  ;;  %6931 = vmatprep.subr.bf16.mxu1 %v10392_v51 }
 0xb39   :  { %4565 = vmatpush1.bf16.msra.mxu0 %v9937_v8  ;;  %6932 = vmatpush3.bf16.msra.mxu1 %v9943_v63 }
 0xb3a   :  { %4566 = vmatprep.subr.bf16.mxu0 %v9949_v11  ;;  %6933 = vmatprep.subr.bf16.mxu1 %v10392_v51 }
 0xb3d   :  { %4567 = vmatpush1.bf16.msra.mxu0 %v9956_v12  ;;  %6934 = vmatpush3.bf16.msra.mxu1 %v9962_v25 }
 0xb3e   :  { %4568 = vmatprep.subr.bf16.mxu0 %v9968_v47  ;;  %6935 = vmatprep.subr.bf16.mxu1 %v10392_v51 }
 0xb41   :  { %4569 = vmatpush1.bf16.msra.mxu0 %v9975_v5  ;;  %6936 = vmatpush3.bf16.msra.mxu1 %v9981_v28 }
 0xb42   :  { %4570 = vmatprep.subr.bf16.mxu0 %v9987_v46  ;;  %6937 = vmatprep.subr.bf16.mxu1 %v10392_v51  ;;  %v5889_v46 = vld [vmem:[%s10271_s1 + $0x3b0] sm:$0xff] }
 0xb45   :  { %4571 = vmatpush1.bf16.msra.mxu0 %v9994_v22  ;;  %6938 = vmatpush3.bf16.msra.mxu1 %v10000_v9 }
 0xb46   :  { %4783 = vmatprep.subr.bf16.mxu0 %v9663_v38  ;;  %6943 = vmatprep.subr.bf16.mxu1 %v10392_v51 }
 0xbdb   :  { %v4278_v27 = vpop.f32.mrb[100].mxu0  ;;  %v4321_v30 = vpop.f32.mrb[100].mxu1 }
 0xbdc   :  { %v4386_v32 = vadd.f32 %v5885_v26, %v4278_v27  ;;  %v4280_v33 = vpop.f32.mrb[101].mxu0  ;;  %v6901_v35 = vpop.f32.mrb[101].mxu1 }
 0xbdd   :  { %v4282_v36 = vpop.f32.mrb[102].mxu0  ;;  %v4324_v40 = vpop.f32.mrb[102].mxu1  ;;  %v4400_v5 = vadd.f32 %v5886_v34, %v4280_v33 }
 0xbde   :  { %v5891_v38 = vmul.f32 -1.442695, %v4386_v32  ;;  %v4387_v9 = vadd.f32 %v5888_v31, %v4282_v36  ;;  %v4284_v22 = vpop.f32.mrb[103].mxu0  ;;  %v6902_v28 = vpop.f32.mrb[103].mxu1 }
 0xbdf   :  { %v4401_v26 = vadd.f32 %v5889_v46, %v4284_v22  ;;  %v5893_v27 = vmul.f32 -1.442695, %v4400_v5  ;;  %v4414_v28 = vadd.f32 %v10489_v2, %v4321_v30 }
 0xbe0   :  { %7291 = vpow2.f32 %v5891_v38  ;;  %v5892_v47 = vmul.f32 -1.442695, %v4387_v9 }
 0xbe1   :  { %v5894_v25 = vmul.f32 -1.442695, %v4401_v26 }
 0xbe2   :  { %7293 = vpow2.f32 %v5892_v47  ;;  %v5887_v47 = vld [vmem:[%s10271_s1 + $0x3a0] sm:$0xff] }
 0xbe3   :  { %7295 = vpow2.f32 %v5893_v27 }
 0xbe4   :  { %7297 = vpow2.f32 %v5894_v25  ;;  %v4415_v25 = vadd.f32 %v10489_v2, %v4324_v40 }
 0xbea   :  { %v7292_v35 = vpop.eup %7291 }
 0xbeb   :  { %v4394_v12 = vadd.f32 1.0, %v7292_v35 }
 0xbec   :  { %v7294_v11 = vpop.eup %7293 }
 0xbed   :  { %7299 = vrcp.f32 %v4394_v12  ;;  %v4395_v31 = vadd.f32 1.0, %v7294_v11  ;;  %v7296_v32 = vpop.eup %7295  ;;  %v5890_v11 = vld [vmem:[%s10271_s1 + $0x3b8] sm:$0xff] }
 0xbee   :  { %v7298_v36 = vpop.eup %7297  ;;  %v4408_v63 = vadd.f32 1.0, %v7296_v32 }
 0xbef   :  { %7301 = vrcp.f32 %v4395_v31  ;;  %v4409_v33 = vadd.f32 1.0, %v7298_v36 }
 0xbf0   :  { %7303 = vrcp.f32 %v4408_v63 }
 0xbf1   :  { %7305 = vrcp.f32 %v4409_v33 }
 0xbf7   :  { %v7300_v38 = vpop.eup %7299 }
 0xbf8   :  { %v4416_v5 = vmul.f32 %v7300_v38, %v4414_v28 }
 0xbf9   :  { %v7302_v46 = vpop.eup %7301 }
 0xbfa   :  { %v4418_v12 = vadd.f32 %v5887_v47, %v4416_v5  ;;  %v4417_v22 = vmul.f32 %v7302_v46, %v4415_v25  ;;  %v7304_v2 = vpop.eup %7303 }
 0xbfb   :  { %v4505_v9 = vpop.f32.mrb[104].mxu0  ;;  %v4548_v30 = vpop.f32.mrb[104].mxu1  ;;  %v4422_v36 = vsub.f32 1.0, %v7304_v2  ;;  %v4426_v47 = vmul.f32 %v7304_v2, %v9689_v37  ;;  %v10501_v37 = vld [vmem:[#allocation16_spill] sm:$0xff] }
 0xbfc   :  { %7307 = vtanh.f32 %v4418_v12  ;;  %v4419_v34 = vadd.f32 %v5890_v11, %v4417_v22  ;;  %v4507_v26 = vpop.f32.mrb[105].mxu0  ;;  %v6921_v27 = vpop.f32.mrb[105].mxu1  ;;  %v10504_v22 = vld [vmem:[#allocation9_spill] sm:$0xff]  ;;  %v10506_v30 = vld [vmem:[#allocation6_spill] sm:$0xff] }
 0xbfd   :  { %v4509_v35 = vpop.f32.mrb[106].mxu0  ;;  %v4551_v31 = vpop.f32.mrb[106].mxu1  ;;  %v10505_v9 = vld [vmem:[#allocation5_spill] sm:$0xff]  ;;  %v10508_v26 = vld [vmem:[#allocation7_spill] sm:$0xff]  ;;  %v10509_v27 = vld [vmem:[#allocation8_spill] sm:$0xff] }
 0xbfe   :  { %7309 = vtanh.f32 %v4419_v34  ;;  %v4511_v63 = vpop.f32.mrb[107].mxu0  ;;  %v6922_v32 = vpop.f32.mrb[107].mxu1  ;;  %v10507_v34 = vld [vmem:[#allocation12_spill] sm:$0xff]  ;;  %v10510_v35 = vld [vmem:[#allocation14_spill] sm:$0xff] }
 0xbff   :  { %v7306_v40 = vpop.eup %7305  ;;  %v10511_v31 = vld [vmem:[#allocation10_spill] sm:$0xff]  ;;  %v5913_v32 = vld [vmem:[%s10271_s1 + $0x360] sm:$0xff] }
 0xc00   :  { %v4423_v38 = vsub.f32 1.0, %v7306_v40  ;;  %v4427_v25 = vmul.f32 %v7306_v40, %v9691_v39  ;;  %v10502_v39 = vld [vmem:[#allocation17_spill] sm:$0xff]  ;;  %v10512_v63 = vld [vmem:[#allocation18_spill] sm:$0xff] }
 0xc06   :  { %v7308_v28 = vpop.eup %7307 }
 0xc07   :  { %v4424_v8 = vmul.f32 %v7308_v28, %v4422_v36  ;;  %v5916_v36 = vld [vmem:[%s10271_s1 + $0x378] sm:$0xff] }
 0xc08   :  { %v7310_v33 = vpop.eup %7309 }
 0xc09   :  { %v4425_v5 = vmul.f32 %v7310_v33, %v4423_v38  ;;  %v10027_v46 = vadd.f32 %v4426_v47, %v4424_v8  ;;  %v10503_v8 = vld [vmem:[#allocation4_spill] sm:$0xff]  ;;  %v5914_v47 = vld [vmem:[%s10271_s1 + $0x368] sm:$0xff] }
 0xc0b   :  { %v10029_v11 = vadd.f32 %v4427_v25, %v4425_v5 }
 0xc0d   :  { %v6066_v12 = vpack.c.bf16 %v10029_v11, %v10027_v46 }
 0xc0f   :  { %6092 = vst [vmem:[%s10270_s5 + $0x18] sm:$0xff] %v6066_v12   ;;  %4589 = vmatmul.mubr.bf16.vlgmr.msra.gmra.mrb[108].mxu0 %v6066_v12  ;;  %6940 = vmatmul.mubr.bf16.vlgmr.msra.gmra.mrb[108].mxu1 %v6066_v12 }
 0xc10   :  { %4784 = vmatpush1.bf16.msra.mxu0 %v9701_v14  ;;  %6944 = vmatpush3.bf16.msra.mxu1 %v9707_v4 }
 0xc11   :  { %4785 = vmatprep.subr.bf16.mxu0 %v9713_v45  ;;  %6945 = vmatprep.subr.bf16.mxu1 %v10392_v51 }
 0xc12   :  { %4815 = vmatprep.mubr.bf16.mxu0 %v10393_v52  ;;  %6959 = vmatprep.mubr.msk.bf16.mxu1 %vm7520_vm0, %v10392_v51 }
 0xc14   :  { %4786 = vmatpush1.bf16.msra.mxu0 %v9723_v41  ;;  %6946 = vmatpush3.bf16.msra.mxu1 %v9729_v16 }
 0xc15   :  { %4787 = vmatprep.subr.bf16.mxu0 %v9735_v42  ;;  %6947 = vmatprep.subr.bf16.mxu1 %v10392_v51 }
 0xc18   :  { %4788 = vmatpush1.bf16.msra.mxu0 %v9742_v56  ;;  %6948 = vmatpush3.bf16.msra.mxu1 %v9748_v57 }
 0xc19   :  { %4789 = vmatprep.subr.bf16.mxu0 %v9754_v29  ;;  %6949 = vmatprep.subr.bf16.mxu1 %v10392_v51 }
 0xc1c   :  { %4790 = vmatpush1.bf16.msra.mxu0 %v9761_v1  ;;  %6950 = vmatpush3.bf16.msra.mxu1 %v9767_v43 }
 0xc1d   :  { %4791 = vmatprep.subr.bf16.mxu0 %v9773_v48  ;;  %6951 = vmatprep.subr.bf16.mxu1 %v10392_v51 }
 0xc20   :  { %4792 = vmatpush1.bf16.msra.mxu0 %v9780_v55  ;;  %6952 = vmatpush3.bf16.msra.mxu1 %v9786_v18 }
 0xc21   :  { %4793 = vmatprep.subr.bf16.mxu0 %v9792_v61  ;;  %6953 = vmatprep.subr.bf16.mxu1 %v10392_v51 }
 0xc24   :  { %4794 = vmatpush1.bf16.msra.mxu0 %v9799_v54  ;;  %6954 = vmatpush3.bf16.msra.mxu1 %v9805_v53 }
 0xc25   :  { %4795 = vmatprep.subr.bf16.mxu0 %v9811_v59  ;;  %6955 = vmatprep.subr.bf16.mxu1 %v10392_v51 }
 0xc28   :  { %4796 = vmatpush1.bf16.msra.mxu0 %v9818_v21  ;;  %6956 = vmatpush3.bf16.msra.mxu1 %v9824_v19 }
 0xc29   :  { %4797 = vmatprep.subr.bf16.mxu0 %v9830_v62  ;;  %6957 = vmatprep.subr.bf16.mxu1 %v10392_v51 }
 0xc2c   :  { %4798 = vmatpush1.bf16.msra.mxu0 %v9837_v23  ;;  %6958 = vmatpush3.bf16.msra.mxu1 %v9843_v0 }
 0xc2d   :  { %4868 = vmatprep.subr.bf16.mxu0 %v9849_v3  ;;  %6963 = vmatprep.subr.bf16.mxu1 %v10392_v51 }
 0xc2f   :  { %4816 = vmatmul.mubr.bf16.vlgmr.msra.gmra.mrb[112].mxu0 %v9623_v60  ;;  %6960 = vmatmul.mubr.bf16.vlgmr.msra.gmra.mrb[112].mxu1 %v9623_v60 }
 0xc30   :  { %4869 = vmatpush1.bf16.msra.mxu0 %v9858_v6  ;;  %6964 = vmatpush3.bf16.msra.mxu1 %v9864_v7 }
 0xc31   :  { %4870 = vmatprep.subr.bf16.mxu0 %v9870_v44  ;;  %6965 = vmatprep.subr.bf16.mxu1 %v10392_v51 }
 0xc32   :  { %4900 = vmatprep.mubr.bf16.mxu0 %v10393_v52  ;;  %6979 = vmatprep.mubr.msk.bf16.mxu1 %vm7520_vm0, %v10392_v51 }
 0xc34   :  { %4871 = vmatpush1.bf16.msra.mxu0 %v9880_v49  ;;  %6966 = vmatpush3.bf16.msra.mxu1 %v9886_v10 }
 0xc35   :  { %4872 = vmatprep.subr.bf16.mxu0 %v9892_v13  ;;  %6967 = vmatprep.subr.bf16.mxu1 %v10392_v51 }
 0xc38   :  { %4873 = vmatpush1.bf16.msra.mxu0 %v9899_v50  ;;  %6968 = vmatpush3.bf16.msra.mxu1 %v9905_v58 }
 0xc39   :  { %4874 = vmatprep.subr.bf16.mxu0 %v9911_v17  ;;  %6969 = vmatprep.subr.bf16.mxu1 %v10392_v51 }
 0xc3c   :  { %4875 = vmatpush1.bf16.msra.mxu0 %v9918_v15  ;;  %6970 = vmatpush3.bf16.msra.mxu1 %v9924_v24 }
 0xc3d   :  { %4876 = vmatprep.subr.bf16.mxu0 %v9930_v20  ;;  %6971 = vmatprep.subr.bf16.mxu1 %v10392_v51 }
 0xc40   :  { %4877 = vmatpush1.bf16.msra.mxu0 %v10501_v37  ;;  %6972 = vmatpush3.bf16.msra.mxu1 %v10502_v39 }
 0xc41   :  { %4878 = vmatprep.subr.bf16.mxu0 %v10503_v8  ;;  %6973 = vmatprep.subr.bf16.mxu1 %v10392_v51 }
 0xc44   :  { %4879 = vmatpush1.bf16.msra.mxu0 %v10504_v22  ;;  %6974 = vmatpush3.bf16.msra.mxu1 %v10505_v9 }
 0xc45   :  { %4880 = vmatprep.subr.bf16.mxu0 %v10506_v30  ;;  %6975 = vmatprep.subr.bf16.mxu1 %v10392_v51 }
 0xc48   :  { %4881 = vmatpush1.bf16.msra.mxu0 %v10507_v34  ;;  %6976 = vmatpush3.bf16.msra.mxu1 %v10508_v26 }
 0xc49   :  { %4882 = vmatprep.subr.bf16.mxu0 %v10509_v27  ;;  %6977 = vmatprep.subr.bf16.mxu1 %v10392_v51 }
 0xc4c   :  { %4883 = vmatpush1.bf16.msra.mxu0 %v10510_v35  ;;  %6978 = vmatpush3.bf16.msra.mxu1 %v10511_v31  ;;  %v5917_v35 = vld [vmem:[%s10271_s1 + $0x380] sm:$0xff] }
 0xc4d   :  { %5094 = vmatprep.subr.bf16.mxu0 %v10512_v63  ;;  %6983 = vmatprep.subr.bf16.mxu1 %v10392_v51 }
 0xce2   :  { %v4590_v2 = vpop.f32.mrb[108].mxu0  ;;  %v4633_v40 = vpop.f32.mrb[108].mxu1 }
 0xce3   :  { %v4698_v28 = vadd.f32 %v5913_v32, %v4590_v2  ;;  %v4592_v38 = vpop.f32.mrb[109].mxu0  ;;  %v6941_v33 = vpop.f32.mrb[109].mxu1 }
 0xce4   :  { %v4594_v5 = vpop.f32.mrb[110].mxu0  ;;  %v4636_v25 = vpop.f32.mrb[110].mxu1  ;;  %v4712_v26 = vadd.f32 %v5914_v47, %v4592_v38  ;;  %v5918_v38 = vld [vmem:[%s10271_s1 + $0x388] sm:$0xff] }
 0xce5   :  { %v5919_v12 = vmul.f32 -1.442695, %v4698_v28  ;;  %v4699_v63 = vadd.f32 %v5916_v36, %v4594_v5  ;;  %v4596_v31 = vpop.f32.mrb[111].mxu0  ;;  %v6942_v27 = vpop.f32.mrb[111].mxu1 }
 0xce6   :  { %v4713_v32 = vadd.f32 %v5917_v35, %v4596_v31  ;;  %v5921_v2 = vmul.f32 -1.442695, %v4712_v26  ;;  %v10123_v27 = vld [vmem:[%s10269_s3 + $0x1] ss:$0 sm:$0xff] }
 0xce7   :  { %7311 = vpow2.f32 %v5919_v12  ;;  %v5920_v34 = vmul.f32 -1.442695, %v4699_v63  ;;  %10513 = vst [vmem:[#allocation11_spill] sm:$0xff] %v10123_v27 }
 0xce8   :  { %v5922_v30 = vmul.f32 -1.442695, %v4713_v32 }
 0xce9   :  { %7313 = vpow2.f32 %v5920_v34  ;;  %v4726_v34 = vadd.f32 %v10123_v27, %v4633_v40 }
 0xcea   :  { %7315 = vpow2.f32 %v5921_v2 }
 0xceb   :  { %7317 = vpow2.f32 %v5922_v30  ;;  %v5915_v30 = vld [vmem:[%s10271_s1 + $0x370] sm:$0xff] }
 0xcf1   :  { %v7312_v33 = vpop.eup %7311 }
 0xcf2   :  { %v4706_v9 = vadd.f32 1.0, %v7312_v33 }
 0xcf3   :  { %v7314_v22 = vpop.eup %7313 }
 0xcf4   :  { %7319 = vrcp.f32 %v4706_v9  ;;  %v4707_v36 = vadd.f32 1.0, %v7314_v22  ;;  %v7316_v28 = vpop.eup %7315  ;;  %v4727_v22 = vadd.f32 %v10123_v27, %v4636_v25 }
 0xcf5   :  { %v7318_v5 = vpop.eup %7317  ;;  %v4720_v8 = vadd.f32 1.0, %v7316_v28 }
 0xcf6   :  { %7321 = vrcp.f32 %v4707_v36  ;;  %v4721_v26 = vadd.f32 1.0, %v7318_v5 }
 0xcf7   :  { %7323 = vrcp.f32 %v4720_v8 }
 0xcf8   :  { %7325 = vrcp.f32 %v4721_v26 }
 0xcfe   :  { %v7320_v35 = vpop.eup %7319 }
 0xcff   :  { %v4728_v31 = vmul.f32 %v7320_v35, %v4726_v34 }
 0xd00   :  { %v7322_v9 = vpop.eup %7321 }
 0xd01   :  { %v4730_v47 = vadd.f32 %v5915_v30, %v4728_v31  ;;  %v4729_v12 = vmul.f32 %v7322_v9, %v4727_v22  ;;  %v7324_v25 = vpop.eup %7323 }
 0xd02   :  { %v4817_v63 = vpop.f32.mrb[112].mxu0  ;;  %v4860_v40 = vpop.f32.mrb[112].mxu1  ;;  %v4734_v35 = vsub.f32 1.0, %v7324_v25  ;;  %v4738_v30 = vmul.f32 %v7324_v25, %v10027_v46 }
 0xd03   :  { %7327 = vtanh.f32 %v4730_v47  ;;  %v4731_v32 = vadd.f32 %v5918_v38, %v4729_v12  ;;  %v4819_v2 = vpop.f32.mrb[113].mxu0  ;;  %v6961_v33 = vpop.f32.mrb[113].mxu1  ;;  %v5946_v40 = vld [vmem:[%s10271_s1 + $0x358] sm:$0xff] }
 0xd04   :  { %v4821_v36 = vpop.f32.mrb[114].mxu0  ;;  %v4863_v28 = vpop.f32.mrb[114].mxu1 }
 0xd05   :  { %7329 = vtanh.f32 %v4731_v32  ;;  %v4823_v8 = vpop.f32.mrb[115].mxu0  ;;  %v6962_v5 = vpop.f32.mrb[115].mxu1 }
 0xd06   :  { %v7326_v34 = vpop.eup %7325 }
 0xd07   :  { %v4735_v39 = vsub.f32 1.0, %v7326_v34  ;;  %v4739_v22 = vmul.f32 %v7326_v34, %v10029_v11 }
 0xd0d   :  { %v7328_v27 = vpop.eup %7327 }
 0xd0e   :  { %v4736_v37 = vmul.f32 %v7328_v27, %v4734_v35 }
 0xd0f   :  { %v7330_v26 = vpop.eup %7329 }
 0xd10   :  { %v4737_v31 = vmul.f32 %v7330_v26, %v4735_v39  ;;  %v10135_v9 = vadd.f32 %v4738_v30, %v4736_v37  ;;  %v5943_v39 = vld [vmem:[%s10271_s1 + $0x340] sm:$0xff] }
 0xd12   :  { %v10137_v38 = vadd.f32 %v4739_v22, %v4737_v31 }
 0xd14   :  { %v6071_v47 = vpack.c.bf16 %v10137_v38, %v10135_v9 }
 0xd16   :  { %6093 = vst [vmem:[%s10270_s5 + $0x10] sm:$0xff] %v6071_v47   ;;  %4901 = vmatmul.mubr.bf16.vlgmr.msra.gmra.mrb[116].mxu0 %v6071_v47  ;;  %6980 = vmatmul.mubr.bf16.vlgmr.msra.gmra.mrb[116].mxu1 %v6071_v47 }
 0xd17   :  { %5095 = vmatpush1.bf16.msra.mxu0 %v9701_v14  ;;  %6984 = vmatpush3.bf16.msra.mxu1 %v9707_v4  ;;  %v10516_v14 = vld [vmem:[#allocation4_spill] sm:$0xff]  ;;  %v10517_v4 = vld [vmem:[#allocation9_spill] sm:$0xff] }
 0xd18   :  { %5096 = vmatprep.subr.bf16.mxu0 %v9713_v45  ;;  %6985 = vmatprep.subr.bf16.mxu1 %v10392_v51  ;;  %v10518_v45 = vld [vmem:[#allocation5_spill] sm:$0xff] }
 0xd19   :  { %5126 = vmatprep.mubr.bf16.mxu0 %v10393_v52  ;;  %6999 = vmatprep.mubr.msk.bf16.mxu1 %vm7520_vm0, %v10392_v51 }
 0xd1b   :  { %5097 = vmatpush1.bf16.msra.mxu0 %v9723_v41  ;;  %6986 = vmatpush3.bf16.msra.mxu1 %v9729_v16  ;;  %v10519_v41 = vld [vmem:[#allocation6_spill] sm:$0xff]  ;;  %v10520_v16 = vld [vmem:[#allocation12_spill] sm:$0xff] }
 0xd1c   :  { %5098 = vmatprep.subr.bf16.mxu0 %v9735_v42  ;;  %6987 = vmatprep.subr.bf16.mxu1 %v10392_v51  ;;  %v10521_v42 = vld [vmem:[#allocation7_spill] sm:$0xff] }
 0xd1f   :  { %5099 = vmatpush1.bf16.msra.mxu0 %v9742_v56  ;;  %6988 = vmatpush3.bf16.msra.mxu1 %v9748_v57  ;;  %v10522_v56 = vld [vmem:[#allocation8_spill] sm:$0xff]  ;;  %v10523_v57 = vld [vmem:[#allocation14_spill] sm:$0xff] }
 0xd20   :  { %5100 = vmatprep.subr.bf16.mxu0 %v9754_v29  ;;  %6989 = vmatprep.subr.bf16.mxu1 %v10392_v51  ;;  %v10524_v29 = vld [vmem:[#allocation10_spill] sm:$0xff] }
 0xd23   :  { %5101 = vmatpush1.bf16.msra.mxu0 %v9761_v1  ;;  %6990 = vmatpush3.bf16.msra.mxu1 %v9767_v43  ;;  %v5941_v1 = vld [vmem:[%s10271_s1 + $0x330] sm:$0xff] }
 0xd24   :  { %5102 = vmatprep.subr.bf16.mxu0 %v9773_v48  ;;  %6991 = vmatprep.subr.bf16.mxu1 %v10392_v51 }
 0xd27   :  { %5103 = vmatpush1.bf16.msra.mxu0 %v9780_v55  ;;  %6992 = vmatpush3.bf16.msra.mxu1 %v9786_v18  ;;  %v5944_v55 = vld [vmem:[%s10271_s1 + $0x348] sm:$0xff] }
 0xd28   :  { %5104 = vmatprep.subr.bf16.mxu0 %v9792_v61  ;;  %6993 = vmatprep.subr.bf16.mxu1 %v10392_v51 }
 0xd2b   :  { %5105 = vmatpush1.bf16.msra.mxu0 %v9799_v54  ;;  %6994 = vmatpush3.bf16.msra.mxu1 %v9805_v53 }
 0xd2c   :  { %5106 = vmatprep.subr.bf16.mxu0 %v9811_v59  ;;  %6995 = vmatprep.subr.bf16.mxu1 %v10392_v51 }
 0xd2f   :  { %5107 = vmatpush1.bf16.msra.mxu0 %v9818_v21  ;;  %6996 = vmatpush3.bf16.msra.mxu1 %v9824_v19 }
 0xd30   :  { %5108 = vmatprep.subr.bf16.mxu0 %v9830_v62  ;;  %6997 = vmatprep.subr.bf16.mxu1 %v10392_v51 }
 0xd33   :  { %5109 = vmatpush1.bf16.msra.mxu0 %v9837_v23  ;;  %6998 = vmatpush3.bf16.msra.mxu1 %v9843_v0  ;;  %v5945_v23 = vld [vmem:[%s10271_s1 + $0x350] sm:$0xff] }
 0xd34   :  { %5179 = vmatprep.subr.bf16.mxu0 %v9849_v3  ;;  %7003 = vmatprep.subr.bf16.mxu1 %v10392_v51 }
 0xd36   :  { %5127 = vmatmul.mubr.bf16.vlgmr.msra.gmra.mrb[120].mxu0 %v9623_v60  ;;  %7000 = vmatmul.mubr.bf16.vlgmr.msra.gmra.mrb[120].mxu1 %v9623_v60  ;;  %v10515_v60 = vld [vmem:[#allocation17_spill] sm:$0xff] }
 0xd37   :  { %5180 = vmatpush1.bf16.msra.mxu0 %v9858_v6  ;;  %7004 = vmatpush3.bf16.msra.mxu1 %v9864_v7 }
 0xd38   :  { %5181 = vmatprep.subr.bf16.mxu0 %v9870_v44  ;;  %7005 = vmatprep.subr.bf16.mxu1 %v10392_v51 }
 0xd39   :  { %5211 = vmatprep.mubr.bf16.mxu0 %v10393_v52  ;;  %7019 = vmatprep.mubr.msk.bf16.mxu1 %vm7520_vm0, %v10392_v51  ;;  %v10514_v52 = vld [vmem:[#allocation16_spill] sm:$0xff] }
 0xd3b   :  { %5182 = vmatpush1.bf16.msra.mxu0 %v9880_v49  ;;  %7006 = vmatpush3.bf16.msra.mxu1 %v9886_v10 }
 0xd3c   :  { %5183 = vmatprep.subr.bf16.mxu0 %v9892_v13  ;;  %7007 = vmatprep.subr.bf16.mxu1 %v10392_v51 }
 0xd3f   :  { %5184 = vmatpush1.bf16.msra.mxu0 %v9899_v50  ;;  %7008 = vmatpush3.bf16.msra.mxu1 %v9905_v58 }
 0xd40   :  { %5185 = vmatprep.subr.bf16.mxu0 %v9911_v17  ;;  %7009 = vmatprep.subr.bf16.mxu1 %v10392_v51 }
 0xd43   :  { %5186 = vmatpush1.bf16.msra.mxu0 %v9918_v15  ;;  %7010 = vmatpush3.bf16.msra.mxu1 %v9924_v24 }
 0xd44   :  { %5187 = vmatprep.subr.bf16.mxu0 %v9930_v20  ;;  %7011 = vmatprep.subr.bf16.mxu1 %v10392_v51  ;;  %v10525_v20 = vld [vmem:[#allocation11_spill] sm:$0xff] }
 0xd47   :  { %5188 = vmatpush1.bf16.msra.mxu0 %v10514_v52  ;;  %7012 = vmatpush3.bf16.msra.mxu1 %v10515_v60 }
 0xd48   :  { %5189 = vmatprep.subr.bf16.mxu0 %v10516_v14  ;;  %7013 = vmatprep.subr.bf16.mxu1 %v10392_v51 }
 0xd4b   :  { %5190 = vmatpush1.bf16.msra.mxu0 %v10517_v4  ;;  %7014 = vmatpush3.bf16.msra.mxu1 %v10518_v45 }
 0xd4c   :  { %5191 = vmatprep.subr.bf16.mxu0 %v10519_v41  ;;  %7015 = vmatprep.subr.bf16.mxu1 %v10392_v51 }
 0xd4f   :  { %5192 = vmatpush1.bf16.msra.mxu0 %v10520_v16  ;;  %7016 = vmatpush3.bf16.msra.mxu1 %v10521_v42 }
 0xd50   :  { %5193 = vmatprep.subr.bf16.mxu0 %v10522_v56  ;;  %7017 = vmatprep.subr.bf16.mxu1 %v10392_v51  ;;  %v5942_v51 = vld [vmem:[%s10271_s1 + $0x338] sm:$0xff] }
 0xd53   :  { %5194 = vmatpush1.bf16.msra.mxu0 %v10523_v57  ;;  %7018 = vmatpush3.bf16.msra.mxu1 %v10524_v29  ;;  %v5969_v57 = vld [vmem:[%s10271_s1 + $0x300] sm:$0xff] }
 0xde9   :  { %v4902_v43 = vpop.f32.mrb[116].mxu0  ;;  %v4945_v48 = vpop.f32.mrb[116].mxu1 }
 0xdea   :  { %v5010_v18 = vadd.f32 %v5941_v1, %v4902_v43  ;;  %v4904_v61 = vpop.f32.mrb[117].mxu0  ;;  %v6981_v54 = vpop.f32.mrb[117].mxu1  ;;  %v5038_v46 = vadd.f32 %v10525_v20, %v4945_v48  ;;  %v5970_v48 = vld [vmem:[%s10271_s1 + $0x308] sm:$0xff] }
 0xdeb   :  { %v4906_v53 = vpop.f32.mrb[118].mxu0  ;;  %v4948_v59 = vpop.f32.mrb[118].mxu1  ;;  %v5024_v3 = vadd.f32 %v5942_v51, %v4904_v61 }
 0xdec   :  { %v5947_v21 = vmul.f32 -1.442695, %v5010_v18  ;;  %v5011_v19 = vadd.f32 %v5944_v55, %v4906_v53  ;;  %v4908_v62 = vpop.f32.mrb[119].mxu0  ;;  %v6982_v0 = vpop.f32.mrb[119].mxu1  ;;  %v5039_v12 = vadd.f32 %v10525_v20, %v4948_v59  ;;  %v5973_v59 = vld [vmem:[%s10271_s1 + $0x320] sm:$0xff] }
 0xded   :  { %v5025_v7 = vadd.f32 %v5945_v23, %v4908_v62  ;;  %v5949_v44 = vmul.f32 -1.442695, %v5024_v3 }
 0xdee   :  { %7331 = vpow2.f32 %v5947_v21  ;;  %v5948_v6 = vmul.f32 -1.442695, %v5011_v19 }
 0xdef   :  { %v5950_v49 = vmul.f32 -1.442695, %v5025_v7 }
 0xdf0   :  { %7333 = vpow2.f32 %v5948_v6 }
 0xdf1   :  { %7335 = vpow2.f32 %v5949_v44 }
 0xdf2   :  { %7337 = vpow2.f32 %v5950_v49 }
 0xdf8   :  { %v7332_v10 = vpop.eup %7331 }
 0xdf9   :  { %v5018_v13 = vadd.f32 1.0, %v7332_v10 }
 0xdfa   :  { %v7334_v50 = vpop.eup %7333 }
 0xdfb   :  { %7339 = vrcp.f32 %v5018_v13  ;;  %v5019_v58 = vadd.f32 1.0, %v7334_v50  ;;  %v7336_v17 = vpop.eup %7335 }
 0xdfc   :  { %v7338_v15 = vpop.eup %7337  ;;  %v5032_v24 = vadd.f32 1.0, %v7336_v17 }
 0xdfd   :  { %7341 = vrcp.f32 %v5019_v58  ;;  %v5033_v11 = vadd.f32 1.0, %v7338_v15 }
 0xdfe   :  { %7343 = vrcp.f32 %v5032_v24  ;;  %v5971_v24 = vld [vmem:[%s10271_s1 + $0x310] sm:$0xff] }
 0xdff   :  { %7345 = vrcp.f32 %v5033_v11 }
 0xe05   :  { %v7340_v37 = vpop.eup %7339 }
 0xe06   :  { %v5040_v27 = vmul.f32 %v7340_v37, %v5038_v46 }
 0xe07   :  { %v7342_v63 = vpop.eup %7341 }
 0xe08   :  { %v5042_v32 = vadd.f32 %v5943_v39, %v5040_v27  ;;  %v5041_v2 = vmul.f32 %v7342_v63, %v5039_v12  ;;  %v7344_v26 = vpop.eup %7343  ;;  %v5974_v39 = vld [vmem:[%s10271_s1 + $0x328] sm:$0xff] }
 0xe09   :  { %v5128_v33 = vpop.f32.mrb[120].mxu0  ;;  %v5171_v36 = vpop.f32.mrb[120].mxu1  ;;  %v5046_v22 = vsub.f32 1.0, %v7344_v26  ;;  %v5050_v14 = vmul.f32 %v7344_v26, %v10135_v9 }
 0xe0a   :  { %7347 = vtanh.f32 %v5042_v32  ;;  %v5043_v28 = vadd.f32 %v5946_v40, %v5041_v2  ;;  %v5130_v8 = vpop.f32.mrb[121].mxu0  ;;  %v7001_v5 = vpop.f32.mrb[121].mxu1 }
 0xe0b   :  { %v5132_v25 = vpop.f32.mrb[122].mxu0  ;;  %v5174_v34 = vpop.f32.mrb[122].mxu1 }
 0xe0c   :  { %7349 = vtanh.f32 %v5043_v28  ;;  %v5134_v35 = vpop.f32.mrb[123].mxu0  ;;  %v7002_v30 = vpop.f32.mrb[123].mxu1 }
 0xe0d   :  { %v7346_v31 = vpop.eup %7345 }
 0xe0e   :  { %v5047_v52 = vsub.f32 1.0, %v7346_v31  ;;  %v5051_v41 = vmul.f32 %v7346_v31, %v10137_v38  ;;  %v5972_v38 = vld [vmem:[%s10271_s1 + $0x318] sm:$0xff] }
 0xe14   :  { %v7348_v47 = vpop.eup %7347 }
 0xe15   :  { %v5048_v60 = vmul.f32 %v7348_v47, %v5046_v22 }
 0xe16   :  { %v7350_v4 = vpop.eup %7349 }
 0xe17   :  { %v5049_v45 = vmul.f32 %v7350_v4, %v5047_v52  ;;  %v5052_v16 = vadd.f32 %v5050_v14, %v5048_v60 }
 0xe19   :  { %v10236_v42 = vadd.f32 %v5051_v41, %v5049_v45 }
 0xe1b   :  { %v6076_v56 = vpack.c.bf16 %v10236_v42, %v5052_v16 }
 0xe1d   :  { %6094 = vst [vmem:[%s10270_s5 + $0x8] sm:$0xff] %v6076_v56   ;;  %5212 = vmatmul.mubr.bf16.vlgmr.msra.gmra.mrb[124].mxu0 %v6076_v56  ;;  %7020 = vmatmul.mubr.bf16.vlgmr.msra.gmra.mrb[124].mxu1 %v6076_v56 }
 0xef0   :  { %v5213_v9 = vpop.f32.mrb[124].mxu0  ;;  %v5256_v29 = vpop.f32.mrb[124].mxu1 }
 0xef1   :  { %v5320_v1 = vadd.f32 %v5969_v57, %v5213_v9  ;;  %v5215_v43 = vpop.f32.mrb[125].mxu0  ;;  %v7021_v55 = vpop.f32.mrb[125].mxu1  ;;  %v5348_v58 = vadd.f32 %v10525_v20, %v5256_v29 }
 0xef2   :  { %v5217_v18 = vpop.f32.mrb[126].mxu0  ;;  %v5259_v61 = vpop.f32.mrb[126].mxu1  ;;  %v5334_v19 = vadd.f32 %v5970_v48, %v5215_v43 }
 0xef3   :  { %v5975_v51 = vmul.f32 -1.442695, %v5320_v1  ;;  %v5321_v54 = vadd.f32 %v5972_v38, %v5217_v18  ;;  %v5219_v53 = vpop.f32.mrb[127].mxu0  ;;  %v7022_v21 = vpop.f32.mrb[127].mxu1  ;;  %v5349_v11 = vadd.f32 %v10525_v20, %v5259_v61 }
 0xef4   :  { %v5335_v23 = vadd.f32 %v5973_v59, %v5219_v53  ;;  %v5977_v0 = vmul.f32 -1.442695, %v5334_v19 }
 0xef5   :  { %7351 = vpow2.f32 %v5975_v51  ;;  %v5976_v62 = vmul.f32 -1.442695, %v5321_v54 }
 0xef6   :  { %v5978_v3 = vmul.f32 -1.442695, %v5335_v23 }
 0xef7   :  { %7353 = vpow2.f32 %v5976_v62 }
 0xef8   :  { %7355 = vpow2.f32 %v5977_v0 }
 0xef9   :  { %7357 = vpow2.f32 %v5978_v3 }
 0xeff   :  { %v7352_v6 = vpop.eup %7351 }
 0xf00   :  { %v5328_v7 = vadd.f32 1.0, %v7352_v6 }
 0xf01   :  { %v7354_v44 = vpop.eup %7353 }
 0xf02   :  { %7359 = vrcp.f32 %v5328_v7  ;;  %v5329_v49 = vadd.f32 1.0, %v7354_v44  ;;  %v7356_v10 = vpop.eup %7355 }
 0xf03   :  { %v7358_v13 = vpop.eup %7357  ;;  %v5342_v50 = vadd.f32 1.0, %v7356_v10 }
 0xf04   :  { %7361 = vrcp.f32 %v5329_v49  ;;  %v5343_v17 = vadd.f32 1.0, %v7358_v13 }
 0xf05   :  { %7363 = vrcp.f32 %v5342_v50 }
 0xf06   :  { %7365 = vrcp.f32 %v5343_v17 }
 0xf0c   :  { %v7360_v15 = vpop.eup %7359 }
 0xf0d   :  { %v5350_v46 = vmul.f32 %v7360_v15, %v5348_v58 }
 0xf0e   :  { %v7362_v37 = vpop.eup %7361 }
 0xf0f   :  { %v5352_v27 = vadd.f32 %v5971_v24, %v5350_v46  ;;  %v5351_v12 = vmul.f32 %v7362_v37, %v5349_v11  ;;  %v7364_v40 = vpop.eup %7363 }
 0xf10   :  { %v7366_v32 = vpop.eup %7365  ;;  %v5356_v2 = vsub.f32 1.0, %v7364_v40  ;;  %v5360_v28 = vmul.f32 %v7364_v40, %v5052_v16 }
 0xf11   :  { %7367 = vtanh.f32 %v5352_v27  ;;  %v5353_v63 = vadd.f32 %v5974_v39, %v5351_v12  ;;  %v5357_v8 = vsub.f32 1.0, %v7366_v32  ;;  %v5361_v34 = vmul.f32 %v7366_v32, %v10236_v42 }
 0xf13   :  { %7369 = vtanh.f32 %v5353_v63 }
 0xf1b   :  { %v7368_v33 = vpop.eup %7367 }
 0xf1c   :  { %v5358_v36 = vmul.f32 %v7368_v33, %v5356_v2 }
 0xf1d   :  { %v7370_v5 = vpop.eup %7369 }
 0xf1e   :  { %v5362_v20 = vadd.f32 %v5360_v28, %v5358_v36  ;;  %v5359_v25 = vmul.f32 %v7370_v5, %v5357_v8 }
 0xf20   :  { %v5363_v35 = vadd.f32 %v5361_v34, %v5359_v25 }
 0xf22   :  { %v6081_v30 = vpack.c.bf16 %v5363_v35, %v5362_v20 }
 0xf24   :  { %6082 = vst [vmem:[%s10270_s5] sm:$0xff] %v6081_v30  }

</bundles_post_ra>
